<compile_context>
chip_gen: v6e
topology: v6e:2x2x1
jax: 0.10.0
libtpu: 0.0.40
codegen_flags: <defaults>
</compile_context>

<pallas_src>
import jax
import jax.numpy as jnp
from jax import lax
from jax.experimental import pallas as pl
from jax.experimental.pallas import tpu as pltpu

TB = 8            # images per grid step == sublane tile (keep == 8)
C = 128           # lane-dense padded channel width (conv1/conv2 out, fc out)
CIN_P = 8         # input channels padded 3 -> 8
KP = 7 * CIN_P    # conv1 packed contraction (kw, cin) = 56


# ------------------------------ fused kernel --------------------------------

def _fused_kernel(x_ref, w1_ref, b1_ref, w2_ref, b2_ref, wf_ref, bf_ref,
                  out_ref, p1_ref, p2_ref):
    f32 = jnp.float32
    bf16 = jnp.bfloat16

    # -------- conv1 (7x7) + bias + relu + 2x2 maxpool -> p1 -----------------
    # x_ref : (30, 24, TB, 56) bf16, last dim packs (kw, cin)
    # p1_ref: (12, 12, TB, 128) bf16
    b1 = b1_ref[...]                                          # (1,128) f32

    def conv1_row_wpooled(row):
        """One conv1 output row for all TB images, W-pooled: (12, TB, 128)."""
        acc = jnp.zeros((24 * TB, C), f32)
        for kh in range(7):                                   # unrolled taps
            lhs = x_ref[row + kh].reshape(24 * TB, KP)        # rows = (ow, tb)
            acc = acc + jnp.dot(lhs, w1_ref[kh],
                                preferred_element_type=f32)
        # pool over W: (ow, tb) rows -> pairs of ow, tb is the sublane tile
        return jnp.max(acc.reshape(12, 2, TB, C), axis=1)     # (12, TB, 128)

    def pool1_body(r, carry):
        even = conv1_row_wpooled(2 * r)
        odd = conv1_row_wpooled(2 * r + 1)
        pooled = jnp.maximum(even, odd)                       # pool over H
        # relu(x+b) monotone -> pool raw conv then bias+relu is exact
        p1_ref[r] = jnp.maximum(pooled + b1, 0.0).astype(bf16)
        return carry

    lax.fori_loop(0, 12, pool1_body, 0)

    # -------- conv2 (3x3) + bias + relu + 2x2 maxpool -> p2 (fc staging) ----
    # 9 taps per pooled output row, each a (160,128)@(128,128) matmul.
    b2 = b2_ref[...]                                          # (1,128) f32
    for r in range(5):                                        # unrolled
        acc = jnp.zeros((2 * 10 * TB, C), f32)                # rows=(ohp,ow,tb)
        for kh in range(3):
            for kw in range(3):
                lhs = p1_ref[2 * r + kh:2 * r + kh + 2,
                             kw:kw + 10].reshape(2 * 10 * TB, C)
                acc = acc + jnp.dot(lhs, w2_ref[kh * 3 + kw],
                                    preferred_element_type=f32)
        h_pooled = jnp.max(acc.reshape(2, 10 * TB, C), axis=0)        # H pool
        pooled = jnp.max(h_pooled.reshape(5, 2, TB, C), axis=1)       # W pool
        act = jnp.maximum(pooled + b2, 0.0).astype(bf16)              # (5,TB,128)
        for w in range(5):
            col = (r * 5 + w) * C          # torch NCHW flatten order is baked
            p2_ref[:, col:col + C] = act[w]  # into wf's (3200,128) row layout

    # -------- fc1 + relu: ONE (TB,3200)@(3200,128) matmul -------------------
    logits = jnp.dot(p2_ref[...], wf_ref[...], preferred_element_type=f32)
    out_ref[...] = jnp.maximum(logits + bf_ref[...], 0.0)


# -------------------------------- wrapper -----------------------------------

def feature_extractor_forward(x, params):
    """x: (B, 3, 30, 30) float32 NCHW -> (B, 128) float32."""
    B, cin, H, W = x.shape
    assert (cin, H, W) == (3, 30, 30)
    w1, b1 = params["w1"], params["b1"]   # (12,3,7,7), (12,)
    w2, b2 = params["w2"], params["b2"]   # (24,12,3,3), (24,)
    wf, bf = params["wf"], params["bf"]   # (128,600), (128,)

    # ---- host-side layout prep (pure pad/transpose/reshape glue) -----------
    B_pad = ((B + TB - 1) // TB) * TB
    if B_pad != B:
        x = jnp.pad(x, ((0, B_pad - B), (0, 0), (0, 0), (0, 0)))

    # input NCHW -> (H, ow, B, kw*8+c) packed bf16 (kw-window packing on host)
    xh = jnp.transpose(x, (0, 2, 3, 1))                       # (B,30,30,3)
    xh = jnp.pad(xh, ((0, 0), (0, 0), (0, 0), (0, CIN_P - 3)))
    xw = jnp.stack([xh[:, :, kw:kw + 24, :] for kw in range(7)], axis=3)
    xp = xw.reshape(B_pad, 30, 24, KP)                        # (B,30,24,56)
    xp = jnp.transpose(xp, (1, 2, 0, 3)).astype(jnp.bfloat16)  # (30,24,B,56)

    # conv1 weight -> (7, 56, 128): [kh, kw*8+c, o] = w1[o, c, kh, kw]
    w1p = jnp.transpose(w1, (2, 3, 1, 0))                     # (7,7,3,12)
    w1p = jnp.pad(w1p, ((0, 0), (0, 0), (0, CIN_P - 3), (0, C - 12)))
    w1p = w1p.reshape(7, KP, C).astype(jnp.bfloat16)
    b1p = jnp.pad(b1, (0, C - 12)).reshape(1, C).astype(jnp.float32)

    # conv2 weight -> (9, 128, 128): [kh*3+kw, c, o] = w2[o, c, kh, kw]
    w2p = jnp.transpose(w2, (2, 3, 1, 0))                     # (3,3,12,24)
    w2p = jnp.pad(w2p, ((0, 0), (0, 0), (0, C - 12), (0, C - 24)))
    w2p = w2p.reshape(9, C, C).astype(jnp.bfloat16)
    b2p = jnp.pad(b2, (0, C - 24)).reshape(1, C).astype(jnp.float32)

    # fc1 weight -> (3200, 128): row (h*5+w)*128 + c  =  wf[:, c*25 + h*5 + w]
    wfp = wf.reshape(C, 24, 5, 5)
    wfp = jnp.transpose(wfp, (2, 3, 1, 0))                    # (5,5,24,128)
    wfp = jnp.pad(wfp, ((0, 0), (0, 0), (0, C - 24), (0, 0)))
    wfp = wfp.reshape(25 * C, C).astype(jnp.bfloat16)
    bfp = bf.reshape(1, C).astype(jnp.float32)

    out = pl.pallas_call(
        _fused_kernel,
        out_shape=jax.ShapeDtypeStruct((B_pad, C), jnp.float32),
        grid_spec=pltpu.PrefetchScalarGridSpec(
            num_scalar_prefetch=0,
            grid=(B_pad // TB,),
            in_specs=[
                pl.BlockSpec((30, 24, TB, KP), lambda b: (0, 0, b, 0)),
                pl.BlockSpec((7, KP, C), lambda b: (0, 0, 0)),
                pl.BlockSpec((1, C), lambda b: (0, 0)),
                pl.BlockSpec((9, C, C), lambda b: (0, 0, 0)),
                pl.BlockSpec((1, C), lambda b: (0, 0)),
                pl.BlockSpec((25 * C, C), lambda b: (0, 0)),
                pl.BlockSpec((1, C), lambda b: (0, 0)),
            ],
            out_specs=pl.BlockSpec((TB, C), lambda b: (b, 0)),
            scratch_shapes=[
                pltpu.VMEM((12, 12, TB, C), jnp.bfloat16),   # pooled conv1
                pltpu.VMEM((TB, 25 * C), jnp.bfloat16),      # fc1 LHS staging
            ],
        ),
        compiler_params=pltpu.CompilerParams(
            dimension_semantics=("parallel",),
            vmem_limit_bytes=32 * 1024 * 1024),
    )(xp, w1p, b1p, w2p, b2p, wfp, bfp)
    return out[:B]


# Pure-JAX reference (no Pallas) for a correctness sanity check.
def reference_forward(x, params):
    dn = ("NCHW", "OIHW", "NCHW")
    h = jax.lax.conv_general_dilated(x, params["w1"], (1, 1), "VALID",
                                     dimension_numbers=dn)
    h = jax.nn.relu(h + params["b1"][None, :, None, None])
    h = jax.lax.reduce_window(h, -jnp.inf, jax.lax.max,
                              (1, 1, 2, 2), (1, 1, 2, 2), "VALID")
    h = jax.lax.conv_general_dilated(h, params["w2"], (1, 1), "VALID",
                                     dimension_numbers=dn)
    h = jax.nn.relu(h + params["b2"][None, :, None, None])
    h = jax.lax.reduce_window(h, -jnp.inf, jax.lax.max,
                              (1, 1, 2, 2), (1, 1, 2, 2), "VALID")
    h = h.reshape(h.shape[0], -1)
    return jax.nn.relu(h @ params["wf"].T + params["bf"])


# ---------------------------------- main -------------------------------------

if __name__ == "__main__":
    key = jax.random.PRNGKey(0)
    k_x, k_w1, k_b1, k_w2, k_b2, k_wf, k_bf = jax.random.split(key, 7)

    # Spatial size 30 is what the module implies for fc1(24*5*5):
    # 30 -conv7-> 24 -pool-> 12 -conv3-> 10 -pool-> 5.
    x = jax.random.normal(k_x, (2, 3, 30, 30), dtype=jnp.float32)

    params = {
        "w1": 0.1 * jax.random.normal(k_w1, (12, 3, 7, 7), dtype=jnp.float32),
        "b1": 0.1 * jax.random.normal(k_b1, (12,), dtype=jnp.float32),
        "w2": 0.1 * jax.random.normal(k_w2, (24, 12, 3, 3), dtype=jnp.float32),
        "b2": 0.1 * jax.random.normal(k_b2, (24,), dtype=jnp.float32),
        "wf": 0.05 * jax.random.normal(k_wf, (128, 24 * 5 * 5), dtype=jnp.float32),
        "bf": 0.1 * jax.random.normal(k_bf, (128,), dtype=jnp.float32),
    }

    fwd = jax.jit(feature_extractor_forward)
    out = jax.block_until_ready(fwd(x, params))
    assert out.shape == (2, 128), out.shape

    ref = jax.block_until_ready(reference_forward(x, params))
    assert jnp.allclose(out, ref, rtol=2e-2, atol=2e-2), (
        float(jnp.max(jnp.abs(out - ref))))

    print("KERNEL_OK")
</pallas_src>

<mosaic_0001>
module attributes {stable_mosaic.version = 11 : i64} {
  func.func @_fused_kernel(%arg0: i32, %arg1: memref<30x24x8x56xbf16, #tpu.memory_space<vmem>>, %arg2: memref<7x56x128xbf16, #tpu.memory_space<vmem>>, %arg3: memref<1x128xf32, #tpu.memory_space<vmem>>, %arg4: memref<9x128x128xbf16, #tpu.memory_space<vmem>>, %arg5: memref<1x128xf32, #tpu.memory_space<vmem>>, %arg6: memref<3200x128xbf16, #tpu.memory_space<vmem>>, %arg7: memref<1x128xf32, #tpu.memory_space<vmem>>, %arg8: memref<8x128xf32, #tpu.memory_space<vmem>>, %arg9: memref<12x12x8x128xbf16, #tpu.memory_space<vmem>>, %arg10: memref<8x3200xbf16, #tpu.memory_space<vmem>>) attributes {dimension_semantics = [#tpu.dimension_semantics<parallel>], iteration_bounds = array<i64: 1>, scalar_prefetch = 0 : i64, scratch_operands = 2 : i64, tpu.core_type = #tpu.core_type<tc>, window_params = [{transform_indices = @transform_0, window_bounds = array<i64: 30, 24, 8, 56>}, {pipeline_mode = #tpu.pipeline_mode<synchronous>, transform_indices = @transform_1, window_bounds = array<i64: 7, 56, 128>}, {pipeline_mode = #tpu.pipeline_mode<synchronous>, transform_indices = @transform_2, window_bounds = array<i64: 1, 128>}, {pipeline_mode = #tpu.pipeline_mode<synchronous>, transform_indices = @transform_3, window_bounds = array<i64: 9, 128, 128>}, {pipeline_mode = #tpu.pipeline_mode<synchronous>, transform_indices = @transform_4, window_bounds = array<i64: 1, 128>}, {pipeline_mode = #tpu.pipeline_mode<synchronous>, transform_indices = @transform_5, window_bounds = array<i64: 3200, 128>}, {pipeline_mode = #tpu.pipeline_mode<synchronous>, transform_indices = @transform_6, window_bounds = array<i64: 1, 128>}, {transform_indices = @transform_7, window_bounds = array<i64: 8, 128>}]} {
    %c0 = arith.constant 0 : index
    %c0_0 = arith.constant 0 : index
    %0 = vector.load %arg3[%c0, %c0_0] : memref<1x128xf32, #tpu.memory_space<vmem>>, vector<1x128xf32>
    %c0_i32 = arith.constant 0 : i32
    %c12_i32 = arith.constant 12 : i32
    %1 = arith.addi %c0_i32, %c12_i32 : i32
    %c1_i32 = arith.constant 1 : i32
    scf.for %arg11 = %c0_i32 to %1 step %c1_i32  : i32 {
      %c2_i32 = arith.constant 2 : i32
      %412 = arith.muli %c2_i32, %arg11 : i32
      %cst_409 = arith.constant 0.000000e+00 : f32
      %413 = vector.broadcast %cst_409 : f32 to vector<192x128xf32>
      %c0_i32_410 = arith.constant 0 : i32
      %414 = arith.addi %412, %c0_i32_410 : i32
      %415 = arith.index_cast %414 : i32 to index
      %c0_411 = arith.constant 0 : index
      %c0_412 = arith.constant 0 : index
      %c0_413 = arith.constant 0 : index
      %416 = vector.load %arg1[%415, %c0_411, %c0_412, %c0_413] : memref<30x24x8x56xbf16, #tpu.memory_space<vmem>>, vector<1x24x8x56xbf16>
      %417 = vector.shape_cast %416 : vector<1x24x8x56xbf16> to vector<24x8x56xbf16>
      %418 = vector.shape_cast %417 : vector<24x8x56xbf16> to vector<192x56xbf16>
      %c0_414 = arith.constant 0 : index
      %c0_415 = arith.constant 0 : index
      %c0_416 = arith.constant 0 : index
      %419 = vector.load %arg2[%c0_414, %c0_415, %c0_416] : memref<7x56x128xbf16, #tpu.memory_space<vmem>>, vector<1x56x128xbf16>
      %420 = vector.shape_cast %419 : vector<1x56x128xbf16> to vector<56x128xbf16>
      %cst_417 = arith.constant dense<0.000000e+00> : vector<192x128xf32>
      %421 = tpu.matmul %418, %420, %cst_417 {dimension_numbers = #tpu.dot_dimension_numbers<[1], [0], [0], [1], [0, 0, 1, 1], [], []>} : vector<192x56xbf16>, vector<56x128xbf16>, vector<192x128xf32> -> vector<192x128xf32>
      %422 = arith.addf %413, %421 : vector<192x128xf32>
      %c1_i32_418 = arith.constant 1 : i32
      %423 = arith.addi %412, %c1_i32_418 : i32
      %424 = arith.index_cast %423 : i32 to index
      %c0_419 = arith.constant 0 : index
      %c0_420 = arith.constant 0 : index
      %c0_421 = arith.constant 0 : index
      %425 = vector.load %arg1[%424, %c0_419, %c0_420, %c0_421] : memref<30x24x8x56xbf16, #tpu.memory_space<vmem>>, vector<1x24x8x56xbf16>
      %426 = vector.shape_cast %425 : vector<1x24x8x56xbf16> to vector<24x8x56xbf16>
      %427 = vector.shape_cast %426 : vector<24x8x56xbf16> to vector<192x56xbf16>
      %c1_422 = arith.constant 1 : index
      %c0_423 = arith.constant 0 : index
      %c0_424 = arith.constant 0 : index
      %428 = vector.load %arg2[%c1_422, %c0_423, %c0_424] : memref<7x56x128xbf16, #tpu.memory_space<vmem>>, vector<1x56x128xbf16>
      %429 = vector.shape_cast %428 : vector<1x56x128xbf16> to vector<56x128xbf16>
      %cst_425 = arith.constant dense<0.000000e+00> : vector<192x128xf32>
      %430 = tpu.matmul %427, %429, %cst_425 {dimension_numbers = #tpu.dot_dimension_numbers<[1], [0], [0], [1], [0, 0, 1, 1], [], []>} : vector<192x56xbf16>, vector<56x128xbf16>, vector<192x128xf32> -> vector<192x128xf32>
      %431 = arith.addf %422, %430 : vector<192x128xf32>
      %c2_i32_426 = arith.constant 2 : i32
      %432 = arith.addi %412, %c2_i32_426 : i32
      %433 = arith.index_cast %432 : i32 to index
      %c0_427 = arith.constant 0 : index
      %c0_428 = arith.constant 0 : index
      %c0_429 = arith.constant 0 : index
      %434 = vector.load %arg1[%433, %c0_427, %c0_428, %c0_429] : memref<30x24x8x56xbf16, #tpu.memory_space<vmem>>, vector<1x24x8x56xbf16>
      %435 = vector.shape_cast %434 : vector<1x24x8x56xbf16> to vector<24x8x56xbf16>
      %436 = vector.shape_cast %435 : vector<24x8x56xbf16> to vector<192x56xbf16>
      %c2_430 = arith.constant 2 : index
      %c0_431 = arith.constant 0 : index
      %c0_432 = arith.constant 0 : index
      %437 = vector.load %arg2[%c2_430, %c0_431, %c0_432] : memref<7x56x128xbf16, #tpu.memory_space<vmem>>, vector<1x56x128xbf16>
      %438 = vector.shape_cast %437 : vector<1x56x128xbf16> to vector<56x128xbf16>
      %cst_433 = arith.constant dense<0.000000e+00> : vector<192x128xf32>
      %439 = tpu.matmul %436, %438, %cst_433 {dimension_numbers = #tpu.dot_dimension_numbers<[1], [0], [0], [1], [0, 0, 1, 1], [], []>} : vector<192x56xbf16>, vector<56x128xbf16>, vector<192x128xf32> -> vector<192x128xf32>
      %440 = arith.addf %431, %439 : vector<192x128xf32>
      %c3_i32 = arith.constant 3 : i32
      %441 = arith.addi %412, %c3_i32 : i32
      %442 = arith.index_cast %441 : i32 to index
      %c0_434 = arith.constant 0 : index
      %c0_435 = arith.constant 0 : index
      %c0_436 = arith.constant 0 : index
      %443 = vector.load %arg1[%442, %c0_434, %c0_435, %c0_436] : memref<30x24x8x56xbf16, #tpu.memory_space<vmem>>, vector<1x24x8x56xbf16>
      %444 = vector.shape_cast %443 : vector<1x24x8x56xbf16> to vector<24x8x56xbf16>
      %445 = vector.shape_cast %444 : vector<24x8x56xbf16> to vector<192x56xbf16>
      %c3_437 = arith.constant 3 : index
      %c0_438 = arith.constant 0 : index
      %c0_439 = arith.constant 0 : index
      %446 = vector.load %arg2[%c3_437, %c0_438, %c0_439] : memref<7x56x128xbf16, #tpu.memory_space<vmem>>, vector<1x56x128xbf16>
      %447 = vector.shape_cast %446 : vector<1x56x128xbf16> to vector<56x128xbf16>
      %cst_440 = arith.constant dense<0.000000e+00> : vector<192x128xf32>
      %448 = tpu.matmul %445, %447, %cst_440 {dimension_numbers = #tpu.dot_dimension_numbers<[1], [0], [0], [1], [0, 0, 1, 1], [], []>} : vector<192x56xbf16>, vector<56x128xbf16>, vector<192x128xf32> -> vector<192x128xf32>
      %449 = arith.addf %440, %448 : vector<192x128xf32>
      %c4_i32 = arith.constant 4 : i32
      %450 = arith.addi %412, %c4_i32 : i32
      %451 = arith.index_cast %450 : i32 to index
      %c0_441 = arith.constant 0 : index
      %c0_442 = arith.constant 0 : index
      %c0_443 = arith.constant 0 : index
      %452 = vector.load %arg1[%451, %c0_441, %c0_442, %c0_443] : memref<30x24x8x56xbf16, #tpu.memory_space<vmem>>, vector<1x24x8x56xbf16>
      %453 = vector.shape_cast %452 : vector<1x24x8x56xbf16> to vector<24x8x56xbf16>
      %454 = vector.shape_cast %453 : vector<24x8x56xbf16> to vector<192x56xbf16>
      %c4_444 = arith.constant 4 : index
      %c0_445 = arith.constant 0 : index
      %c0_446 = arith.constant 0 : index
      %455 = vector.load %arg2[%c4_444, %c0_445, %c0_446] : memref<7x56x128xbf16, #tpu.memory_space<vmem>>, vector<1x56x128xbf16>
      %456 = vector.shape_cast %455 : vector<1x56x128xbf16> to vector<56x128xbf16>
      %cst_447 = arith.constant dense<0.000000e+00> : vector<192x128xf32>
      %457 = tpu.matmul %454, %456, %cst_447 {dimension_numbers = #tpu.dot_dimension_numbers<[1], [0], [0], [1], [0, 0, 1, 1], [], []>} : vector<192x56xbf16>, vector<56x128xbf16>, vector<192x128xf32> -> vector<192x128xf32>
      %458 = arith.addf %449, %457 : vector<192x128xf32>
      %c5_i32 = arith.constant 5 : i32
      %459 = arith.addi %412, %c5_i32 : i32
      %460 = arith.index_cast %459 : i32 to index
      %c0_448 = arith.constant 0 : index
      %c0_449 = arith.constant 0 : index
      %c0_450 = arith.constant 0 : index
      %461 = vector.load %arg1[%460, %c0_448, %c0_449, %c0_450] : memref<30x24x8x56xbf16, #tpu.memory_space<vmem>>, vector<1x24x8x56xbf16>
      %462 = vector.shape_cast %461 : vector<1x24x8x56xbf16> to vector<24x8x56xbf16>
      %463 = vector.shape_cast %462 : vector<24x8x56xbf16> to vector<192x56xbf16>
      %c5_451 = arith.constant 5 : index
      %c0_452 = arith.constant 0 : index
      %c0_453 = arith.constant 0 : index
      %464 = vector.load %arg2[%c5_451, %c0_452, %c0_453] : memref<7x56x128xbf16, #tpu.memory_space<vmem>>, vector<1x56x128xbf16>
      %465 = vector.shape_cast %464 : vector<1x56x128xbf16> to vector<56x128xbf16>
      %cst_454 = arith.constant dense<0.000000e+00> : vector<192x128xf32>
      %466 = tpu.matmul %463, %465, %cst_454 {dimension_numbers = #tpu.dot_dimension_numbers<[1], [0], [0], [1], [0, 0, 1, 1], [], []>} : vector<192x56xbf16>, vector<56x128xbf16>, vector<192x128xf32> -> vector<192x128xf32>
      %467 = arith.addf %458, %466 : vector<192x128xf32>
      %c6_i32 = arith.constant 6 : i32
      %468 = arith.addi %412, %c6_i32 : i32
      %469 = arith.index_cast %468 : i32 to index
      %c0_455 = arith.constant 0 : index
      %c0_456 = arith.constant 0 : index
      %c0_457 = arith.constant 0 : index
      %470 = vector.load %arg1[%469, %c0_455, %c0_456, %c0_457] : memref<30x24x8x56xbf16, #tpu.memory_space<vmem>>, vector<1x24x8x56xbf16>
      %471 = vector.shape_cast %470 : vector<1x24x8x56xbf16> to vector<24x8x56xbf16>
      %472 = vector.shape_cast %471 : vector<24x8x56xbf16> to vector<192x56xbf16>
      %c6_458 = arith.constant 6 : index
      %c0_459 = arith.constant 0 : index
      %c0_460 = arith.constant 0 : index
      %473 = vector.load %arg2[%c6_458, %c0_459, %c0_460] : memref<7x56x128xbf16, #tpu.memory_space<vmem>>, vector<1x56x128xbf16>
      %474 = vector.shape_cast %473 : vector<1x56x128xbf16> to vector<56x128xbf16>
      %cst_461 = arith.constant dense<0.000000e+00> : vector<192x128xf32>
      %475 = tpu.matmul %472, %474, %cst_461 {dimension_numbers = #tpu.dot_dimension_numbers<[1], [0], [0], [1], [0, 0, 1, 1], [], []>} : vector<192x56xbf16>, vector<56x128xbf16>, vector<192x128xf32> -> vector<192x128xf32>
      %476 = arith.addf %467, %475 : vector<192x128xf32>
      %477 = vector.shape_cast %476 : vector<192x128xf32> to vector<12x2x8x128xf32>
      %cst_462 = arith.constant dense<0xFF800000> : vector<12x8x128xf32>
      %478 = vector.multi_reduction <maximumf>, %477, %cst_462 [1] : vector<12x2x8x128xf32> to vector<12x8x128xf32>
      %c2_i32_463 = arith.constant 2 : i32
      %479 = arith.muli %c2_i32_463, %arg11 : i32
      %c1_i32_464 = arith.constant 1 : i32
      %480 = arith.addi %479, %c1_i32_464 : i32
      %cst_465 = arith.constant 0.000000e+00 : f32
      %481 = vector.broadcast %cst_465 : f32 to vector<192x128xf32>
      %c0_i32_466 = arith.constant 0 : i32
      %482 = arith.addi %480, %c0_i32_466 : i32
      %483 = arith.index_cast %482 : i32 to index
      %c0_467 = arith.constant 0 : index
      %c0_468 = arith.constant 0 : index
      %c0_469 = arith.constant 0 : index
      %484 = vector.load %arg1[%483, %c0_467, %c0_468, %c0_469] : memref<30x24x8x56xbf16, #tpu.memory_space<vmem>>, vector<1x24x8x56xbf16>
      %485 = vector.shape_cast %484 : vector<1x24x8x56xbf16> to vector<24x8x56xbf16>
      %486 = vector.shape_cast %485 : vector<24x8x56xbf16> to vector<192x56xbf16>
      %c0_470 = arith.constant 0 : index
      %c0_471 = arith.constant 0 : index
      %c0_472 = arith.constant 0 : index
      %487 = vector.load %arg2[%c0_470, %c0_471, %c0_472] : memref<7x56x128xbf16, #tpu.memory_space<vmem>>, vector<1x56x128xbf16>
      %488 = vector.shape_cast %487 : vector<1x56x128xbf16> to vector<56x128xbf16>
      %cst_473 = arith.constant dense<0.000000e+00> : vector<192x128xf32>
      %489 = tpu.matmul %486, %488, %cst_473 {dimension_numbers = #tpu.dot_dimension_numbers<[1], [0], [0], [1], [0, 0, 1, 1], [], []>} : vector<192x56xbf16>, vector<56x128xbf16>, vector<192x128xf32> -> vector<192x128xf32>
      %490 = arith.addf %481, %489 : vector<192x128xf32>
      %c1_i32_474 = arith.constant 1 : i32
      %491 = arith.addi %480, %c1_i32_474 : i32
      %492 = arith.index_cast %491 : i32 to index
      %c0_475 = arith.constant 0 : index
      %c0_476 = arith.constant 0 : index
      %c0_477 = arith.constant 0 : index
      %493 = vector.load %arg1[%492, %c0_475, %c0_476, %c0_477] : memref<30x24x8x56xbf16, #tpu.memory_space<vmem>>, vector<1x24x8x56xbf16>
      %494 = vector.shape_cast %493 : vector<1x24x8x56xbf16> to vector<24x8x56xbf16>
      %495 = vector.shape_cast %494 : vector<24x8x56xbf16> to vector<192x56xbf16>
      %c1_478 = arith.constant 1 : index
      %c0_479 = arith.constant 0 : index
      %c0_480 = arith.constant 0 : index
      %496 = vector.load %arg2[%c1_478, %c0_479, %c0_480] : memref<7x56x128xbf16, #tpu.memory_space<vmem>>, vector<1x56x128xbf16>
      %497 = vector.shape_cast %496 : vector<1x56x128xbf16> to vector<56x128xbf16>
      %cst_481 = arith.constant dense<0.000000e+00> : vector<192x128xf32>
      %498 = tpu.matmul %495, %497, %cst_481 {dimension_numbers = #tpu.dot_dimension_numbers<[1], [0], [0], [1], [0, 0, 1, 1], [], []>} : vector<192x56xbf16>, vector<56x128xbf16>, vector<192x128xf32> -> vector<192x128xf32>
      %499 = arith.addf %490, %498 : vector<192x128xf32>
      %c2_i32_482 = arith.constant 2 : i32
      %500 = arith.addi %480, %c2_i32_482 : i32
      %501 = arith.index_cast %500 : i32 to index
      %c0_483 = arith.constant 0 : index
      %c0_484 = arith.constant 0 : index
      %c0_485 = arith.constant 0 : index
      %502 = vector.load %arg1[%501, %c0_483, %c0_484, %c0_485] : memref<30x24x8x56xbf16, #tpu.memory_space<vmem>>, vector<1x24x8x56xbf16>
      %503 = vector.shape_cast %502 : vector<1x24x8x56xbf16> to vector<24x8x56xbf16>
      %504 = vector.shape_cast %503 : vector<24x8x56xbf16> to vector<192x56xbf16>
      %c2_486 = arith.constant 2 : index
      %c0_487 = arith.constant 0 : index
      %c0_488 = arith.constant 0 : index
      %505 = vector.load %arg2[%c2_486, %c0_487, %c0_488] : memref<7x56x128xbf16, #tpu.memory_space<vmem>>, vector<1x56x128xbf16>
      %506 = vector.shape_cast %505 : vector<1x56x128xbf16> to vector<56x128xbf16>
      %cst_489 = arith.constant dense<0.000000e+00> : vector<192x128xf32>
      %507 = tpu.matmul %504, %506, %cst_489 {dimension_numbers = #tpu.dot_dimension_numbers<[1], [0], [0], [1], [0, 0, 1, 1], [], []>} : vector<192x56xbf16>, vector<56x128xbf16>, vector<192x128xf32> -> vector<192x128xf32>
      %508 = arith.addf %499, %507 : vector<192x128xf32>
      %c3_i32_490 = arith.constant 3 : i32
      %509 = arith.addi %480, %c3_i32_490 : i32
      %510 = arith.index_cast %509 : i32 to index
      %c0_491 = arith.constant 0 : index
      %c0_492 = arith.constant 0 : index
      %c0_493 = arith.constant 0 : index
      %511 = vector.load %arg1[%510, %c0_491, %c0_492, %c0_493] : memref<30x24x8x56xbf16, #tpu.memory_space<vmem>>, vector<1x24x8x56xbf16>
      %512 = vector.shape_cast %511 : vector<1x24x8x56xbf16> to vector<24x8x56xbf16>
      %513 = vector.shape_cast %512 : vector<24x8x56xbf16> to vector<192x56xbf16>
      %c3_494 = arith.constant 3 : index
      %c0_495 = arith.constant 0 : index
      %c0_496 = arith.constant 0 : index
      %514 = vector.load %arg2[%c3_494, %c0_495, %c0_496] : memref<7x56x128xbf16, #tpu.memory_space<vmem>>, vector<1x56x128xbf16>
      %515 = vector.shape_cast %514 : vector<1x56x128xbf16> to vector<56x128xbf16>
      %cst_497 = arith.constant dense<0.000000e+00> : vector<192x128xf32>
      %516 = tpu.matmul %513, %515, %cst_497 {dimension_numbers = #tpu.dot_dimension_numbers<[1], [0], [0], [1], [0, 0, 1, 1], [], []>} : vector<192x56xbf16>, vector<56x128xbf16>, vector<192x128xf32> -> vector<192x128xf32>
      %517 = arith.addf %508, %516 : vector<192x128xf32>
      %c4_i32_498 = arith.constant 4 : i32
      %518 = arith.addi %480, %c4_i32_498 : i32
      %519 = arith.index_cast %518 : i32 to index
      %c0_499 = arith.constant 0 : index
      %c0_500 = arith.constant 0 : index
      %c0_501 = arith.constant 0 : index
      %520 = vector.load %arg1[%519, %c0_499, %c0_500, %c0_501] : memref<30x24x8x56xbf16, #tpu.memory_space<vmem>>, vector<1x24x8x56xbf16>
      %521 = vector.shape_cast %520 : vector<1x24x8x56xbf16> to vector<24x8x56xbf16>
      %522 = vector.shape_cast %521 : vector<24x8x56xbf16> to vector<192x56xbf16>
      %c4_502 = arith.constant 4 : index
      %c0_503 = arith.constant 0 : index
      %c0_504 = arith.constant 0 : index
      %523 = vector.load %arg2[%c4_502, %c0_503, %c0_504] : memref<7x56x128xbf16, #tpu.memory_space<vmem>>, vector<1x56x128xbf16>
      %524 = vector.shape_cast %523 : vector<1x56x128xbf16> to vector<56x128xbf16>
      %cst_505 = arith.constant dense<0.000000e+00> : vector<192x128xf32>
      %525 = tpu.matmul %522, %524, %cst_505 {dimension_numbers = #tpu.dot_dimension_numbers<[1], [0], [0], [1], [0, 0, 1, 1], [], []>} : vector<192x56xbf16>, vector<56x128xbf16>, vector<192x128xf32> -> vector<192x128xf32>
      %526 = arith.addf %517, %525 : vector<192x128xf32>
      %c5_i32_506 = arith.constant 5 : i32
      %527 = arith.addi %480, %c5_i32_506 : i32
      %528 = arith.index_cast %527 : i32 to index
      %c0_507 = arith.constant 0 : index
      %c0_508 = arith.constant 0 : index
      %c0_509 = arith.constant 0 : index
      %529 = vector.load %arg1[%528, %c0_507, %c0_508, %c0_509] : memref<30x24x8x56xbf16, #tpu.memory_space<vmem>>, vector<1x24x8x56xbf16>
      %530 = vector.shape_cast %529 : vector<1x24x8x56xbf16> to vector<24x8x56xbf16>
      %531 = vector.shape_cast %530 : vector<24x8x56xbf16> to vector<192x56xbf16>
      %c5_510 = arith.constant 5 : index
      %c0_511 = arith.constant 0 : index
      %c0_512 = arith.constant 0 : index
      %532 = vector.load %arg2[%c5_510, %c0_511, %c0_512] : memref<7x56x128xbf16, #tpu.memory_space<vmem>>, vector<1x56x128xbf16>
      %533 = vector.shape_cast %532 : vector<1x56x128xbf16> to vector<56x128xbf16>
      %cst_513 = arith.constant dense<0.000000e+00> : vector<192x128xf32>
      %534 = tpu.matmul %531, %533, %cst_513 {dimension_numbers = #tpu.dot_dimension_numbers<[1], [0], [0], [1], [0, 0, 1, 1], [], []>} : vector<192x56xbf16>, vector<56x128xbf16>, vector<192x128xf32> -> vector<192x128xf32>
      %535 = arith.addf %526, %534 : vector<192x128xf32>
      %c6_i32_514 = arith.constant 6 : i32
      %536 = arith.addi %480, %c6_i32_514 : i32
      %537 = arith.index_cast %536 : i32 to index
      %c0_515 = arith.constant 0 : index
      %c0_516 = arith.constant 0 : index
      %c0_517 = arith.constant 0 : index
      %538 = vector.load %arg1[%537, %c0_515, %c0_516, %c0_517] : memref<30x24x8x56xbf16, #tpu.memory_space<vmem>>, vector<1x24x8x56xbf16>
      %539 = vector.shape_cast %538 : vector<1x24x8x56xbf16> to vector<24x8x56xbf16>
      %540 = vector.shape_cast %539 : vector<24x8x56xbf16> to vector<192x56xbf16>
      %c6_518 = arith.constant 6 : index
      %c0_519 = arith.constant 0 : index
      %c0_520 = arith.constant 0 : index
      %541 = vector.load %arg2[%c6_518, %c0_519, %c0_520] : memref<7x56x128xbf16, #tpu.memory_space<vmem>>, vector<1x56x128xbf16>
      %542 = vector.shape_cast %541 : vector<1x56x128xbf16> to vector<56x128xbf16>
      %cst_521 = arith.constant dense<0.000000e+00> : vector<192x128xf32>
      %543 = tpu.matmul %540, %542, %cst_521 {dimension_numbers = #tpu.dot_dimension_numbers<[1], [0], [0], [1], [0, 0, 1, 1], [], []>} : vector<192x56xbf16>, vector<56x128xbf16>, vector<192x128xf32> -> vector<192x128xf32>
      %544 = arith.addf %535, %543 : vector<192x128xf32>
      %545 = vector.shape_cast %544 : vector<192x128xf32> to vector<12x2x8x128xf32>
      %cst_522 = arith.constant dense<0xFF800000> : vector<12x8x128xf32>
      %546 = vector.multi_reduction <maximumf>, %545, %cst_522 [1] : vector<12x2x8x128xf32> to vector<12x8x128xf32>
      %547 = arith.maximumf %478, %546 : vector<12x8x128xf32>
      %548 = vector.shape_cast %0 : vector<1x128xf32> to vector<1x1x128xf32>
      %549 = vector.broadcast %548 : vector<1x1x128xf32> to vector<12x8x128xf32>
      %550 = arith.addf %547, %549 : vector<12x8x128xf32>
      %cst_523 = arith.constant 0.000000e+00 : f32
      %551 = vector.broadcast %cst_523 : f32 to vector<12x8x128xf32>
      %552 = arith.maximumf %550, %551 : vector<12x8x128xf32>
      %553 = arith.truncf %552 : vector<12x8x128xf32> to vector<12x8x128xbf16>
      %554 = arith.index_cast %arg11 : i32 to index
      %c0_524 = arith.constant 0 : index
      %c0_525 = arith.constant 0 : index
      %c0_526 = arith.constant 0 : index
      %555 = vector.load %arg9[%554, %c0_524, %c0_525, %c0_526] : memref<12x12x8x128xbf16, #tpu.memory_space<vmem>>, vector<1x12x8x128xbf16>
      %556 = vector.shape_cast %555 : vector<1x12x8x128xbf16> to vector<12x8x128xbf16>
      %557 = vector.shape_cast %553 : vector<12x8x128xbf16> to vector<1x12x8x128xbf16>
      tpu.vector_store %arg9[%554, %c0_524, %c0_525, %c0_526], %557 {strides = array<i32>} : memref<12x12x8x128xbf16, #tpu.memory_space<vmem>>, vector<1x12x8x128xbf16>,
    }
    %c12_i32_1 = arith.constant 12 : i32
    %c0_2 = arith.constant 0 : index
    %c0_3 = arith.constant 0 : index
    %2 = vector.load %arg5[%c0_2, %c0_3] : memref<1x128xf32, #tpu.memory_space<vmem>>, vector<1x128xf32>
    %cst = arith.constant 0.000000e+00 : f32
    %3 = vector.broadcast %cst : f32 to vector<160x128xf32>
    %c0_4 = arith.constant 0 : index
    %c0_5 = arith.constant 0 : index
    %c0_6 = arith.constant 0 : index
    %c0_7 = arith.constant 0 : index
    %4 = vector.load %arg9[%c0_4, %c0_5, %c0_6, %c0_7] : memref<12x12x8x128xbf16, #tpu.memory_space<vmem>>, vector<2x10x8x128xbf16>
    %5 = vector.shape_cast %4 : vector<2x10x8x128xbf16> to vector<160x128xbf16>
    %c0_8 = arith.constant 0 : index
    %c0_9 = arith.constant 0 : index
    %c0_10 = arith.constant 0 : index
    %6 = vector.load %arg4[%c0_8, %c0_9, %c0_10] : memref<9x128x128xbf16, #tpu.memory_space<vmem>>, vector<1x128x128xbf16>
    %7 = vector.shape_cast %6 : vector<1x128x128xbf16> to vector<128x128xbf16>
    %cst_11 = arith.constant dense<0.000000e+00> : vector<160x128xf32>
    %8 = tpu.matmul %5, %7, %cst_11 {dimension_numbers = #tpu.dot_dimension_numbers<[1], [0], [0], [1], [0, 0, 1, 1], [], []>} : vector<160x128xbf16>, vector<128x128xbf16>, vector<160x128xf32> -> vector<160x128xf32>
    %9 = arith.addf %3, %8 : vector<160x128xf32>
    %c0_12 = arith.constant 0 : index
    %c1 = arith.constant 1 : index
    %c0_13 = arith.constant 0 : index
    %c0_14 = arith.constant 0 : index
    %10 = vector.load %arg9[%c0_12, %c1, %c0_13, %c0_14] : memref<12x12x8x128xbf16, #tpu.memory_space<vmem>>, vector<2x10x8x128xbf16>
    %11 = vector.shape_cast %10 : vector<2x10x8x128xbf16> to vector<160x128xbf16>
    %c1_15 = arith.constant 1 : index
    %c0_16 = arith.constant 0 : index
    %c0_17 = arith.constant 0 : index
    %12 = vector.load %arg4[%c1_15, %c0_16, %c0_17] : memref<9x128x128xbf16, #tpu.memory_space<vmem>>, vector<1x128x128xbf16>
    %13 = vector.shape_cast %12 : vector<1x128x128xbf16> to vector<128x128xbf16>
    %cst_18 = arith.constant dense<0.000000e+00> : vector<160x128xf32>
    %14 = tpu.matmul %11, %13, %cst_18 {dimension_numbers = #tpu.dot_dimension_numbers<[1], [0], [0], [1], [0, 0, 1, 1], [], []>} : vector<160x128xbf16>, vector<128x128xbf16>, vector<160x128xf32> -> vector<160x128xf32>
    %15 = arith.addf %9, %14 : vector<160x128xf32>
    %c0_19 = arith.constant 0 : index
    %c2 = arith.constant 2 : index
    %c0_20 = arith.constant 0 : index
    %c0_21 = arith.constant 0 : index
    %16 = vector.load %arg9[%c0_19, %c2, %c0_20, %c0_21] : memref<12x12x8x128xbf16, #tpu.memory_space<vmem>>, vector<2x10x8x128xbf16>
    %17 = vector.shape_cast %16 : vector<2x10x8x128xbf16> to vector<160x128xbf16>
    %c2_22 = arith.constant 2 : index
    %c0_23 = arith.constant 0 : index
    %c0_24 = arith.constant 0 : index
    %18 = vector.load %arg4[%c2_22, %c0_23, %c0_24] : memref<9x128x128xbf16, #tpu.memory_space<vmem>>, vector<1x128x128xbf16>
    %19 = vector.shape_cast %18 : vector<1x128x128xbf16> to vector<128x128xbf16>
    %cst_25 = arith.constant dense<0.000000e+00> : vector<160x128xf32>
    %20 = tpu.matmul %17, %19, %cst_25 {dimension_numbers = #tpu.dot_dimension_numbers<[1], [0], [0], [1], [0, 0, 1, 1], [], []>} : vector<160x128xbf16>, vector<128x128xbf16>, vector<160x128xf32> -> vector<160x128xf32>
    %21 = arith.addf %15, %20 : vector<160x128xf32>
    %c1_26 = arith.constant 1 : index
    %c0_27 = arith.constant 0 : index
    %c0_28 = arith.constant 0 : index
    %c0_29 = arith.constant 0 : index
    %22 = vector.load %arg9[%c1_26, %c0_27, %c0_28, %c0_29] : memref<12x12x8x128xbf16, #tpu.memory_space<vmem>>, vector<2x10x8x128xbf16>
    %23 = vector.shape_cast %22 : vector<2x10x8x128xbf16> to vector<160x128xbf16>
    %c3 = arith.constant 3 : index
    %c0_30 = arith.constant 0 : index
    %c0_31 = arith.constant 0 : index
    %24 = vector.load %arg4[%c3, %c0_30, %c0_31] : memref<9x128x128xbf16, #tpu.memory_space<vmem>>, vector<1x128x128xbf16>
    %25 = vector.shape_cast %24 : vector<1x128x128xbf16> to vector<128x128xbf16>
    %cst_32 = arith.constant dense<0.000000e+00> : vector<160x128xf32>
    %26 = tpu.matmul %23, %25, %cst_32 {dimension_numbers = #tpu.dot_dimension_numbers<[1], [0], [0], [1], [0, 0, 1, 1], [], []>} : vector<160x128xbf16>, vector<128x128xbf16>, vector<160x128xf32> -> vector<160x128xf32>
    %27 = arith.addf %21, %26 : vector<160x128xf32>
    %c1_33 = arith.constant 1 : index
    %c1_34 = arith.constant 1 : index
    %c0_35 = arith.constant 0 : index
    %c0_36 = arith.constant 0 : index
    %28 = vector.load %arg9[%c1_33, %c1_34, %c0_35, %c0_36] : memref<12x12x8x128xbf16, #tpu.memory_space<vmem>>, vector<2x10x8x128xbf16>
    %29 = vector.shape_cast %28 : vector<2x10x8x128xbf16> to vector<160x128xbf16>
    %c4 = arith.constant 4 : index
    %c0_37 = arith.constant 0 : index
    %c0_38 = arith.constant 0 : index
    %30 = vector.load %arg4[%c4, %c0_37, %c0_38] : memref<9x128x128xbf16, #tpu.memory_space<vmem>>, vector<1x128x128xbf16>
    %31 = vector.shape_cast %30 : vector<1x128x128xbf16> to vector<128x128xbf16>
    %cst_39 = arith.constant dense<0.000000e+00> : vector<160x128xf32>
    %32 = tpu.matmul %29, %31, %cst_39 {dimension_numbers = #tpu.dot_dimension_numbers<[1], [0], [0], [1], [0, 0, 1, 1], [], []>} : vector<160x128xbf16>, vector<128x128xbf16>, vector<160x128xf32> -> vector<160x128xf32>
    %33 = arith.addf %27, %32 : vector<160x128xf32>
    %c1_40 = arith.constant 1 : index
    %c2_41 = arith.constant 2 : index
    %c0_42 = arith.constant 0 : index
    %c0_43 = arith.constant 0 : index
    %34 = vector.load %arg9[%c1_40, %c2_41, %c0_42, %c0_43] : memref<12x12x8x128xbf16, #tpu.memory_space<vmem>>, vector<2x10x8x128xbf16>
    %35 = vector.shape_cast %34 : vector<2x10x8x128xbf16> to vector<160x128xbf16>
    %c5 = arith.constant 5 : index
    %c0_44 = arith.constant 0 : index
    %c0_45 = arith.constant 0 : index
    %36 = vector.load %arg4[%c5, %c0_44, %c0_45] : memref<9x128x128xbf16, #tpu.memory_space<vmem>>, vector<1x128x128xbf16>
    %37 = vector.shape_cast %36 : vector<1x128x128xbf16> to vector<128x128xbf16>
    %cst_46 = arith.constant dense<0.000000e+00> : vector<160x128xf32>
    %38 = tpu.matmul %35, %37, %cst_46 {dimension_numbers = #tpu.dot_dimension_numbers<[1], [0], [0], [1], [0, 0, 1, 1], [], []>} : vector<160x128xbf16>, vector<128x128xbf16>, vector<160x128xf32> -> vector<160x128xf32>
    %39 = arith.addf %33, %38 : vector<160x128xf32>
    %c2_47 = arith.constant 2 : index
    %c0_48 = arith.constant 0 : index
    %c0_49 = arith.constant 0 : index
    %c0_50 = arith.constant 0 : index
    %40 = vector.load %arg9[%c2_47, %c0_48, %c0_49, %c0_50] : memref<12x12x8x128xbf16, #tpu.memory_space<vmem>>, vector<2x10x8x128xbf16>
    %41 = vector.shape_cast %40 : vector<2x10x8x128xbf16> to vector<160x128xbf16>
    %c6 = arith.constant 6 : index
    %c0_51 = arith.constant 0 : index
    %c0_52 = arith.constant 0 : index
    %42 = vector.load %arg4[%c6, %c0_51, %c0_52] : memref<9x128x128xbf16, #tpu.memory_space<vmem>>, vector<1x128x128xbf16>
    %43 = vector.shape_cast %42 : vector<1x128x128xbf16> to vector<128x128xbf16>
    %cst_53 = arith.constant dense<0.000000e+00> : vector<160x128xf32>
    %44 = tpu.matmul %41, %43, %cst_53 {dimension_numbers = #tpu.dot_dimension_numbers<[1], [0], [0], [1], [0, 0, 1, 1], [], []>} : vector<160x128xbf16>, vector<128x128xbf16>, vector<160x128xf32> -> vector<160x128xf32>
    %45 = arith.addf %39, %44 : vector<160x128xf32>
    %c2_54 = arith.constant 2 : index
    %c1_55 = arith.constant 1 : index
    %c0_56 = arith.constant 0 : index
    %c0_57 = arith.constant 0 : index
    %46 = vector.load %arg9[%c2_54, %c1_55, %c0_56, %c0_57] : memref<12x12x8x128xbf16, #tpu.memory_space<vmem>>, vector<2x10x8x128xbf16>
    %47 = vector.shape_cast %46 : vector<2x10x8x128xbf16> to vector<160x128xbf16>
    %c7 = arith.constant 7 : index
    %c0_58 = arith.constant 0 : index
    %c0_59 = arith.constant 0 : index
    %48 = vector.load %arg4[%c7, %c0_58, %c0_59] : memref<9x128x128xbf16, #tpu.memory_space<vmem>>, vector<1x128x128xbf16>
    %49 = vector.shape_cast %48 : vector<1x128x128xbf16> to vector<128x128xbf16>
    %cst_60 = arith.constant dense<0.000000e+00> : vector<160x128xf32>
    %50 = tpu.matmul %47, %49, %cst_60 {dimension_numbers = #tpu.dot_dimension_numbers<[1], [0], [0], [1], [0, 0, 1, 1], [], []>} : vector<160x128xbf16>, vector<128x128xbf16>, vector<160x128xf32> -> vector<160x128xf32>
    %51 = arith.addf %45, %50 : vector<160x128xf32>
    %c2_61 = arith.constant 2 : index
    %c2_62 = arith.constant 2 : index
    %c0_63 = arith.constant 0 : index
    %c0_64 = arith.constant 0 : index
    %52 = vector.load %arg9[%c2_61, %c2_62, %c0_63, %c0_64] : memref<12x12x8x128xbf16, #tpu.memory_space<vmem>>, vector<2x10x8x128xbf16>
    %53 = vector.shape_cast %52 : vector<2x10x8x128xbf16> to vector<160x128xbf16>
    %c8 = arith.constant 8 : index
    %c0_65 = arith.constant 0 : index
    %c0_66 = arith.constant 0 : index
    %54 = vector.load %arg4[%c8, %c0_65, %c0_66] : memref<9x128x128xbf16, #tpu.memory_space<vmem>>, vector<1x128x128xbf16>
    %55 = vector.shape_cast %54 : vector<1x128x128xbf16> to vector<128x128xbf16>
    %cst_67 = arith.constant dense<0.000000e+00> : vector<160x128xf32>
    %56 = tpu.matmul %53, %55, %cst_67 {dimension_numbers = #tpu.dot_dimension_numbers<[1], [0], [0], [1], [0, 0, 1, 1], [], []>} : vector<160x128xbf16>, vector<128x128xbf16>, vector<160x128xf32> -> vector<160x128xf32>
    %57 = arith.addf %51, %56 : vector<160x128xf32>
    %58 = vector.shape_cast %57 : vector<160x128xf32> to vector<2x80x128xf32>
    %cst_68 = arith.constant dense<0xFF800000> : vector<80x128xf32>
    %59 = vector.multi_reduction <maximumf>, %58, %cst_68 [0] : vector<2x80x128xf32> to vector<80x128xf32>
    %60 = vector.shape_cast %59 : vector<80x128xf32> to vector<5x2x8x128xf32>
    %cst_69 = arith.constant dense<0xFF800000> : vector<5x8x128xf32>
    %61 = vector.multi_reduction <maximumf>, %60, %cst_69 [1] : vector<5x2x8x128xf32> to vector<5x8x128xf32>
    %62 = vector.shape_cast %2 : vector<1x128xf32> to vector<1x1x128xf32>
    %63 = vector.broadcast %62 : vector<1x1x128xf32> to vector<5x8x128xf32>
    %64 = arith.addf %61, %63 : vector<5x8x128xf32>
    %cst_70 = arith.constant 0.000000e+00 : f32
    %65 = vector.broadcast %cst_70 : f32 to vector<5x8x128xf32>
    %66 = arith.maximumf %64, %65 : vector<5x8x128xf32>
    %67 = arith.truncf %66 : vector<5x8x128xf32> to vector<5x8x128xbf16>
    %68 = vector.extract_strided_slice %67 {offsets = [0, 0, 0], sizes = [1, 8, 128], strides = [1, 1, 1]} : vector<5x8x128xbf16> to vector<1x8x128xbf16>
    %69 = vector.shape_cast %68 : vector<1x8x128xbf16> to vector<8x128xbf16>
    %c0_71 = arith.constant 0 : index
    %c0_72 = arith.constant 0 : index
    %70 = vector.load %arg10[%c0_71, %c0_72] : memref<8x3200xbf16, #tpu.memory_space<vmem>>, vector<8x128xbf16>
    tpu.vector_store %arg10[%c0_71, %c0_72], %69 {strides = array<i32>} : memref<8x3200xbf16, #tpu.memory_space<vmem>>, vector<8x128xbf16>,
    %71 = vector.extract_strided_slice %67 {offsets = [1, 0, 0], sizes = [1, 8, 128], strides = [1, 1, 1]} : vector<5x8x128xbf16> to vector<1x8x128xbf16>
    %72 = vector.shape_cast %71 : vector<1x8x128xbf16> to vector<8x128xbf16>
    %c0_73 = arith.constant 0 : index
    %c128 = arith.constant 128 : index
    %73 = vector.load %arg10[%c0_73, %c128] : memref<8x3200xbf16, #tpu.memory_space<vmem>>, vector<8x128xbf16>
    tpu.vector_store %arg10[%c0_73, %c128], %72 {strides = array<i32>} : memref<8x3200xbf16, #tpu.memory_space<vmem>>, vector<8x128xbf16>,
    %74 = vector.extract_strided_slice %67 {offsets = [2, 0, 0], sizes = [1, 8, 128], strides = [1, 1, 1]} : vector<5x8x128xbf16> to vector<1x8x128xbf16>
    %75 = vector.shape_cast %74 : vector<1x8x128xbf16> to vector<8x128xbf16>
    %c0_74 = arith.constant 0 : index
    %c256 = arith.constant 256 : index
    %76 = vector.load %arg10[%c0_74, %c256] : memref<8x3200xbf16, #tpu.memory_space<vmem>>, vector<8x128xbf16>
    tpu.vector_store %arg10[%c0_74, %c256], %75 {strides = array<i32>} : memref<8x3200xbf16, #tpu.memory_space<vmem>>, vector<8x128xbf16>,
    %77 = vector.extract_strided_slice %67 {offsets = [3, 0, 0], sizes = [1, 8, 128], strides = [1, 1, 1]} : vector<5x8x128xbf16> to vector<1x8x128xbf16>
    %78 = vector.shape_cast %77 : vector<1x8x128xbf16> to vector<8x128xbf16>
    %c0_75 = arith.constant 0 : index
    %c384 = arith.constant 384 : index
    %79 = vector.load %arg10[%c0_75, %c384] : memref<8x3200xbf16, #tpu.memory_space<vmem>>, vector<8x128xbf16>
    tpu.vector_store %arg10[%c0_75, %c384], %78 {strides = array<i32>} : memref<8x3200xbf16, #tpu.memory_space<vmem>>, vector<8x128xbf16>,
    %80 = vector.extract_strided_slice %67 {offsets = [4, 0, 0], sizes = [1, 8, 128], strides = [1, 1, 1]} : vector<5x8x128xbf16> to vector<1x8x128xbf16>
    %81 = vector.shape_cast %80 : vector<1x8x128xbf16> to vector<8x128xbf16>
    %c0_76 = arith.constant 0 : index
    %c512 = arith.constant 512 : index
    %82 = vector.load %arg10[%c0_76, %c512] : memref<8x3200xbf16, #tpu.memory_space<vmem>>, vector<8x128xbf16>
    tpu.vector_store %arg10[%c0_76, %c512], %81 {strides = array<i32>} : memref<8x3200xbf16, #tpu.memory_space<vmem>>, vector<8x128xbf16>,
    %cst_77 = arith.constant 0.000000e+00 : f32
    %83 = vector.broadcast %cst_77 : f32 to vector<160x128xf32>
    %c2_78 = arith.constant 2 : index
    %c0_79 = arith.constant 0 : index
    %c0_80 = arith.constant 0 : index
    %c0_81 = arith.constant 0 : index
    %84 = vector.load %arg9[%c2_78, %c0_79, %c0_80, %c0_81] : memref<12x12x8x128xbf16, #tpu.memory_space<vmem>>, vector<2x10x8x128xbf16>
    %85 = vector.shape_cast %84 : vector<2x10x8x128xbf16> to vector<160x128xbf16>
    %c0_82 = arith.constant 0 : index
    %c0_83 = arith.constant 0 : index
    %c0_84 = arith.constant 0 : index
    %86 = vector.load %arg4[%c0_82, %c0_83, %c0_84] : memref<9x128x128xbf16, #tpu.memory_space<vmem>>, vector<1x128x128xbf16>
    %87 = vector.shape_cast %86 : vector<1x128x128xbf16> to vector<128x128xbf16>
    %cst_85 = arith.constant dense<0.000000e+00> : vector<160x128xf32>
    %88 = tpu.matmul %85, %87, %cst_85 {dimension_numbers = #tpu.dot_dimension_numbers<[1], [0], [0], [1], [0, 0, 1, 1], [], []>} : vector<160x128xbf16>, vector<128x128xbf16>, vector<160x128xf32> -> vector<160x128xf32>
    %89 = arith.addf %83, %88 : vector<160x128xf32>
    %c2_86 = arith.constant 2 : index
    %c1_87 = arith.constant 1 : index
    %c0_88 = arith.constant 0 : index
    %c0_89 = arith.constant 0 : index
    %90 = vector.load %arg9[%c2_86, %c1_87, %c0_88, %c0_89] : memref<12x12x8x128xbf16, #tpu.memory_space<vmem>>, vector<2x10x8x128xbf16>
    %91 = vector.shape_cast %90 : vector<2x10x8x128xbf16> to vector<160x128xbf16>
    %c1_90 = arith.constant 1 : index
    %c0_91 = arith.constant 0 : index
    %c0_92 = arith.constant 0 : index
    %92 = vector.load %arg4[%c1_90, %c0_91, %c0_92] : memref<9x128x128xbf16, #tpu.memory_space<vmem>>, vector<1x128x128xbf16>
    %93 = vector.shape_cast %92 : vector<1x128x128xbf16> to vector<128x128xbf16>
    %cst_93 = arith.constant dense<0.000000e+00> : vector<160x128xf32>
    %94 = tpu.matmul %91, %93, %cst_93 {dimension_numbers = #tpu.dot_dimension_numbers<[1], [0], [0], [1], [0, 0, 1, 1], [], []>} : vector<160x128xbf16>, vector<128x128xbf16>, vector<160x128xf32> -> vector<160x128xf32>
    %95 = arith.addf %89, %94 : vector<160x128xf32>
    %c2_94 = arith.constant 2 : index
    %c2_95 = arith.constant 2 : index
    %c0_96 = arith.constant 0 : index
    %c0_97 = arith.constant 0 : index
    %96 = vector.load %arg9[%c2_94, %c2_95, %c0_96, %c0_97] : memref<12x12x8x128xbf16, #tpu.memory_space<vmem>>, vector<2x10x8x128xbf16>
    %97 = vector.shape_cast %96 : vector<2x10x8x128xbf16> to vector<160x128xbf16>
    %c2_98 = arith.constant 2 : index
    %c0_99 = arith.constant 0 : index
    %c0_100 = arith.constant 0 : index
    %98 = vector.load %arg4[%c2_98, %c0_99, %c0_100] : memref<9x128x128xbf16, #tpu.memory_space<vmem>>, vector<1x128x128xbf16>
    %99 = vector.shape_cast %98 : vector<1x128x128xbf16> to vector<128x128xbf16>
    %cst_101 = arith.constant dense<0.000000e+00> : vector<160x128xf32>
    %100 = tpu.matmul %97, %99, %cst_101 {dimension_numbers = #tpu.dot_dimension_numbers<[1], [0], [0], [1], [0, 0, 1, 1], [], []>} : vector<160x128xbf16>, vector<128x128xbf16>, vector<160x128xf32> -> vector<160x128xf32>
    %101 = arith.addf %95, %100 : vector<160x128xf32>
    %c3_102 = arith.constant 3 : index
    %c0_103 = arith.constant 0 : index
    %c0_104 = arith.constant 0 : index
    %c0_105 = arith.constant 0 : index
    %102 = vector.load %arg9[%c3_102, %c0_103, %c0_104, %c0_105] : memref<12x12x8x128xbf16, #tpu.memory_space<vmem>>, vector<2x10x8x128xbf16>
    %103 = vector.shape_cast %102 : vector<2x10x8x128xbf16> to vector<160x128xbf16>
    %c3_106 = arith.constant 3 : index
    %c0_107 = arith.constant 0 : index
    %c0_108 = arith.constant 0 : index
    %104 = vector.load %arg4[%c3_106, %c0_107, %c0_108] : memref<9x128x128xbf16, #tpu.memory_space<vmem>>, vector<1x128x128xbf16>
    %105 = vector.shape_cast %104 : vector<1x128x128xbf16> to vector<128x128xbf16>
    %cst_109 = arith.constant dense<0.000000e+00> : vector<160x128xf32>
    %106 = tpu.matmul %103, %105, %cst_109 {dimension_numbers = #tpu.dot_dimension_numbers<[1], [0], [0], [1], [0, 0, 1, 1], [], []>} : vector<160x128xbf16>, vector<128x128xbf16>, vector<160x128xf32> -> vector<160x128xf32>
    %107 = arith.addf %101, %106 : vector<160x128xf32>
    %c3_110 = arith.constant 3 : index
    %c1_111 = arith.constant 1 : index
    %c0_112 = arith.constant 0 : index
    %c0_113 = arith.constant 0 : index
    %108 = vector.load %arg9[%c3_110, %c1_111, %c0_112, %c0_113] : memref<12x12x8x128xbf16, #tpu.memory_space<vmem>>, vector<2x10x8x128xbf16>
    %109 = vector.shape_cast %108 : vector<2x10x8x128xbf16> to vector<160x128xbf16>
    %c4_114 = arith.constant 4 : index
    %c0_115 = arith.constant 0 : index
    %c0_116 = arith.constant 0 : index
    %110 = vector.load %arg4[%c4_114, %c0_115, %c0_116] : memref<9x128x128xbf16, #tpu.memory_space<vmem>>, vector<1x128x128xbf16>
    %111 = vector.shape_cast %110 : vector<1x128x128xbf16> to vector<128x128xbf16>
    %cst_117 = arith.constant dense<0.000000e+00> : vector<160x128xf32>
    %112 = tpu.matmul %109, %111, %cst_117 {dimension_numbers = #tpu.dot_dimension_numbers<[1], [0], [0], [1], [0, 0, 1, 1], [], []>} : vector<160x128xbf16>, vector<128x128xbf16>, vector<160x128xf32> -> vector<160x128xf32>
    %113 = arith.addf %107, %112 : vector<160x128xf32>
    %c3_118 = arith.constant 3 : index
    %c2_119 = arith.constant 2 : index
    %c0_120 = arith.constant 0 : index
    %c0_121 = arith.constant 0 : index
    %114 = vector.load %arg9[%c3_118, %c2_119, %c0_120, %c0_121] : memref<12x12x8x128xbf16, #tpu.memory_space<vmem>>, vector<2x10x8x128xbf16>
    %115 = vector.shape_cast %114 : vector<2x10x8x128xbf16> to vector<160x128xbf16>
    %c5_122 = arith.constant 5 : index
    %c0_123 = arith.constant 0 : index
    %c0_124 = arith.constant 0 : index
    %116 = vector.load %arg4[%c5_122, %c0_123, %c0_124] : memref<9x128x128xbf16, #tpu.memory_space<vmem>>, vector<1x128x128xbf16>
    %117 = vector.shape_cast %116 : vector<1x128x128xbf16> to vector<128x128xbf16>
    %cst_125 = arith.constant dense<0.000000e+00> : vector<160x128xf32>
    %118 = tpu.matmul %115, %117, %cst_125 {dimension_numbers = #tpu.dot_dimension_numbers<[1], [0], [0], [1], [0, 0, 1, 1], [], []>} : vector<160x128xbf16>, vector<128x128xbf16>, vector<160x128xf32> -> vector<160x128xf32>
    %119 = arith.addf %113, %118 : vector<160x128xf32>
    %c4_126 = arith.constant 4 : index
    %c0_127 = arith.constant 0 : index
    %c0_128 = arith.constant 0 : index
    %c0_129 = arith.constant 0 : index
    %120 = vector.load %arg9[%c4_126, %c0_127, %c0_128, %c0_129] : memref<12x12x8x128xbf16, #tpu.memory_space<vmem>>, vector<2x10x8x128xbf16>
    %121 = vector.shape_cast %120 : vector<2x10x8x128xbf16> to vector<160x128xbf16>
    %c6_130 = arith.constant 6 : index
    %c0_131 = arith.constant 0 : index
    %c0_132 = arith.constant 0 : index
    %122 = vector.load %arg4[%c6_130, %c0_131, %c0_132] : memref<9x128x128xbf16, #tpu.memory_space<vmem>>, vector<1x128x128xbf16>
    %123 = vector.shape_cast %122 : vector<1x128x128xbf16> to vector<128x128xbf16>
    %cst_133 = arith.constant dense<0.000000e+00> : vector<160x128xf32>
    %124 = tpu.matmul %121, %123, %cst_133 {dimension_numbers = #tpu.dot_dimension_numbers<[1], [0], [0], [1], [0, 0, 1, 1], [], []>} : vector<160x128xbf16>, vector<128x128xbf16>, vector<160x128xf32> -> vector<160x128xf32>
    %125 = arith.addf %119, %124 : vector<160x128xf32>
    %c4_134 = arith.constant 4 : index
    %c1_135 = arith.constant 1 : index
    %c0_136 = arith.constant 0 : index
    %c0_137 = arith.constant 0 : index
    %126 = vector.load %arg9[%c4_134, %c1_135, %c0_136, %c0_137] : memref<12x12x8x128xbf16, #tpu.memory_space<vmem>>, vector<2x10x8x128xbf16>
    %127 = vector.shape_cast %126 : vector<2x10x8x128xbf16> to vector<160x128xbf16>
    %c7_138 = arith.constant 7 : index
    %c0_139 = arith.constant 0 : index
    %c0_140 = arith.constant 0 : index
    %128 = vector.load %arg4[%c7_138, %c0_139, %c0_140] : memref<9x128x128xbf16, #tpu.memory_space<vmem>>, vector<1x128x128xbf16>
    %129 = vector.shape_cast %128 : vector<1x128x128xbf16> to vector<128x128xbf16>
    %cst_141 = arith.constant dense<0.000000e+00> : vector<160x128xf32>
    %130 = tpu.matmul %127, %129, %cst_141 {dimension_numbers = #tpu.dot_dimension_numbers<[1], [0], [0], [1], [0, 0, 1, 1], [], []>} : vector<160x128xbf16>, vector<128x128xbf16>, vector<160x128xf32> -> vector<160x128xf32>
    %131 = arith.addf %125, %130 : vector<160x128xf32>
    %c4_142 = arith.constant 4 : index
    %c2_143 = arith.constant 2 : index
    %c0_144 = arith.constant 0 : index
    %c0_145 = arith.constant 0 : index
    %132 = vector.load %arg9[%c4_142, %c2_143, %c0_144, %c0_145] : memref<12x12x8x128xbf16, #tpu.memory_space<vmem>>, vector<2x10x8x128xbf16>
    %133 = vector.shape_cast %132 : vector<2x10x8x128xbf16> to vector<160x128xbf16>
    %c8_146 = arith.constant 8 : index
    %c0_147 = arith.constant 0 : index
    %c0_148 = arith.constant 0 : index
    %134 = vector.load %arg4[%c8_146, %c0_147, %c0_148] : memref<9x128x128xbf16, #tpu.memory_space<vmem>>, vector<1x128x128xbf16>
    %135 = vector.shape_cast %134 : vector<1x128x128xbf16> to vector<128x128xbf16>
    %cst_149 = arith.constant dense<0.000000e+00> : vector<160x128xf32>
    %136 = tpu.matmul %133, %135, %cst_149 {dimension_numbers = #tpu.dot_dimension_numbers<[1], [0], [0], [1], [0, 0, 1, 1], [], []>} : vector<160x128xbf16>, vector<128x128xbf16>, vector<160x128xf32> -> vector<160x128xf32>
    %137 = arith.addf %131, %136 : vector<160x128xf32>
    %138 = vector.shape_cast %137 : vector<160x128xf32> to vector<2x80x128xf32>
    %cst_150 = arith.constant dense<0xFF800000> : vector<80x128xf32>
    %139 = vector.multi_reduction <maximumf>, %138, %cst_150 [0] : vector<2x80x128xf32> to vector<80x128xf32>
    %140 = vector.shape_cast %139 : vector<80x128xf32> to vector<5x2x8x128xf32>
    %cst_151 = arith.constant dense<0xFF800000> : vector<5x8x128xf32>
    %141 = vector.multi_reduction <maximumf>, %140, %cst_151 [1] : vector<5x2x8x128xf32> to vector<5x8x128xf32>
    %142 = vector.shape_cast %2 : vector<1x128xf32> to vector<1x1x128xf32>
    %143 = vector.broadcast %142 : vector<1x1x128xf32> to vector<5x8x128xf32>
    %144 = arith.addf %141, %143 : vector<5x8x128xf32>
    %cst_152 = arith.constant 0.000000e+00 : f32
    %145 = vector.broadcast %cst_152 : f32 to vector<5x8x128xf32>
    %146 = arith.maximumf %144, %145 : vector<5x8x128xf32>
    %147 = arith.truncf %146 : vector<5x8x128xf32> to vector<5x8x128xbf16>
    %148 = vector.extract_strided_slice %147 {offsets = [0, 0, 0], sizes = [1, 8, 128], strides = [1, 1, 1]} : vector<5x8x128xbf16> to vector<1x8x128xbf16>
    %149 = vector.shape_cast %148 : vector<1x8x128xbf16> to vector<8x128xbf16>
    %c0_153 = arith.constant 0 : index
    %c640 = arith.constant 640 : index
    %150 = vector.load %arg10[%c0_153, %c640] : memref<8x3200xbf16, #tpu.memory_space<vmem>>, vector<8x128xbf16>
    tpu.vector_store %arg10[%c0_153, %c640], %149 {strides = array<i32>} : memref<8x3200xbf16, #tpu.memory_space<vmem>>, vector<8x128xbf16>,
    %151 = vector.extract_strided_slice %147 {offsets = [1, 0, 0], sizes = [1, 8, 128], strides = [1, 1, 1]} : vector<5x8x128xbf16> to vector<1x8x128xbf16>
    %152 = vector.shape_cast %151 : vector<1x8x128xbf16> to vector<8x128xbf16>
    %c0_154 = arith.constant 0 : index
    %c768 = arith.constant 768 : index
    %153 = vector.load %arg10[%c0_154, %c768] : memref<8x3200xbf16, #tpu.memory_space<vmem>>, vector<8x128xbf16>
    tpu.vector_store %arg10[%c0_154, %c768], %152 {strides = array<i32>} : memref<8x3200xbf16, #tpu.memory_space<vmem>>, vector<8x128xbf16>,
    %154 = vector.extract_strided_slice %147 {offsets = [2, 0, 0], sizes = [1, 8, 128], strides = [1, 1, 1]} : vector<5x8x128xbf16> to vector<1x8x128xbf16>
    %155 = vector.shape_cast %154 : vector<1x8x128xbf16> to vector<8x128xbf16>
    %c0_155 = arith.constant 0 : index
    %c896 = arith.constant 896 : index
    %156 = vector.load %arg10[%c0_155, %c896] : memref<8x3200xbf16, #tpu.memory_space<vmem>>, vector<8x128xbf16>
    tpu.vector_store %arg10[%c0_155, %c896], %155 {strides = array<i32>} : memref<8x3200xbf16, #tpu.memory_space<vmem>>, vector<8x128xbf16>,
    %157 = vector.extract_strided_slice %147 {offsets = [3, 0, 0], sizes = [1, 8, 128], strides = [1, 1, 1]} : vector<5x8x128xbf16> to vector<1x8x128xbf16>
    %158 = vector.shape_cast %157 : vector<1x8x128xbf16> to vector<8x128xbf16>
    %c0_156 = arith.constant 0 : index
    %c1024 = arith.constant 1024 : index
    %159 = vector.load %arg10[%c0_156, %c1024] : memref<8x3200xbf16, #tpu.memory_space<vmem>>, vector<8x128xbf16>
    tpu.vector_store %arg10[%c0_156, %c1024], %158 {strides = array<i32>} : memref<8x3200xbf16, #tpu.memory_space<vmem>>, vector<8x128xbf16>,
    %160 = vector.extract_strided_slice %147 {offsets = [4, 0, 0], sizes = [1, 8, 128], strides = [1, 1, 1]} : vector<5x8x128xbf16> to vector<1x8x128xbf16>
    %161 = vector.shape_cast %160 : vector<1x8x128xbf16> to vector<8x128xbf16>
    %c0_157 = arith.constant 0 : index
    %c1152 = arith.constant 1152 : index
    %162 = vector.load %arg10[%c0_157, %c1152] : memref<8x3200xbf16, #tpu.memory_space<vmem>>, vector<8x128xbf16>
    tpu.vector_store %arg10[%c0_157, %c1152], %161 {strides = array<i32>} : memref<8x3200xbf16, #tpu.memory_space<vmem>>, vector<8x128xbf16>,
    %cst_158 = arith.constant 0.000000e+00 : f32
    %163 = vector.broadcast %cst_158 : f32 to vector<160x128xf32>
    %c4_159 = arith.constant 4 : index
    %c0_160 = arith.constant 0 : index
    %c0_161 = arith.constant 0 : index
    %c0_162 = arith.constant 0 : index
    %164 = vector.load %arg9[%c4_159, %c0_160, %c0_161, %c0_162] : memref<12x12x8x128xbf16, #tpu.memory_space<vmem>>, vector<2x10x8x128xbf16>
    %165 = vector.shape_cast %164 : vector<2x10x8x128xbf16> to vector<160x128xbf16>
    %c0_163 = arith.constant 0 : index
    %c0_164 = arith.constant 0 : index
    %c0_165 = arith.constant 0 : index
    %166 = vector.load %arg4[%c0_163, %c0_164, %c0_165] : memref<9x128x128xbf16, #tpu.memory_space<vmem>>, vector<1x128x128xbf16>
    %167 = vector.shape_cast %166 : vector<1x128x128xbf16> to vector<128x128xbf16>
    %cst_166 = arith.constant dense<0.000000e+00> : vector<160x128xf32>
    %168 = tpu.matmul %165, %167, %cst_166 {dimension_numbers = #tpu.dot_dimension_numbers<[1], [0], [0], [1], [0, 0, 1, 1], [], []>} : vector<160x128xbf16>, vector<128x128xbf16>, vector<160x128xf32> -> vector<160x128xf32>
    %169 = arith.addf %163, %168 : vector<160x128xf32>
    %c4_167 = arith.constant 4 : index
    %c1_168 = arith.constant 1 : index
    %c0_169 = arith.constant 0 : index
    %c0_170 = arith.constant 0 : index
    %170 = vector.load %arg9[%c4_167, %c1_168, %c0_169, %c0_170] : memref<12x12x8x128xbf16, #tpu.memory_space<vmem>>, vector<2x10x8x128xbf16>
    %171 = vector.shape_cast %170 : vector<2x10x8x128xbf16> to vector<160x128xbf16>
    %c1_171 = arith.constant 1 : index
    %c0_172 = arith.constant 0 : index
    %c0_173 = arith.constant 0 : index
    %172 = vector.load %arg4[%c1_171, %c0_172, %c0_173] : memref<9x128x128xbf16, #tpu.memory_space<vmem>>, vector<1x128x128xbf16>
    %173 = vector.shape_cast %172 : vector<1x128x128xbf16> to vector<128x128xbf16>
    %cst_174 = arith.constant dense<0.000000e+00> : vector<160x128xf32>
    %174 = tpu.matmul %171, %173, %cst_174 {dimension_numbers = #tpu.dot_dimension_numbers<[1], [0], [0], [1], [0, 0, 1, 1], [], []>} : vector<160x128xbf16>, vector<128x128xbf16>, vector<160x128xf32> -> vector<160x128xf32>
    %175 = arith.addf %169, %174 : vector<160x128xf32>
    %c4_175 = arith.constant 4 : index
    %c2_176 = arith.constant 2 : index
    %c0_177 = arith.constant 0 : index
    %c0_178 = arith.constant 0 : index
    %176 = vector.load %arg9[%c4_175, %c2_176, %c0_177, %c0_178] : memref<12x12x8x128xbf16, #tpu.memory_space<vmem>>, vector<2x10x8x128xbf16>
    %177 = vector.shape_cast %176 : vector<2x10x8x128xbf16> to vector<160x128xbf16>
    %c2_179 = arith.constant 2 : index
    %c0_180 = arith.constant 0 : index
    %c0_181 = arith.constant 0 : index
    %178 = vector.load %arg4[%c2_179, %c0_180, %c0_181] : memref<9x128x128xbf16, #tpu.memory_space<vmem>>, vector<1x128x128xbf16>
    %179 = vector.shape_cast %178 : vector<1x128x128xbf16> to vector<128x128xbf16>
    %cst_182 = arith.constant dense<0.000000e+00> : vector<160x128xf32>
    %180 = tpu.matmul %177, %179, %cst_182 {dimension_numbers = #tpu.dot_dimension_numbers<[1], [0], [0], [1], [0, 0, 1, 1], [], []>} : vector<160x128xbf16>, vector<128x128xbf16>, vector<160x128xf32> -> vector<160x128xf32>
    %181 = arith.addf %175, %180 : vector<160x128xf32>
    %c5_183 = arith.constant 5 : index
    %c0_184 = arith.constant 0 : index
    %c0_185 = arith.constant 0 : index
    %c0_186 = arith.constant 0 : index
    %182 = vector.load %arg9[%c5_183, %c0_184, %c0_185, %c0_186] : memref<12x12x8x128xbf16, #tpu.memory_space<vmem>>, vector<2x10x8x128xbf16>
    %183 = vector.shape_cast %182 : vector<2x10x8x128xbf16> to vector<160x128xbf16>
    %c3_187 = arith.constant 3 : index
    %c0_188 = arith.constant 0 : index
    %c0_189 = arith.constant 0 : index
    %184 = vector.load %arg4[%c3_187, %c0_188, %c0_189] : memref<9x128x128xbf16, #tpu.memory_space<vmem>>, vector<1x128x128xbf16>
    %185 = vector.shape_cast %184 : vector<1x128x128xbf16> to vector<128x128xbf16>
    %cst_190 = arith.constant dense<0.000000e+00> : vector<160x128xf32>
    %186 = tpu.matmul %183, %185, %cst_190 {dimension_numbers = #tpu.dot_dimension_numbers<[1], [0], [0], [1], [0, 0, 1, 1], [], []>} : vector<160x128xbf16>, vector<128x128xbf16>, vector<160x128xf32> -> vector<160x128xf32>
    %187 = arith.addf %181, %186 : vector<160x128xf32>
    %c5_191 = arith.constant 5 : index
    %c1_192 = arith.constant 1 : index
    %c0_193 = arith.constant 0 : index
    %c0_194 = arith.constant 0 : index
    %188 = vector.load %arg9[%c5_191, %c1_192, %c0_193, %c0_194] : memref<12x12x8x128xbf16, #tpu.memory_space<vmem>>, vector<2x10x8x128xbf16>
    %189 = vector.shape_cast %188 : vector<2x10x8x128xbf16> to vector<160x128xbf16>
    %c4_195 = arith.constant 4 : index
    %c0_196 = arith.constant 0 : index
    %c0_197 = arith.constant 0 : index
    %190 = vector.load %arg4[%c4_195, %c0_196, %c0_197] : memref<9x128x128xbf16, #tpu.memory_space<vmem>>, vector<1x128x128xbf16>
    %191 = vector.shape_cast %190 : vector<1x128x128xbf16> to vector<128x128xbf16>
    %cst_198 = arith.constant dense<0.000000e+00> : vector<160x128xf32>
    %192 = tpu.matmul %189, %191, %cst_198 {dimension_numbers = #tpu.dot_dimension_numbers<[1], [0], [0], [1], [0, 0, 1, 1], [], []>} : vector<160x128xbf16>, vector<128x128xbf16>, vector<160x128xf32> -> vector<160x128xf32>
    %193 = arith.addf %187, %192 : vector<160x128xf32>
    %c5_199 = arith.constant 5 : index
    %c2_200 = arith.constant 2 : index
    %c0_201 = arith.constant 0 : index
    %c0_202 = arith.constant 0 : index
    %194 = vector.load %arg9[%c5_199, %c2_200, %c0_201, %c0_202] : memref<12x12x8x128xbf16, #tpu.memory_space<vmem>>, vector<2x10x8x128xbf16>
    %195 = vector.shape_cast %194 : vector<2x10x8x128xbf16> to vector<160x128xbf16>
    %c5_203 = arith.constant 5 : index
    %c0_204 = arith.constant 0 : index
    %c0_205 = arith.constant 0 : index
    %196 = vector.load %arg4[%c5_203, %c0_204, %c0_205] : memref<9x128x128xbf16, #tpu.memory_space<vmem>>, vector<1x128x128xbf16>
    %197 = vector.shape_cast %196 : vector<1x128x128xbf16> to vector<128x128xbf16>
    %cst_206 = arith.constant dense<0.000000e+00> : vector<160x128xf32>
    %198 = tpu.matmul %195, %197, %cst_206 {dimension_numbers = #tpu.dot_dimension_numbers<[1], [0], [0], [1], [0, 0, 1, 1], [], []>} : vector<160x128xbf16>, vector<128x128xbf16>, vector<160x128xf32> -> vector<160x128xf32>
    %199 = arith.addf %193, %198 : vector<160x128xf32>
    %c6_207 = arith.constant 6 : index
    %c0_208 = arith.constant 0 : index
    %c0_209 = arith.constant 0 : index
    %c0_210 = arith.constant 0 : index
    %200 = vector.load %arg9[%c6_207, %c0_208, %c0_209, %c0_210] : memref<12x12x8x128xbf16, #tpu.memory_space<vmem>>, vector<2x10x8x128xbf16>
    %201 = vector.shape_cast %200 : vector<2x10x8x128xbf16> to vector<160x128xbf16>
    %c6_211 = arith.constant 6 : index
    %c0_212 = arith.constant 0 : index
    %c0_213 = arith.constant 0 : index
    %202 = vector.load %arg4[%c6_211, %c0_212, %c0_213] : memref<9x128x128xbf16, #tpu.memory_space<vmem>>, vector<1x128x128xbf16>
    %203 = vector.shape_cast %202 : vector<1x128x128xbf16> to vector<128x128xbf16>
    %cst_214 = arith.constant dense<0.000000e+00> : vector<160x128xf32>
    %204 = tpu.matmul %201, %203, %cst_214 {dimension_numbers = #tpu.dot_dimension_numbers<[1], [0], [0], [1], [0, 0, 1, 1], [], []>} : vector<160x128xbf16>, vector<128x128xbf16>, vector<160x128xf32> -> vector<160x128xf32>
    %205 = arith.addf %199, %204 : vector<160x128xf32>
    %c6_215 = arith.constant 6 : index
    %c1_216 = arith.constant 1 : index
    %c0_217 = arith.constant 0 : index
    %c0_218 = arith.constant 0 : index
    %206 = vector.load %arg9[%c6_215, %c1_216, %c0_217, %c0_218] : memref<12x12x8x128xbf16, #tpu.memory_space<vmem>>, vector<2x10x8x128xbf16>
    %207 = vector.shape_cast %206 : vector<2x10x8x128xbf16> to vector<160x128xbf16>
    %c7_219 = arith.constant 7 : index
    %c0_220 = arith.constant 0 : index
    %c0_221 = arith.constant 0 : index
    %208 = vector.load %arg4[%c7_219, %c0_220, %c0_221] : memref<9x128x128xbf16, #tpu.memory_space<vmem>>, vector<1x128x128xbf16>
    %209 = vector.shape_cast %208 : vector<1x128x128xbf16> to vector<128x128xbf16>
    %cst_222 = arith.constant dense<0.000000e+00> : vector<160x128xf32>
    %210 = tpu.matmul %207, %209, %cst_222 {dimension_numbers = #tpu.dot_dimension_numbers<[1], [0], [0], [1], [0, 0, 1, 1], [], []>} : vector<160x128xbf16>, vector<128x128xbf16>, vector<160x128xf32> -> vector<160x128xf32>
    %211 = arith.addf %205, %210 : vector<160x128xf32>
    %c6_223 = arith.constant 6 : index
    %c2_224 = arith.constant 2 : index
    %c0_225 = arith.constant 0 : index
    %c0_226 = arith.constant 0 : index
    %212 = vector.load %arg9[%c6_223, %c2_224, %c0_225, %c0_226] : memref<12x12x8x128xbf16, #tpu.memory_space<vmem>>, vector<2x10x8x128xbf16>
    %213 = vector.shape_cast %212 : vector<2x10x8x128xbf16> to vector<160x128xbf16>
    %c8_227 = arith.constant 8 : index
    %c0_228 = arith.constant 0 : index
    %c0_229 = arith.constant 0 : index
    %214 = vector.load %arg4[%c8_227, %c0_228, %c0_229] : memref<9x128x128xbf16, #tpu.memory_space<vmem>>, vector<1x128x128xbf16>
    %215 = vector.shape_cast %214 : vector<1x128x128xbf16> to vector<128x128xbf16>
    %cst_230 = arith.constant dense<0.000000e+00> : vector<160x128xf32>
    %216 = tpu.matmul %213, %215, %cst_230 {dimension_numbers = #tpu.dot_dimension_numbers<[1], [0], [0], [1], [0, 0, 1, 1], [], []>} : vector<160x128xbf16>, vector<128x128xbf16>, vector<160x128xf32> -> vector<160x128xf32>
    %217 = arith.addf %211, %216 : vector<160x128xf32>
    %218 = vector.shape_cast %217 : vector<160x128xf32> to vector<2x80x128xf32>
    %cst_231 = arith.constant dense<0xFF800000> : vector<80x128xf32>
    %219 = vector.multi_reduction <maximumf>, %218, %cst_231 [0] : vector<2x80x128xf32> to vector<80x128xf32>
    %220 = vector.shape_cast %219 : vector<80x128xf32> to vector<5x2x8x128xf32>
    %cst_232 = arith.constant dense<0xFF800000> : vector<5x8x128xf32>
    %221 = vector.multi_reduction <maximumf>, %220, %cst_232 [1] : vector<5x2x8x128xf32> to vector<5x8x128xf32>
    %222 = vector.shape_cast %2 : vector<1x128xf32> to vector<1x1x128xf32>
    %223 = vector.broadcast %222 : vector<1x1x128xf32> to vector<5x8x128xf32>
    %224 = arith.addf %221, %223 : vector<5x8x128xf32>
    %cst_233 = arith.constant 0.000000e+00 : f32
    %225 = vector.broadcast %cst_233 : f32 to vector<5x8x128xf32>
    %226 = arith.maximumf %224, %225 : vector<5x8x128xf32>
    %227 = arith.truncf %226 : vector<5x8x128xf32> to vector<5x8x128xbf16>
    %228 = vector.extract_strided_slice %227 {offsets = [0, 0, 0], sizes = [1, 8, 128], strides = [1, 1, 1]} : vector<5x8x128xbf16> to vector<1x8x128xbf16>
    %229 = vector.shape_cast %228 : vector<1x8x128xbf16> to vector<8x128xbf16>
    %c0_234 = arith.constant 0 : index
    %c1280 = arith.constant 1280 : index
    %230 = vector.load %arg10[%c0_234, %c1280] : memref<8x3200xbf16, #tpu.memory_space<vmem>>, vector<8x128xbf16>
    tpu.vector_store %arg10[%c0_234, %c1280], %229 {strides = array<i32>} : memref<8x3200xbf16, #tpu.memory_space<vmem>>, vector<8x128xbf16>,
    %231 = vector.extract_strided_slice %227 {offsets = [1, 0, 0], sizes = [1, 8, 128], strides = [1, 1, 1]} : vector<5x8x128xbf16> to vector<1x8x128xbf16>
    %232 = vector.shape_cast %231 : vector<1x8x128xbf16> to vector<8x128xbf16>
    %c0_235 = arith.constant 0 : index
    %c1408 = arith.constant 1408 : index
    %233 = vector.load %arg10[%c0_235, %c1408] : memref<8x3200xbf16, #tpu.memory_space<vmem>>, vector<8x128xbf16>
    tpu.vector_store %arg10[%c0_235, %c1408], %232 {strides = array<i32>} : memref<8x3200xbf16, #tpu.memory_space<vmem>>, vector<8x128xbf16>,
    %234 = vector.extract_strided_slice %227 {offsets = [2, 0, 0], sizes = [1, 8, 128], strides = [1, 1, 1]} : vector<5x8x128xbf16> to vector<1x8x128xbf16>
    %235 = vector.shape_cast %234 : vector<1x8x128xbf16> to vector<8x128xbf16>
    %c0_236 = arith.constant 0 : index
    %c1536 = arith.constant 1536 : index
    %236 = vector.load %arg10[%c0_236, %c1536] : memref<8x3200xbf16, #tpu.memory_space<vmem>>, vector<8x128xbf16>
    tpu.vector_store %arg10[%c0_236, %c1536], %235 {strides = array<i32>} : memref<8x3200xbf16, #tpu.memory_space<vmem>>, vector<8x128xbf16>,
    %237 = vector.extract_strided_slice %227 {offsets = [3, 0, 0], sizes = [1, 8, 128], strides = [1, 1, 1]} : vector<5x8x128xbf16> to vector<1x8x128xbf16>
    %238 = vector.shape_cast %237 : vector<1x8x128xbf16> to vector<8x128xbf16>
    %c0_237 = arith.constant 0 : index
    %c1664 = arith.constant 1664 : index
    %239 = vector.load %arg10[%c0_237, %c1664] : memref<8x3200xbf16, #tpu.memory_space<vmem>>, vector<8x128xbf16>
    tpu.vector_store %arg10[%c0_237, %c1664], %238 {strides = array<i32>} : memref<8x3200xbf16, #tpu.memory_space<vmem>>, vector<8x128xbf16>,
    %240 = vector.extract_strided_slice %227 {offsets = [4, 0, 0], sizes = [1, 8, 128], strides = [1, 1, 1]} : vector<5x8x128xbf16> to vector<1x8x128xbf16>
    %241 = vector.shape_cast %240 : vector<1x8x128xbf16> to vector<8x128xbf16>
    %c0_238 = arith.constant 0 : index
    %c1792 = arith.constant 1792 : index
    %242 = vector.load %arg10[%c0_238, %c1792] : memref<8x3200xbf16, #tpu.memory_space<vmem>>, vector<8x128xbf16>
    tpu.vector_store %arg10[%c0_238, %c1792], %241 {strides = array<i32>} : memref<8x3200xbf16, #tpu.memory_space<vmem>>, vector<8x128xbf16>,
    %cst_239 = arith.constant 0.000000e+00 : f32
    %243 = vector.broadcast %cst_239 : f32 to vector<160x128xf32>
    %c6_240 = arith.constant 6 : index
    %c0_241 = arith.constant 0 : index
    %c0_242 = arith.constant 0 : index
    %c0_243 = arith.constant 0 : index
    %244 = vector.load %arg9[%c6_240, %c0_241, %c0_242, %c0_243] : memref<12x12x8x128xbf16, #tpu.memory_space<vmem>>, vector<2x10x8x128xbf16>
    %245 = vector.shape_cast %244 : vector<2x10x8x128xbf16> to vector<160x128xbf16>
    %c0_244 = arith.constant 0 : index
    %c0_245 = arith.constant 0 : index
    %c0_246 = arith.constant 0 : index
    %246 = vector.load %arg4[%c0_244, %c0_245, %c0_246] : memref<9x128x128xbf16, #tpu.memory_space<vmem>>, vector<1x128x128xbf16>
    %247 = vector.shape_cast %246 : vector<1x128x128xbf16> to vector<128x128xbf16>
    %cst_247 = arith.constant dense<0.000000e+00> : vector<160x128xf32>
    %248 = tpu.matmul %245, %247, %cst_247 {dimension_numbers = #tpu.dot_dimension_numbers<[1], [0], [0], [1], [0, 0, 1, 1], [], []>} : vector<160x128xbf16>, vector<128x128xbf16>, vector<160x128xf32> -> vector<160x128xf32>
    %249 = arith.addf %243, %248 : vector<160x128xf32>
    %c6_248 = arith.constant 6 : index
    %c1_249 = arith.constant 1 : index
    %c0_250 = arith.constant 0 : index
    %c0_251 = arith.constant 0 : index
    %250 = vector.load %arg9[%c6_248, %c1_249, %c0_250, %c0_251] : memref<12x12x8x128xbf16, #tpu.memory_space<vmem>>, vector<2x10x8x128xbf16>
    %251 = vector.shape_cast %250 : vector<2x10x8x128xbf16> to vector<160x128xbf16>
    %c1_252 = arith.constant 1 : index
    %c0_253 = arith.constant 0 : index
    %c0_254 = arith.constant 0 : index
    %252 = vector.load %arg4[%c1_252, %c0_253, %c0_254] : memref<9x128x128xbf16, #tpu.memory_space<vmem>>, vector<1x128x128xbf16>
    %253 = vector.shape_cast %252 : vector<1x128x128xbf16> to vector<128x128xbf16>
    %cst_255 = arith.constant dense<0.000000e+00> : vector<160x128xf32>
    %254 = tpu.matmul %251, %253, %cst_255 {dimension_numbers = #tpu.dot_dimension_numbers<[1], [0], [0], [1], [0, 0, 1, 1], [], []>} : vector<160x128xbf16>, vector<128x128xbf16>, vector<160x128xf32> -> vector<160x128xf32>
    %255 = arith.addf %249, %254 : vector<160x128xf32>
    %c6_256 = arith.constant 6 : index
    %c2_257 = arith.constant 2 : index
    %c0_258 = arith.constant 0 : index
    %c0_259 = arith.constant 0 : index
    %256 = vector.load %arg9[%c6_256, %c2_257, %c0_258, %c0_259] : memref<12x12x8x128xbf16, #tpu.memory_space<vmem>>, vector<2x10x8x128xbf16>
    %257 = vector.shape_cast %256 : vector<2x10x8x128xbf16> to vector<160x128xbf16>
    %c2_260 = arith.constant 2 : index
    %c0_261 = arith.constant 0 : index
    %c0_262 = arith.constant 0 : index
    %258 = vector.load %arg4[%c2_260, %c0_261, %c0_262] : memref<9x128x128xbf16, #tpu.memory_space<vmem>>, vector<1x128x128xbf16>
    %259 = vector.shape_cast %258 : vector<1x128x128xbf16> to vector<128x128xbf16>
    %cst_263 = arith.constant dense<0.000000e+00> : vector<160x128xf32>
    %260 = tpu.matmul %257, %259, %cst_263 {dimension_numbers = #tpu.dot_dimension_numbers<[1], [0], [0], [1], [0, 0, 1, 1], [], []>} : vector<160x128xbf16>, vector<128x128xbf16>, vector<160x128xf32> -> vector<160x128xf32>
    %261 = arith.addf %255, %260 : vector<160x128xf32>
    %c7_264 = arith.constant 7 : index
    %c0_265 = arith.constant 0 : index
    %c0_266 = arith.constant 0 : index
    %c0_267 = arith.constant 0 : index
    %262 = vector.load %arg9[%c7_264, %c0_265, %c0_266, %c0_267] : memref<12x12x8x128xbf16, #tpu.memory_space<vmem>>, vector<2x10x8x128xbf16>
    %263 = vector.shape_cast %262 : vector<2x10x8x128xbf16> to vector<160x128xbf16>
    %c3_268 = arith.constant 3 : index
    %c0_269 = arith.constant 0 : index
    %c0_270 = arith.constant 0 : index
    %264 = vector.load %arg4[%c3_268, %c0_269, %c0_270] : memref<9x128x128xbf16, #tpu.memory_space<vmem>>, vector<1x128x128xbf16>
    %265 = vector.shape_cast %264 : vector<1x128x128xbf16> to vector<128x128xbf16>
    %cst_271 = arith.constant dense<0.000000e+00> : vector<160x128xf32>
    %266 = tpu.matmul %263, %265, %cst_271 {dimension_numbers = #tpu.dot_dimension_numbers<[1], [0], [0], [1], [0, 0, 1, 1], [], []>} : vector<160x128xbf16>, vector<128x128xbf16>, vector<160x128xf32> -> vector<160x128xf32>
    %267 = arith.addf %261, %266 : vector<160x128xf32>
    %c7_272 = arith.constant 7 : index
    %c1_273 = arith.constant 1 : index
    %c0_274 = arith.constant 0 : index
    %c0_275 = arith.constant 0 : index
    %268 = vector.load %arg9[%c7_272, %c1_273, %c0_274, %c0_275] : memref<12x12x8x128xbf16, #tpu.memory_space<vmem>>, vector<2x10x8x128xbf16>
    %269 = vector.shape_cast %268 : vector<2x10x8x128xbf16> to vector<160x128xbf16>
    %c4_276 = arith.constant 4 : index
    %c0_277 = arith.constant 0 : index
    %c0_278 = arith.constant 0 : index
    %270 = vector.load %arg4[%c4_276, %c0_277, %c0_278] : memref<9x128x128xbf16, #tpu.memory_space<vmem>>, vector<1x128x128xbf16>
    %271 = vector.shape_cast %270 : vector<1x128x128xbf16> to vector<128x128xbf16>
    %cst_279 = arith.constant dense<0.000000e+00> : vector<160x128xf32>
    %272 = tpu.matmul %269, %271, %cst_279 {dimension_numbers = #tpu.dot_dimension_numbers<[1], [0], [0], [1], [0, 0, 1, 1], [], []>} : vector<160x128xbf16>, vector<128x128xbf16>, vector<160x128xf32> -> vector<160x128xf32>
    %273 = arith.addf %267, %272 : vector<160x128xf32>
    %c7_280 = arith.constant 7 : index
    %c2_281 = arith.constant 2 : index
    %c0_282 = arith.constant 0 : index
    %c0_283 = arith.constant 0 : index
    %274 = vector.load %arg9[%c7_280, %c2_281, %c0_282, %c0_283] : memref<12x12x8x128xbf16, #tpu.memory_space<vmem>>, vector<2x10x8x128xbf16>
    %275 = vector.shape_cast %274 : vector<2x10x8x128xbf16> to vector<160x128xbf16>
    %c5_284 = arith.constant 5 : index
    %c0_285 = arith.constant 0 : index
    %c0_286 = arith.constant 0 : index
    %276 = vector.load %arg4[%c5_284, %c0_285, %c0_286] : memref<9x128x128xbf16, #tpu.memory_space<vmem>>, vector<1x128x128xbf16>
    %277 = vector.shape_cast %276 : vector<1x128x128xbf16> to vector<128x128xbf16>
    %cst_287 = arith.constant dense<0.000000e+00> : vector<160x128xf32>
    %278 = tpu.matmul %275, %277, %cst_287 {dimension_numbers = #tpu.dot_dimension_numbers<[1], [0], [0], [1], [0, 0, 1, 1], [], []>} : vector<160x128xbf16>, vector<128x128xbf16>, vector<160x128xf32> -> vector<160x128xf32>
    %279 = arith.addf %273, %278 : vector<160x128xf32>
    %c8_288 = arith.constant 8 : index
    %c0_289 = arith.constant 0 : index
    %c0_290 = arith.constant 0 : index
    %c0_291 = arith.constant 0 : index
    %280 = vector.load %arg9[%c8_288, %c0_289, %c0_290, %c0_291] : memref<12x12x8x128xbf16, #tpu.memory_space<vmem>>, vector<2x10x8x128xbf16>
    %281 = vector.shape_cast %280 : vector<2x10x8x128xbf16> to vector<160x128xbf16>
    %c6_292 = arith.constant 6 : index
    %c0_293 = arith.constant 0 : index
    %c0_294 = arith.constant 0 : index
    %282 = vector.load %arg4[%c6_292, %c0_293, %c0_294] : memref<9x128x128xbf16, #tpu.memory_space<vmem>>, vector<1x128x128xbf16>
    %283 = vector.shape_cast %282 : vector<1x128x128xbf16> to vector<128x128xbf16>
    %cst_295 = arith.constant dense<0.000000e+00> : vector<160x128xf32>
    %284 = tpu.matmul %281, %283, %cst_295 {dimension_numbers = #tpu.dot_dimension_numbers<[1], [0], [0], [1], [0, 0, 1, 1], [], []>} : vector<160x128xbf16>, vector<128x128xbf16>, vector<160x128xf32> -> vector<160x128xf32>
    %285 = arith.addf %279, %284 : vector<160x128xf32>
    %c8_296 = arith.constant 8 : index
    %c1_297 = arith.constant 1 : index
    %c0_298 = arith.constant 0 : index
    %c0_299 = arith.constant 0 : index
    %286 = vector.load %arg9[%c8_296, %c1_297, %c0_298, %c0_299] : memref<12x12x8x128xbf16, #tpu.memory_space<vmem>>, vector<2x10x8x128xbf16>
    %287 = vector.shape_cast %286 : vector<2x10x8x128xbf16> to vector<160x128xbf16>
    %c7_300 = arith.constant 7 : index
    %c0_301 = arith.constant 0 : index
    %c0_302 = arith.constant 0 : index
    %288 = vector.load %arg4[%c7_300, %c0_301, %c0_302] : memref<9x128x128xbf16, #tpu.memory_space<vmem>>, vector<1x128x128xbf16>
    %289 = vector.shape_cast %288 : vector<1x128x128xbf16> to vector<128x128xbf16>
    %cst_303 = arith.constant dense<0.000000e+00> : vector<160x128xf32>
    %290 = tpu.matmul %287, %289, %cst_303 {dimension_numbers = #tpu.dot_dimension_numbers<[1], [0], [0], [1], [0, 0, 1, 1], [], []>} : vector<160x128xbf16>, vector<128x128xbf16>, vector<160x128xf32> -> vector<160x128xf32>
    %291 = arith.addf %285, %290 : vector<160x128xf32>
    %c8_304 = arith.constant 8 : index
    %c2_305 = arith.constant 2 : index
    %c0_306 = arith.constant 0 : index
    %c0_307 = arith.constant 0 : index
    %292 = vector.load %arg9[%c8_304, %c2_305, %c0_306, %c0_307] : memref<12x12x8x128xbf16, #tpu.memory_space<vmem>>, vector<2x10x8x128xbf16>
    %293 = vector.shape_cast %292 : vector<2x10x8x128xbf16> to vector<160x128xbf16>
    %c8_308 = arith.constant 8 : index
    %c0_309 = arith.constant 0 : index
    %c0_310 = arith.constant 0 : index
    %294 = vector.load %arg4[%c8_308, %c0_309, %c0_310] : memref<9x128x128xbf16, #tpu.memory_space<vmem>>, vector<1x128x128xbf16>
    %295 = vector.shape_cast %294 : vector<1x128x128xbf16> to vector<128x128xbf16>
    %cst_311 = arith.constant dense<0.000000e+00> : vector<160x128xf32>
    %296 = tpu.matmul %293, %295, %cst_311 {dimension_numbers = #tpu.dot_dimension_numbers<[1], [0], [0], [1], [0, 0, 1, 1], [], []>} : vector<160x128xbf16>, vector<128x128xbf16>, vector<160x128xf32> -> vector<160x128xf32>
    %297 = arith.addf %291, %296 : vector<160x128xf32>
    %298 = vector.shape_cast %297 : vector<160x128xf32> to vector<2x80x128xf32>
    %cst_312 = arith.constant dense<0xFF800000> : vector<80x128xf32>
    %299 = vector.multi_reduction <maximumf>, %298, %cst_312 [0] : vector<2x80x128xf32> to vector<80x128xf32>
    %300 = vector.shape_cast %299 : vector<80x128xf32> to vector<5x2x8x128xf32>
    %cst_313 = arith.constant dense<0xFF800000> : vector<5x8x128xf32>
    %301 = vector.multi_reduction <maximumf>, %300, %cst_313 [1] : vector<5x2x8x128xf32> to vector<5x8x128xf32>
    %302 = vector.shape_cast %2 : vector<1x128xf32> to vector<1x1x128xf32>
    %303 = vector.broadcast %302 : vector<1x1x128xf32> to vector<5x8x128xf32>
    %304 = arith.addf %301, %303 : vector<5x8x128xf32>
    %cst_314 = arith.constant 0.000000e+00 : f32
    %305 = vector.broadcast %cst_314 : f32 to vector<5x8x128xf32>
    %306 = arith.maximumf %304, %305 : vector<5x8x128xf32>
    %307 = arith.truncf %306 : vector<5x8x128xf32> to vector<5x8x128xbf16>
    %308 = vector.extract_strided_slice %307 {offsets = [0, 0, 0], sizes = [1, 8, 128], strides = [1, 1, 1]} : vector<5x8x128xbf16> to vector<1x8x128xbf16>
    %309 = vector.shape_cast %308 : vector<1x8x128xbf16> to vector<8x128xbf16>
    %c0_315 = arith.constant 0 : index
    %c1920 = arith.constant 1920 : index
    %310 = vector.load %arg10[%c0_315, %c1920] : memref<8x3200xbf16, #tpu.memory_space<vmem>>, vector<8x128xbf16>
    tpu.vector_store %arg10[%c0_315, %c1920], %309 {strides = array<i32>} : memref<8x3200xbf16, #tpu.memory_space<vmem>>, vector<8x128xbf16>,
    %311 = vector.extract_strided_slice %307 {offsets = [1, 0, 0], sizes = [1, 8, 128], strides = [1, 1, 1]} : vector<5x8x128xbf16> to vector<1x8x128xbf16>
    %312 = vector.shape_cast %311 : vector<1x8x128xbf16> to vector<8x128xbf16>
    %c0_316 = arith.constant 0 : index
    %c2048 = arith.constant 2048 : index
    %313 = vector.load %arg10[%c0_316, %c2048] : memref<8x3200xbf16, #tpu.memory_space<vmem>>, vector<8x128xbf16>
    tpu.vector_store %arg10[%c0_316, %c2048], %312 {strides = array<i32>} : memref<8x3200xbf16, #tpu.memory_space<vmem>>, vector<8x128xbf16>,
    %314 = vector.extract_strided_slice %307 {offsets = [2, 0, 0], sizes = [1, 8, 128], strides = [1, 1, 1]} : vector<5x8x128xbf16> to vector<1x8x128xbf16>
    %315 = vector.shape_cast %314 : vector<1x8x128xbf16> to vector<8x128xbf16>
    %c0_317 = arith.constant 0 : index
    %c2176 = arith.constant 2176 : index
    %316 = vector.load %arg10[%c0_317, %c2176] : memref<8x3200xbf16, #tpu.memory_space<vmem>>, vector<8x128xbf16>
    tpu.vector_store %arg10[%c0_317, %c2176], %315 {strides = array<i32>} : memref<8x3200xbf16, #tpu.memory_space<vmem>>, vector<8x128xbf16>,
    %317 = vector.extract_strided_slice %307 {offsets = [3, 0, 0], sizes = [1, 8, 128], strides = [1, 1, 1]} : vector<5x8x128xbf16> to vector<1x8x128xbf16>
    %318 = vector.shape_cast %317 : vector<1x8x128xbf16> to vector<8x128xbf16>
    %c0_318 = arith.constant 0 : index
    %c2304 = arith.constant 2304 : index
    %319 = vector.load %arg10[%c0_318, %c2304] : memref<8x3200xbf16, #tpu.memory_space<vmem>>, vector<8x128xbf16>
    tpu.vector_store %arg10[%c0_318, %c2304], %318 {strides = array<i32>} : memref<8x3200xbf16, #tpu.memory_space<vmem>>, vector<8x128xbf16>,
    %320 = vector.extract_strided_slice %307 {offsets = [4, 0, 0], sizes = [1, 8, 128], strides = [1, 1, 1]} : vector<5x8x128xbf16> to vector<1x8x128xbf16>
    %321 = vector.shape_cast %320 : vector<1x8x128xbf16> to vector<8x128xbf16>
    %c0_319 = arith.constant 0 : index
    %c2432 = arith.constant 2432 : index
    %322 = vector.load %arg10[%c0_319, %c2432] : memref<8x3200xbf16, #tpu.memory_space<vmem>>, vector<8x128xbf16>
    tpu.vector_store %arg10[%c0_319, %c2432], %321 {strides = array<i32>} : memref<8x3200xbf16, #tpu.memory_space<vmem>>, vector<8x128xbf16>,
    %cst_320 = arith.constant 0.000000e+00 : f32
    %323 = vector.broadcast %cst_320 : f32 to vector<160x128xf32>
    %c8_321 = arith.constant 8 : index
    %c0_322 = arith.constant 0 : index
    %c0_323 = arith.constant 0 : index
    %c0_324 = arith.constant 0 : index
    %324 = vector.load %arg9[%c8_321, %c0_322, %c0_323, %c0_324] : memref<12x12x8x128xbf16, #tpu.memory_space<vmem>>, vector<2x10x8x128xbf16>
    %325 = vector.shape_cast %324 : vector<2x10x8x128xbf16> to vector<160x128xbf16>
    %c0_325 = arith.constant 0 : index
    %c0_326 = arith.constant 0 : index
    %c0_327 = arith.constant 0 : index
    %326 = vector.load %arg4[%c0_325, %c0_326, %c0_327] : memref<9x128x128xbf16, #tpu.memory_space<vmem>>, vector<1x128x128xbf16>
    %327 = vector.shape_cast %326 : vector<1x128x128xbf16> to vector<128x128xbf16>
    %cst_328 = arith.constant dense<0.000000e+00> : vector<160x128xf32>
    %328 = tpu.matmul %325, %327, %cst_328 {dimension_numbers = #tpu.dot_dimension_numbers<[1], [0], [0], [1], [0, 0, 1, 1], [], []>} : vector<160x128xbf16>, vector<128x128xbf16>, vector<160x128xf32> -> vector<160x128xf32>
    %329 = arith.addf %323, %328 : vector<160x128xf32>
    %c8_329 = arith.constant 8 : index
    %c1_330 = arith.constant 1 : index
    %c0_331 = arith.constant 0 : index
    %c0_332 = arith.constant 0 : index
    %330 = vector.load %arg9[%c8_329, %c1_330, %c0_331, %c0_332] : memref<12x12x8x128xbf16, #tpu.memory_space<vmem>>, vector<2x10x8x128xbf16>
    %331 = vector.shape_cast %330 : vector<2x10x8x128xbf16> to vector<160x128xbf16>
    %c1_333 = arith.constant 1 : index
    %c0_334 = arith.constant 0 : index
    %c0_335 = arith.constant 0 : index
    %332 = vector.load %arg4[%c1_333, %c0_334, %c0_335] : memref<9x128x128xbf16, #tpu.memory_space<vmem>>, vector<1x128x128xbf16>
    %333 = vector.shape_cast %332 : vector<1x128x128xbf16> to vector<128x128xbf16>
    %cst_336 = arith.constant dense<0.000000e+00> : vector<160x128xf32>
    %334 = tpu.matmul %331, %333, %cst_336 {dimension_numbers = #tpu.dot_dimension_numbers<[1], [0], [0], [1], [0, 0, 1, 1], [], []>} : vector<160x128xbf16>, vector<128x128xbf16>, vector<160x128xf32> -> vector<160x128xf32>
    %335 = arith.addf %329, %334 : vector<160x128xf32>
    %c8_337 = arith.constant 8 : index
    %c2_338 = arith.constant 2 : index
    %c0_339 = arith.constant 0 : index
    %c0_340 = arith.constant 0 : index
    %336 = vector.load %arg9[%c8_337, %c2_338, %c0_339, %c0_340] : memref<12x12x8x128xbf16, #tpu.memory_space<vmem>>, vector<2x10x8x128xbf16>
    %337 = vector.shape_cast %336 : vector<2x10x8x128xbf16> to vector<160x128xbf16>
    %c2_341 = arith.constant 2 : index
    %c0_342 = arith.constant 0 : index
    %c0_343 = arith.constant 0 : index
    %338 = vector.load %arg4[%c2_341, %c0_342, %c0_343] : memref<9x128x128xbf16, #tpu.memory_space<vmem>>, vector<1x128x128xbf16>
    %339 = vector.shape_cast %338 : vector<1x128x128xbf16> to vector<128x128xbf16>
    %cst_344 = arith.constant dense<0.000000e+00> : vector<160x128xf32>
    %340 = tpu.matmul %337, %339, %cst_344 {dimension_numbers = #tpu.dot_dimension_numbers<[1], [0], [0], [1], [0, 0, 1, 1], [], []>} : vector<160x128xbf16>, vector<128x128xbf16>, vector<160x128xf32> -> vector<160x128xf32>
    %341 = arith.addf %335, %340 : vector<160x128xf32>
    %c9 = arith.constant 9 : index
    %c0_345 = arith.constant 0 : index
    %c0_346 = arith.constant 0 : index
    %c0_347 = arith.constant 0 : index
    %342 = vector.load %arg9[%c9, %c0_345, %c0_346, %c0_347] : memref<12x12x8x128xbf16, #tpu.memory_space<vmem>>, vector<2x10x8x128xbf16>
    %343 = vector.shape_cast %342 : vector<2x10x8x128xbf16> to vector<160x128xbf16>
    %c3_348 = arith.constant 3 : index
    %c0_349 = arith.constant 0 : index
    %c0_350 = arith.constant 0 : index
    %344 = vector.load %arg4[%c3_348, %c0_349, %c0_350] : memref<9x128x128xbf16, #tpu.memory_space<vmem>>, vector<1x128x128xbf16>
    %345 = vector.shape_cast %344 : vector<1x128x128xbf16> to vector<128x128xbf16>
    %cst_351 = arith.constant dense<0.000000e+00> : vector<160x128xf32>
    %346 = tpu.matmul %343, %345, %cst_351 {dimension_numbers = #tpu.dot_dimension_numbers<[1], [0], [0], [1], [0, 0, 1, 1], [], []>} : vector<160x128xbf16>, vector<128x128xbf16>, vector<160x128xf32> -> vector<160x128xf32>
    %347 = arith.addf %341, %346 : vector<160x128xf32>
    %c9_352 = arith.constant 9 : index
    %c1_353 = arith.constant 1 : index
    %c0_354 = arith.constant 0 : index
    %c0_355 = arith.constant 0 : index
    %348 = vector.load %arg9[%c9_352, %c1_353, %c0_354, %c0_355] : memref<12x12x8x128xbf16, #tpu.memory_space<vmem>>, vector<2x10x8x128xbf16>
    %349 = vector.shape_cast %348 : vector<2x10x8x128xbf16> to vector<160x128xbf16>
    %c4_356 = arith.constant 4 : index
    %c0_357 = arith.constant 0 : index
    %c0_358 = arith.constant 0 : index
    %350 = vector.load %arg4[%c4_356, %c0_357, %c0_358] : memref<9x128x128xbf16, #tpu.memory_space<vmem>>, vector<1x128x128xbf16>
    %351 = vector.shape_cast %350 : vector<1x128x128xbf16> to vector<128x128xbf16>
    %cst_359 = arith.constant dense<0.000000e+00> : vector<160x128xf32>
    %352 = tpu.matmul %349, %351, %cst_359 {dimension_numbers = #tpu.dot_dimension_numbers<[1], [0], [0], [1], [0, 0, 1, 1], [], []>} : vector<160x128xbf16>, vector<128x128xbf16>, vector<160x128xf32> -> vector<160x128xf32>
    %353 = arith.addf %347, %352 : vector<160x128xf32>
    %c9_360 = arith.constant 9 : index
    %c2_361 = arith.constant 2 : index
    %c0_362 = arith.constant 0 : index
    %c0_363 = arith.constant 0 : index
    %354 = vector.load %arg9[%c9_360, %c2_361, %c0_362, %c0_363] : memref<12x12x8x128xbf16, #tpu.memory_space<vmem>>, vector<2x10x8x128xbf16>
    %355 = vector.shape_cast %354 : vector<2x10x8x128xbf16> to vector<160x128xbf16>
    %c5_364 = arith.constant 5 : index
    %c0_365 = arith.constant 0 : index
    %c0_366 = arith.constant 0 : index
    %356 = vector.load %arg4[%c5_364, %c0_365, %c0_366] : memref<9x128x128xbf16, #tpu.memory_space<vmem>>, vector<1x128x128xbf16>
    %357 = vector.shape_cast %356 : vector<1x128x128xbf16> to vector<128x128xbf16>
    %cst_367 = arith.constant dense<0.000000e+00> : vector<160x128xf32>
    %358 = tpu.matmul %355, %357, %cst_367 {dimension_numbers = #tpu.dot_dimension_numbers<[1], [0], [0], [1], [0, 0, 1, 1], [], []>} : vector<160x128xbf16>, vector<128x128xbf16>, vector<160x128xf32> -> vector<160x128xf32>
    %359 = arith.addf %353, %358 : vector<160x128xf32>
    %c10 = arith.constant 10 : index
    %c0_368 = arith.constant 0 : index
    %c0_369 = arith.constant 0 : index
    %c0_370 = arith.constant 0 : index
    %360 = vector.load %arg9[%c10, %c0_368, %c0_369, %c0_370] : memref<12x12x8x128xbf16, #tpu.memory_space<vmem>>, vector<2x10x8x128xbf16>
    %361 = vector.shape_cast %360 : vector<2x10x8x128xbf16> to vector<160x128xbf16>
    %c6_371 = arith.constant 6 : index
    %c0_372 = arith.constant 0 : index
    %c0_373 = arith.constant 0 : index
    %362 = vector.load %arg4[%c6_371, %c0_372, %c0_373] : memref<9x128x128xbf16, #tpu.memory_space<vmem>>, vector<1x128x128xbf16>
    %363 = vector.shape_cast %362 : vector<1x128x128xbf16> to vector<128x128xbf16>
    %cst_374 = arith.constant dense<0.000000e+00> : vector<160x128xf32>
    %364 = tpu.matmul %361, %363, %cst_374 {dimension_numbers = #tpu.dot_dimension_numbers<[1], [0], [0], [1], [0, 0, 1, 1], [], []>} : vector<160x128xbf16>, vector<128x128xbf16>, vector<160x128xf32> -> vector<160x128xf32>
    %365 = arith.addf %359, %364 : vector<160x128xf32>
    %c10_375 = arith.constant 10 : index
    %c1_376 = arith.constant 1 : index
    %c0_377 = arith.constant 0 : index
    %c0_378 = arith.constant 0 : index
    %366 = vector.load %arg9[%c10_375, %c1_376, %c0_377, %c0_378] : memref<12x12x8x128xbf16, #tpu.memory_space<vmem>>, vector<2x10x8x128xbf16>
    %367 = vector.shape_cast %366 : vector<2x10x8x128xbf16> to vector<160x128xbf16>
    %c7_379 = arith.constant 7 : index
    %c0_380 = arith.constant 0 : index
    %c0_381 = arith.constant 0 : index
    %368 = vector.load %arg4[%c7_379, %c0_380, %c0_381] : memref<9x128x128xbf16, #tpu.memory_space<vmem>>, vector<1x128x128xbf16>
    %369 = vector.shape_cast %368 : vector<1x128x128xbf16> to vector<128x128xbf16>
    %cst_382 = arith.constant dense<0.000000e+00> : vector<160x128xf32>
    %370 = tpu.matmul %367, %369, %cst_382 {dimension_numbers = #tpu.dot_dimension_numbers<[1], [0], [0], [1], [0, 0, 1, 1], [], []>} : vector<160x128xbf16>, vector<128x128xbf16>, vector<160x128xf32> -> vector<160x128xf32>
    %371 = arith.addf %365, %370 : vector<160x128xf32>
    %c10_383 = arith.constant 10 : index
    %c2_384 = arith.constant 2 : index
    %c0_385 = arith.constant 0 : index
    %c0_386 = arith.constant 0 : index
    %372 = vector.load %arg9[%c10_383, %c2_384, %c0_385, %c0_386] : memref<12x12x8x128xbf16, #tpu.memory_space<vmem>>, vector<2x10x8x128xbf16>
    %373 = vector.shape_cast %372 : vector<2x10x8x128xbf16> to vector<160x128xbf16>
    %c8_387 = arith.constant 8 : index
    %c0_388 = arith.constant 0 : index
    %c0_389 = arith.constant 0 : index
    %374 = vector.load %arg4[%c8_387, %c0_388, %c0_389] : memref<9x128x128xbf16, #tpu.memory_space<vmem>>, vector<1x128x128xbf16>
    %375 = vector.shape_cast %374 : vector<1x128x128xbf16> to vector<128x128xbf16>
    %cst_390 = arith.constant dense<0.000000e+00> : vector<160x128xf32>
    %376 = tpu.matmul %373, %375, %cst_390 {dimension_numbers = #tpu.dot_dimension_numbers<[1], [0], [0], [1], [0, 0, 1, 1], [], []>} : vector<160x128xbf16>, vector<128x128xbf16>, vector<160x128xf32> -> vector<160x128xf32>
    %377 = arith.addf %371, %376 : vector<160x128xf32>
    %378 = vector.shape_cast %377 : vector<160x128xf32> to vector<2x80x128xf32>
    %cst_391 = arith.constant dense<0xFF800000> : vector<80x128xf32>
    %379 = vector.multi_reduction <maximumf>, %378, %cst_391 [0] : vector<2x80x128xf32> to vector<80x128xf32>
    %380 = vector.shape_cast %379 : vector<80x128xf32> to vector<5x2x8x128xf32>
    %cst_392 = arith.constant dense<0xFF800000> : vector<5x8x128xf32>
    %381 = vector.multi_reduction <maximumf>, %380, %cst_392 [1] : vector<5x2x8x128xf32> to vector<5x8x128xf32>
    %382 = vector.shape_cast %2 : vector<1x128xf32> to vector<1x1x128xf32>
    %383 = vector.broadcast %382 : vector<1x1x128xf32> to vector<5x8x128xf32>
    %384 = arith.addf %381, %383 : vector<5x8x128xf32>
    %cst_393 = arith.constant 0.000000e+00 : f32
    %385 = vector.broadcast %cst_393 : f32 to vector<5x8x128xf32>
    %386 = arith.maximumf %384, %385 : vector<5x8x128xf32>
    %387 = arith.truncf %386 : vector<5x8x128xf32> to vector<5x8x128xbf16>
    %388 = vector.extract_strided_slice %387 {offsets = [0, 0, 0], sizes = [1, 8, 128], strides = [1, 1, 1]} : vector<5x8x128xbf16> to vector<1x8x128xbf16>
    %389 = vector.shape_cast %388 : vector<1x8x128xbf16> to vector<8x128xbf16>
    %c0_394 = arith.constant 0 : index
    %c2560 = arith.constant 2560 : index
    %390 = vector.load %arg10[%c0_394, %c2560] : memref<8x3200xbf16, #tpu.memory_space<vmem>>, vector<8x128xbf16>
    tpu.vector_store %arg10[%c0_394, %c2560], %389 {strides = array<i32>} : memref<8x3200xbf16, #tpu.memory_space<vmem>>, vector<8x128xbf16>,
    %391 = vector.extract_strided_slice %387 {offsets = [1, 0, 0], sizes = [1, 8, 128], strides = [1, 1, 1]} : vector<5x8x128xbf16> to vector<1x8x128xbf16>
    %392 = vector.shape_cast %391 : vector<1x8x128xbf16> to vector<8x128xbf16>
    %c0_395 = arith.constant 0 : index
    %c2688 = arith.constant 2688 : index
    %393 = vector.load %arg10[%c0_395, %c2688] : memref<8x3200xbf16, #tpu.memory_space<vmem>>, vector<8x128xbf16>
    tpu.vector_store %arg10[%c0_395, %c2688], %392 {strides = array<i32>} : memref<8x3200xbf16, #tpu.memory_space<vmem>>, vector<8x128xbf16>,
    %394 = vector.extract_strided_slice %387 {offsets = [2, 0, 0], sizes = [1, 8, 128], strides = [1, 1, 1]} : vector<5x8x128xbf16> to vector<1x8x128xbf16>
    %395 = vector.shape_cast %394 : vector<1x8x128xbf16> to vector<8x128xbf16>
    %c0_396 = arith.constant 0 : index
    %c2816 = arith.constant 2816 : index
    %396 = vector.load %arg10[%c0_396, %c2816] : memref<8x3200xbf16, #tpu.memory_space<vmem>>, vector<8x128xbf16>
    tpu.vector_store %arg10[%c0_396, %c2816], %395 {strides = array<i32>} : memref<8x3200xbf16, #tpu.memory_space<vmem>>, vector<8x128xbf16>,
    %397 = vector.extract_strided_slice %387 {offsets = [3, 0, 0], sizes = [1, 8, 128], strides = [1, 1, 1]} : vector<5x8x128xbf16> to vector<1x8x128xbf16>
    %398 = vector.shape_cast %397 : vector<1x8x128xbf16> to vector<8x128xbf16>
    %c0_397 = arith.constant 0 : index
    %c2944 = arith.constant 2944 : index
    %399 = vector.load %arg10[%c0_397, %c2944] : memref<8x3200xbf16, #tpu.memory_space<vmem>>, vector<8x128xbf16>
    tpu.vector_store %arg10[%c0_397, %c2944], %398 {strides = array<i32>} : memref<8x3200xbf16, #tpu.memory_space<vmem>>, vector<8x128xbf16>,
    %400 = vector.extract_strided_slice %387 {offsets = [4, 0, 0], sizes = [1, 8, 128], strides = [1, 1, 1]} : vector<5x8x128xbf16> to vector<1x8x128xbf16>
    %401 = vector.shape_cast %400 : vector<1x8x128xbf16> to vector<8x128xbf16>
    %c0_398 = arith.constant 0 : index
    %c3072 = arith.constant 3072 : index
    %402 = vector.load %arg10[%c0_398, %c3072] : memref<8x3200xbf16, #tpu.memory_space<vmem>>, vector<8x128xbf16>
    tpu.vector_store %arg10[%c0_398, %c3072], %401 {strides = array<i32>} : memref<8x3200xbf16, #tpu.memory_space<vmem>>, vector<8x128xbf16>,
    %c0_399 = arith.constant 0 : index
    %c0_400 = arith.constant 0 : index
    %403 = vector.load %arg10[%c0_399, %c0_400] : memref<8x3200xbf16, #tpu.memory_space<vmem>>, vector<8x3200xbf16>
    %c0_401 = arith.constant 0 : index
    %c0_402 = arith.constant 0 : index
    %404 = vector.load %arg6[%c0_401, %c0_402] : memref<3200x128xbf16, #tpu.memory_space<vmem>>, vector<3200x128xbf16>
    %cst_403 = arith.constant dense<0.000000e+00> : vector<8x128xf32>
    %405 = tpu.matmul %403, %404, %cst_403 {dimension_numbers = #tpu.dot_dimension_numbers<[1], [0], [0], [1], [0, 0, 1, 1], [], []>} : vector<8x3200xbf16>, vector<3200x128xbf16>, vector<8x128xf32> -> vector<8x128xf32>
    %c0_404 = arith.constant 0 : index
    %c0_405 = arith.constant 0 : index
    %406 = vector.load %arg7[%c0_404, %c0_405] : memref<1x128xf32, #tpu.memory_space<vmem>>, vector<1x128xf32>
    %407 = vector.broadcast %406 : vector<1x128xf32> to vector<8x128xf32>
    %408 = arith.addf %405, %407 : vector<8x128xf32>
    %cst_406 = arith.constant 0.000000e+00 : f32
    %409 = vector.broadcast %cst_406 : f32 to vector<8x128xf32>
    %410 = arith.maximumf %408, %409 : vector<8x128xf32>
    %c0_407 = arith.constant 0 : index
    %c0_408 = arith.constant 0 : index
    %411 = vector.load %arg8[%c0_407, %c0_408] : memref<8x128xf32, #tpu.memory_space<vmem>>, vector<8x128xf32>
    tpu.vector_store %arg8[%c0_407, %c0_408], %410 {strides = array<i32>} : memref<8x128xf32, #tpu.memory_space<vmem>>, vector<8x128xf32>,
    return
  }
  func.func @transform_0(%arg0: i32) -> (i32, i32, i32, i32) {
    %c0_i32 = arith.constant 0 : i32
    %c0_i32_0 = arith.constant 0 : i32
    %c0_i32_1 = arith.constant 0 : i32
    %c0_i32_2 = arith.constant 0 : i32
    return %c0_i32, %c0_i32_0, %arg0, %c0_i32_1 : i32, i32, i32, i32
  }
  func.func @transform_1(%arg0: i32) -> (i32, i32, i32) {
    %c0_i32 = arith.constant 0 : i32
    %c0_i32_0 = arith.constant 0 : i32
    %c0_i32_1 = arith.constant 0 : i32
    %c0_i32_2 = arith.constant 0 : i32
    return %c0_i32, %c0_i32_0, %c0_i32_1 : i32, i32, i32
  }
  func.func @transform_2(%arg0: i32) -> (i32, i32) {
    %c0_i32 = arith.constant 0 : i32
    %c0_i32_0 = arith.constant 0 : i32
    %c0_i32_1 = arith.constant 0 : i32
    return %c0_i32, %c0_i32_0 : i32, i32
  }
  func.func @transform_3(%arg0: i32) -> (i32, i32, i32) {
    %c0_i32 = arith.constant 0 : i32
    %c0_i32_0 = arith.constant 0 : i32
    %c0_i32_1 = arith.constant 0 : i32
    %c0_i32_2 = arith.constant 0 : i32
    return %c0_i32, %c0_i32_0, %c0_i32_1 : i32, i32, i32
  }
  func.func @transform_4(%arg0: i32) -> (i32, i32) {
    %c0_i32 = arith.constant 0 : i32
    %c0_i32_0 = arith.constant 0 : i32
    %c0_i32_1 = arith.constant 0 : i32
    return %c0_i32, %c0_i32_0 : i32, i32
  }
  func.func @transform_5(%arg0: i32) -> (i32, i32) {
    %c0_i32 = arith.constant 0 : i32
    %c0_i32_0 = arith.constant 0 : i32
    %c0_i32_1 = arith.constant 0 : i32
    return %c0_i32, %c0_i32_0 : i32, i32
  }
  func.func @transform_6(%arg0: i32) -> (i32, i32) {
    %c0_i32 = arith.constant 0 : i32
    %c0_i32_0 = arith.constant 0 : i32
    %c0_i32_1 = arith.constant 0 : i32
    return %c0_i32, %c0_i32_0 : i32, i32
  }
  func.func @transform_7(%arg0: i32) -> (i32, i32) {
    %c0_i32 = arith.constant 0 : i32
    %c0_i32_0 = arith.constant 0 : i32
    return %arg0, %c0_i32 : i32, i32
  }
}

</mosaic_0001>

<bundles_post_ra>
// kernel: feature_extractor_forward.1
= control target key start
LH: loop header
LB: loop body
LE: loop exit
PB: predicated region body
PF: predicated region fallthrough
CT: control target
= control target key end

     0   :  { %s25079_s26 = smov 0   ;;  %s29957_s0 = inlined_call_operand.vmem [shape: bf16[30,24,8,56], index: 0, kind: input, shape index: {}]   ;;  %s29958_s1 = inlined_call_operand.vmem [shape: bf16[7,56,128], index: 1, kind: input, shape index: {}]   ;;  %s29959_s2 = inlined_call_operand.vmem [shape: f32[1,128], index: 2, kind: input, shape index: {}]   ;;  %s29960_s3 = inlined_call_operand.vmem [shape: bf16[9,128,128], index: 3, kind: input, shape index: {}]   ;;  %s29961_s4 = inlined_call_operand.vmem [shape: f32[1,128], index: 4, kind: input, shape index: {}]   ;;  %s29962_s5 = inlined_call_operand.vmem [shape: bf16[3200,128], index: 5, kind: input, shape index: {}]   ;;  %s29963_s6 = inlined_call_operand.vmem [shape: f32[1,128], index: 6, kind: input, shape index: {}]   ;;  %s29964_s7 = inlined_call_operand.vmem [shape: f32[8,128], index: 7, kind: output, shape index: {}]  }
   0x1   :  { %v25077_v0 = vld [vmem:[%s29959_s2] ss:$0 sm:$0xff] }
   0x2   :  { %30015 = vst [vmem:[#allocation4_spill] sm:$0xff] %v25077_v0 }
   0x3 LB: > { %v25087_v1 = vld [vmem:[%s29958_s1 + $0x34] ss:$0 sps:$4 sm:$0xff]   ;;  %vm223_vm0 = vcmask 1043456   ;;  %v25092_v2 = vld [vmem:[%s29958_s1 + $0x2c] sm:$0xff]   ;;  %v25097_v3 = vld [vmem:[%s29958_s1 + $0x18] ss:$0 sps:$4 sm:$0xff]   ;;  %s25030_s26 = sphi %s25079_s26, %s33_s26  }
   0x4   : > { %23837 = vmatprep.subr.msk.bf16.mxu0 %vm223_vm0, %v25087_v1  ;;  %v25103_v4 = vsel %vm223_vm0, %v25087_v1, 0  ;;  %v25108_v5 = vld [vmem:[%s29958_s1 + $0x10] sm:$0xff]   ;;  %23838 = vmatprep.subr.msk.bf16.mxu1 %vm223_vm0, %v25097_v3  ;;  %v25115_v6 = vsel %vm223_vm0, %v25097_v3, 0  ;;  %v25120_v7 = vld [vmem:[%s29958_s1 + $0x24] sm:$0xff]   ;;  %s20346_s15 = smul.u32 192, %s25030_s26  ;;  %v25135_v9 = vld [vmem:[%s29958_s1 + $0x1c] sm:$0xff]  }
   0x5   : > { %21750 = vmatpush3.bf16.msra.mxu0 %v25103_v4  ;;  %21782 = vmatpush3.bf16.msra.mxu1 %v25115_v6  ;;  %v25128_v8 = vld [vmem:[%s29958_s1 + $0x8] sm:$0xff]   ;;  %v25140_v10 = vld [vmem:[%s29958_s1] sm:$0xff]   ;;  %vm186_vm1 = vcmask 457728   ;;  %v25161_v13 = vld [vmem:[%s29958_s1 + $0x50] ss:$0 sps:$4 sm:$0xff]  }
   0x6   : > { %21751 = vmatprep.subr.bf16.mxu0 %v25092_v2  ;;  %21783 = vmatprep.subr.bf16.mxu1 %v25108_v5  ;;  %s25145_s22 = scalar_lea.vmem %s29957_s0, %s20346_s15  ;;  %v25172_v15 = vld [vmem:[%s29958_s1 + $0x6c] ss:$0 sps:$4 sm:$0xff]   ;;  %v25184_v18 = vsel %vm223_vm0, %v25161_v13, 0  ;;  %v25203_v22 = vld [vmem:[%s29958_s1 + $0x64] sm:$0xff]   ;;  %v25237_v28 = vld [vmem:[%s29958_s1 + $0x5c] sm:$0xff]  }
   0x7   : > { %v25150_v11 = vld [vmem:[%s25145_s22 + $0x60] sm:$0xff]   ;;  %v25166_v14 = vld [vmem:[%s25145_s22 + $0x68] sm:$0xff]   ;;  %v25177_v17 = vld [vmem:[%s25145_s22 + $0x70] sm:$0xff]   ;;  %v25191_v20 = vsel %vm223_vm0, %v25172_v15, 0 }
   0x8   : > { %v23870_v12 = vld [vmem:[%s25145_s22] sm:$0xff]   ;;  %21757 = vmatprep.mubr.msk.bf16.mxu0 %vm186_vm1, %v25150_v11  ;;  %v23872_v16 = vld [vmem:[%s25145_s22 + $0x8] sm:$0xff]   ;;  %v23876_v19 = vld [vmem:[%s25145_s22 + $0x10] sm:$0xff]  }
   0x9   : > { %21752 = vmatpush3.bf16.msra.mxu0 %v25092_v2  ;;  %21784 = vmatpush3.bf16.msra.mxu1 %v25108_v5  ;;  %v25196_v21 = vld [vmem:[%s29958_s1 + $0x48] sm:$0xff]   ;;  %v25212_v23 = vld [vmem:[%s25145_s22 + $0x78] sm:$0xff]   ;;  %v25219_v25 = vld [vmem:[%s25145_s22 + $0x80] sm:$0xff]  }
   0xa   : > { %21753 = vmatprep.subr.bf16.mxu0 %v25120_v7  ;;  %21785 = vmatprep.subr.bf16.mxu1 %v25128_v8  ;;  %v23878_v24 = vld [vmem:[%s25145_s22 + $0x18] sm:$0xff]   ;;  %v23882_v26 = vld [vmem:[%s25145_s22 + $0x20] sm:$0xff]   ;;  %v25240_v29 = vld [vmem:[%s25145_s22 + $0x88] sm:$0xff]  }
   0xb   : > { %21789 = vmatprep.mubr.msk.bf16.mxu1 %vm186_vm1, %v23870_v12  ;;  %v25231_v27 = vld [vmem:[%s29958_s1 + $0x40] sm:$0xff]   ;;  %v23884_v30 = vld [vmem:[%s25145_s22 + $0x28] sm:$0xff]   ;;  %v25247_v31 = vld [vmem:[%s25145_s22 + $0x90] sm:$0xff]  }
   0xc   : > { %v23886_v32 = vld [vmem:[%s25145_s22 + $0x30] sm:$0xff]   ;;  %v25254_v33 = vld [vmem:[%s29958_s1 + $0x38] sm:$0xff]   ;;  %v25276_v37 = vld [vmem:[%s25145_s22 + $0xa0] sm:$0xff]  }
   0xd   : > { %21754 = vmatpush3.bf16.msra.mxu0 %v25120_v7  ;;  %21786 = vmatpush3.bf16.msra.mxu1 %v25128_v8  ;;  %v25261_v34 = vld [vmem:[%s29958_s1 + $0x54] sm:$0xff]   ;;  %v23892_v38 = vld [vmem:[%s25145_s22 + $0x40] sm:$0xff]   ;;  %v25287_v39 = vld [vmem:[%s29958_s1 + $0x88] ss:$0 sps:$4 sm:$0xff]  }
   0xe   : > { %21755 = vmatprep.subr.bf16.mxu0 %v25135_v9  ;;  %21787 = vmatprep.subr.bf16.mxu1 %v25140_v10  ;;  %v25269_v35 = vld [vmem:[%s25145_s22 + $0x98] sm:$0xff]   ;;  %v25292_v40 = vld [vmem:[%s29958_s1 + $0xa4] ss:$0 sps:$4 sm:$0xff]   ;;  %v25296_v41 = vld [vmem:[%s25145_s22 + $0xa8] sm:$0xff]   ;;  %v25341_v52 = vsel %vm223_vm0, %v25287_v39, 0 }
   0xf   : > { %v23888_v36 = vld [vmem:[%s25145_s22 + $0x38] sm:$0xff]   ;;  %30016 = vst [vmem:[#allocation5_spill] sm:$0xff] %v25296_v41  ;;  %v23894_v42 = vld [vmem:[%s25145_s22 + $0x48] sm:$0xff]   ;;  %v25304_v43 = vld [vmem:[%s25145_s22 + $0xb0] sm:$0xff]   ;;  %v25348_v54 = vsel %vm223_vm0, %v25292_v40, 0 }
  0x10   : > { %30017 = vst [vmem:[#allocation6_spill] sm:$0xff] %v25304_v43  ;;  %v23898_v44 = vld [vmem:[%s25145_s22 + $0x50] sm:$0xff]   ;;  %v25314_v45 = vld [vmem:[%s25145_s22 + $0xb8] sm:$0xff]   ;;  %v25318_v47 = vld [vmem:[%s25145_s22 + $0xc0] sm:$0xff]  }
  0x11   : > { %21756 = vmatpush3.bf16.msra.mxu0 %v25135_v9  ;;  %21788 = vmatpush3.bf16.msra.mxu1 %v25140_v10  ;;  %30018 = vst [vmem:[#allocation7_spill] sm:$0xff] %v25314_v45  ;;  %v23900_v46 = vld [vmem:[%s25145_s22 + $0x58] sm:$0xff]   ;;  %v25321_v48 = vld [vmem:[%s25145_s22 + $0x120] sm:$0xff]   ;;  %v25331_v49 = vld [vmem:[%s25145_s22 + $0xc8] sm:$0xff]  }
  0x12   : > { %23839 = vmatprep.subr.msk.bf16.mxu0 %vm223_vm0, %v25161_v13  ;;  %23840 = vmatprep.subr.msk.bf16.mxu1 %vm223_vm0, %v25172_v15  ;;  %v25334_v50 = vld [vmem:[%s25145_s22 + $0x128] sm:$0xff]   ;;  %v25337_v51 = vld [vmem:[%s25145_s22 + $0xd0] sm:$0xff]   ;;  %30019 = vst [vmem:[#allocation8_spill] sm:$0xff] %v25348_v54  ;;  %v25353_v55 = vld [vmem:[%s29958_s1 + $0x80] sm:$0xff]  }
  0x13   : > { %v25344_v53 = vld [vmem:[%s25145_s22 + $0x130] sm:$0xff]   ;;  %v25360_v56 = vld [vmem:[%s29958_s1 + $0x9c] sm:$0xff]  }
  0x14   : > { %21758 = vmatmul.mubr.msk.bf16.vlgmr.msra.gmra.mxu0 %vm186_vm1, %v25166_v14  ;;  %21790 = vmatmul.mubr.msk.bf16.vlgmr.msra.gmra.mxu1 %vm186_vm1, %v23872_v16  ;;  %30020 = vst [vmem:[#allocation9_spill] sm:$0xff] %v25360_v56  ;;  %v25369_v57 = vld [vmem:[%s25145_s22 + $0xd8] sm:$0xff]   ;;  %v25390_v61 = vld [vmem:[%s25145_s22 + $0xe0] sm:$0xff]   ;;  %v25401_v63 = vld [vmem:[%s29958_s1 + $0x70] sm:$0xff]  }
  0x15   : > { %21814 = vmatpush3.bf16.msra.mxu0 %v25184_v18  ;;  %21846 = vmatpush3.bf16.msra.mxu1 %v25191_v20  ;;  %v25374_v58 = vld [vmem:[%s29958_s1 + $0x78] sm:$0xff]   ;;  %v25393_v62 = vld [vmem:[%s25145_s22 + $0x140] sm:$0xff]   ;;  %v25408_v12 = vld [vmem:[%s29958_s1 + $0x8c] sm:$0xff]  }
  0x16   : > { %21761 = vmatprep.mubr.msk.bf16.mxu0 %vm186_vm1, %v25177_v17  ;;  %21793 = vmatprep.mubr.msk.bf16.mxu1 %vm186_vm1, %v23876_v19  ;;  %v25382_v59 = vld [vmem:[%s29958_s1 + $0x94] sm:$0xff]   ;;  %30022 = vst [vmem:[#allocation11_spill] sm:$0xff] %v25408_v12  ;;  %v25417_v16 = vld [vmem:[%s25145_s22 + $0xe8] sm:$0xff]   ;;  %v25425_v19 = vld [vmem:[%s29958_s1 + $0xc0] ss:$0 sps:$4 sm:$0xff]  }
  0x17   : > { %21815 = vmatprep.subr.bf16.mxu0 %v25196_v21  ;;  %21847 = vmatprep.subr.bf16.mxu1 %v25203_v22  ;;  %30021 = vst [vmem:[#allocation10_spill] sm:$0xff] %v25382_v59  ;;  %v25385_v60 = vld [vmem:[%s25145_s22 + $0x138] sm:$0xff]   ;;  %v25481_v0 = vld [vmem:[%s25145_s22 + $0x170] sm:$0xff]  }
  0x18   : > { %30024 = vst [vmem:[#allocation13_spill] sm:$0xff] %v25481_v0 }
  0x19   : > { %21816 = vmatpush3.bf16.msra.mxu0 %v25196_v21  ;;  %21848 = vmatpush3.bf16.msra.mxu1 %v25203_v22 }
  0x1a   : > { %21817 = vmatprep.subr.bf16.mxu0 %v25231_v27  ;;  %21849 = vmatprep.subr.bf16.mxu1 %v25237_v28 }
  0x1c   : > { %21762 = vmatmul.mubr.msk.bf16.gmra.mxu0 %vm186_vm1, %v25212_v23  ;;  %21794 = vmatmul.mubr.msk.bf16.gmra.mxu1 %vm186_vm1, %v23878_v24  ;;  %v25428_v24 = vld [vmem:[%s25145_s22 + $0x148] sm:$0xff]  }
  0x1d   : > { %21765 = vmatprep.mubr.msk.bf16.mxu0 %vm186_vm1, %v25219_v25  ;;  %21797 = vmatprep.mubr.msk.bf16.mxu1 %vm186_vm1, %v23882_v26  ;;  %v25432_v26 = vld [vmem:[%s25145_s22 + $0xf0] sm:$0xff]  }
  0x1e   : > { %21818 = vmatpush3.bf16.msra.mxu0 %v25231_v27  ;;  %21850 = vmatpush3.bf16.msra.mxu1 %v25237_v28 }
  0x1f   : > { %21819 = vmatprep.subr.bf16.mxu0 %v25254_v33  ;;  %21851 = vmatprep.subr.bf16.mxu1 %v25261_v34 }
  0x22   : > { %21820 = vmatpush3.bf16.msra.mxu0 %v25254_v33  ;;  %21852 = vmatpush3.bf16.msra.mxu1 %v25261_v34 }
  0x23   : > { %23841 = vmatprep.subr.msk.bf16.mxu0 %vm223_vm0, %v25287_v39  ;;  %23842 = vmatprep.subr.msk.bf16.mxu1 %vm223_vm0, %v25292_v40 }
  0x24   : > { %21766 = vmatmul.mubr.msk.bf16.gmra.mxu0 %vm186_vm1, %v25240_v29  ;;  %21798 = vmatmul.mubr.msk.bf16.gmra.mxu1 %vm186_vm1, %v23884_v30  ;;  %v25435_v30 = vld [vmem:[%s25145_s22 + $0x150] sm:$0xff]  }
  0x25   : > { %21769 = vmatprep.mubr.msk.bf16.mxu0 %vm186_vm1, %v25247_v31  ;;  %21801 = vmatprep.mubr.msk.bf16.mxu1 %vm186_vm1, %v23886_v32  ;;  %v25452_v32 = vld [vmem:[%s25145_s22 + $0xf8] sm:$0xff]  }
  0x2c   : > { %21770 = vmatmul.mubr.msk.bf16.gmra.mxu0 %vm186_vm1, %v25269_v35  ;;  %21802 = vmatmul.mubr.msk.bf16.gmra.mxu1 %vm186_vm1, %v23888_v36  ;;  %v25455_v36 = vld [vmem:[%s25145_s22 + $0x158] sm:$0xff]  }
  0x2d   : > { %21773 = vmatprep.mubr.msk.bf16.mxu0 %vm186_vm1, %v25276_v37  ;;  %21805 = vmatprep.mubr.msk.bf16.mxu1 %vm186_vm1, %v23892_v38  ;;  %v25458_v38 = vld [vmem:[%s25145_s22 + $0x100] sm:$0xff]  }
  0x34   : > { %21774 = vmatmul.mubr.msk.bf16.gmra.mxu0 %vm186_vm1, %v25296_v41  ;;  %21806 = vmatmul.mubr.msk.bf16.gmra.mxu1 %vm186_vm1, %v23894_v42  ;;  %v25461_v42 = vld [vmem:[%s25145_s22 + $0x160] sm:$0xff]   ;;  %v25553_v41 = vld [vmem:[%s25145_s22 + $0x1f8] sm:$0xff]  }
  0x35   : > { %21777 = vmatprep.mubr.msk.bf16.mxu0 %vm186_vm1, %v25304_v43  ;;  %21809 = vmatprep.mubr.msk.bf16.mxu1 %vm186_vm1, %v23898_v44  ;;  %v25475_v44 = vld [vmem:[%s25145_s22 + $0x168] sm:$0xff]   ;;  %v25519_v43 = vsel %vm223_vm0, %v25425_v19, 0  ;;  %30032 = vst [vmem:[#allocation21_spill] sm:$0xff] %v25553_v41 }
  0x36   : > { %30023 = vst [vmem:[#allocation12_spill] sm:$0xff] %v25475_v44  ;;  %30029 = vst [vmem:[#allocation18_spill] sm:$0xff] %v25519_v43 }
  0x3c   : > { %21778 = vmatmul.mubr.msk.bf16.gmra.mxu0 %vm186_vm1, %v25314_v45  ;;  %21810 = vmatmul.mubr.msk.bf16.gmra.mxu1 %vm186_vm1, %v23900_v46  ;;  %v25478_v46 = vld [vmem:[%s25145_s22 + $0x110] sm:$0xff]   ;;  %v25512_v45 = vld [vmem:[%s25145_s22 + $0x188] sm:$0xff]  }
  0x3d   : > { %21821 = vmatprep.mubr.msk.bf16.mxu0 %vm186_vm1, %v25318_v47  ;;  %21853 = vmatprep.mubr.msk.bf16.mxu1 %vm186_vm1, %v25321_v48  ;;  %30028 = vst [vmem:[#allocation17_spill] sm:$0xff] %v25512_v45 }
  0x44   : > { %21822 = vmatmul.mubr.msk.bf16.vlgmr.msra.gmra.mxu0 %vm186_vm1, %v25331_v49  ;;  %21854 = vmatmul.mubr.msk.bf16.vlgmr.msra.gmra.mxu1 %vm186_vm1, %v25334_v50 }
  0x45   : > { %21878 = vmatpush3.bf16.msra.mxu0 %v25341_v52  ;;  %21910 = vmatpush3.bf16.msra.mxu1 %v25348_v54  ;;  %v25501_v54 = vld [vmem:[%s25145_s22 + $0x1e0] sm:$0xff]  }
  0x46   : > { %21825 = vmatprep.mubr.msk.bf16.mxu0 %vm186_vm1, %v25337_v51  ;;  %21857 = vmatprep.mubr.msk.bf16.mxu1 %vm186_vm1, %v25344_v53  ;;  %30027 = vst [vmem:[#allocation16_spill] sm:$0xff] %v25501_v54 }
  0x47   : > { %21879 = vmatprep.subr.bf16.mxu0 %v25353_v55  ;;  %21911 = vmatprep.subr.bf16.mxu1 %v25360_v56 }
  0x49   : > { %21880 = vmatpush3.bf16.msra.mxu0 %v25353_v55  ;;  %21912 = vmatpush3.bf16.msra.mxu1 %v25360_v56  ;;  %v25498_v56 = vld [vmem:[%s25145_s22 + $0x180] sm:$0xff]  }
  0x4a   : > { %21881 = vmatprep.subr.bf16.mxu0 %v25374_v58  ;;  %21913 = vmatprep.subr.bf16.mxu1 %v25382_v59  ;;  %30026 = vst [vmem:[#allocation15_spill] sm:$0xff] %v25498_v56 }
  0x4c   : > { %21826 = vmatmul.mubr.msk.bf16.gmra.mxu0 %vm186_vm1, %v25369_v57  ;;  %21858 = vmatmul.mubr.msk.bf16.gmra.mxu1 %vm186_vm1, %v25385_v60 }
  0x4d   : > { %21829 = vmatprep.mubr.msk.bf16.mxu0 %vm186_vm1, %v25390_v61  ;;  %21861 = vmatprep.mubr.msk.bf16.mxu1 %vm186_vm1, %v25393_v62 }
  0x4e   : > { %21882 = vmatpush3.bf16.msra.mxu0 %v25374_v58  ;;  %21914 = vmatpush3.bf16.msra.mxu1 %v25382_v59  ;;  %v25495_v59 = vld [vmem:[%s25145_s22 + $0x178] sm:$0xff]  }
  0x4f   : > { %21883 = vmatprep.subr.bf16.mxu0 %v25401_v63  ;;  %21915 = vmatprep.subr.bf16.mxu1 %v25408_v12  ;;  %30025 = vst [vmem:[#allocation14_spill] sm:$0xff] %v25495_v59 }
  0x52   : > { %21884 = vmatpush3.bf16.msra.mxu0 %v25401_v63  ;;  %21916 = vmatpush3.bf16.msra.mxu1 %v25408_v12  ;;  %v25492_v12 = vld [vmem:[%s25145_s22 + $0x118] sm:$0xff]  }
  0x53   : > { %23843 = vmatprep.subr.msk.bf16.mxu0 %vm223_vm0, %v25425_v19  ;;  %23844 = vmatprep.subr.msk.bf16.mxu1 %vm223_vm0, %v25087_v1  ;;  %v25472_v1 = vld [vmem:[%s25145_s22 + $0x108] sm:$0xff]  }
  0x54   : > { %21830 = vmatmul.mubr.msk.bf16.gmra.mxu0 %vm186_vm1, %v25417_v16  ;;  %21862 = vmatmul.mubr.msk.bf16.gmra.mxu1 %vm186_vm1, %v25428_v24 }
  0x55   : > { %21833 = vmatprep.mubr.msk.bf16.mxu0 %vm186_vm1, %v25432_v26  ;;  %21865 = vmatprep.mubr.msk.bf16.mxu1 %vm186_vm1, %v25435_v30 }
  0x5c   : > { %21834 = vmatmul.mubr.msk.bf16.gmra.mxu0 %vm186_vm1, %v25452_v32  ;;  %21866 = vmatmul.mubr.msk.bf16.gmra.mxu1 %vm186_vm1, %v25455_v36 }
  0x5d   : > { %21837 = vmatprep.mubr.msk.bf16.mxu0 %vm186_vm1, %v25458_v38  ;;  %21869 = vmatprep.mubr.msk.bf16.mxu1 %vm186_vm1, %v25461_v42 }
  0x64   : > { %21838 = vmatmul.mubr.msk.bf16.gmra.mxu0 %vm186_vm1, %v25472_v1  ;;  %21870 = vmatmul.mubr.msk.bf16.gmra.mxu1 %vm186_vm1, %v25475_v44  ;;  %v25522_v44 = vld [vmem:[%s25145_s22 + $0x190] sm:$0xff]  }
  0x65   : > { %21841 = vmatprep.mubr.msk.bf16.mxu0 %vm186_vm1, %v25478_v46  ;;  %21873 = vmatprep.mubr.msk.bf16.mxu1 %vm186_vm1, %v25481_v0  ;;  %v25515_v0 = vld [vmem:[%s25145_s22 + $0x1e8] sm:$0xff]  }
  0x6c   : > { %21842 = vmatmul.mubr.msk.bf16.gmra.mxu0 %vm186_vm1, %v25492_v12  ;;  %21874 = vmatmul.mubr.msk.bf16.gmra.mxu1 %vm186_vm1, %v25495_v59  ;;  %v25525_v59 = vld [vmem:[%s25145_s22 + $0x1f0] sm:$0xff]  }
  0x6d   : > { %21885 = vmatprep.mubr.msk.bf16.mxu0 %vm186_vm1, %v25498_v56  ;;  %21917 = vmatprep.mubr.msk.bf16.mxu1 %vm186_vm1, %v25501_v54  ;;  %30030 = vst [vmem:[#allocation19_spill] sm:$0xff] %v25525_v59  ;;  %v25530_v56 = vld [vmem:[%s29958_s1 + $0xb8] sm:$0xff]   ;;  %v25537_v54 = vld [vmem:[%s29958_s1 + $0xb0] sm:$0xff]  }
  0x74   : > { %21886 = vmatmul.mubr.msk.bf16.vlgmr.msra.gmra.mxu0 %vm186_vm1, %v25512_v45  ;;  %21918 = vmatmul.mubr.msk.bf16.vlgmr.msra.gmra.mxu1 %vm186_vm1, %v25515_v0  ;;  %v25549_v45 = vld [vmem:[%s25145_s22 + $0x198] sm:$0xff]  }
  0x75   : > { %21942 = vmatpush3.bf16.msra.mxu0 %v25519_v43  ;;  %21974 = vmatpush3.bf16.msra.mxu1 %v25103_v4  ;;  %30031 = vst [vmem:[#allocation20_spill] sm:$0xff] %v25549_v45  ;;  %v25557_v43 = vld [vmem:[%s25145_s22 + $0x1a0] sm:$0xff]  }
  0x76   : > { %21889 = vmatprep.mubr.msk.bf16.mxu0 %vm186_vm1, %v25522_v44  ;;  %21921 = vmatprep.mubr.msk.bf16.mxu1 %vm186_vm1, %v25525_v59  ;;  %30033 = vst [vmem:[#allocation22_spill] sm:$0xff] %v25557_v43  ;;  %v25560_v4 = vld [vmem:[%s25145_s22 + $0x200] sm:$0xff]   ;;  %v25568_v59 = vld [vmem:[%s29958_s1 + $0xa8] sm:$0xff]  }
  0x77   : > { %21943 = vmatprep.subr.bf16.mxu0 %v25530_v56  ;;  %21975 = vmatprep.subr.bf16.mxu1 %v25092_v2 }
  0x79   : > { %21944 = vmatpush3.bf16.msra.mxu0 %v25530_v56  ;;  %21976 = vmatpush3.bf16.msra.mxu1 %v25092_v2  ;;  %v25582_v2 = vld [vmem:[%s25145_s22 + $0x1a8] sm:$0xff]  }
  0x7a   : > { %21945 = vmatprep.subr.bf16.mxu0 %v25537_v54  ;;  %21977 = vmatprep.subr.bf16.mxu1 %v25120_v7  ;;  %30034 = vst [vmem:[#allocation23_spill] sm:$0xff] %v25582_v2 }
  0x7c   : > { %21890 = vmatmul.mubr.msk.bf16.gmra.mxu0 %vm186_vm1, %v25549_v45  ;;  %21922 = vmatmul.mubr.msk.bf16.gmra.mxu1 %vm186_vm1, %v25553_v41  ;;  %v25586_v41 = vld [vmem:[%s25145_s22 + $0x208] sm:$0xff]   ;;  %v25592_v45 = vld [vmem:[%s25145_s22 + $0x210] sm:$0xff]  }
  0x7d   : > { %21893 = vmatprep.mubr.msk.bf16.mxu0 %vm186_vm1, %v25557_v43  ;;  %21925 = vmatprep.mubr.msk.bf16.mxu1 %vm186_vm1, %v25560_v4  ;;  %30035 = vst [vmem:[#allocation24_spill] sm:$0xff] %v25586_v41  ;;  %v25589_v43 = vld [vmem:[%s25145_s22 + $0x1b0] sm:$0xff]   ;;  %30037 = vst [vmem:[#allocation26_spill] sm:$0xff] %v25592_v45 }
  0x7e   : > { %21946 = vmatpush3.bf16.msra.mxu0 %v25537_v54  ;;  %21978 = vmatpush3.bf16.msra.mxu1 %v25120_v7  ;;  %30036 = vst [vmem:[#allocation25_spill] sm:$0xff] %v25589_v43  ;;  %v25609_v7 = vld [vmem:[%s25145_s22 + $0x1b8] sm:$0xff]  }
  0x7f   : > { %21947 = vmatprep.subr.bf16.mxu0 %v25568_v59  ;;  %21979 = vmatprep.subr.bf16.mxu1 %v25135_v9 }
  0x82   : > { %21948 = vmatpush3.bf16.msra.mxu0 %v25568_v59  ;;  %21980 = vmatpush3.bf16.msra.mxu1 %v25135_v9  ;;  %v25615_v9 = vld [vmem:[%s25145_s22 + $0x1c0] sm:$0xff]  }
  0x83   : > { %23845 = vmatprep.subr.msk.bf16.mxu0 %vm223_vm0, %v25097_v3  ;;  %23846 = vmatprep.subr.msk.bf16.mxu1 %vm223_vm0, %v25161_v13  ;;  %v25612_v3 = vld [vmem:[%s25145_s22 + $0x218] sm:$0xff]   ;;  %30039 = vst [vmem:[#allocation28_spill] sm:$0xff] %v25615_v9  ;;  %v25629_v13 = vld [vmem:[%s25145_s22 + $0x1c8] sm:$0xff]  }
  0x84   : > { %21894 = vmatmul.mubr.msk.bf16.gmra.mxu0 %vm186_vm1, %v25582_v2  ;;  %21926 = vmatmul.mubr.msk.bf16.gmra.mxu1 %vm186_vm1, %v25586_v41  ;;  %30038 = vst [vmem:[#allocation27_spill] sm:$0xff] %v25612_v3  ;;  %v25618_v2 = vld [vmem:[%s25145_s22 + $0x220] sm:$0xff]   ;;  %v25638_v41 = vld [vmem:[%s25145_s22 + $0x230] sm:$0xff]  }
  0x85   : > { %21897 = vmatprep.mubr.msk.bf16.mxu0 %vm186_vm1, %v25589_v43  ;;  %21929 = vmatprep.mubr.msk.bf16.mxu1 %vm186_vm1, %v25592_v45  ;;  %30040 = vst [vmem:[#allocation29_spill] sm:$0xff] %v25618_v2  ;;  %v25632_v45 = vld [vmem:[%s25145_s22 + $0x228] sm:$0xff]   ;;  %v25635_v43 = vld [vmem:[%s25145_s22 + $0x1d0] sm:$0xff]   ;;  %30042 = vst [vmem:[#allocation31_spill] sm:$0xff] %v25638_v41 }
  0x86   : > { %30041 = vst [vmem:[#allocation30_spill] sm:$0xff] %v25635_v43 }
  0x8c   : > { %21898 = vmatmul.mubr.msk.bf16.gmra.mxu0 %vm186_vm1, %v25609_v7  ;;  %21930 = vmatmul.mubr.msk.bf16.gmra.mxu1 %vm186_vm1, %v25612_v3  ;;  %v25655_v3 = vld [vmem:[%s25145_s22 + $0x240] sm:$0xff]  }
  0x8d   : > { %21901 = vmatprep.mubr.msk.bf16.mxu0 %vm186_vm1, %v25615_v9  ;;  %21933 = vmatprep.mubr.msk.bf16.mxu1 %vm186_vm1, %v25618_v2  ;;  %v25649_v2 = vld [vmem:[%s25145_s22 + $0x1d8] sm:$0xff]  }
  0x8e   : > { %v25652_v9 = vld [vmem:[%s25145_s22 + $0x238] sm:$0xff]  }
  0x94   : > { %21902 = vmatmul.mubr.msk.bf16.gmra.mxu0 %vm186_vm1, %v25629_v13  ;;  %21934 = vmatmul.mubr.msk.bf16.gmra.mxu1 %vm186_vm1, %v25632_v45 }
  0x95   : > { %21905 = vmatprep.mubr.msk.bf16.mxu0 %vm186_vm1, %v25635_v43  ;;  %21937 = vmatprep.mubr.msk.bf16.mxu1 %vm186_vm1, %v25638_v41  ;;  %v25666_v41 = vld [vmem:[%s25145_s22 + $0x248] sm:$0xff]   ;;  %v25669_v43 = vld [vmem:[%s25145_s22 + $0x250] sm:$0xff]  }
  0x9c   : > { %21906 = vmatmul.mubr.msk.bf16.gmra.mxu0 %vm186_vm1, %v25649_v2  ;;  %21938 = vmatmul.mubr.msk.bf16.gmra.mxu1 %vm186_vm1, %v25652_v9 }
  0x9d   : > { %21949 = vmatprep.mubr.msk.bf16.mxu0 %vm186_vm1, %v25655_v3  ;;  %21981 = vmatprep.mubr.msk.bf16.mxu1 %vm186_vm1, %v25318_v47  ;;  %v25683_v47 = vld [vmem:[%s25145_s22 + $0x258] sm:$0xff]  }
  0xa4   : > { %21950 = vmatmul.mubr.msk.bf16.vlgmr.msra.gmra.mxu0 %vm186_vm1, %v25666_v41  ;;  %21982 = vmatmul.mubr.msk.bf16.vlgmr.msra.gmra.mxu1 %vm186_vm1, %v25331_v49  ;;  %v25688_v49 = vld [vmem:[%s25145_s22 + $0x260] sm:$0xff]  }
  0xa5   : > { %22006 = vmatpush3.bf16.msra.mxu0 %v25115_v6  ;;  %22038 = vmatpush3.bf16.msra.mxu1 %v25184_v18  ;;  %v25709_v6 = vld [vmem:[%s25145_s22 + $0x270] sm:$0xff]  }
  0xa6   : > { %21953 = vmatprep.mubr.msk.bf16.mxu0 %vm186_vm1, %v25669_v43  ;;  %21985 = vmatprep.mubr.msk.bf16.mxu1 %vm186_vm1, %v25337_v51  ;;  %v25743_v18 = vld [vmem:[%s25145_s22 + $0x290] sm:$0xff]  }
  0xa7   : > { %22007 = vmatprep.subr.bf16.mxu0 %v25108_v5  ;;  %22039 = vmatprep.subr.bf16.mxu1 %v25196_v21 }
  0xa9   : > { %22008 = vmatpush3.bf16.msra.mxu0 %v25108_v5  ;;  %22040 = vmatpush3.bf16.msra.mxu1 %v25196_v21  ;;  %v25705_v5 = vld [vmem:[%s25145_s22 + $0x268] sm:$0xff]   ;;  %v25754_v21 = vld [vmem:[%s25145_s22 + $0x298] sm:$0xff]  }
  0xaa   : > { %22009 = vmatprep.subr.bf16.mxu0 %v25128_v8  ;;  %22041 = vmatprep.subr.bf16.mxu1 %v25231_v27 }
  0xac   : > { %21954 = vmatmul.mubr.msk.bf16.gmra.mxu0 %vm186_vm1, %v25683_v47  ;;  %21986 = vmatmul.mubr.msk.bf16.gmra.mxu1 %vm186_vm1, %v25369_v57 }
  0xad   : > { %21957 = vmatprep.mubr.msk.bf16.mxu0 %vm186_vm1, %v25688_v49  ;;  %21989 = vmatprep.mubr.msk.bf16.mxu1 %vm186_vm1, %v25390_v61 }
  0xae   : > { %22010 = vmatpush3.bf16.msra.mxu0 %v25128_v8  ;;  %22042 = vmatpush3.bf16.msra.mxu1 %v25231_v27  ;;  %v25726_v8 = vld [vmem:[%s25145_s22 + $0x278] sm:$0xff]  }
  0xaf   : > { %22011 = vmatprep.subr.bf16.mxu0 %v25140_v10  ;;  %22043 = vmatprep.subr.bf16.mxu1 %v25254_v33 }
  0xb2   : > { %22012 = vmatpush3.bf16.msra.mxu0 %v25140_v10  ;;  %22044 = vmatpush3.bf16.msra.mxu1 %v25254_v33  ;;  %v25729_v10 = vld [vmem:[%s25145_s22 + $0x280] sm:$0xff]  }
  0xb3   : > { %23847 = vmatprep.subr.msk.bf16.mxu0 %vm223_vm0, %v25172_v15  ;;  %23848 = vmatprep.subr.msk.bf16.mxu1 %vm223_vm0, %v25287_v39  ;;  %v25740_v15 = vld [vmem:[%s25145_s22 + $0x288] sm:$0xff]  }
  0xb4   : > { %21958 = vmatmul.mubr.msk.bf16.gmra.mxu0 %vm186_vm1, %v25705_v5  ;;  %21990 = vmatmul.mubr.msk.bf16.gmra.mxu1 %vm186_vm1, %v25417_v16 }
  0xb5   : > { %21961 = vmatprep.mubr.msk.bf16.mxu0 %vm186_vm1, %v25709_v6  ;;  %21993 = vmatprep.mubr.msk.bf16.mxu1 %vm186_vm1, %v25432_v26 }
  0xbc   : > { %21962 = vmatmul.mubr.msk.bf16.gmra.mxu0 %vm186_vm1, %v25726_v8  ;;  %21994 = vmatmul.mubr.msk.bf16.gmra.mxu1 %vm186_vm1, %v25452_v32 }
  0xbd   : > { %21965 = vmatprep.mubr.msk.bf16.mxu0 %vm186_vm1, %v25729_v10  ;;  %21997 = vmatprep.mubr.msk.bf16.mxu1 %vm186_vm1, %v25458_v38 }
  0xc4   : > { %21966 = vmatmul.mubr.msk.bf16.gmra.mxu0 %vm186_vm1, %v25740_v15  ;;  %21998 = vmatmul.mubr.msk.bf16.gmra.mxu1 %vm186_vm1, %v25472_v1 }
  0xc5   : > { %21969 = vmatprep.mubr.msk.bf16.mxu0 %vm186_vm1, %v25743_v18  ;;  %22001 = vmatprep.mubr.msk.bf16.mxu1 %vm186_vm1, %v25478_v46 }
  0xcc   : > { %21970 = vmatmul.mubr.msk.bf16.gmra.mxu0 %vm186_vm1, %v25754_v21  ;;  %22002 = vmatmul.mubr.msk.bf16.gmra.mxu1 %vm186_vm1, %v25492_v12 }
  0xcd   : > { %22013 = vmatprep.mubr.msk.bf16.mxu0 %vm186_vm1, %v25150_v11  ;;  %22045 = vmatprep.mubr.msk.bf16.mxu1 %vm186_vm1, %v25321_v48 }
  0xd4   : > { %v21759_v27 = vpop.f32.mrf.mxu0  ;;  %22014 = vmatmul.mubr.msk.bf16.vlgmr.msra.gmra.mxu0 %vm186_vm1, %v25166_v14  ;;  %v21791_v33 = vpop.f32.mrf.mxu1  ;;  %22046 = vmatmul.mubr.msk.bf16.vlgmr.msra.gmra.mxu1 %vm186_vm1, %v25334_v50 }
  0xd5   : > { %22070 = vmatpush3.bf16.msra.mxu0 %v25191_v20  ;;  %v25769_v39 = vadd.f32 %v21791_v33, %v21759_v27  ;;  %22102 = vmatpush3.bf16.msra.mxu1 %v25341_v52 }
  0xd6   : > { %v261_v51 = vpop.f32.mrf.mxu0  ;;  %22017 = vmatprep.mubr.msk.bf16.mxu0 %vm186_vm1, %v25177_v17  ;;  %v510_v11 = vpop.f32.mrf.mxu1  ;;  %22049 = vmatprep.mubr.msk.bf16.mxu1 %vm186_vm1, %v25344_v53 }
  0xd7   : > { %22071 = vmatprep.subr.bf16.mxu0 %v25203_v22  ;;  %v25777_v14 = vadd.f32 %v510_v11, %v261_v51  ;;  %22103 = vmatprep.subr.bf16.mxu1 %v25353_v55 }
  0xd8   : > { %v21760_v48 = vpop.f32.mrf.mxu0  ;;  %v21792_v20 = vpop.f32.mrf.mxu1 }
  0xd9   : > { %22072 = vmatpush3.bf16.msra.mxu0 %v25203_v22  ;;  %v25781_v50 = vadd.f32 %v21792_v20, %v21760_v48  ;;  %22104 = vmatpush3.bf16.msra.mxu1 %v25353_v55 }
  0xda   : > { %v264_v52 = vpop.f32.mrf.mxu0  ;;  %22073 = vmatprep.subr.bf16.mxu0 %v25237_v28  ;;  %v513_v17 = vpop.f32.mrf.mxu1  ;;  %22105 = vmatprep.subr.bf16.mxu1 %v25374_v58 }
  0xdb   : > { %v25786_v53 = vadd.f32 %v513_v17, %v264_v52 }
  0xdc   : > { %v21763_v57 = vpop.f32.mrf.mxu0  ;;  %22018 = vmatmul.mubr.msk.bf16.gmra.mxu0 %vm186_vm1, %v25212_v23  ;;  %v21795_v61 = vpop.f32.mrf.mxu1  ;;  %22050 = vmatmul.mubr.msk.bf16.gmra.mxu1 %vm186_vm1, %v25385_v60 }
  0xdd   : > { %22021 = vmatprep.mubr.msk.bf16.mxu0 %vm186_vm1, %v25219_v25  ;;  %v25794_v22 = vadd.f32 %v21795_v61, %v21763_v57  ;;  %22053 = vmatprep.mubr.msk.bf16.mxu1 %vm186_vm1, %v25393_v62 }
  0xde   : > { %v277_v55 = vpop.f32.mrf.mxu0  ;;  %22074 = vmatpush3.bf16.msra.mxu0 %v25237_v28  ;;  %v526_v12 = vpop.f32.mrf.mxu1  ;;  %22106 = vmatpush3.bf16.msra.mxu1 %v25374_v58 }
  0xdf   : > { %22075 = vmatprep.subr.bf16.mxu0 %v25261_v34  ;;  %v25801_v23 = vadd.f32 %v526_v12, %v277_v55  ;;  %22107 = vmatprep.subr.bf16.mxu1 %v25401_v63  ;;  %v30043_v55 = vld [vmem:[#allocation5_spill] sm:$0xff]  ;;  %v30044_v12 = vld [vmem:[#allocation12_spill] sm:$0xff] }
  0xe0   : > { %v21764_v16 = vpop.f32.mrf.mxu0  ;;  %v21796_v60 = vpop.f32.mrf.mxu1 }
  0xe1   : > { %v25804_v25 = vadd.f32 %v21796_v60, %v21764_v16 }
  0xe2   : > { %v280_v26 = vpop.f32.mrf.mxu0  ;;  %22076 = vmatpush3.bf16.msra.mxu0 %v25261_v34  ;;  %v529_v32 = vpop.f32.mrf.mxu1  ;;  %22108 = vmatpush3.bf16.msra.mxu1 %v25401_v63 }
  0xe3   : > { %23849 = vmatprep.subr.msk.bf16.mxu0 %vm223_vm0, %v25292_v40  ;;  %v25810_v28 = vadd.f32 %v529_v32, %v280_v26  ;;  %23850 = vmatprep.subr.msk.bf16.mxu1 %vm223_vm0, %v25425_v19  ;;  %v30046_v26 = vld [vmem:[#allocation13_spill] sm:$0xff] }
  0xe4   : > { %v21767_v58 = vpop.f32.mrf.mxu0  ;;  %22022 = vmatmul.mubr.msk.bf16.gmra.mxu0 %vm186_vm1, %v25240_v29  ;;  %v21799_v62 = vpop.f32.mrf.mxu1  ;;  %22054 = vmatmul.mubr.msk.bf16.gmra.mxu1 %vm186_vm1, %v25428_v24 }
  0xe5   : > { %22025 = vmatprep.mubr.msk.bf16.mxu0 %vm186_vm1, %v25247_v31  ;;  %v25820_v34 = vadd.f32 %v21799_v62, %v21767_v58  ;;  %22057 = vmatprep.mubr.msk.bf16.mxu1 %vm186_vm1, %v25435_v30 }
  0xe6   : > { %v293_v63 = vpop.f32.mrf.mxu0  ;;  %v542_v40 = vpop.f32.mrf.mxu1 }
  0xe7   : > { %v25824_v38 = vadd.f32 %v542_v40, %v293_v63 }
  0xe8   : > { %v21768_v29 = vpop.f32.mrf.mxu0  ;;  %v21800_v1 = vpop.f32.mrf.mxu1 }
  0xe9   : > { %v25826_v46 = vadd.f32 %v21800_v1, %v21768_v29 }
  0xea   : > { %v296_v19 = vpop.f32.mrf.mxu0  ;;  %v545_v27 = vpop.f32.mrf.mxu1 }
  0xeb   : > { %v25828_v33 = vadd.f32 %v545_v27, %v296_v19 }
  0xec   : > { %v21771_v24 = vpop.f32.mrf.mxu0  ;;  %22026 = vmatmul.mubr.msk.bf16.gmra.mxu0 %vm186_vm1, %v25269_v35  ;;  %v21803_v31 = vpop.f32.mrf.mxu1  ;;  %22058 = vmatmul.mubr.msk.bf16.gmra.mxu1 %vm186_vm1, %v25455_v36 }
  0xed   : > { %22029 = vmatprep.mubr.msk.bf16.mxu0 %vm186_vm1, %v25276_v37  ;;  %v25836_v30 = vadd.f32 %v21803_v31, %v21771_v24  ;;  %22061 = vmatprep.mubr.msk.bf16.mxu1 %vm186_vm1, %v25461_v42  ;;  %v30045_v42 = vld [vmem:[#allocation6_spill] sm:$0xff]  ;;  %v30047_v24 = vld [vmem:[#allocation7_spill] sm:$0xff] }
  0xee   : > { %v309_v51 = vpop.f32.mrf.mxu0  ;;  %v558_v11 = vpop.f32.mrf.mxu1 }
  0xef   : > { %v25840_v48 = vadd.f32 %v558_v11, %v309_v51  ;;  %v30048_v51 = vld [vmem:[#allocation14_spill] sm:$0xff]  ;;  %v30049_v11 = vld [vmem:[#allocation15_spill] sm:$0xff] }
  0xf0   : > { %v21772_v20 = vpop.f32.mrf.mxu0  ;;  %v21804_v52 = vpop.f32.mrf.mxu1 }
  0xf1   : > { %v25842_v17 = vadd.f32 %v21804_v52, %v21772_v20 }
  0xf2   : > { %v312_v35 = vpop.f32.mrf.mxu0  ;;  %v561_v57 = vpop.f32.mrf.mxu1 }
  0xf3   : > { %v25844_v61 = vadd.f32 %v561_v57, %v312_v35  ;;  %v30050_v35 = vld [vmem:[#allocation16_spill] sm:$0xff] }
  0xf4   : > { %v21775_v36 = vpop.f32.mrf.mxu0  ;;  %22030 = vmatmul.mubr.msk.bf16.gmra.mxu0 %vm186_vm1, %v30043_v55  ;;  %v21807_v37 = vpop.f32.mrf.mxu1  ;;  %22062 = vmatmul.mubr.msk.bf16.gmra.mxu1 %vm186_vm1, %v30044_v12 }
  0xf5   : > { %22033 = vmatprep.mubr.msk.bf16.mxu0 %vm186_vm1, %v30045_v42  ;;  %v25852_v16 = vadd.f32 %v21807_v37, %v21775_v36  ;;  %22065 = vmatprep.mubr.msk.bf16.mxu1 %vm186_vm1, %v30046_v26 }
  0xf6   : > { %v325_v60 = vpop.f32.mrf.mxu0  ;;  %v574_v32 = vpop.f32.mrf.mxu1 }
  0xf7   : > { %v25856_v58 = vadd.f32 %v574_v32, %v325_v60 }
  0xf8   : > { %v21776_v62 = vpop.f32.mrf.mxu0  ;;  %v21808_v63 = vpop.f32.mrf.mxu1 }
  0xf9   : > { %v25858_v40 = vadd.f32 %v21808_v63, %v21776_v62  ;;  %v30051_v62 = vld [vmem:[#allocation17_spill] sm:$0xff] }
  0xfa   : > { %v328_v29 = vpop.f32.mrf.mxu0  ;;  %v577_v1 = vpop.f32.mrf.mxu1 }
  0xfb   : > { %v25860_v19 = vadd.f32 %v577_v1, %v328_v29  ;;  %v30052_v1 = vld [vmem:[#allocation8_spill] sm:$0xff] }
  0xfc   : > { %v21779_v27 = vpop.f32.mrf.mxu0  ;;  %22034 = vmatmul.mubr.msk.bf16.gmra.mxu0 %vm186_vm1, %v30047_v24  ;;  %v21811_v31 = vpop.f32.mrf.mxu1  ;;  %22066 = vmatmul.mubr.msk.bf16.gmra.mxu1 %vm186_vm1, %v30048_v51  ;;  %v30053_v24 = vld [vmem:[#allocation18_spill] sm:$0xff] }
  0xfd   : > { %22077 = vmatprep.mubr.msk.bf16.mxu0 %vm186_vm1, %v30049_v11  ;;  %v25868_v20 = vadd.f32 %v21811_v31, %v21779_v27  ;;  %22109 = vmatprep.mubr.msk.bf16.mxu1 %vm186_vm1, %v30050_v35 }
  0xfe   : > { %v341_v52 = vpop.f32.mrf.mxu0  ;;  %v590_v57 = vpop.f32.mrf.mxu1 }
  0xff   : > { %v25872_v36 = vadd.f32 %v590_v57, %v341_v52  ;;  %v30054_v52 = vld [vmem:[#allocation19_spill] sm:$0xff] }
 0x100   : > { %v21780_v55 = vpop.f32.mrf.mxu0  ;;  %v21812_v37 = vpop.f32.mrf.mxu1 }
 0x101   : > { %v25874_v12 = vadd.f32 %v21812_v37, %v21780_v55 }
 0x102   : > { %v344_v42 = vpop.f32.mrf.mxu0  ;;  %v593_v60 = vpop.f32.mrf.mxu1 }
 0x103   : > { %v25876_v26 = vadd.f32 %v593_v60, %v344_v42 }
 0x104   : > { %v21823_v32 = vpop.f32.mrf.mxu0  ;;  %22078 = vmatmul.mubr.msk.bf16.vlgmr.msra.gmra.mxu0 %vm186_vm1, %v30051_v62  ;;  %v21855_v29 = vpop.f32.mrf.mxu1  ;;  %22110 = vmatmul.mubr.msk.bf16.vlgmr.msra.gmra.mxu1 %vm186_vm1, %v25515_v0  ;;  %v30057_v62 = vld [vmem:[#allocation20_spill] sm:$0xff] }
 0x105   : > { %v892_v63 = vadd.f32 %v21823_v32, %v25769_v39  ;;  %22134 = vmatpush3.bf16.msra.mxu0 %v30052_v1  ;;  %22166 = vmatpush3.bf16.msra.mxu1 %v30053_v24  ;;  %v30055_v39 = vld [vmem:[#allocation9_spill] sm:$0xff] }
 0x106   : > { %v795_v27 = vpop.f32.mrf.mxu0  ;;  %22081 = vmatprep.mubr.msk.bf16.mxu0 %vm186_vm1, %v25522_v44  ;;  %v1104_v11 = vpop.f32.mrf.mxu1  ;;  %22113 = vmatprep.mubr.msk.bf16.mxu1 %vm186_vm1, %v30054_v52  ;;  %v30058_v1 = vld [vmem:[#allocation21_spill] sm:$0xff] }
 0x107   : > { %v25887_v31 = vadd.f32 %v21855_v29, %v892_v63  ;;  %v890_v51 = vadd.f32 %v795_v27, %v25777_v14  ;;  %22135 = vmatprep.subr.bf16.mxu0 %v30055_v39  ;;  %22167 = vmatprep.subr.bf16.mxu1 %v25530_v56  ;;  %v30056_v14 = vld [vmem:[#allocation10_spill] sm:$0xff] }
 0x108   : > { %v21824_v35 = vpop.f32.mrf.mxu0  ;;  %v21856_v55 = vpop.f32.mrf.mxu1 }
 0x109   : > { %v25894_v0 = vadd.f32 %v1104_v11, %v890_v51  ;;  %v893_v57 = vadd.f32 %v21824_v35, %v25781_v50  ;;  %22136 = vmatpush3.bf16.msra.mxu0 %v30055_v39  ;;  %22168 = vmatpush3.bf16.msra.mxu1 %v25530_v56  ;;  %v30059_v56 = vld [vmem:[#allocation22_spill] sm:$0xff] }
 0x10a   : > { %v798_v44 = vpop.f32.mrf.mxu0  ;;  %22137 = vmatprep.subr.bf16.mxu0 %v30056_v14  ;;  %v1107_v60 = vpop.f32.mrf.mxu1  ;;  %22169 = vmatprep.subr.bf16.mxu1 %v25537_v54 }
 0x10b   : > { %v25900_v37 = vadd.f32 %v21856_v55, %v893_v57  ;;  %v891_v42 = vadd.f32 %v798_v44, %v25786_v53  ;;  %v30061_v44 = vld [vmem:[#allocation23_spill] sm:$0xff] }
 0x10c   : > { %v21827_v32 = vpop.f32.mrf.mxu0  ;;  %22082 = vmatmul.mubr.msk.bf16.gmra.mxu0 %vm186_vm1, %v30057_v62  ;;  %v21859_v29 = vpop.f32.mrf.mxu1  ;;  %22114 = vmatmul.mubr.msk.bf16.gmra.mxu1 %vm186_vm1, %v30058_v1 }
 0x10d   : > { %v25906_v50 = vadd.f32 %v1107_v60, %v891_v42  ;;  %v896_v63 = vadd.f32 %v21827_v32, %v25794_v22  ;;  %22085 = vmatprep.mubr.msk.bf16.mxu0 %vm186_vm1, %v30059_v56  ;;  %22117 = vmatprep.mubr.msk.bf16.mxu1 %vm186_vm1, %v25560_v4  ;;  %v30060_v22 = vld [vmem:[#allocation11_spill] sm:$0xff]  ;;  %v30062_v60 = vld [vmem:[#allocation24_spill] sm:$0xff]  ;;  %v30063_v32 = vld [vmem:[#allocation25_spill] sm:$0xff] }
 0x10e   : > { %v811_v27 = vpop.f32.mrf.mxu0  ;;  %22138 = vmatpush3.bf16.msra.mxu0 %v30056_v14  ;;  %v1120_v51 = vpop.f32.mrf.mxu1  ;;  %22170 = vmatpush3.bf16.msra.mxu1 %v25537_v54 }
 0x10f   : > { %v25916_v53 = vadd.f32 %v21859_v29, %v896_v63  ;;  %v894_v24 = vadd.f32 %v811_v27, %v25801_v23  ;;  %22139 = vmatprep.subr.bf16.mxu0 %v30060_v22  ;;  %22171 = vmatprep.subr.bf16.mxu1 %v25568_v59 }
 0x110   : > { %v21828_v11 = vpop.f32.mrf.mxu0  ;;  %v21860_v35 = vpop.f32.mrf.mxu1 }
 0x111   : > { %v25922_v52 = vadd.f32 %v1120_v51, %v894_v24  ;;  %v897_v39 = vadd.f32 %v21828_v11, %v25804_v25 }
 0x112   : > { %v814_v4 = vpop.f32.mrf.mxu0  ;;  %22140 = vmatpush3.bf16.msra.mxu0 %v30060_v22  ;;  %v1123_v55 = vpop.f32.mrf.mxu1  ;;  %22172 = vmatpush3.bf16.msra.mxu1 %v25568_v59 }
 0x113   : > { %v25926_v57 = vadd.f32 %v21860_v35, %v897_v39  ;;  %v895_v23 = vadd.f32 %v814_v4, %v25810_v28  ;;  %v30064_v28 = vld [vmem:[#allocation26_spill] sm:$0xff] }
 0x114   : > { %v21831_v54 = vpop.f32.mrf.mxu0  ;;  %22086 = vmatmul.mubr.msk.bf16.gmra.mxu0 %vm186_vm1, %v30061_v44  ;;  %v21863_v25 = vpop.f32.mrf.mxu1  ;;  %22118 = vmatmul.mubr.msk.bf16.gmra.mxu1 %vm186_vm1, %v30062_v60 }
 0x115   : > { %v25932_v14 = vadd.f32 %v1123_v55, %v895_v23  ;;  %v900_v42 = vadd.f32 %v21831_v54, %v25820_v34  ;;  %22089 = vmatprep.mubr.msk.bf16.mxu0 %vm186_vm1, %v30063_v32  ;;  %22121 = vmatprep.mubr.msk.bf16.mxu1 %vm186_vm1, %v30064_v28  ;;  %v30065_v23 = vld [vmem:[#allocation27_spill] sm:$0xff]  ;;  %v30067_v54 = vld [vmem:[#allocation29_spill] sm:$0xff] }
 0x116   : > { %v827_v62 = vpop.f32.mrf.mxu0  ;;  %v1136_v29 = vpop.f32.mrf.mxu1 }
 0x117   : > { %v25941_v59 = vadd.f32 %v21863_v25, %v900_v42  ;;  %v898_v63 = vadd.f32 %v827_v62, %v25824_v38 }
 0x118   : > { %v21832_v1 = vpop.f32.mrf.mxu0  ;;  %v21864_v27 = vpop.f32.mrf.mxu1 }
 0x119   : > { %v25944_v56 = vadd.f32 %v1136_v29, %v898_v63  ;;  %v901_v34 = vadd.f32 %v21832_v1, %v25826_v46  ;;  %v30066_v46 = vld [vmem:[#allocation28_spill] sm:$0xff] }
 0x11a   : > { %v830_v24 = vpop.f32.mrf.mxu0  ;;  %v1139_v11 = vpop.f32.mrf.mxu1 }
 0x11b   : > { %v25947_v51 = vadd.f32 %v21864_v27, %v901_v34  ;;  %v899_v22 = vadd.f32 %v830_v24, %v25828_v33  ;;  %v30069_v24 = vld [vmem:[#allocation31_spill] sm:$0xff] }
 0x11c   : > { %v21835_v39 = vpop.f32.mrf.mxu0  ;;  %22090 = vmatmul.mubr.msk.bf16.gmra.mxu0 %vm186_vm1, %v25609_v7  ;;  %v21867_v4 = vpop.f32.mrf.mxu1  ;;  %22122 = vmatmul.mubr.msk.bf16.gmra.mxu1 %vm186_vm1, %v30065_v23 }
 0x11d   : > { %v25952_v35 = vadd.f32 %v1139_v11, %v899_v22  ;;  %v904_v38 = vadd.f32 %v21835_v39, %v25836_v30  ;;  %22093 = vmatprep.mubr.msk.bf16.mxu0 %vm186_vm1, %v30066_v46  ;;  %22125 = vmatprep.mubr.msk.bf16.mxu1 %vm186_vm1, %v30067_v54 }
 0x11e   : > { %v843_v55 = vpop.f32.mrf.mxu0  ;;  %v1152_v7 = vpop.f32.mrf.mxu1 }
 0x11f   : > { %v25961_v33 = vadd.f32 %v21867_v4, %v904_v38  ;;  %v902_v44 = vadd.f32 %v843_v55, %v25840_v48 }
 0x120   : > { %v21836_v42 = vpop.f32.mrf.mxu0  ;;  %v21868_v60 = vpop.f32.mrf.mxu1 }
 0x121   : > { %v25964_v25 = vadd.f32 %v1152_v7, %v902_v44  ;;  %v905_v30 = vadd.f32 %v21836_v42, %v25842_v17  ;;  %v30068_v17 = vld [vmem:[#allocation30_spill] sm:$0xff] }
 0x122   : > { %v846_v32 = vpop.f32.mrf.mxu0  ;;  %v1155_v63 = vpop.f32.mrf.mxu1 }
 0x123   : > { %v25967_v62 = vadd.f32 %v21868_v60, %v905_v30  ;;  %v903_v28 = vadd.f32 %v846_v32, %v25844_v61 }
 0x124   : > { %v21839_v29 = vpop.f32.mrf.mxu0  ;;  %22094 = vmatmul.mubr.msk.bf16.gmra.mxu0 %vm186_vm1, %v25629_v13  ;;  %v21871_v34 = vpop.f32.mrf.mxu1  ;;  %22126 = vmatmul.mubr.msk.bf16.gmra.mxu1 %vm186_vm1, %v25632_v45  ;;  %v23973_v45 = vld [vmem:[%s25145_s22 + $0x2a0] sm:$0xff]  }
 0x125   : > { %v25972_v1 = vadd.f32 %v1155_v63, %v903_v28  ;;  %v908_v48 = vadd.f32 %v21839_v29, %v25852_v16  ;;  %22097 = vmatprep.mubr.msk.bf16.mxu0 %vm186_vm1, %v30068_v17  ;;  %22129 = vmatprep.mubr.msk.bf16.mxu1 %vm186_vm1, %v30069_v24  ;;  %v23974_v28 = vld [vmem:[%s25145_s22 + $0x2a8] sm:$0xff]  }
 0x126   : > { %v859_v27 = vpop.f32.mrf.mxu0  ;;  %v1168_v22 = vpop.f32.mrf.mxu1 }
 0x127   : > { %v25981_v61 = vadd.f32 %v21871_v34, %v908_v48  ;;  %v906_v13 = vadd.f32 %v859_v27, %v25856_v58 }
 0x128   : > { %v21840_v11 = vpop.f32.mrf.mxu0  ;;  %v21872_v38 = vpop.f32.mrf.mxu1 }
 0x129   : > { %v25984_v39 = vadd.f32 %v1168_v22, %v906_v13  ;;  %v909_v16 = vadd.f32 %v21840_v11, %v25858_v40 }
 0x12a   : > { %v862_v4 = vpop.f32.mrf.mxu0  ;;  %v1171_v55 = vpop.f32.mrf.mxu1 }
 0x12b   : > { %v25988_v23 = vadd.f32 %v21872_v38, %v909_v16  ;;  %v907_v46 = vadd.f32 %v862_v4, %v25860_v19  ;;  %v23976_v16 = vld [vmem:[%s25145_s22 + $0x2b8] sm:$0xff]   ;;  %v23977_v4 = vld [vmem:[%s25145_s22 + $0x2c0] sm:$0xff]  }
 0x12c   : > { %v21843_v54 = vpop.f32.mrf.mxu0  ;;  %22098 = vmatmul.mubr.msk.bf16.gmra.mxu0 %vm186_vm1, %v25649_v2  ;;  %v21875_v7 = vpop.f32.mrf.mxu1  ;;  %22130 = vmatmul.mubr.msk.bf16.gmra.mxu1 %vm186_vm1, %v25652_v9  ;;  %v23975_v9 = vld [vmem:[%s25145_s22 + $0x2b0] sm:$0xff]  }
 0x12d   : > { %v25993_v58 = vadd.f32 %v1171_v55, %v907_v46  ;;  %v912_v44 = vadd.f32 %v21843_v54, %v25868_v20  ;;  %22141 = vmatprep.mubr.msk.bf16.mxu0 %vm186_vm1, %v25655_v3  ;;  %22173 = vmatprep.mubr.msk.bf16.mxu1 %vm186_vm1, %v23973_v45 }
 0x12e   : > { %v875_v40 = vpop.f32.mrf.mxu0  ;;  %v1184_v2 = vpop.f32.mrf.mxu1 }
 0x12f   : > { %v26001_v19 = vadd.f32 %v21875_v7, %v912_v44  ;;  %v910_v42 = vadd.f32 %v875_v40, %v25872_v36 }
 0x130   : > { %v21844_v30 = vpop.f32.mrf.mxu0  ;;  %v21876_v32 = vpop.f32.mrf.mxu1 }
 0x131   : > { %v26004_v60 = vadd.f32 %v1184_v2, %v910_v42  ;;  %v913_v20 = vadd.f32 %v21844_v30, %v25874_v12  ;;  %v23978_v30 = vld [vmem:[%s25145_s22 + $0x2c8] sm:$0xff]  }
 0x132   : > { %v878_v63 = vpop.f32.mrf.mxu0  ;;  %v1187_v48 = vpop.f32.mrf.mxu1 }
 0x133   : > { %v26009_v29 = vadd.f32 %v21876_v32, %v913_v20  ;;  %v911_v3 = vadd.f32 %v878_v63, %v25876_v26  ;;  %v23979_v32 = vld [vmem:[%s25145_s22 + $0x2d0] sm:$0xff]  }
 0x134   : > { %v21887_v34 = vpop.f32.mrf.mxu0  ;;  %22142 = vmatmul.mubr.msk.bf16.vlgmr.msra.gmra.mxu0 %vm186_vm1, %v25666_v41  ;;  %v21919_v12 = vpop.f32.mrf.mxu1  ;;  %22174 = vmatmul.mubr.msk.bf16.vlgmr.msra.gmra.mxu1 %vm186_vm1, %v23974_v28 }
 0x135   : > { %v26014_v36 = vadd.f32 %v1187_v48, %v911_v3  ;;  %v1510_v17 = vadd.f32 %v21887_v34, %v25887_v31  ;;  %22145 = vmatprep.mubr.msk.bf16.mxu0 %vm186_vm1, %v25669_v43  ;;  %22177 = vmatprep.mubr.msk.bf16.mxu1 %vm186_vm1, %v23975_v9 }
 0x136   : > { %v1413_v27 = vpop.f32.mrf.mxu0  ;;  %v1722_v13 = vpop.f32.mrf.mxu1 }
 0x137   : > { %v26021_v26 = vadd.f32 %v21919_v12, %v1510_v17  ;;  %v1508_v24 = vadd.f32 %v1413_v27, %v25894_v0 }
 0x138   : > { %v21888_v41 = vpop.f32.mrf.mxu0  ;;  %v21920_v31 = vpop.f32.mrf.mxu1 }
 0x139   : > { %v26024_v22 = vadd.f32 %v1722_v13, %v1508_v24  ;;  %v1511_v11 = vadd.f32 %v21888_v41, %v25900_v37  ;;  %v23980_v24 = vld [vmem:[%s25145_s22 + $0x2d8] sm:$0xff]   ;;  %v23981_v41 = vld [vmem:[%s25145_s22 + $0x2e0] sm:$0xff]  }
 0x13a   : > { %v1416_v38 = vpop.f32.mrf.mxu0  ;;  %v1725_v46 = vpop.f32.mrf.mxu1 }
 0x13b   : > { %v26029_v45 = vadd.f32 %v21920_v31, %v1511_v11  ;;  %v1509_v43 = vadd.f32 %v1416_v38, %v25906_v50 }
 0x13c   : > { %v21891_v55 = vpop.f32.mrf.mxu0  ;;  %22146 = vmatmul.mubr.msk.bf16.gmra.mxu0 %vm186_vm1, %v25683_v47  ;;  %v21923_v37 = vpop.f32.mrf.mxu1  ;;  %22178 = vmatmul.mubr.msk.bf16.gmra.mxu1 %vm186_vm1, %v23976_v16 }
 0x13d   : > { %v26034_v0 = vadd.f32 %v1725_v46, %v1509_v43  ;;  %v1514_v54 = vadd.f32 %v21891_v55, %v25916_v53  ;;  %22149 = vmatprep.mubr.msk.bf16.mxu0 %vm186_vm1, %v25688_v49  ;;  %22181 = vmatprep.mubr.msk.bf16.mxu1 %vm186_vm1, %v23977_v4 }
 0x13e   : > { %v1429_v44 = vpop.f32.mrf.mxu0  ;;  %v1738_v40 = vpop.f32.mrf.mxu1 }
 0x13f   : > { %v26041_v50 = vadd.f32 %v21923_v37, %v1514_v54  ;;  %v1512_v7 = vadd.f32 %v1429_v44, %v25922_v52  ;;  %v23982_v37 = vld [vmem:[%s25145_s22 + $0x2e8] sm:$0xff]  }
 0x140   : > { %v21892_v47 = vpop.f32.mrf.mxu0  ;;  %v21924_v53 = vpop.f32.mrf.mxu1 }
 0x141   : > { %v26044_v42 = vadd.f32 %v1738_v40, %v1512_v7  ;;  %v1515_v2 = vadd.f32 %v21892_v47, %v25926_v57  ;;  %v23983_v7 = vld [vmem:[%s25145_s22 + $0x2f0] sm:$0xff]  }
 0x142   : > { %v1432_v20 = vpop.f32.mrf.mxu0  ;;  %v1741_v63 = vpop.f32.mrf.mxu1 }
 0x143   : > { %v26049_v28 = vadd.f32 %v21924_v53, %v1515_v2  ;;  %v1513_v49 = vadd.f32 %v1432_v20, %v25932_v14 }
 0x144   : > { %v21895_v9 = vpop.f32.mrf.mxu0  ;;  %22150 = vmatmul.mubr.msk.bf16.gmra.mxu0 %vm186_vm1, %v25705_v5  ;;  %v21927_v57 = vpop.f32.mrf.mxu1  ;;  %22182 = vmatmul.mubr.msk.bf16.gmra.mxu1 %vm186_vm1, %v23978_v30 }
 0x145   : > { %v26054_v52 = vadd.f32 %v1741_v63, %v1513_v49  ;;  %v1518_v3 = vadd.f32 %v21895_v9, %v25941_v59  ;;  %22153 = vmatprep.mubr.msk.bf16.mxu0 %vm186_vm1, %v25709_v6  ;;  %22185 = vmatprep.mubr.msk.bf16.mxu1 %vm186_vm1, %v23979_v32  ;;  %v23984_v9 = vld [vmem:[%s25145_s22 + $0x2f8] sm:$0xff]   ;;  %s20347_s22 = smul.u32 48, %s25030_s26  ;;  %s33_s26 = sadd.s32 1, %s25030_s26  }
 0x146   : > { %v1445_v48 = vpop.f32.mrf.mxu0  ;;  %v1754_v17 = vpop.f32.mrf.mxu1  ;;  %p30_p0 = scmp.ge.s32.totalorder %s33_s26, 12  }
 0x147   : > { %v26061_v14 = vadd.f32 %v21927_v57, %v1518_v3  ;;  %v1516_v34 = vadd.f32 %v1445_v48, %v25944_v56  ;;  %s26454_s18 = scalar_lea.vmem [#allocation2], %s20347_s22  ;;  %vm25033_vm2 = vmmov (%p30_p0), 0  }
 0x148   : > { %v21896_v5 = vpop.f32.mrf.mxu0  ;;  %v21928_v59 = vpop.f32.mrf.mxu1 }
 0x149   : > { %v26064_v12 = vadd.f32 %v1754_v17, %v1516_v34  ;;  %v1519_v27 = vadd.f32 %v21896_v5, %v25947_v51 }
 0x14a   : > { %v1448_v13 = vpop.f32.mrf.mxu0  ;;  %v1757_v31 = vpop.f32.mrf.mxu1 }
 0x14b   : > { %v26069_v11 = vadd.f32 %v21928_v59, %v1519_v27  ;;  %v1517_v6 = vadd.f32 %v1448_v13, %v25952_v35 }
 0x14c   : > { %v21899_v16 = vpop.f32.mrf.mxu0  ;;  %22154 = vmatmul.mubr.msk.bf16.gmra.mxu0 %vm186_vm1, %v25726_v8  ;;  %v21931_v51 = vpop.f32.mrf.mxu1  ;;  %22186 = vmatmul.mubr.msk.bf16.gmra.mxu1 %vm186_vm1, %v23980_v24 }
 0x14d   : > { %v26074_v56 = vadd.f32 %v1757_v31, %v1517_v6  ;;  %v1522_v38 = vadd.f32 %v21899_v16, %v25961_v33  ;;  %22157 = vmatprep.mubr.msk.bf16.mxu0 %vm186_vm1, %v25729_v10  ;;  %22189 = vmatprep.mubr.msk.bf16.mxu1 %vm186_vm1, %v23981_v41 }
 0x14e   : > { %v1461_v4 = vpop.f32.mrf.mxu0  ;;  %v1770_v46 = vpop.f32.mrf.mxu1 }
 0x14f   : > { %v26081_v35 = vadd.f32 %v21931_v51, %v1522_v38  ;;  %v1520_v43 = vadd.f32 %v1461_v4, %v25964_v25 }
 0x150   : > { %v21900_v8 = vpop.f32.mrf.mxu0  ;;  %v21932_v33 = vpop.f32.mrf.mxu1 }
 0x151   : > { %v26084_v55 = vadd.f32 %v1770_v46, %v1520_v43  ;;  %v1523_v54 = vadd.f32 %v21900_v8, %v25967_v62 }
 0x152   : > { %v1464_v44 = vpop.f32.mrf.mxu0  ;;  %v1773_v47 = vpop.f32.mrf.mxu1 }
 0x153   : > { %v26089_v40 = vadd.f32 %v21932_v33, %v1523_v54  ;;  %v1521_v10 = vadd.f32 %v1464_v44, %v25972_v1 }
 0x154   : > { %v21903_v2 = vpop.f32.mrf.mxu0  ;;  %22158 = vmatmul.mubr.msk.bf16.gmra.mxu0 %vm186_vm1, %v25740_v15  ;;  %v21935_v30 = vpop.f32.mrf.mxu1  ;;  %22190 = vmatmul.mubr.msk.bf16.gmra.mxu1 %vm186_vm1, %v23982_v37 }
 0x155   : > { %v26094_v25 = vadd.f32 %v1773_v47, %v1521_v10  ;;  %v1526_v53 = vadd.f32 %v21903_v2, %v25981_v61  ;;  %22161 = vmatprep.mubr.msk.bf16.mxu0 %vm186_vm1, %v25743_v18  ;;  %22193 = vmatprep.mubr.msk.bf16.mxu1 %vm186_vm1, %v23983_v7 }
 0x156   : > { %v1477_v62 = vpop.f32.mrf.mxu0  ;;  %v1786_v32 = vpop.f32.mrf.mxu1 }
 0x157   : > { %v26101_v1 = vadd.f32 %v21935_v30, %v1526_v53  ;;  %v1524_v20 = vadd.f32 %v1477_v62, %v25984_v39 }
 0x158   : > { %v21904_v49 = vpop.f32.mrf.mxu0  ;;  %v21936_v61 = vpop.f32.mrf.mxu1 }
 0x159   : > { %v26104_v15 = vadd.f32 %v1786_v32, %v1524_v20  ;;  %v1527_v63 = vadd.f32 %v21904_v49, %v25988_v23 }
 0x15a   : > { %v1480_v3 = vpop.f32.mrf.mxu0  ;;  %v1789_v48 = vpop.f32.mrf.mxu1 }
 0x15b   : > { %v26108_v57 = vadd.f32 %v21936_v61, %v1527_v63  ;;  %v1525_v18 = vadd.f32 %v1480_v3, %v25993_v58 }
 0x15c   : > { %v21907_v34 = vpop.f32.mrf.mxu0  ;;  %22162 = vmatmul.mubr.msk.bf16.gmra.mxu0 %vm186_vm1, %v25754_v21  ;;  %v21939_v5 = vpop.f32.mrf.mxu1  ;;  %22194 = vmatmul.mubr.msk.bf16.gmra.mxu1 %vm186_vm1, %v23984_v9 }
 0x15d   : > { %v26113_v17 = vadd.f32 %v1789_v48, %v1525_v18  ;;  %v1530_v39 = vadd.f32 %v21907_v34, %v26001_v19 }
 0x15e   : > { %v1493_v23 = vpop.f32.mrf.mxu0  ;;  %v1802_v24 = vpop.f32.mrf.mxu1 }
 0x15f   : > { %v26117_v27 = vadd.f32 %v21939_v5, %v1530_v39  ;;  %v1528_v59 = vadd.f32 %v1493_v23, %v26004_v60 }
 0x160   : > { %v21908_v13 = vpop.f32.mrf.mxu0  ;;  %v21940_v6 = vpop.f32.mrf.mxu1 }
 0x161   : > { %v26120_v58 = vadd.f32 %v1802_v24, %v1528_v59  ;;  %v1531_v41 = vadd.f32 %v21908_v13, %v26009_v29 }
 0x162   : > { %v1496_v21 = vpop.f32.mrf.mxu0  ;;  %v1805_v16 = vpop.f32.mrf.mxu1 }
 0x163   : > { %v26123_v31 = vadd.f32 %v21940_v6, %v1531_v41  ;;  %v1529_v19 = vadd.f32 %v1496_v21, %v26014_v36 }
 0x164   : > { %v21951_v38 = vpop.f32.mrf.mxu0  ;;  %v26131_v60 = vpop.f32.mrf.mxu1 }
 0x165   : > { %v26126_v51 = vadd.f32 %v1805_v16, %v1529_v19  ;;  %v26129_v4 = vadd.f32 %v21951_v38, %v26021_v26 }
 0x166   : > { %v2031_v43 = vpop.f32.mrf.mxu0  ;;  %v26136_v29 = vpop.f32.mrf.mxu1 }
 0x167   : > { %v26134_v46 = vadd.f32 %v2031_v43, %v26024_v22 }
 0x168   : > { %v21952_v8 = vpop.f32.mrf.mxu0  ;;  %v26141_v36 = vpop.f32.mrf.mxu1 }
 0x169   : > { %v26139_v54 = vadd.f32 %v21952_v8, %v26029_v45 }
 0x16a   : > { %v2034_v33 = vpop.f32.mrf.mxu0  ;;  %v26148_v44 = vpop.f32.mrf.mxu1 }
 0x16b   : > { %v26146_v26 = vadd.f32 %v2034_v33, %v26034_v0 }
 0x16c   : > { %v21955_v7 = vpop.f32.mrf.mxu0  ;;  %v26155_v45 = vpop.f32.mrf.mxu1 }
 0x16d   : > { %v26153_v10 = vadd.f32 %v21955_v7, %v26041_v50 }
 0x16e   : > { %v2047_v47 = vpop.f32.mrf.mxu0  ;;  %v26160_v53 = vpop.f32.mrf.mxu1 }
 0x16f   : > { %v26158_v2 = vadd.f32 %v2047_v47, %v26044_v42 }
 0x170   : > { %v21956_v30 = vpop.f32.mrf.mxu0  ;;  %v26165_v62 = vpop.f32.mrf.mxu1 }
 0x171   : > { %v26163_v0 = vadd.f32 %v21956_v30, %v26049_v28 }
 0x172   : > { %v2050_v20 = vpop.f32.mrf.mxu0  ;;  %v26172_v49 = vpop.f32.mrf.mxu1 }
 0x173   : > { %v26170_v50 = vadd.f32 %v2050_v20, %v26054_v52 }
 0x174   : > { %v21959_v63 = vpop.f32.mrf.mxu0  ;;  %v26179_v28 = vpop.f32.mrf.mxu1 }
 0x175   : > { %v26177_v61 = vadd.f32 %v21959_v63, %v26061_v14 }
 0x176   : > { %v2063_v9 = vpop.f32.mrf.mxu0  ;;  %v26184_v18 = vpop.f32.mrf.mxu1 }
 0x177   : > { %30070 = vst [vmem:[#allocation5_spill] sm:$0xff] %v26177_v61  ;;  %v26182_v3 = vadd.f32 %v2063_v9, %v26064_v12 }
 0x178   : > { %v21960_v48 = vpop.f32.mrf.mxu0  ;;  %v26189_v34 = vpop.f32.mrf.mxu1 }
 0x179   : > { %30071 = vst [vmem:[#allocation12_spill] sm:$0xff] %v26182_v3  ;;  %v26187_v52 = vadd.f32 %v21960_v48, %v26069_v11 }
 0x17a   : > { %v2066_v39 = vpop.f32.mrf.mxu0  ;;  %v26196_v23 = vpop.f32.mrf.mxu1 }
 0x17b   : > { %30072 = vst [vmem:[#allocation6_spill] sm:$0xff] %v26187_v52  ;;  %v26194_v14 = vadd.f32 %v2066_v39, %v26074_v56 }
 0x17c   : > { %v21963_v59 = vpop.f32.mrf.mxu0  ;;  %v26203_v11 = vpop.f32.mrf.mxu1 }
 0x17d   : > { %30073 = vst [vmem:[#allocation13_spill] sm:$0xff] %v26194_v14  ;;  %v26201_v24 = vadd.f32 %v21963_v59, %v26081_v35 }
 0x17e   : > { %v2079_v13 = vpop.f32.mrf.mxu0  ;;  %v26208_v6 = vpop.f32.mrf.mxu1 }
 0x17f   : > { %30074 = vst [vmem:[#allocation7_spill] sm:$0xff] %v26201_v24  ;;  %v26206_v41 = vadd.f32 %v2079_v13, %v26084_v55 }
 0x180   : > { %v21964_v21 = vpop.f32.mrf.mxu0  ;;  %v26213_v19 = vpop.f32.mrf.mxu1 }
 0x181   : > { %30075 = vst [vmem:[#allocation14_spill] sm:$0xff] %v26206_v41  ;;  %v26211_v56 = vadd.f32 %v21964_v21, %v26089_v40 }
 0x182   : > { %v2082_v16 = vpop.f32.mrf.mxu0  ;;  %v26220_v43 = vpop.f32.mrf.mxu1 }
 0x183   : > { %30076 = vst [vmem:[#allocation15_spill] sm:$0xff] %v26211_v56  ;;  %v26218_v35 = vadd.f32 %v2082_v16, %v26094_v25 }
 0x184   : > { %v21967_v8 = vpop.f32.mrf.mxu0  ;;  %v26227_v40 = vpop.f32.mrf.mxu1 }
 0x185   : > { %30077 = vst [vmem:[#allocation16_spill] sm:$0xff] %v26218_v35  ;;  %v26225_v33 = vadd.f32 %v21967_v8, %v26101_v1 }
 0x186   : > { %v2095_v7 = vpop.f32.mrf.mxu0  ;;  %v26232_v30 = vpop.f32.mrf.mxu1 }
 0x187   : > { %30078 = vst [vmem:[#allocation17_spill] sm:$0xff] %v26225_v33  ;;  %v26230_v47 = vadd.f32 %v2095_v7, %v26104_v15 }
 0x188   : > { %v21968_v20 = vpop.f32.mrf.mxu0  ;;  %v26237_v63 = vpop.f32.mrf.mxu1 }
 0x189   : > { %30079 = vst [vmem:[#allocation8_spill] sm:$0xff] %v26230_v47  ;;  %v26235_v25 = vadd.f32 %v21968_v20, %v26108_v57 }
 0x18a   : > { %v2098_v9 = vpop.f32.mrf.mxu0  ;;  %v26244_v39 = vpop.f32.mrf.mxu1 }
 0x18b   : > { %30080 = vst [vmem:[#allocation18_spill] sm:$0xff] %v26235_v25  ;;  %v26242_v1 = vadd.f32 %v2098_v9, %v26113_v17 }
 0x18c   : > { %v21971_v59 = vpop.f32.mrf.mxu0  ;;  %v26251_v57 = vpop.f32.mrf.mxu1 }
 0x18d   : > { %30081 = vst [vmem:[#allocation19_spill] sm:$0xff] %v26242_v1  ;;  %v26249_v13 = vadd.f32 %v21971_v59, %v26117_v27 }
 0x18e   : > { %v2111_v21 = vpop.f32.mrf.mxu0  ;;  %v26256_v8 = vpop.f32.mrf.mxu1 }
 0x18f   : > { %30082 = vst [vmem:[#allocation9_spill] sm:$0xff] %v26249_v13  ;;  %v26254_v16 = vadd.f32 %v2111_v21, %v26120_v58 }
 0x190   : > { %v21972_v7 = vpop.f32.mrf.mxu0  ;;  %v26261_v20 = vpop.f32.mrf.mxu1 }
 0x191   : > { %30083 = vst [vmem:[#allocation10_spill] sm:$0xff] %v26254_v16  ;;  %v26259_v17 = vadd.f32 %v21972_v7, %v26123_v31 }
 0x192   : > { %v2114_v9 = vpop.f32.mrf.mxu0  ;;  %v26268_v59 = vpop.f32.mrf.mxu1 }
 0x193   : > { %30084 = vst [vmem:[#allocation20_spill] sm:$0xff] %v26259_v17  ;;  %v26266_v27 = vadd.f32 %v2114_v9, %v26126_v51 }
 0x194   : > { %v22015_v48 = vpop.f32.mrf.mxu0  ;;  %v22047_v55 = vpop.f32.mrf.mxu1 }
 0x195   : > { %30085 = vst [vmem:[#allocation21_spill] sm:$0xff] %v26266_v27  ;;  %v2334_v21 = vadd.f32 %v22015_v48, %v26131_v60 }
 0x196   : > { %v2325_v31 = vpop.f32.mrf.mxu0  ;;  %v2454_v12 = vpop.f32.mrf.mxu1 }
 0x197   : > { %v26273_v7 = vadd.f32 %v22047_v55, %v2334_v21  ;;  %v2326_v38 = vadd.f32 %v2325_v31, %v26136_v29 }
 0x198   : > { %v22016_v5 = vpop.f32.mrf.mxu0  ;;  %v22048_v9 = vpop.f32.mrf.mxu1 }
 0x199   : > { %v26276_v15 = vadd.f32 %v2454_v12, %v2326_v38  ;;  %v2337_v51 = vadd.f32 %v22016_v5, %v26141_v36 }
 0x19a   : > { %v2328_v42 = vpop.f32.mrf.mxu0  ;;  %v2457_v22 = vpop.f32.mrf.mxu1 }
 0x19b   : > { %v26279_v32 = vadd.f32 %v22048_v9, %v2337_v51  ;;  %v2329_v58 = vadd.f32 %v2328_v42, %v26148_v44 }
 0x19c   : > { %v22019_v60 = vpop.f32.mrf.mxu0  ;;  %v22051_v21 = vpop.f32.mrf.mxu1 }
 0x19d   : > { %v26282_v48 = vadd.f32 %v2457_v22, %v2329_v58  ;;  %v2350_v55 = vadd.f32 %v22019_v60, %v26155_v45 }
 0x19e   : > { %v2341_v29 = vpop.f32.mrf.mxu0  ;;  %v2470_v38 = vpop.f32.mrf.mxu1 }
 0x19f   : > { %v26285_v31 = vadd.f32 %v22051_v21, %v2350_v55  ;;  %v2342_v12 = vadd.f32 %v2341_v29, %v26160_v53 }
 0x1a0   : > { %v22020_v36 = vpop.f32.mrf.mxu0  ;;  %v22052_v9 = vpop.f32.mrf.mxu1 }
 0x1a1   : > { %v26288_v5 = vadd.f32 %v2470_v38, %v2342_v12  ;;  %v2353_v51 = vadd.f32 %v22020_v36, %v26165_v62 }
 0x1a2   : > { %v2344_v44 = vpop.f32.mrf.mxu0  ;;  %v2473_v58 = vpop.f32.mrf.mxu1 }
 0x1a3   : > { %v26291_v42 = vadd.f32 %v22052_v9, %v2353_v51  ;;  %v2345_v22 = vadd.f32 %v2344_v44, %v26172_v49 }
 0x1a4   : > { %v22023_v45 = vpop.f32.mrf.mxu0  ;;  %v22055_v21 = vpop.f32.mrf.mxu1 }
 0x1a5   : > { %v26294_v60 = vadd.f32 %v2473_v58, %v2345_v22  ;;  %v2366_v55 = vadd.f32 %v22023_v45, %v26179_v28 }
 0x1a6   : > { %v2357_v53 = vpop.f32.mrf.mxu0  ;;  %v2486_v38 = vpop.f32.mrf.mxu1 }
 0x1a7   : > { %v26297_v29 = vadd.f32 %v22055_v21, %v2366_v55  ;;  %v2358_v12 = vadd.f32 %v2357_v53, %v26184_v18 }
 0x1a8   : > { %v22024_v62 = vpop.f32.mrf.mxu0  ;;  %v22056_v9 = vpop.f32.mrf.mxu1 }
 0x1a9   : > { %v26300_v36 = vadd.f32 %v2486_v38, %v2358_v12  ;;  %v2369_v51 = vadd.f32 %v22024_v62, %v26189_v34 }
 0x1aa   : > { %v2360_v49 = vpop.f32.mrf.mxu0  ;;  %v2489_v58 = vpop.f32.mrf.mxu1 }
 0x1ab   : > { %v26303_v44 = vadd.f32 %v22056_v9, %v2369_v51  ;;  %v2361_v22 = vadd.f32 %v2360_v49, %v26196_v23 }
 0x1ac   : > { %v22027_v28 = vpop.f32.mrf.mxu0  ;;  %v22059_v21 = vpop.f32.mrf.mxu1 }
 0x1ad   : > { %v26306_v45 = vadd.f32 %v2489_v58, %v2361_v22  ;;  %v2382_v55 = vadd.f32 %v22027_v28, %v26203_v11 }
 0x1ae   : > { %v2373_v18 = vpop.f32.mrf.mxu0  ;;  %v2502_v38 = vpop.f32.mrf.mxu1 }
 0x1af   : > { %v26309_v53 = vadd.f32 %v22059_v21, %v2382_v55  ;;  %v2374_v12 = vadd.f32 %v2373_v18, %v26208_v6 }
 0x1b0   : > { %v22028_v34 = vpop.f32.mrf.mxu0  ;;  %v22060_v9 = vpop.f32.mrf.mxu1 }
 0x1b1   : > { %v26312_v62 = vadd.f32 %v2502_v38, %v2374_v12  ;;  %v2385_v51 = vadd.f32 %v22028_v34, %v26213_v19 }
 0x1b2   : > { %v2376_v23 = vpop.f32.mrf.mxu0  ;;  %v2505_v58 = vpop.f32.mrf.mxu1 }
 0x1b3   : > { %v26315_v49 = vadd.f32 %v22060_v9, %v2385_v51  ;;  %v2377_v22 = vadd.f32 %v2376_v23, %v26220_v43 }
 0x1b4   : > { %v22031_v11 = vpop.f32.mrf.mxu0  ;;  %v22063_v21 = vpop.f32.mrf.mxu1 }
 0x1b5   : > { %v26318_v28 = vadd.f32 %v2505_v58, %v2377_v22  ;;  %v2398_v55 = vadd.f32 %v22031_v11, %v26227_v40 }
 0x1b6   : > { %v2389_v6 = vpop.f32.mrf.mxu0  ;;  %v2518_v38 = vpop.f32.mrf.mxu1 }
 0x1b7   : > { %30086 = vst [vmem:[#allocation22_spill] sm:$0xff] %v26318_v28  ;;  %v26321_v18 = vadd.f32 %v22063_v21, %v2398_v55  ;;  %v2390_v12 = vadd.f32 %v2389_v6, %v26232_v30 }
 0x1b8   : > { %v22032_v19 = vpop.f32.mrf.mxu0  ;;  %v22064_v9 = vpop.f32.mrf.mxu1 }
 0x1b9   : > { %30087 = vst [vmem:[#allocation11_spill] sm:$0xff] %v26321_v18  ;;  %v26324_v34 = vadd.f32 %v2518_v38, %v2390_v12  ;;  %v2401_v51 = vadd.f32 %v22032_v19, %v26237_v63 }
 0x1ba   : > { %v2392_v43 = vpop.f32.mrf.mxu0  ;;  %v2521_v58 = vpop.f32.mrf.mxu1 }
 0x1bb   : > { %30088 = vst [vmem:[#allocation23_spill] sm:$0xff] %v26324_v34  ;;  %v26327_v23 = vadd.f32 %v22064_v9, %v2401_v51  ;;  %v2393_v22 = vadd.f32 %v2392_v43, %v26244_v39 }
 0x1bc   : > { %v22035_v40 = vpop.f32.mrf.mxu0  ;;  %v22067_v21 = vpop.f32.mrf.mxu1 }
 0x1bd   : > { %30089 = vst [vmem:[#allocation24_spill] sm:$0xff] %v26327_v23  ;;  %v26330_v11 = vadd.f32 %v2521_v58, %v2393_v22  ;;  %v2414_v55 = vadd.f32 %v22035_v40, %v26251_v57 }
 0x1be   : > { %v2405_v30 = vpop.f32.mrf.mxu0  ;;  %v2534_v38 = vpop.f32.mrf.mxu1 }
 0x1bf   : > { %30090 = vst [vmem:[#allocation25_spill] sm:$0xff] %v26330_v11  ;;  %v26333_v6 = vadd.f32 %v22067_v21, %v2414_v55  ;;  %v2406_v12 = vadd.f32 %v2405_v30, %v26256_v8 }
 0x1c0   : > { %v22036_v63 = vpop.f32.mrf.mxu0  ;;  %v22068_v9 = vpop.f32.mrf.mxu1 }
 0x1c1   : > { %30091 = vst [vmem:[#allocation26_spill] sm:$0xff] %v26333_v6  ;;  %v26336_v19 = vadd.f32 %v2534_v38, %v2406_v12  ;;  %v2417_v51 = vadd.f32 %v22036_v63, %v26261_v20 }
 0x1c2   : > { %v2408_v39 = vpop.f32.mrf.mxu0  ;;  %v2537_v58 = vpop.f32.mrf.mxu1 }
 0x1c3   : > { %30092 = vst [vmem:[#allocation27_spill] sm:$0xff] %v26336_v19  ;;  %v26339_v43 = vadd.f32 %v22068_v9, %v2417_v51  ;;  %v2409_v22 = vadd.f32 %v2408_v39, %v26268_v59 }
 0x1c4   : > { %v22079_v57 = vpop.f32.mrf.mxu0  ;;  %v22111_v55 = vpop.f32.mrf.mxu1 }
 0x1c5   : > { %30093 = vst [vmem:[#allocation28_spill] sm:$0xff] %v26339_v43  ;;  %v26342_v40 = vadd.f32 %v2537_v58, %v2409_v22 }
 0x1c6   : > { %v2607_v21 = vpop.f32.mrf.mxu0  ;;  %v2760_v37 = vpop.f32.mrf.mxu1 }
 0x1c7   : > { %30094 = vst [vmem:[#allocation29_spill] sm:$0xff] %v26342_v40 }
 0x1c8   : > { %v22080_v8 = vpop.f32.mrf.mxu0  ;;  %v22112_v30 = vpop.f32.mrf.mxu1 }
 0x1ca   : > { %v2610_v27 = vpop.f32.mrf.mxu0  ;;  %v2763_v12 = vpop.f32.mrf.mxu1 }
 0x1cc   : > { %v22083_v38 = vpop.f32.mrf.mxu0  ;;  %v26344_v16 = vpop.f32.mrf.mxu1 }
 0x1ce   : > { %v2623_v20 = vpop.f32.mrf.mxu0  ;;  %v26346_v63 = vpop.f32.mrf.mxu1 }
 0x1d0   : > { %v22084_v51 = vpop.f32.mrf.mxu0  ;;  %v26348_v9 = vpop.f32.mrf.mxu1 }
 0x1d2   : > { %v2626_v59 = vpop.f32.mrf.mxu0  ;;  %v26350_v39 = vpop.f32.mrf.mxu1 }
 0x1d4   : > { %v26352_v22 = vpop.f32.mrf.mxu0  ;;  %v26354_v58 = vpop.f32.mrf.mxu1 }
 0x1d6   : > { %v26356_v17 = vpop.f32.mrf.mxu0  ;;  %v26358_v13 = vpop.f32.mrf.mxu1 }
 0x1d8   : > { %v26360_v1 = vpop.f32.mrf.mxu0  ;;  %v26362_v47 = vpop.f32.mrf.mxu1 }
 0x1da   : > { %v26364_v25 = vpop.f32.mrf.mxu0  ;;  %v26366_v33 = vpop.f32.mrf.mxu1 }
 0x1dc   : > { %v26368_v40 = vpop.f32.mrf.mxu0  ;;  %v26370_v43 = vpop.f32.mrf.mxu1 }
 0x1dd   : > { %30095 = vst [vmem:[#allocation30_spill] sm:$0xff] %v26370_v43 }
 0x1de   : > { %v26372_v19 = vpop.f32.mrf.mxu0  ;;  %v26374_v35 = vpop.f32.mrf.mxu1 }
 0x1df   : > { %30096 = vst [vmem:[#allocation31_spill] sm:$0xff] %v26374_v35 }
 0x1e0   : > { %v26376_v41 = vpop.f32.mrf.mxu0  ;;  %v26378_v6 = vpop.f32.mrf.mxu1 }
 0x1e1   : > { %30097 = vst [vmem:[#allocation32_spill] sm:$0xff] %v26376_v41  ;;  %30098 = vst [vmem:[#allocation33_spill] sm:$0xff] %v26378_v6 }
 0x1e2   : > { %v26380_v56 = vpop.f32.mrf.mxu0  ;;  %v26382_v24 = vpop.f32.mrf.mxu1 }
 0x1e3   : > { %30099 = vst [vmem:[#allocation34_spill] sm:$0xff] %v26380_v56  ;;  %30100 = vst [vmem:[#allocation35_spill] sm:$0xff] %v26382_v24 }
 0x1e4   : > { %v26384_v11 = vpop.f32.mrf.mxu0  ;;  %v26386_v23 = vpop.f32.mrf.mxu1 }
 0x1e5   : > { %30101 = vst [vmem:[#allocation36_spill] sm:$0xff] %v26384_v11  ;;  %30102 = vst [vmem:[#allocation37_spill] sm:$0xff] %v26386_v23 }
 0x1e6   : > { %v26388_v34 = vpop.f32.mrf.mxu0  ;;  %v26390_v14 = vpop.f32.mrf.mxu1 }
 0x1e7   : > { %30103 = vst [vmem:[#allocation38_spill] sm:$0xff] %v26388_v34  ;;  %30104 = vst [vmem:[#allocation39_spill] sm:$0xff] %v26390_v14  ;;  %v2704_v14 = vadd.f32 %v22079_v57, %v26273_v7  ;;  %v2708_v57 = vadd.f32 %v22083_v38, %v26285_v31 }
 0x1e8   : > { %v26392_v3 = vpop.f32.mrf.mxu0  ;;  %v26394_v18 = vpop.f32.mrf.mxu1 }
 0x1e9   : > { %30105 = vst [vmem:[#allocation40_spill] sm:$0xff] %v26392_v3  ;;  %30106 = vst [vmem:[#allocation41_spill] sm:$0xff] %v26394_v18  ;;  %v2702_v18 = vadd.f32 %v2607_v21, %v26276_v15 }
 0x1ea   : > { %v26396_v52 = vpop.f32.mrf.mxu0  ;;  %v26398_v61 = vpop.f32.mrf.mxu1 }
 0x1eb   : > { %30107 = vst [vmem:[#allocation42_spill] sm:$0xff] %v26396_v52  ;;  %30108 = vst [vmem:[#allocation43_spill] sm:$0xff] %v26398_v61  ;;  %v2705_v61 = vadd.f32 %v22080_v8, %v26279_v32  ;;  %v2855_v28 = vadd.f32 %v2760_v37, %v2702_v18  ;;  %v2706_v32 = vadd.f32 %v2623_v20, %v26288_v5 }
 0x1ec   : > { %v26400_v6 = vpop.f32.mrf.mxu0  ;;  %v26402_v35 = vpop.f32.mrf.mxu1  ;;  %v2861_v37 = vadd.f32 %v26344_v16, %v2708_v57 }
 0x1ed   : > { %30109 = vst [vmem:[#allocation44_spill] sm:$0xff] %v26400_v6  ;;  %30110 = vst [vmem:[#allocation45_spill] sm:$0xff] %v26402_v35  ;;  %v2857_v35 = vadd.f32 %v22111_v55, %v2704_v14  ;;  %v2709_v14 = vadd.f32 %v22084_v51, %v26291_v42 }
 0x1ee   : > { %v26404_v24 = vpop.f32.mrf.mxu0  ;;  %v26406_v11 = vpop.f32.mrf.mxu1 }
 0x1ef   : > { %30111 = vst [vmem:[#allocation46_spill] sm:$0xff] %v26404_v24  ;;  %30112 = vst [vmem:[#allocation47_spill] sm:$0xff] %v26406_v11  ;;  %v2703_v24 = vadd.f32 %v2610_v27, %v26282_v48  ;;  %v2862_v5 = vadd.f32 %v26348_v9, %v2709_v14 }
 0x1f0   : > { %v26408_v23 = vpop.f32.mrf.mxu0  ;;  %v26411_v34 = vpop.f32.mrf.mxu1 }
 0x1f1   : > { %30113 = vst [vmem:[#allocation48_spill] sm:$0xff] %v26408_v23  ;;  %30114 = vst [vmem:[#allocation49_spill] sm:$0xff] %v26411_v34  ;;  %v2858_v23 = vadd.f32 %v22112_v30, %v2705_v61 }
 0x1f2   : > { %v26413_v3 = vpop.f32.mrf.mxu0  ;;  %v26417_v52 = vpop.f32.mrf.mxu1 }
 0x1f3   : > { %30115 = vst [vmem:[#allocation50_spill] sm:$0xff] %v26413_v3  ;;  %30116 = vst [vmem:[#allocation51_spill] sm:$0xff] %v26417_v52  ;;  %v2856_v3 = vadd.f32 %v2763_v12, %v2703_v24  ;;  %v30119_v12 = vmax.f32 %v26134_v46, %v26146_v26  ;;  %v2711_v46 = vadd.f32 %v26364_v25, %v26306_v45 }
 0x1f4   : > { %v22143_v6 = vpop.f32.mrf.mxu0  ;;  %v22175_v56 = vpop.f32.mrf.mxu1  ;;  %v2716_v45 = vadd.f32 %v26368_v40, %v26309_v53  ;;  %v30122_v53 = vld [vmem:[#allocation32_spill] sm:$0xff] }
 0x1f5   : > { %v3010_v43 = vadd.f32 %v22143_v6, %v2857_v35  ;;  %v2707_v35 = vadd.f32 %v2626_v59, %v26294_v60  ;;  %v2712_v60 = vadd.f32 %v26352_v22, %v26297_v29  ;;  %v2717_v40 = vadd.f32 %v30122_v53, %v26315_v49 }
 0x1f6   : > { %v2913_v11 = vpop.f32.mrf.mxu0  ;;  %v3190_v7 = vpop.f32.mrf.mxu1 }
 0x1f7   : > { %v3008_v41 = vadd.f32 %v2913_v11, %v2855_v28  ;;  %v3287_v55 = vadd.f32 %v22175_v56, %v3010_v43  ;;  %v30117_v56 = vmax.f32 %v26129_v4, %v26139_v54  ;;  %v30118_v43 = vld [vmem:[#allocation4_spill] sm:$0xff]  ;;  %v2710_v4 = vadd.f32 %v26356_v17, %v26300_v36 }
 0x1f8   : > { %v22144_v34 = vpop.f32.mrf.mxu0  ;;  %v22176_v21 = vpop.f32.mrf.mxu1  ;;  %v2713_v54 = vadd.f32 %v26360_v1, %v26303_v44 }
 0x1f9   : > { %v3011_v15 = vadd.f32 %v22144_v34, %v2858_v23  ;;  %v3285_v31 = vadd.f32 %v3190_v7, %v3008_v41  ;;  %v2859_v34 = vadd.f32 %v26346_v63, %v2706_v32  ;;  %v2865_v7 = vadd.f32 %v26354_v58, %v2712_v60 }
 0x1fa   : > { %v2916_v8 = vpop.f32.mrf.mxu0  ;;  %v3193_v52 = vpop.f32.mrf.mxu1  ;;  %v2863_v44 = vadd.f32 %v26358_v13, %v2710_v4  ;;  %v2866_v32 = vadd.f32 %v26362_v47, %v2713_v54  ;;  %v30129_v4 = vld [vmem:[#allocation6_spill] sm:$0xff] }
 0x1fb   : > { %v3288_v27 = vadd.f32 %v22176_v21, %v3011_v15  ;;  %v3009_v48 = vadd.f32 %v2916_v8, %v2856_v3 }
 0x1fc   : > { %v22147_v61 = vpop.f32.mrf.mxu0  ;;  %v22179_v28 = vpop.f32.mrf.mxu1 }
 0x1fd   : > { %v3310_v18 = vmax.f32 %v3287_v55, %v3288_v27  ;;  %v3286_v24 = vadd.f32 %v3193_v52, %v3009_v48  ;;  %v3014_v11 = vadd.f32 %v22147_v61, %v2861_v37  ;;  %v2860_v52 = vadd.f32 %v26350_v39, %v2707_v35 }
 0x1fe   : > { %v2929_v23 = vpop.f32.mrf.mxu0  ;;  %v3206_v16 = vpop.f32.mrf.mxu1  ;;  %v30120_v55 = vmax.f32 %v26153_v10, %v26163_v0  ;;  %v2864_v35 = vadd.f32 %v26366_v33, %v2711_v46  ;;  %v30121_v10 = vmax.f32 %v26158_v2, %v26170_v50  ;;  %v30125_v2 = vld [vmem:[#allocation34_spill] sm:$0xff] }
 0x1ff   : > { %v3322_v3 = vmax.f32 %v30117_v56, %v3310_v18  ;;  %v3309_v42 = vmax.f32 %v3285_v31, %v3286_v24  ;;  %v3012_v41 = vadd.f32 %v2929_v23, %v2859_v34  ;;  %v3291_v9 = vadd.f32 %v22179_v28, %v3014_v11  ;;  %v30123_v56 = vld [vmem:[#allocation30_spill] sm:$0xff] }
 0x200   : > { %v22148_v6 = vpop.f32.mrf.mxu0  ;;  %v22180_v63 = vpop.f32.mrf.mxu1  ;;  %v2714_v18 = vadd.f32 %v26372_v19, %v26312_v62 }
 0x201   : > { %v3340_v30 = vadd.f32 %v30118_v43, %v3322_v3  ;;  %v3321_v38 = vmax.f32 %v30119_v12, %v3309_v42  ;;  %v3015_v20 = vadd.f32 %v22148_v6, %v2862_v5  ;;  %v3289_v26 = vadd.f32 %v3206_v16, %v3012_v41  ;;  %v30124_v42 = vld [vmem:[#allocation22_spill] sm:$0xff]  ;;  %v30126_v6 = vld [vmem:[#allocation31_spill] sm:$0xff] }
 0x202   : > { %v2932_v29 = vpop.f32.mrf.mxu0  ;;  %v3209_v22 = vpop.f32.mrf.mxu1  ;;  %v2869_v3 = vadd.f32 %v30123_v56, %v2716_v45  ;;  %v2715_v50 = vadd.f32 %v30125_v2, %v30124_v42  ;;  %v30144_v56 = vld [vmem:[#allocation39_spill] sm:$0xff]  ;;  %v30145_v42 = vld [vmem:[#allocation41_spill] sm:$0xff] }
 0x203   : > { %v3339_v51 = vadd.f32 %v30118_v43, %v3321_v38  ;;  %v3292_v59 = vadd.f32 %v22180_v63, %v3015_v20  ;;  %v3013_v39 = vadd.f32 %v2932_v29, %v2860_v52  ;;  %v3352_v15 = vmax.f32 %v3340_v30, 0.0  ;;  %v30127_v30 = vld [vmem:[#allocation33_spill] sm:$0xff] }
 0x204   : > { %v22151_v57 = vpop.f32.mrf.mxu0  ;;  %v22183_v1 = vpop.f32.mrf.mxu1  ;;  %v2867_v52 = vadd.f32 %v30126_v6, %v2714_v18  ;;  %v2870_v12 = vadd.f32 %v30127_v30, %v2717_v40  ;;  %v30128_v63 = vld [vmem:[#allocation5_spill] sm:$0xff]  ;;  %v30143_v18 = vld [vmem:[#allocation42_spill] sm:$0xff]  ;;  %v30150_v30 = vld [vmem:[#allocation44_spill] sm:$0xff] }
 0x205   : > { %v3351_v17 = vmax.f32 %v3339_v51, 0.0  ;;  %v3312_v36 = vmax.f32 %v3291_v9, %v3292_v59  ;;  %v3290_v21 = vadd.f32 %v3209_v22, %v3013_v39  ;;  %v3018_v48 = vadd.f32 %v22151_v57, %v2865_v7  ;;  %v30131_v39 = vld [vmem:[#allocation11_spill] sm:$0xff]  ;;  %v30132_v22 = vld [vmem:[#allocation36_spill] sm:$0xff] }
 0x206   : > { %v2945_v8 = vpop.f32.mrf.mxu0  ;;  %v3222_v25 = vpop.f32.mrf.mxu1  ;;  %v30130_v54 = vmax.f32 %v30128_v63, %v30129_v4  ;;  %v2720_v7 = vadd.f32 %v30132_v22, %v30131_v39  ;;  %v30133_v57 = vld [vmem:[#allocation35_spill] sm:$0xff] }
 0x207   : > { %v20351_v14 = vpack.c.bf16 %v3352_v15, %v3351_v17  ;;  %v3324_v58 = vmax.f32 %v30120_v55, %v3312_v36  ;;  %v3311_v27 = vmax.f32 %v3289_v26, %v3290_v21  ;;  %v3016_v37 = vadd.f32 %v2945_v8, %v2863_v44  ;;  %v30134_v36 = vld [vmem:[#allocation12_spill] sm:$0xff]  ;;  %v30135_v21 = vld [vmem:[#allocation13_spill] sm:$0xff]  ;;  %v30138_v55 = vld [vmem:[#allocation38_spill] sm:$0xff] }
 0x208   : > { %v22152_v61 = vpop.f32.mrf.mxu0  ;;  %v22184_v31 = vpop.f32.mrf.mxu1  ;;  %v3295_v28 = vadd.f32 %v22183_v1, %v3018_v48  ;;  %v2868_v15 = vadd.f32 %v30133_v57, %v2715_v50  ;;  %v30136_v1 = vmax.f32 %v30134_v36, %v30135_v21  ;;  %v30140_v48 = vld [vmem:[#allocation40_spill] sm:$0xff]  ;;  %v30151_v63 = vld [vmem:[#allocation43_spill] sm:$0xff] }
 0x209   : > { %20352 = vst [vmem:[%s26454_s18] sm:$0xff] %v20351_v14   ;;  %v3342_v47 = vadd.f32 %v30118_v43, %v3324_v58  ;;  %v3323_v0 = vmax.f32 %v30121_v10, %v3311_v27  ;;  %v3019_v13 = vadd.f32 %v22152_v61, %v2866_v32  ;;  %v3293_v11 = vadd.f32 %v3222_v25, %v3016_v37  ;;  %v30137_v14 = vld [vmem:[#allocation23_spill] sm:$0xff]  ;;  %v30139_v27 = vld [vmem:[#allocation24_spill] sm:$0xff] }
 0x20a   : > { %v2948_v24 = vpop.f32.mrf.mxu0  ;;  %v3225_v5 = vpop.f32.mrf.mxu1  ;;  %v2718_v58 = vadd.f32 %v30138_v55, %v30137_v14  ;;  %v2721_v25 = vadd.f32 %v30140_v48, %v30139_v27  ;;  %v30157_v57 = vld [vmem:[#allocation28_spill] sm:$0xff]  ;;  %v30159_v14 = vld [vmem:[#allocation45_spill] sm:$0xff]  ;;  %v30161_v27 = vld [vmem:[#allocation50_spill] sm:$0xff] }
 0x20b   : > { %v3341_v33 = vadd.f32 %v30118_v43, %v3323_v0  ;;  %v3296_v34 = vadd.f32 %v22184_v31, %v3019_v13  ;;  %v3017_v23 = vadd.f32 %v2948_v24, %v2864_v35  ;;  %v3354_v60 = vmax.f32 %v3342_v47, 0.0  ;;  %v30141_v0 = vld [vmem:[#allocation37_spill] sm:$0xff] }
 0x20c   : > { %v22155_v16 = vpop.f32.mrf.mxu0  ;;  %v22187_v49 = vpop.f32.mrf.mxu1  ;;  %v2873_v13 = vadd.f32 %v30141_v0, %v2720_v7  ;;  %v30142_v31 = vld [vmem:[#allocation25_spill] sm:$0xff]  ;;  %v2874_v2 = vadd.f32 %v30145_v42, %v2721_v25  ;;  %v30155_v7 = vld [vmem:[#allocation27_spill] sm:$0xff] }
 0x20d   : > { %v3353_v41 = vmax.f32 %v3341_v33, 0.0  ;;  %v3314_v62 = vmax.f32 %v3295_v28, %v3296_v34  ;;  %v3294_v19 = vadd.f32 %v3225_v5, %v3017_v23  ;;  %v3022_v9 = vadd.f32 %v22155_v16, %v2869_v3  ;;  %v30146_v16 = vld [vmem:[#allocation7_spill] sm:$0xff] }
 0x20e   : > { %v2961_v38 = vpop.f32.mrf.mxu0  ;;  %v3238_v59 = vpop.f32.mrf.mxu1  ;;  %v2719_v53 = vadd.f32 %v30143_v18, %v30142_v31  ;;  %v2871_v3 = vadd.f32 %v30144_v56, %v2718_v58  ;;  %v30160_v58 = vld [vmem:[#allocation29_spill] sm:$0xff]  ;;  %v30162_v0 = vld [vmem:[#allocation47_spill] sm:$0xff] }
 0x20f   : > { %v20356_v20 = vpack.c.bf16 %v3354_v60, %v3353_v41  ;;  %v3326_v29 = vmax.f32 %v30130_v54, %v3314_v62  ;;  %v3313_v51 = vmax.f32 %v3293_v11, %v3294_v19  ;;  %v3020_v46 = vadd.f32 %v2961_v38, %v2867_v52  ;;  %v30147_v60 = vld [vmem:[#allocation15_spill] sm:$0xff]  ;;  %v30149_v52 = vld [vmem:[#allocation26_spill] sm:$0xff]  ;;  %v30163_v31 = vld [vmem:[#allocation49_spill] sm:$0xff] }
 0x210   : > { %v22156_v26 = vpop.f32.mrf.mxu0  ;;  %v22188_v8 = vpop.f32.mrf.mxu1  ;;  %v3299_v61 = vadd.f32 %v22187_v49, %v3022_v9  ;;  %v30148_v41 = vmax.f32 %v30146_v16, %v30147_v60  ;;  %v2872_v4 = vadd.f32 %v30151_v63, %v2719_v53  ;;  %v2723_v48 = vadd.f32 %v30161_v27, %v30160_v58  ;;  %v30168_v16 = vld [vmem:[#allocation8_spill] sm:$0xff]  ;;  %v30169_v60 = vld [vmem:[#allocation19_spill] sm:$0xff] }
 0x211   : > { %20428 = vst [vmem:[%s26454_s18 + $0x8] sm:$0xff] %v20356_v20   ;;  %v3344_v17 = vadd.f32 %v30118_v43, %v3326_v29  ;;  %v3325_v44 = vmax.f32 %v30136_v1, %v3313_v51  ;;  %v3023_v32 = vadd.f32 %v22156_v26, %v2870_v12  ;;  %v3297_v40 = vadd.f32 %v3238_v59, %v3020_v46  ;;  %v30152_v29 = vld [vmem:[#allocation14_spill] sm:$0xff]  ;;  %v30153_v51 = vld [vmem:[#allocation16_spill] sm:$0xff] }
 0x212   : > { %v2964_v45 = vpop.f32.mrf.mxu0  ;;  %v3241_v10 = vpop.f32.mrf.mxu1  ;;  %v2724_v12 = vadd.f32 %v30150_v30, %v30149_v52  ;;  %v30154_v9 = vmax.f32 %v30152_v29, %v30153_v51  ;;  %v30156_v46 = vld [vmem:[#allocation46_spill] sm:$0xff]  ;;  %v23988_v58 = vld [vmem:[%s29960_s3 + $0x30] sm:$0xff] (%p30_p0)  }
 0x213   : > { %v3343_v37 = vadd.f32 %v30118_v43, %v3325_v44  ;;  %v3300_v35 = vadd.f32 %v22188_v8, %v3023_v32  ;;  %v3021_v47 = vadd.f32 %v2964_v45, %v2868_v15  ;;  %v3356_v33 = vmax.f32 %v3344_v17, 0.0  ;;  %v30158_v15 = vld [vmem:[#allocation48_spill] sm:$0xff]  ;;  %v23990_v27 = vld [vmem:[%s29960_s3 + $0x28] sm:$0xff] (%p30_p0)  }
 0x214   : > { %v22159_v24 = vpop.f32.mrf.mxu0  ;;  %v22191_v5 = vpop.f32.mrf.mxu1  ;;  %v2722_v26 = vadd.f32 %v30156_v46, %v30155_v7  ;;  %v2725_v17 = vadd.f32 %v30158_v15, %v30157_v57  ;;  %v2877_v55 = vadd.f32 %v30159_v14, %v2724_v12  ;;  %v30174_v57 = vld [vmem:[#allocation10_spill] sm:$0xff]  ;;  %v30175_v15 = vld [vmem:[#allocation21_spill] sm:$0xff] }
 0x215   : > { %v3355_v28 = vmax.f32 %v3343_v37, 0.0  ;;  %v3316_v34 = vmax.f32 %v3299_v61, %v3300_v35  ;;  %v3298_v23 = vadd.f32 %v3241_v10, %v3021_v47  ;;  %v3026_v49 = vadd.f32 %v22159_v24, %v2873_v13  ;;  %v30164_v24 = vld [vmem:[#allocation17_spill] sm:$0xff] }
 0x216   : > { %v2977_v50 = vpop.f32.mrf.mxu0  ;;  %v3254_v6 = vpop.f32.mrf.mxu1  ;;  %v2875_v13 = vadd.f32 %v30162_v0, %v2722_v26  ;;  %v2878_v18 = vadd.f32 %v30163_v31, %v2725_v17  ;;  %v30176_v17 = vmax.f32 %v30174_v57, %v30175_v15  ;;  %v23986_v14 = vld [vmem:[%s29960_s3 + $0x38] sm:$0xff] (%p30_p0)   ;;  %v23997_v0 = vld [vmem:[%s29960_s3 + $0x48] sm:$0xff] (%p30_p0)   ;;  %v23999_v31 = vld [vmem:[%s29960_s3 + $0x40] sm:$0xff] (%p30_p0)  }
 0x217   : > { %v20361_v11 = vpack.c.bf16 %v3356_v33, %v3355_v28  ;;  %v3328_v62 = vmax.f32 %v30148_v41, %v3316_v34  ;;  %v3315_v19 = vmax.f32 %v3297_v40, %v3298_v23  ;;  %v3024_v38 = vadd.f32 %v2977_v50, %v2871_v3  ;;  %v30165_v33 = vld [vmem:[#allocation18_spill] sm:$0xff]  ;;  %22233 = vmatprep.subr.bf16.mxu1 (%p30_p0), %v23986_v14 }
 0x218   : > { %v22160_v20 = vpop.f32.mrf.mxu0  ;;  %v22192_v22 = vpop.f32.mrf.mxu1  ;;  %v3303_v1 = vadd.f32 %v22191_v5, %v3026_v49  ;;  %v30166_v28 = vmax.f32 %v30164_v24, %v30165_v33  ;;  %v30170_v41 = vmax.f32 %v30168_v16, %v30169_v60  ;;  %22234 = vmatpush3.bf16.msra.mxu1 (%p30_p0), %v23986_v14  ;;  %v24011_v24 = vld [vmem:[%s29960_s3 + $0xf8] sm:$0xff] (%p30_p0)   ;;  %v24016_v16 = vld [vmem:[%s29960_s3 + $0xa0] sm:$0xff] (%p30_p0)   ;;  %v24055_v14 = vld [vmem:[%s29960_s3 + $0x168] sm:$0xff] (%p30_p0)  }
 0x219   : > { %20429 = vst [vmem:[%s26454_s18 + $0x10] sm:$0xff] %v20361_v11   ;;  %v3346_v54 = vadd.f32 %v30118_v43, %v3328_v62  ;;  %v3327_v59 = vmax.f32 %v30154_v9, %v3315_v19  ;;  %v3027_v39 = vadd.f32 %v22160_v20, %v2874_v2  ;;  %v3301_v25 = vadd.f32 %v3254_v6, %v3024_v38  ;;  %v30167_v2 = vld [vmem:[#allocation51_spill] sm:$0xff]  ;;  %v24021_v60 = vld [vmem:[%s29960_s3 + $0xe0] sm:$0xff] (%p30_p0)  }
 0x21a   : > { %v2980_v36 = vpop.f32.mrf.mxu0  ;;  %v3257_v8 = vpop.f32.mrf.mxu1  ;;  %v2876_v50 = vadd.f32 %v30167_v2, %v2723_v48  ;;  %22235 = vmatprep.subr.bf16.mxu1 (%p30_p0), %v23988_v58  ;;  %v23991_v48 = vld [vmem:[%s29960_s3 + $0x60] sm:$0xff] (%p30_p0)   ;;  %v24019_v2 = vld [vmem:[%s29960_s3 + $0xe8] sm:$0xff] (%p30_p0)  }
 0x21b   : > { %v3345_v21 = vadd.f32 %v30118_v43, %v3327_v59  ;;  %v3304_v44 = vadd.f32 %v22192_v22, %v3027_v39  ;;  %v3025_v32 = vadd.f32 %v2980_v36, %v2872_v4  ;;  %v3358_v37 = vmax.f32 %v3346_v54, 0.0  ;;  %v30171_v59 = vld [vmem:[#allocation9_spill] sm:$0xff]  ;;  %v30172_v39 = vld [vmem:[#allocation20_spill] sm:$0xff] }
 0x21c   : > { %v22163_v45 = vpop.f32.mrf.mxu0  ;;  %v22195_v10 = vpop.f32.mrf.mxu1  ;;  %v30173_v22 = vmax.f32 %v30171_v59, %v30172_v39  ;;  %22236 = vmatpush3.bf16.msra.mxu1 (%p30_p0), %v23988_v58 }
 0x21d   : > { %v3357_v61 = vmax.f32 %v3345_v21, 0.0  ;;  %v3318_v35 = vmax.f32 %v3303_v1, %v3304_v44  ;;  %v3302_v47 = vadd.f32 %v3257_v8, %v3025_v32  ;;  %v3030_v5 = vadd.f32 %v22163_v45, %v2877_v55  ;;  %v23985_v8 = vld [vmem:[%s29960_s3 + $0x78] sm:$0xff] (%p30_p0)   ;;  %v23987_v55 = vld [vmem:[%s29960_s3 + $0x70] sm:$0xff] (%p30_p0)   ;;  %22237 = vmatprep.subr.bf16.mxu1 (%p30_p0), %v23990_v27 }
 0x21e   : > { %v2993_v53 = vpop.f32.mrf.mxu0  ;;  %v3270_v56 = vpop.f32.mrf.mxu1  ;;  %22197 = vmatprep.subr.bf16.mxu0 (%p30_p0), %v23985_v8  ;;  %v23993_v45 = vld [vmem:[%s29960_s3 + $0x58] sm:$0xff] (%p30_p0)  }
 0x21f   : > { %v20366_v40 = vpack.c.bf16 %v3358_v37, %v3357_v61  ;;  %v3330_v34 = vmax.f32 %v30166_v28, %v3318_v35  ;;  %v3317_v23 = vmax.f32 %v3301_v25, %v3302_v47  ;;  %v3028_v3 = vadd.f32 %v2993_v53, %v2875_v13  ;;  %22198 = vmatpush3.bf16.msra.mxu0 (%p30_p0), %v23985_v8  ;;  %v23992_v25 = vld [vmem:[%s29960_s3 + $0x20] sm:$0xff] (%p30_p0)   ;;  %v23994_v37 = vld [vmem:[%s29960_s3 + $0x18] sm:$0xff] (%p30_p0)   ;;  %v23995_v61 = vld [vmem:[%s29960_s3 + $0x50] sm:$0xff] (%p30_p0)  }
 0x220   : > { %v22164_v42 = vpop.f32.mrf.mxu0  ;;  %v22196_v49 = vpop.f32.mrf.mxu1  ;;  %v3307_v30 = vadd.f32 %v22195_v10, %v3030_v5  ;;  %22199 = vmatprep.subr.bf16.mxu0 (%p30_p0), %v23987_v55  ;;  %22238 = vmatpush3.bf16.msra.mxu1 (%p30_p0), %v23990_v27  ;;  %v23996_v35 = vld [vmem:[%s29960_s3 + $0x10] sm:$0xff] (%p30_p0)   ;;  %v23998_v13 = vld [vmem:[%s29960_s3 + $0x8] sm:$0xff] (%p30_p0)   ;;  %v24057_v27 = vld [vmem:[%s29960_s3 + $0x160] sm:$0xff] (%p30_p0)  }
 0x221   : > { %20430 = vst [vmem:[%s26454_s18 + $0x18] sm:$0xff] %v20366_v40   ;;  %v3348_v11 = vadd.f32 %v30118_v43, %v3330_v34  ;;  %v3329_v62 = vmax.f32 %v30170_v41, %v3317_v23  ;;  %v3031_v19 = vadd.f32 %v22164_v42, %v2878_v18  ;;  %v3305_v20 = vadd.f32 %v3270_v56, %v3028_v3  ;;  %v24000_v18 = vld [vmem:[%s29960_s3] sm:$0xff] (%p30_p0)   ;;  %v24005_v40 = vld [vmem:[%s29960_s3 + $0xb8] sm:$0xff] (%p30_p0)   ;;  %v24006_v28 = vld [vmem:[%s29960_s3 + $0xb0] sm:$0xff] (%p30_p0)  }
 0x222   : > { %v2996_v6 = vpop.f32.mrf.mxu0  ;;  %v3273_v63 = vpop.f32.mrf.mxu1  ;;  %22239 = vmatprep.subr.bf16.mxu1 (%p30_p0), %v23992_v25  ;;  %v24013_v5 = vld [vmem:[%s29960_s3 + $0xf0] sm:$0xff] (%p30_p0)   ;;  %v24012_v3 = vld [vmem:[%s29960_s3 + $0xa8] sm:$0xff] (%p30_p0)  }
 0x223   : > { %v3347_v52 = vadd.f32 %v30118_v43, %v3329_v62  ;;  %v3308_v12 = vadd.f32 %v22196_v49, %v3031_v19  ;;  %v3029_v38 = vadd.f32 %v2996_v6, %v2876_v50  ;;  %v3360_v4 = vmax.f32 %v3348_v11, 0.0  ;;  %22200 = vmatpush3.bf16.msra.mxu0 (%p30_p0), %v23987_v55  ;;  %v24020_v62 = vld [vmem:[%s29960_s3 + $0x98] sm:$0xff] (%p30_p0)  }
 0x224   :  { %22240 = vmatpush3.bf16.msra.mxu1 (%p30_p0), %v23992_v25  ;;  %v24026_v49 = vld [vmem:[%s29960_s3 + $0xd8] sm:$0xff] (%p30_p0)  }
 0x225   : > { %v3359_v54 = vmax.f32 %v3347_v52, 0.0  ;;  %v3320_v29 = vmax.f32 %v3307_v30, %v3308_v12  ;;  %v3306_v51 = vadd.f32 %v3273_v63, %v3029_v38  ;;  %22241 = vmatprep.subr.bf16.mxu1 (%p30_p0), %v23994_v37  ;;  %v24027_v30 = vld [vmem:[%s29960_s3 + $0x90] sm:$0xff] (%p30_p0)   ;;  %v24056_v25 = vld [vmem:[%s29960_s3 + $0x118] sm:$0xff] (%p30_p0)  }
 0x226   :  { %v24028_v12 = vld [vmem:[%s29960_s3 + $0xd0] sm:$0xff] (%p30_p0)  }
 0x227   : > { %v20371_v9 = vpack.c.bf16 %v3360_v4, %v3359_v54  ;;  %v3332_v7 = vmax.f32 %v30173_v22, %v3320_v29  ;;  %v3319_v46 = vmax.f32 %v3305_v20, %v3306_v51  ;;  %v24029_v20 = vld [vmem:[%s29960_s3 + $0x88] sm:$0xff] (%p30_p0)   ;;  %v24035_v51 = vld [vmem:[%s29960_s3 + $0x80] sm:$0xff] (%p30_p0)   ;;  %v24041_v22 = vld [vmem:[%s29960_s3 + $0x138] sm:$0xff] (%p30_p0)  }
 0x228   :  { %22242 = vmatpush3.bf16.msra.mxu1 (%p30_p0), %v23994_v37  ;;  %v24034_v4 = vld [vmem:[%s29960_s3 + $0xc8] sm:$0xff] (%p30_p0)   ;;  %v24062_v37 = vld [vmem:[%s29960_s3 + $0x158] sm:$0xff] (%p30_p0)  }
 0x229   : > { %20431 = vst [vmem:[%s26454_s18 + $0x20] sm:$0xff] %v20371_v9   ;;  %v3350_v26 = vadd.f32 %v30118_v43, %v3332_v7  ;;  %v3331_v36 = vmax.f32 %v30176_v17, %v3319_v46  ;;  %22243 = vmatprep.subr.bf16.mxu1 (%p30_p0), %v23996_v35  ;;  %v24036_v9 = vld [vmem:[%s29960_s3 + $0xc0] sm:$0xff] (%p30_p0)   ;;  %v24047_v7 = vld [vmem:[%s29960_s3 + $0x178] sm:$0xff] (%p30_p0)   ;;  %v24042_v17 = vld [vmem:[%s29960_s3 + $0x130] sm:$0xff] (%p30_p0)  }
 0x22b   : > { %v3349_v21 = vadd.f32 %v30118_v43, %v3331_v36  ;;  %v3362_v1 = vmax.f32 %v3350_v26, 0.0  ;;  %v23989_v43 = vld [vmem:[%s29960_s3 + $0x68] sm:$0xff] (%p30_p0)  }
 0x22c   :  { %22201 = vmatprep.subr.bf16.mxu0 (%p30_p0), %v23989_v43  ;;  %22244 = vmatpush3.bf16.msra.mxu1 (%p30_p0), %v23996_v35 }
 0x22d   : > { %v3361_v44 = vmax.f32 %v3349_v21, 0.0  ;;  %32 = sbr.rel (!%p30_p0) target bundleno = 3 (0x3), region = 110  ;;  %22202 = vmatpush3.bf16.msra.mxu0 (%p30_p0), %v23989_v43  ;;  %22245 = vmatprep.subr.bf16.mxu1 (%p30_p0), %v23998_v13  ;;  %v24052_v43 = vld [vmem:[%s29960_s3 + $0x120] sm:$0xff] (%p30_p0)  }
 0x22e   :  { %22203 = vmatprep.subr.bf16.mxu0 (%p30_p0), %v23991_v48 }
 0x22f   : > { %v20376_v32 = vpack.c.bf16 %v3362_v1, %v3361_v44  ;;  %v24049_v1 = vld [vmem:[%s29960_s3 + $0x170] sm:$0xff] (%p30_p0)  }
 0x230   :  { %22246 = vmatpush3.bf16.msra.mxu1 (%p30_p0), %v23998_v13  ;;  %v24065_v13 = vld [vmem:[%s29960_s3 + $0x108] sm:$0xff] (%p30_p0)  }
 0x231   : > { %20432 = vst [vmem:[%s26454_s18 + $0x28] sm:$0xff] %v20376_v32   ;;  %22204 = vmatpush3.bf16.msra.mxu0 (%p30_p0), %v23991_v48  ;;  %22247 = vmatprep.subr.bf16.mxu1 (%p30_p0), %v24000_v18  ;;  %v24048_v32 = vld [vmem:[%s29960_s3 + $0x128] sm:$0xff] (%p30_p0)  }
 0x232   :  { %22205 = vmatprep.subr.bf16.mxu0 %v23993_v45 }
 0x234   :  { %22248 = vmatpush3.bf16.msra.mxu1 %v24000_v18  ;;  %v24070_v18 = vld [vmem:[%s29960_s3 + $0x148] sm:$0xff]  }
 0x235   :  { %22206 = vmatpush3.bf16.msra.mxu0 %v23993_v45  ;;  %22305 = vmatprep.subr.bf16.mxu1 %v24011_v24 }
 0x236   :  { %22207 = vmatprep.subr.bf16.mxu0 %v23995_v61 }
 0x238   :  { %v24001_v47 = vld [vmem:[#allocation2 + $0x4] sm:$0xff]   ;;  %v24003_v53 = vld [vmem:[#allocation2 + $0xc] sm:$0xff]   ;;  %v24007_v34 = vld [vmem:[#allocation2 + $0x14] sm:$0xff]  }
 0x239   :  { %v24002_v10 = vld [vmem:[#allocation2] sm:$0xff]   ;;  %22213 = vmatprep.mubr.bf16.mxu0 %v24001_v47  ;;  %22208 = vmatpush3.bf16.msra.mxu0 %v23995_v61  ;;  %v24004_v33 = vld [vmem:[#allocation2 + $0x8] sm:$0xff]   ;;  %v24008_v23 = vld [vmem:[#allocation2 + $0x10] sm:$0xff]  }
 0x23a   :  { %22249 = vmatprep.mubr.bf16.mxu1 %v24002_v10  ;;  %22209 = vmatprep.subr.bf16.mxu0 %v23997_v0  ;;  %v24009_v56 = vld [vmem:[#allocation2 + $0x1c] sm:$0xff]   ;;  %v24014_v50 = vld [vmem:[#allocation2 + $0x24] sm:$0xff]   ;;  %v24017_v41 = vld [vmem:[#allocation2 + $0x34] sm:$0xff]  }
 0x23b   :  { %22250 = vmatmul.mubr.bf16.vlgmr.msra.gmra.mxu1 %v24004_v33  ;;  %v24010_v42 = vld [vmem:[#allocation2 + $0x18] sm:$0xff]   ;;  %v24015_v11 = vld [vmem:[#allocation2 + $0x20] sm:$0xff]   ;;  %v24018_v19 = vld [vmem:[#allocation2 + $0x30] sm:$0xff]  }
 0x23c   :  { %22253 = vmatprep.mubr.bf16.mxu1 %v24008_v23  ;;  %22306 = vmatpush3.bf16.msra.mxu1 %v24011_v24  ;;  %v24022_v6 = vld [vmem:[#allocation2 + $0x3c] sm:$0xff]   ;;  %v24024_v38 = vld [vmem:[#allocation2 + $0x44] sm:$0xff]   ;;  %v24030_v54 = vld [vmem:[#allocation2 + $0x4c] sm:$0xff]  }
 0x23d   :  { %22210 = vmatpush3.bf16.msra.mxu0 %v23997_v0  ;;  %22307 = vmatprep.subr.bf16.mxu1 %v24013_v5  ;;  %v24023_v52 = vld [vmem:[#allocation2 + $0x38] sm:$0xff]   ;;  %v24025_v63 = vld [vmem:[#allocation2 + $0x40] sm:$0xff]   ;;  %v24031_v29 = vld [vmem:[#allocation2 + $0x48] sm:$0xff]  }
 0x23e   :  { %22211 = vmatprep.subr.bf16.mxu0 %v23999_v31  ;;  %v24032_v59 = vld [vmem:[#allocation2 + $0x54] sm:$0xff]   ;;  %v24037_v46 = vld [vmem:[#allocation2 + $0x8] sm:$0xff]   ;;  %v24044_v21 = vld [vmem:[#allocation2 + $0x40] sm:$0xff]  }
 0x23f   :  { %v24033_v39 = vld [vmem:[#allocation2 + $0x50] sm:$0xff]   ;;  %v24040_v15 = vld [vmem:[#allocation2 + $0x38] sm:$0xff]   ;;  %v24045_v44 = vld [vmem:[#allocation2 + $0x20] sm:$0xff]  }
 0x240   :  { %22308 = vmatpush3.bf16.msra.mxu1 %v24013_v5  ;;  %v24038_v26 = vld [vmem:[#allocation2 + $0x30] sm:$0xff]   ;;  %v24043_v36 = vld [vmem:[#allocation2 + $0x18] sm:$0xff]   ;;  %v24046_v8 = vld [vmem:[#allocation2 + $0x48] sm:$0xff]  }
 0x241   :  { %22212 = vmatpush3.bf16.msra.mxu0 %v23999_v31  ;;  %22309 = vmatprep.subr.bf16.mxu1 %v24019_v2  ;;  %v24039_v57 = vld [vmem:[#allocation2 + $0x10] sm:$0xff]   ;;  %v24050_v55 = vld [vmem:[#allocation2 + $0x28] sm:$0xff]   ;;  %v24053_v48 = vld [vmem:[#allocation2 + $0x38] sm:$0xff]  }
 0x242   :  { %22269 = vmatprep.subr.bf16.mxu0 %v24005_v40  ;;  %v24051_v58 = vld [vmem:[#allocation2 + $0x50] sm:$0xff]   ;;  %v24054_v45 = vld [vmem:[#allocation2 + $0x60] sm:$0xff]   ;;  %v24059_v35 = vld [vmem:[#allocation2 + $0x68] sm:$0xff]  }
 0x243   :  { %22254 = vmatmul.mubr.bf16.gmra.mxu1 %v24010_v42  ;;  %v24058_v61 = vld [vmem:[#allocation2 + $0x40] sm:$0xff]   ;;  %v24063_v47 = vld [vmem:[%s29960_s3 + $0x110] sm:$0xff]   ;;  %v24060_v0 = vld [vmem:[#allocation2 + $0x48] sm:$0xff]  }
 0x244   :  { %22214 = vmatmul.mubr.bf16.vlgmr.msra.gmra.mxu0 %v24003_v53  ;;  %22257 = vmatprep.mubr.bf16.mxu1 %v24015_v11  ;;  %v24064_v10 = vld [vmem:[%s29960_s3 + $0x150] sm:$0xff]   ;;  %v24071_v24 = vld [vmem:[%s29960_s3 + $0x100] sm:$0xff]   ;;  %v24077_v23 = vld [vmem:[%s29960_s3 + $0x1b8] sm:$0xff]  }
 0x245   :  { %22270 = vmatpush3.bf16.msra.mxu0 %v24005_v40  ;;  %22217 = vmatprep.mubr.bf16.mxu0 %v24007_v34  ;;  %v24061_v31 = vld [vmem:[#allocation2 + $0x70] sm:$0xff]   ;;  %v24067_v40 = vld [vmem:[#allocation2 + $0x78] sm:$0xff]   ;;  %v24072_v33 = vld [vmem:[%s29960_s3 + $0x140] sm:$0xff]  }
 0x246   :  { %22271 = vmatprep.subr.bf16.mxu0 %v24006_v28  ;;  %22310 = vmatpush3.bf16.msra.mxu1 %v24019_v2  ;;  %v24066_v53 = vld [vmem:[#allocation2 + $0x50] sm:$0xff]   ;;  %v24069_v34 = vld [vmem:[#allocation2 + $0x80] sm:$0xff]   ;;  %v24083_v5 = vld [vmem:[%s29960_s3 + $0x1f8] sm:$0xff]  }
 0x247   :  { %22311 = vmatprep.subr.bf16.mxu1 %v24021_v60  ;;  %v24075_v42 = vld [vmem:[#allocation2 + $0x3c] sm:$0xff]   ;;  %v24079_v11 = vld [vmem:[#allocation2 + $0x44] sm:$0xff]  }
 0x248   :  { %v24076_v2 = vld [vmem:[#allocation2 + $0x40] sm:$0xff]  }
 0x249   :  { %22272 = vmatpush3.bf16.msra.mxu0 %v24006_v28  ;;  %v24068_v28 = vld [vmem:[#allocation2 + $0x58] sm:$0xff]  }
 0x24a   :  { %22273 = vmatprep.subr.bf16.mxu0 %v24012_v3  ;;  %22312 = vmatpush3.bf16.msra.mxu1 %v24021_v60  ;;  %v24085_v60 = vld [vmem:[%s29960_s3 + $0x1f0] sm:$0xff]  }
 0x24b   :  { %22313 = vmatprep.subr.bf16.mxu1 %v24026_v49  ;;  %22258 = vmatmul.mubr.bf16.gmra.mxu1 %v24018_v19  ;;  %v24082_v19 = vld [vmem:[#allocation2 + $0x50] sm:$0xff]  }
 0x24c   :  { %22218 = vmatmul.mubr.bf16.gmra.mxu0 %v24009_v56  ;;  %22261 = vmatprep.mubr.bf16.mxu1 %v24023_v52  ;;  %v24073_v56 = vld [vmem:[#allocation2 + $0x34] sm:$0xff]  }
 0x24d   :  { %22274 = vmatpush3.bf16.msra.mxu0 %v24012_v3  ;;  %22221 = vmatprep.mubr.bf16.mxu0 %v24014_v50  ;;  %v24074_v3 = vld [vmem:[#allocation2 + $0x38] sm:$0xff]   ;;  %v24078_v50 = vld [vmem:[%s29960_s3 + $0x1b0] sm:$0xff]  }
 0x24e   :  { %22275 = vmatprep.subr.bf16.mxu0 %v24016_v16  ;;  %22314 = vmatpush3.bf16.msra.mxu1 %v24026_v49  ;;  %v24091_v49 = vld [vmem:[%s29960_s3 + $0x1e8] sm:$0xff]   ;;  %v24087_v52 = vld [vmem:[#allocation2 + $0x58] sm:$0xff]  }
 0x24f   :  { %22315 = vmatprep.subr.bf16.mxu1 %v24028_v12 }
 0x251   :  { %22276 = vmatpush3.bf16.msra.mxu0 %v24016_v16  ;;  %v24080_v16 = vld [vmem:[#allocation2 + $0x48] sm:$0xff]  }
 0x252   :  { %22277 = vmatprep.subr.bf16.mxu0 %v24020_v62  ;;  %22316 = vmatpush3.bf16.msra.mxu1 %v24028_v12  ;;  %v24093_v12 = vld [vmem:[%s29960_s3 + $0x1e0] sm:$0xff]  }
 0x253   :  { %22317 = vmatprep.subr.bf16.mxu1 %v24034_v4  ;;  %22262 = vmatmul.mubr.bf16.gmra.mxu1 %v24025_v63  ;;  %v24090_v63 = vld [vmem:[#allocation2 + $0x68] sm:$0xff]  }
 0x254   :  { %22222 = vmatmul.mubr.bf16.gmra.mxu0 %v24017_v41  ;;  %22265 = vmatprep.mubr.bf16.mxu1 %v24031_v29  ;;  %v24081_v41 = vld [vmem:[#allocation2 + $0x4c] sm:$0xff]  }
 0x255   :  { %22278 = vmatpush3.bf16.msra.mxu0 %v24020_v62  ;;  %22225 = vmatprep.mubr.bf16.mxu0 %v24022_v6  ;;  %v24084_v62 = vld [vmem:[%s29960_s3 + $0x1a8] sm:$0xff]   ;;  %v24086_v6 = vld [vmem:[#allocation2 + $0x54] sm:$0xff]  }
 0x256   :  { %22279 = vmatprep.subr.bf16.mxu0 %v24027_v30  ;;  %22318 = vmatpush3.bf16.msra.mxu1 %v24034_v4  ;;  %v24098_v4 = vld [vmem:[%s29960_s3 + $0x1d8] sm:$0xff]   ;;  %v24095_v29 = vld [vmem:[#allocation2 + $0x70] sm:$0xff]  }
 0x257   :  { %22319 = vmatprep.subr.bf16.mxu1 %v24036_v9 }
 0x259   :  { %22280 = vmatpush3.bf16.msra.mxu0 %v24027_v30  ;;  %v24088_v30 = vld [vmem:[%s29960_s3 + $0x1a0] sm:$0xff]  }
 0x25a   :  { %22281 = vmatprep.subr.bf16.mxu0 %v24029_v20  ;;  %22320 = vmatpush3.bf16.msra.mxu1 %v24036_v9  ;;  %v24100_v9 = vld [vmem:[%s29960_s3 + $0x1d0] sm:$0xff]  }
 0x25b   :  { %22377 = vmatprep.subr.bf16.mxu1 %v24047_v7  ;;  %22266 = vmatmul.mubr.bf16.gmra.mxu1 %v24033_v39  ;;  %v24101_v39 = vld [vmem:[%s29960_s3 + $0x188] sm:$0xff]  }
 0x25c   :  { %22226 = vmatmul.mubr.bf16.gmra.mxu0 %v24024_v38  ;;  %22321 = vmatprep.mubr.bf16.mxu1 %v24038_v26  ;;  %v24089_v38 = vld [vmem:[#allocation2 + $0x64] sm:$0xff]  }
 0x25d   :  { %22229 = vmatprep.mubr.bf16.mxu0 %v24030_v54  ;;  %22282 = vmatpush3.bf16.msra.mxu0 %v24029_v20  ;;  %v24092_v20 = vld [vmem:[%s29960_s3 + $0x198] sm:$0xff]   ;;  %v24094_v54 = vld [vmem:[#allocation2 + $0x6c] sm:$0xff]   ;;  %v24103_v26 = vld [vmem:[#allocation2 + $0x80] sm:$0xff]  }
 0x25e   :  { %22283 = vmatprep.subr.bf16.mxu0 %v24035_v51 }
 0x261   :  { %22284 = vmatpush3.bf16.msra.mxu0 %v24035_v51  ;;  %v24099_v51 = vld [vmem:[%s29960_s3 + $0x190] sm:$0xff]  }
 0x262   :  { %22341 = vmatprep.subr.bf16.mxu0 %v24041_v22 }
 0x263   :  { %22322 = vmatmul.mubr.bf16.vlgmr.msra.gmra.mxu1 %v24040_v15  ;;  %v24108_v15 = vld [vmem:[%s29960_s3 + $0x1c0] sm:$0xff]  }
 0x264   :  { %22230 = vmatmul.mubr.bf16.gmra.mxu0 %v24032_v59  ;;  %22325 = vmatprep.mubr.bf16.mxu1 %v24044_v21  ;;  %v24096_v59 = vld [vmem:[#allocation2 + $0x74] sm:$0xff]  }
 0x265   :  { %22285 = vmatprep.mubr.bf16.mxu0 %v24037_v46  ;;  %22378 = vmatpush3.bf16.msra.mxu1 %v24047_v7  ;;  %v24106_v7 = vld [vmem:[%s29960_s3 + $0x1c8] sm:$0xff]   ;;  %v24102_v46 = vld [vmem:[#allocation2 + $0x7c] sm:$0xff]  }
 0x266   :  { %22379 = vmatprep.subr.bf16.mxu1 %v24049_v1  ;;  %v24113_v21 = vld [vmem:[%s29960_s3 + $0x238] sm:$0xff]  }
 0x269   :  { %22380 = vmatpush3.bf16.msra.mxu1 %v24049_v1  ;;  %v24119_v1 = vld [vmem:[%s29960_s3 + $0x78] sm:$0xff]  }
 0x26a   :  { %22381 = vmatprep.subr.bf16.mxu1 %v24055_v14 }
 0x26b   :  { %22326 = vmatmul.mubr.bf16.gmra.mxu1 %v24046_v8  ;;  %v24111_v8 = vld [vmem:[#allocation2 + $0x68] sm:$0xff]  }
 0x26c   :  { %22286 = vmatmul.mubr.bf16.vlgmr.msra.gmra.mxu0 %v24039_v57  ;;  %22329 = vmatprep.mubr.bf16.mxu1 %v24051_v58  ;;  %v24107_v57 = vld [vmem:[%s29960_s3 + $0x180] sm:$0xff]   ;;  %v24115_v58 = vld [vmem:[#allocation2 + $0x70] sm:$0xff]  }
 0x26d   :  { %22342 = vmatpush3.bf16.msra.mxu0 %v24041_v22  ;;  %22289 = vmatprep.mubr.bf16.mxu0 %v24043_v36  ;;  %v24097_v22 = vld [vmem:[#allocation2 + $0x78] sm:$0xff]   ;;  %v24105_v36 = vld [vmem:[#allocation2 + $0x88] sm:$0xff]  }
 0x26e   :  { %22343 = vmatprep.subr.bf16.mxu0 %v24042_v17  ;;  %22382 = vmatpush3.bf16.msra.mxu1 %v24055_v14  ;;  %v24112_v14 = vld [vmem:[#allocation2 + $0x6c] sm:$0xff]  }
 0x26f   :  { %22383 = vmatprep.subr.bf16.mxu1 %v24057_v27 }
 0x271   :  { %22344 = vmatpush3.bf16.msra.mxu0 %v24042_v17  ;;  %v24104_v17 = vld [vmem:[#allocation2 + $0x84] sm:$0xff]  }
 0x272   :  { %22345 = vmatprep.subr.bf16.mxu0 %v24048_v32  ;;  %22384 = vmatpush3.bf16.msra.mxu1 %v24057_v27  ;;  %v24121_v27 = vld [vmem:[%s29960_s3 + $0x70] sm:$0xff]  }
 0x273   :  { %22385 = vmatprep.subr.bf16.mxu1 %v24062_v37  ;;  %22330 = vmatmul.mubr.bf16.gmra.mxu1 %v24054_v45  ;;  %v24118_v45 = vld [vmem:[#allocation2 + $0x7c] sm:$0xff]  }
 0x274   :  { %22290 = vmatmul.mubr.bf16.gmra.mxu0 %v24045_v44  ;;  %22333 = vmatprep.mubr.bf16.mxu1 %v24059_v35  ;;  %v24109_v44 = vld [vmem:[#allocation2 + $0x60] sm:$0xff]  }
 0x275   :  { %22346 = vmatpush3.bf16.msra.mxu0 %v24048_v32  ;;  %22293 = vmatprep.mubr.bf16.mxu0 %v24050_v55  ;;  %v24110_v32 = vld [vmem:[#allocation2 + $0x64] sm:$0xff]   ;;  %v24114_v55 = vld [vmem:[%s29960_s3 + $0x230] sm:$0xff]  }
 0x276   :  { %22347 = vmatprep.subr.bf16.mxu0 %v24052_v43  ;;  %22386 = vmatpush3.bf16.msra.mxu1 %v24062_v37  ;;  %v24127_v37 = vld [vmem:[%s29960_s3 + $0x68] sm:$0xff]  }
 0x277   :  { %22387 = vmatprep.subr.bf16.mxu1 %v24064_v10  ;;  %v24123_v35 = vld [vmem:[#allocation2 + $0x84] sm:$0xff]  }
 0x279   :  { %22348 = vmatpush3.bf16.msra.mxu0 %v24052_v43  ;;  %v24116_v43 = vld [vmem:[#allocation2 + $0x74] sm:$0xff]  }
 0x27a   :  { %22349 = vmatprep.subr.bf16.mxu0 %v24056_v25  ;;  %22388 = vmatpush3.bf16.msra.mxu1 %v24064_v10  ;;  %v24129_v10 = vld [vmem:[%s29960_s3 + $0x60] sm:$0xff]  }
 0x27b   :  { %22389 = vmatprep.subr.bf16.mxu1 %v24070_v18  ;;  %22334 = vmatmul.mubr.bf16.gmra.mxu1 %v24061_v31  ;;  %v24126_v31 = vld [vmem:[#allocation2 + $0x94] sm:$0xff]  }
 0x27c   :  { %22294 = vmatmul.mubr.bf16.gmra.mxu0 %v24053_v48  ;;  %22337 = vmatprep.mubr.bf16.mxu1 %v24067_v40  ;;  %v24117_v48 = vld [vmem:[#allocation2 + $0x78] sm:$0xff]  }
 0x27d   :  { %22350 = vmatpush3.bf16.msra.mxu0 %v24056_v25  ;;  %22297 = vmatprep.mubr.bf16.mxu0 %v24058_v61  ;;  %v24120_v25 = vld [vmem:[%s29960_s3 + $0x228] sm:$0xff]   ;;  %v24122_v61 = vld [vmem:[#allocation2 + $0x80] sm:$0xff]  }
 0x27e   :  { %22351 = vmatprep.subr.bf16.mxu0 %v24063_v47  ;;  %22390 = vmatpush3.bf16.msra.mxu1 %v24070_v18  ;;  %v24134_v18 = vld [vmem:[%s29960_s3 + $0x58] sm:$0xff]  }
 0x27f   :  { %22391 = vmatprep.subr.bf16.mxu1 %v24072_v33  ;;  %v24131_v40 = vld [vmem:[#allocation2 + $0x9c] sm:$0xff]  }
 0x281   :  { %22352 = vmatpush3.bf16.msra.mxu0 %v24063_v47  ;;  %v24124_v47 = vld [vmem:[%s29960_s3 + $0x220] sm:$0xff]  }
 0x282   :  { %22353 = vmatprep.subr.bf16.mxu0 %v24065_v13  ;;  %22392 = vmatpush3.bf16.msra.mxu1 %v24072_v33  ;;  %v24136_v33 = vld [vmem:[%s29960_s3 + $0x50] sm:$0xff]  }
 0x283   :  { %22449 = vmatprep.subr.bf16.mxu1 %v24083_v5  ;;  %22338 = vmatmul.mubr.bf16.gmra.mxu1 %v24069_v34  ;;  %v24137_v34 = vld [vmem:[%s29960_s3 + $0x208] sm:$0xff]  }
 0x284   :  { %22298 = vmatmul.mubr.bf16.gmra.mxu0 %v24060_v0  ;;  %22393 = vmatprep.mubr.bf16.mxu1 %v24074_v3  ;;  %v24125_v0 = vld [vmem:[#allocation2 + $0x90] sm:$0xff]  }
 0x285   :  { %22301 = vmatprep.mubr.bf16.mxu0 %v24066_v53  ;;  %22354 = vmatpush3.bf16.msra.mxu0 %v24065_v13  ;;  %v24128_v13 = vld [vmem:[%s29960_s3 + $0x218] sm:$0xff]   ;;  %v24139_v3 = vld [vmem:[#allocation2 + $0xac] sm:$0xff]  }
 0x286   :  { %22355 = vmatprep.subr.bf16.mxu0 %v24071_v24  ;;  %v24130_v53 = vld [vmem:[#allocation2 + $0x98] sm:$0xff]  }
 0x289   :  { %22356 = vmatpush3.bf16.msra.mxu0 %v24071_v24  ;;  %v24135_v24 = vld [vmem:[%s29960_s3 + $0x210] sm:$0xff]  }
 0x28a   :  { %22413 = vmatprep.subr.bf16.mxu0 %v24077_v23 }
 0x28b   :  { %22394 = vmatmul.mubr.bf16.vlgmr.msra.gmra.mxu1 %v24076_v2  ;;  %v24144_v2 = vld [vmem:[%s29960_s3 + $0x40] sm:$0xff]  }
 0x28c   :  { %22302 = vmatmul.mubr.bf16.gmra.mxu0 %v24068_v28  ;;  %22397 = vmatprep.mubr.bf16.mxu1 %v24080_v16  ;;  %v24132_v28 = vld [vmem:[#allocation2 + $0xa0] sm:$0xff]   ;;  %v24149_v16 = vld [vmem:[%s29960_s3 + $0x38] sm:$0xff]  }
 0x28d   :  { %22357 = vmatprep.mubr.bf16.mxu0 %v24073_v56  ;;  %22450 = vmatpush3.bf16.msra.mxu1 %v24083_v5  ;;  %v24142_v5 = vld [vmem:[%s29960_s3 + $0x48] sm:$0xff]  }
 0x28e   :  { %22451 = vmatprep.subr.bf16.mxu1 %v24085_v60  ;;  %v24138_v56 = vld [vmem:[#allocation2 + $0xa8] sm:$0xff]  }
 0x291   :  { %22452 = vmatpush3.bf16.msra.mxu1 %v24085_v60  ;;  %v24155_v60 = vld [vmem:[%s29960_s3 + $0xb8] sm:$0xff]  }
 0x292   :  { %22453 = vmatprep.subr.bf16.mxu1 %v24091_v49 }
 0x293   :  { %22398 = vmatmul.mubr.bf16.gmra.mxu1 %v24082_v19  ;;  %v24147_v19 = vld [vmem:[#allocation2 + $0x70] sm:$0xff]  }
 0x294   :  { %22358 = vmatmul.mubr.bf16.vlgmr.msra.gmra.mxu0 %v24075_v42  ;;  %22401 = vmatprep.mubr.bf16.mxu1 %v24087_v52  ;;  %v24143_v42 = vld [vmem:[%s29960_s3 + $0x200] sm:$0xff]   ;;  %v24151_v52 = vld [vmem:[#allocation2 + $0x78] sm:$0xff]  }
 0x295   :  { %22414 = vmatpush3.bf16.msra.mxu0 %v24077_v23  ;;  %22361 = vmatprep.mubr.bf16.mxu0 %v24079_v11  ;;  %v24133_v23 = vld [vmem:[#allocation2 + $0xa4] sm:$0xff]   ;;  %v24141_v11 = vld [vmem:[#allocation2 + $0xb4] sm:$0xff]  }
 0x296   :  { %22415 = vmatprep.subr.bf16.mxu0 %v24078_v50  ;;  %22454 = vmatpush3.bf16.msra.mxu1 %v24091_v49  ;;  %v24148_v49 = vld [vmem:[#allocation2 + $0x6c] sm:$0xff]  }
 0x297   :  { %22455 = vmatprep.subr.bf16.mxu1 %v24093_v12 }
 0x299   :  { %22416 = vmatpush3.bf16.msra.mxu0 %v24078_v50  ;;  %v24140_v50 = vld [vmem:[#allocation2 + $0xb0] sm:$0xff]  }
 0x29a   :  { %22417 = vmatprep.subr.bf16.mxu0 %v24084_v62  ;;  %22456 = vmatpush3.bf16.msra.mxu1 %v24093_v12  ;;  %v24157_v12 = vld [vmem:[%s29960_s3 + $0xb0] sm:$0xff]  }
 0x29b   :  { %22457 = vmatprep.subr.bf16.mxu1 %v24098_v4  ;;  %22402 = vmatmul.mubr.bf16.gmra.mxu1 %v24090_v63  ;;  %v24154_v63 = vld [vmem:[#allocation2 + $0x7c] sm:$0xff]  }
 0x29c   :  { %22362 = vmatmul.mubr.bf16.gmra.mxu0 %v24081_v41  ;;  %22405 = vmatprep.mubr.bf16.mxu1 %v24095_v29  ;;  %v24145_v41 = vld [vmem:[#allocation2 + $0x68] sm:$0xff]  }
 0x29d   :  { %22418 = vmatpush3.bf16.msra.mxu0 %v24084_v62  ;;  %22365 = vmatprep.mubr.bf16.mxu0 %v24086_v6  ;;  %v24146_v62 = vld [vmem:[#allocation2 + $0x64] sm:$0xff]   ;;  %v24150_v6 = vld [vmem:[%s29960_s3 + $0x30] sm:$0xff]  }
 0x29e   :  { %22419 = vmatprep.subr.bf16.mxu0 %v24088_v30  ;;  %22458 = vmatpush3.bf16.msra.mxu1 %v24098_v4  ;;  %v24163_v4 = vld [vmem:[%s29960_s3 + $0xa8] sm:$0xff]  }
 0x29f   :  { %22459 = vmatprep.subr.bf16.mxu1 %v24100_v9  ;;  %v24159_v29 = vld [vmem:[#allocation2 + $0x84] sm:$0xff]  }
 0x2a1   :  { %22420 = vmatpush3.bf16.msra.mxu0 %v24088_v30  ;;  %v24152_v30 = vld [vmem:[#allocation2 + $0x74] sm:$0xff]  }
 0x2a2   :  { %22421 = vmatprep.subr.bf16.mxu0 %v24092_v20  ;;  %22460 = vmatpush3.bf16.msra.mxu1 %v24100_v9  ;;  %v24165_v9 = vld [vmem:[%s29960_s3 + $0xa0] sm:$0xff]  }
 0x2a3   :  { %22461 = vmatprep.subr.bf16.mxu1 %v24106_v7  ;;  %22406 = vmatmul.mubr.bf16.gmra.mxu1 %v24097_v22  ;;  %v24162_v22 = vld [vmem:[#allocation2 + $0x94] sm:$0xff]  }
 0x2a4   :  { %22366 = vmatmul.mubr.bf16.gmra.mxu0 %v24089_v38  ;;  %22409 = vmatprep.mubr.bf16.mxu1 %v24103_v26  ;;  %v24153_v38 = vld [vmem:[#allocation2 + $0x80] sm:$0xff]  }
 0x2a5   :  { %22422 = vmatpush3.bf16.msra.mxu0 %v24092_v20  ;;  %22369 = vmatprep.mubr.bf16.mxu0 %v24094_v54  ;;  %v24156_v20 = vld [vmem:[%s29960_s3 + $0x28] sm:$0xff]   ;;  %v24167_v26 = vld [vmem:[#allocation2 + $0x9c] sm:$0xff]  }
 0x2a6   :  { %22423 = vmatprep.subr.bf16.mxu0 %v24099_v51  ;;  %22462 = vmatpush3.bf16.msra.mxu1 %v24106_v7  ;;  %v24158_v54 = vld [vmem:[#allocation2 + $0x88] sm:$0xff]   ;;  %v24170_v7 = vld [vmem:[%s29960_s3 + $0x98] sm:$0xff]  }
 0x2a7   :  { %22463 = vmatprep.subr.bf16.mxu1 %v24108_v15 }
 0x2a9   :  { %22424 = vmatpush3.bf16.msra.mxu0 %v24099_v51  ;;  %v24160_v51 = vld [vmem:[%s29960_s3 + $0x20] sm:$0xff]  }
 0x2aa   :  { %22425 = vmatprep.subr.bf16.mxu0 %v24101_v39  ;;  %22464 = vmatpush3.bf16.msra.mxu1 %v24108_v15  ;;  %v24172_v15 = vld [vmem:[%s29960_s3 + $0x90] sm:$0xff]  }
 0x2ab   :  { %22521 = vmatprep.subr.bf16.mxu1 %v24119_v1  ;;  %22410 = vmatmul.mubr.bf16.gmra.mxu1 %v24105_v36  ;;  %v24173_v36 = vld [vmem:[%s29960_s3 + $0x8] sm:$0xff]  }
 0x2ac   :  { %22370 = vmatmul.mubr.bf16.gmra.mxu0 %v24096_v59  ;;  %22465 = vmatprep.mubr.bf16.mxu1 %v24110_v32  ;;  %v24161_v59 = vld [vmem:[#allocation2 + $0x98] sm:$0xff]   ;;  %v24175_v32 = vld [vmem:[#allocation2 + $0xac] sm:$0xff]  }
 0x2ad   :  { %22373 = vmatprep.mubr.bf16.mxu0 %v24102_v46  ;;  %22426 = vmatpush3.bf16.msra.mxu0 %v24101_v39  ;;  %v24164_v39 = vld [vmem:[%s29960_s3 + $0x18] sm:$0xff]   ;;  %v24166_v46 = vld [vmem:[#allocation2 + $0xa0] sm:$0xff]  }
 0x2ae   :  { %22427 = vmatprep.subr.bf16.mxu0 %v24107_v57 }
 0x2b1   :  { %22428 = vmatpush3.bf16.msra.mxu0 %v24107_v57  ;;  %v24171_v57 = vld [vmem:[%s29960_s3 + $0x10] sm:$0xff]  }
 0x2b2   :  { %22485 = vmatprep.subr.bf16.mxu0 %v24113_v21 }
 0x2b3   :  { %22466 = vmatmul.mubr.bf16.vlgmr.msra.gmra.mxu1 %v24112_v14  ;;  %v24180_v14 = vld [vmem:[%s29960_s3 + $0x80] sm:$0xff]  }
 0x2b4   :  { %22374 = vmatmul.mubr.bf16.gmra.mxu0 %v24104_v17  ;;  %22469 = vmatprep.mubr.bf16.mxu1 %v24116_v43  ;;  %v24168_v17 = vld [vmem:[#allocation2 + $0xa8] sm:$0xff]   ;;  %v24185_v43 = vld [vmem:[%s29960_s3 + $0xf8] sm:$0xff]  }
 0x2b5   :  { %22429 = vmatprep.mubr.bf16.mxu0 %v24109_v44  ;;  %22522 = vmatpush3.bf16.msra.mxu1 %v24119_v1  ;;  %v24178_v1 = vld [vmem:[%s29960_s3 + $0x88] sm:$0xff]   ;;  %v24174_v44 = vld [vmem:[#allocation2 + $0xb0] sm:$0xff]  }
 0x2b6   :  { %22523 = vmatprep.subr.bf16.mxu1 %v24121_v27 }
 0x2b9   :  { %22524 = vmatpush3.bf16.msra.mxu1 %v24121_v27  ;;  %v24191_v27 = vld [vmem:[%s29960_s3 + $0x138] sm:$0xff]  }
 0x2ba   :  { %22525 = vmatprep.subr.bf16.mxu1 %v24127_v37 }
 0x2bb   :  { %22470 = vmatmul.mubr.bf16.gmra.mxu1 %v24118_v45 }
 0x2bc   :  { %22430 = vmatmul.mubr.bf16.vlgmr.msra.gmra.mxu0 %v24111_v8  ;;  %22473 = vmatprep.mubr.bf16.mxu1 %v24123_v35  ;;  %v24179_v8 = vld [vmem:[%s29960_s3] sm:$0xff]  }
 0x2bd   :  { %22486 = vmatpush3.bf16.msra.mxu0 %v24113_v21  ;;  %22433 = vmatprep.mubr.bf16.mxu0 %v24115_v58  ;;  %v24169_v21 = vld [vmem:[#allocation2 + $0xa4] sm:$0xff]   ;;  %v24177_v58 = vld [vmem:[#allocation2 + $0xb4] sm:$0xff]  }
 0x2be   :  { %22487 = vmatprep.subr.bf16.mxu0 %v24114_v55  ;;  %22526 = vmatpush3.bf16.msra.mxu1 %v24127_v37 }
 0x2bf   :  { %22527 = vmatprep.subr.bf16.mxu1 %v24129_v10 }
 0x2c1   :  { %22488 = vmatpush3.bf16.msra.mxu0 %v24114_v55  ;;  %v24176_v55 = vld [vmem:[#allocation2 + $0xb8] sm:$0xff]  }
 0x2c2   :  { %22489 = vmatprep.subr.bf16.mxu0 %v24120_v25  ;;  %22528 = vmatpush3.bf16.msra.mxu1 %v24129_v10  ;;  %v24183_v10 = vld [vmem:[#allocation2 + $0x68] sm:$0xff]  }
 0x2c3   :  { %22529 = vmatprep.subr.bf16.mxu1 %v24134_v18  ;;  %22474 = vmatmul.mubr.bf16.gmra.mxu1 %v24126_v31  ;;  %v24184_v31 = vld [vmem:[#allocation2 + $0x70] sm:$0xff]  }
 0x2c4   :  { %22434 = vmatmul.mubr.bf16.gmra.mxu0 %v24117_v48  ;;  %22477 = vmatprep.mubr.bf16.mxu1 %v24131_v40  ;;  %v24181_v48 = vld [vmem:[#allocation2 + $0x60] sm:$0xff]  }
 0x2c5   :  { %22490 = vmatpush3.bf16.msra.mxu0 %v24120_v25  ;;  %22437 = vmatprep.mubr.bf16.mxu0 %v24122_v61  ;;  %v24182_v25 = vld [vmem:[#allocation2 + $0x68] sm:$0xff]  }
 0x2c6   :  { %22491 = vmatprep.subr.bf16.mxu0 %v24124_v47  ;;  %22530 = vmatpush3.bf16.msra.mxu1 %v24134_v18 }
 0x2c7   :  { %22531 = vmatprep.subr.bf16.mxu1 %v24136_v33 }
 0x2c9   :  { %22492 = vmatpush3.bf16.msra.mxu0 %v24124_v47 }
 0x2ca   :  { %22493 = vmatprep.subr.bf16.mxu0 %v24128_v13  ;;  %22532 = vmatpush3.bf16.msra.mxu1 %v24136_v33  ;;  %v24187_v33 = vld [vmem:[#allocation2 + $0x70] sm:$0xff]  }
 0x2cb   :  { %22533 = vmatprep.subr.bf16.mxu1 %v24142_v5  ;;  %22478 = vmatmul.mubr.bf16.gmra.mxu1 %v24133_v23 }
 0x2cc   :  { %22438 = vmatmul.mubr.bf16.gmra.mxu0 %v24125_v0  ;;  %22481 = vmatprep.mubr.bf16.mxu1 %v24139_v3 }
 0x2cd   :  { %22494 = vmatpush3.bf16.msra.mxu0 %v24128_v13  ;;  %22441 = vmatprep.mubr.bf16.mxu0 %v24130_v53  ;;  %v24186_v53 = vld [vmem:[%s29960_s3 + $0xf0] sm:$0xff]  }
 0x2ce   :  { %22495 = vmatprep.subr.bf16.mxu0 %v24135_v24  ;;  %22534 = vmatpush3.bf16.msra.mxu1 %v24142_v5 }
 0x2cf   :  { %22535 = vmatprep.subr.bf16.mxu1 %v24144_v2 }
 0x2d1   :  { %22496 = vmatpush3.bf16.msra.mxu0 %v24135_v24 }
 0x2d2   :  { %22497 = vmatprep.subr.bf16.mxu0 %v24137_v34  ;;  %22536 = vmatpush3.bf16.msra.mxu1 %v24144_v2 }
 0x2d3   :  { %22593 = vmatprep.subr.bf16.mxu1 %v24155_v60  ;;  %22482 = vmatmul.mubr.bf16.gmra.mxu1 %v24141_v11  ;;  %v24192_v11 = vld [vmem:[%s29960_s3 + $0xe8] sm:$0xff]  }
 0x2d4   :  { %22442 = vmatmul.mubr.bf16.gmra.mxu0 %v24132_v28  ;;  %22537 = vmatprep.mubr.bf16.mxu1 %v24146_v62 }
 0x2d5   :  { %22445 = vmatprep.mubr.bf16.mxu0 %v24138_v56  ;;  %22498 = vmatpush3.bf16.msra.mxu0 %v24137_v34  ;;  %v24188_v34 = vld [vmem:[#allocation2 + $0x78] sm:$0xff]   ;;  %v24193_v56 = vld [vmem:[%s29960_s3 + $0x130] sm:$0xff]  }
 0x2d6   :  { %22499 = vmatprep.subr.bf16.mxu0 %v24143_v42 }
 0x2d9   :  { %22500 = vmatpush3.bf16.msra.mxu0 %v24143_v42 }
 0x2da   :  { %22557 = vmatprep.subr.bf16.mxu0 %v24149_v16 }
 0x2db   :  { %22538 = vmatmul.mubr.bf16.vlgmr.msra.gmra.mxu1 %v24148_v49 }
 0x2dc   :  { %22446 = vmatmul.mubr.bf16.gmra.mxu0 %v24140_v50  ;;  %22541 = vmatprep.mubr.bf16.mxu1 %v24152_v30  ;;  %v24189_v50 = vld [vmem:[#allocation2 + $0x78] sm:$0xff]  }
 0x2dd   :  { %22501 = vmatprep.mubr.bf16.mxu0 %v24145_v41  ;;  %22594 = vmatpush3.bf16.msra.mxu1 %v24155_v60  ;;  %v24190_v60 = vld [vmem:[#allocation2 + $0x80] sm:$0xff]  }
 0x2de   :  { %22595 = vmatprep.subr.bf16.mxu1 %v24157_v12 }
 0x2e1   :  { %22596 = vmatpush3.bf16.msra.mxu1 %v24157_v12  ;;  %v24195_v12 = vld [vmem:[#allocation2 + $0x88] sm:$0xff]  }
 0x2e2   :  { %22597 = vmatprep.subr.bf16.mxu1 %v24163_v4 }
 0x2e3   :  { %22542 = vmatmul.mubr.bf16.gmra.mxu1 %v24154_v63 }
 0x2e4   :  { %22502 = vmatmul.mubr.bf16.vlgmr.msra.gmra.mxu0 %v24147_v19  ;;  %22545 = vmatprep.mubr.bf16.mxu1 %v24159_v29  ;;  %v24199_v19 = vld [vmem:[%s29960_s3 + $0x128] sm:$0xff]  }
 0x2e5   :  { %22558 = vmatpush3.bf16.msra.mxu0 %v24149_v16  ;;  %22505 = vmatprep.mubr.bf16.mxu0 %v24151_v52 }
 0x2e6   :  { %22559 = vmatprep.subr.bf16.mxu0 %v24150_v6  ;;  %22598 = vmatpush3.bf16.msra.mxu1 %v24163_v4 }
 0x2e7   :  { %22599 = vmatprep.subr.bf16.mxu1 %v24165_v9 }
 0x2e9   :  { %22560 = vmatpush3.bf16.msra.mxu0 %v24150_v6  ;;  %v24194_v6 = vld [vmem:[#allocation2 + $0x80] sm:$0xff]  }
 0x2ea   :  { %22561 = vmatprep.subr.bf16.mxu0 %v24156_v20  ;;  %22600 = vmatpush3.bf16.msra.mxu1 %v24165_v9 }
 0x2eb   :  { %22601 = vmatprep.subr.bf16.mxu1 %v24170_v7  ;;  %22546 = vmatmul.mubr.bf16.gmra.mxu1 %v24162_v22 }
 0x2ec   :  { %22506 = vmatmul.mubr.bf16.gmra.mxu0 %v24153_v38  ;;  %22549 = vmatprep.mubr.bf16.mxu1 %v24167_v26 }
 0x2ed   :  { %22562 = vmatpush3.bf16.msra.mxu0 %v24156_v20  ;;  %22509 = vmatprep.mubr.bf16.mxu0 %v24158_v54  ;;  %v24196_v20 = vld [vmem:[%s29960_s3 + $0xe0] sm:$0xff]  }
 0x2ee   :  { %22563 = vmatprep.subr.bf16.mxu0 %v24160_v51  ;;  %22602 = vmatpush3.bf16.msra.mxu1 %v24170_v7  ;;  %v24201_v54 = vld [vmem:[%s29960_s3 + $0x120] sm:$0xff]   ;;  %v24198_v7 = vld [vmem:[#allocation2 + $0x98] sm:$0xff]  }
 0x2ef   :  { %22603 = vmatprep.subr.bf16.mxu1 %v24172_v15 }
 0x2f1   :  { %22564 = vmatpush3.bf16.msra.mxu0 %v24160_v51 }
 0x2f2   :  { %22565 = vmatprep.subr.bf16.mxu0 %v24164_v39  ;;  %22604 = vmatpush3.bf16.msra.mxu1 %v24172_v15 }
 0x2f3   :  { %22605 = vmatprep.subr.bf16.mxu1 %v24178_v1  ;;  %22550 = vmatmul.mubr.bf16.gmra.mxu1 %v24169_v21 }
 0x2f4   :  { %22510 = vmatmul.mubr.bf16.gmra.mxu0 %v24161_v59  ;;  %22553 = vmatprep.mubr.bf16.mxu1 %v24175_v32  ;;  %v24197_v59 = vld [vmem:[#allocation2 + $0x90] sm:$0xff]  }
 0x2f5   :  { %22566 = vmatpush3.bf16.msra.mxu0 %v24164_v39  ;;  %22513 = vmatprep.mubr.bf16.mxu0 %v24166_v46  ;;  %v24200_v39 = vld [vmem:[%s29960_s3 + $0xd8] sm:$0xff]   ;;  %v24207_v32 = vld [vmem:[%s29960_s3 + $0xd0] sm:$0xff]  }
 0x2f6   :  { %22567 = vmatprep.subr.bf16.mxu0 %v24171_v57  ;;  %22606 = vmatpush3.bf16.msra.mxu1 %v24178_v1  ;;  %v24203_v1 = vld [vmem:[#allocation2 + $0xa0] sm:$0xff]  }
 0x2f7   :  { %22607 = vmatprep.subr.bf16.mxu1 %v24180_v14 }
 0x2f9   :  { %22568 = vmatpush3.bf16.msra.mxu0 %v24171_v57  ;;  %v24206_v57 = vld [vmem:[%s29960_s3 + $0x118] sm:$0xff]  }
 0x2fa   :  { %22569 = vmatprep.subr.bf16.mxu0 %v24173_v36  ;;  %22608 = vmatpush3.bf16.msra.mxu1 %v24180_v14 }
 0x2fb   :  { %22665 = vmatprep.subr.bf16.mxu1 %v24191_v27  ;;  %v22251_v37 = vpop.f32.mrf.mxu1  ;;  %22554 = vmatmul.mubr.bf16.gmra.mxu1 %v24177_v58 }
 0x2fc   :  { %22514 = vmatmul.mubr.bf16.gmra.mxu0 %v24168_v17  ;;  %22609 = vmatprep.mubr.bf16.mxu1 %v24182_v25  ;;  %v24202_v17 = vld [vmem:[#allocation2 + $0x98] sm:$0xff]   ;;  %v24209_v25 = vld [vmem:[%s29960_s3 + $0xc8] sm:$0xff]  }
 0x2fd   :  { %22517 = vmatprep.mubr.bf16.mxu0 %v24174_v44  ;;  %22570 = vmatpush3.bf16.msra.mxu0 %v24173_v36  ;;  %v3828_v47 = vpop.f32.mrf.mxu1 }
 0x2fe   :  { %22571 = vmatprep.subr.bf16.mxu0 %v24179_v8 }
 0x2ff   :  { %v22252_v18 = vpop.f32.mrf.mxu1 }
 0x301   :  { %22572 = vmatpush3.bf16.msra.mxu0 %v24179_v8  ;;  %v3831_v28 = vpop.f32.mrf.mxu1 }
 0x302   :  { %22629 = vmatprep.subr.bf16.mxu0 %v24185_v43 }
 0x303   :  { %v22255_v3 = vpop.f32.mrf.mxu1  ;;  %22610 = vmatmul.mubr.bf16.vlgmr.msra.gmra.mxu1 %v24184_v31  ;;  %v24210_v31 = vld [vmem:[#allocation2 + $0xa8] sm:$0xff]  }
 0x304   :  { %v22215_v45 = vpop.f32.mrf.mxu0  ;;  %22518 = vmatmul.mubr.bf16.gmra.mxu0 %v24176_v55  ;;  %22613 = vmatprep.mubr.bf16.mxu1 %v24188_v34  ;;  %v24208_v55 = vld [vmem:[%s29960_s3 + $0x110] sm:$0xff]  }
 0x305   :  { %22573 = vmatprep.mubr.bf16.mxu0 %v24181_v48  ;;  %v26830_v61 = vadd.f32 %v22251_v37, %v22215_v45  ;;  %v3844_v16 = vpop.f32.mrf.mxu1  ;;  %22666 = vmatpush3.bf16.msra.mxu1 %v24191_v27  ;;  %v24204_v48 = vld [vmem:[#allocation2 + $0xa0] sm:$0xff]   ;;  %v24205_v37 = vld [vmem:[#allocation2 + $0xa8] sm:$0xff]  }
 0x306   :  { %v3607_v35 = vpop.f32.mrf.mxu0  ;;  %22667 = vmatprep.subr.bf16.mxu1 %v24193_v56 }
 0x307   :  { %v26832_v0 = vadd.f32 %v3828_v47, %v3607_v35  ;;  %v22256_v49 = vpop.f32.mrf.mxu1 }
 0x308   :  { %v22216_v13 = vpop.f32.mrf.mxu0 }
 0x309   :  { %v26837_v40 = vadd.f32 %v22252_v18, %v22216_v13  ;;  %v3847_v38 = vpop.f32.mrf.mxu1  ;;  %22668 = vmatpush3.bf16.msra.mxu1 %v24193_v56  ;;  %v24216_v56 = vld [vmem:[%s29960_s3 + $0x100] sm:$0xff]  }
 0x30a   :  { %v3610_v24 = vpop.f32.mrf.mxu0  ;;  %22669 = vmatprep.subr.bf16.mxu1 %v24199_v19 }
 0x30b   :  { %v26839_v23 = vadd.f32 %v3831_v28, %v3610_v24  ;;  %v22259_v29 = vpop.f32.mrf.mxu1  ;;  %22614 = vmatmul.mubr.bf16.gmra.mxu1 %v24190_v60  ;;  %v24211_v24 = vld [vmem:[#allocation2 + $0xb0] sm:$0xff]   ;;  %v24215_v28 = vld [vmem:[%s29960_s3 + $0xc0] sm:$0xff]   ;;  %v24213_v60 = vld [vmem:[#allocation2 + $0xb8] sm:$0xff]  }
 0x30c   :  { %v22219_v5 = vpop.f32.mrf.mxu0  ;;  %22574 = vmatmul.mubr.bf16.vlgmr.msra.gmra.mxu0 %v24183_v10  ;;  %22617 = vmatprep.mubr.bf16.mxu1 %v24195_v12  ;;  %v24214_v10 = vld [vmem:[%s29960_s3 + $0x108] sm:$0xff]   ;;  %v24217_v12 = vld [vmem:[#allocation2 + $0x90] sm:$0xff]  }
 0x30d   :  { %22630 = vmatpush3.bf16.msra.mxu0 %v24185_v43  ;;  %v26844_v42 = vadd.f32 %v22255_v3, %v22219_v5  ;;  %22577 = vmatprep.mubr.bf16.mxu0 %v24187_v33  ;;  %v3860_v22 = vpop.f32.mrf.mxu1 }
 0x30e   :  { %v3623_v2 = vpop.f32.mrf.mxu0  ;;  %22631 = vmatprep.subr.bf16.mxu0 %v24186_v53  ;;  %22670 = vmatpush3.bf16.msra.mxu1 %v24199_v19 }
 0x30f   :  { %v26849_v41 = vadd.f32 %v3844_v16, %v3623_v2  ;;  %22671 = vmatprep.subr.bf16.mxu1 %v24201_v54  ;;  %v22260_v15 = vpop.f32.mrf.mxu1 }
 0x310   :  { %v22220_v62 = vpop.f32.mrf.mxu0 }
 0x311   :  { %22632 = vmatpush3.bf16.msra.mxu0 %v24186_v53  ;;  %v26854_v52 = vadd.f32 %v22256_v49, %v22220_v62  ;;  %v3863_v44 = vpop.f32.mrf.mxu1  ;;  %v24221_v62 = vld [vmem:[%s29960_s3 + $0x178] sm:$0xff]  }
 0x312   :  { %v3626_v30 = vpop.f32.mrf.mxu0  ;;  %22633 = vmatprep.subr.bf16.mxu0 %v24192_v11  ;;  %22672 = vmatpush3.bf16.msra.mxu1 %v24201_v54 }
 0x313   :  { %v26859_v63 = vadd.f32 %v3847_v38, %v3626_v30  ;;  %22673 = vmatprep.subr.bf16.mxu1 %v24206_v57  ;;  %v22263_v58 = vpop.f32.mrf.mxu1  ;;  %22618 = vmatmul.mubr.bf16.gmra.mxu1 %v24198_v7 }
 0x314   :  { %v22223_v4 = vpop.f32.mrf.mxu0  ;;  %22578 = vmatmul.mubr.bf16.gmra.mxu0 %v24189_v50  ;;  %22621 = vmatprep.mubr.bf16.mxu1 %v24203_v1 }
 0x315   :  { %22634 = vmatpush3.bf16.msra.mxu0 %v24192_v11  ;;  %v26864_v51 = vadd.f32 %v22259_v29, %v22223_v4  ;;  %22581 = vmatprep.mubr.bf16.mxu0 %v24194_v6  ;;  %v3876_v45 = vpop.f32.mrf.mxu1  ;;  %v24212_v11 = vld [vmem:[#allocation2 + $0xb0] sm:$0xff]   ;;  %v24227_v6 = vld [vmem:[%s29960_s3 + $0x1b8] sm:$0xff]  }
 0x316   :  { %v3639_v9 = vpop.f32.mrf.mxu0  ;;  %22635 = vmatprep.subr.bf16.mxu0 %v24196_v20  ;;  %22674 = vmatpush3.bf16.msra.mxu1 %v24206_v57  ;;  %v24218_v4 = vld [vmem:[#allocation2 + $0x94] sm:$0xff]  }
 0x317   :  { %v26869_v46 = vadd.f32 %v3860_v22, %v3639_v9  ;;  %22675 = vmatprep.subr.bf16.mxu1 %v24208_v55  ;;  %v22264_v13 = vpop.f32.mrf.mxu1 }
 0x318   :  { %v22224_v26 = vpop.f32.mrf.mxu0 }
 0x319   :  { %22636 = vmatpush3.bf16.msra.mxu0 %v24196_v20  ;;  %v26874_v36 = vadd.f32 %v22260_v15, %v22224_v26  ;;  %v3879_v33 = vpop.f32.mrf.mxu1  ;;  %v24219_v15 = vld [vmem:[#allocation2 + $0x98] sm:$0xff]  }
 0x31a   :  { %v3642_v21 = vpop.f32.mrf.mxu0  ;;  %22637 = vmatprep.subr.bf16.mxu0 %v24200_v39  ;;  %22676 = vmatpush3.bf16.msra.mxu1 %v24208_v55  ;;  %v24223_v55 = vld [vmem:[#allocation2 + $0xa0] sm:$0xff]  }
 0x31b   :  { %v26879_v8 = vadd.f32 %v3863_v44, %v3642_v21  ;;  %22677 = vmatprep.subr.bf16.mxu1 %v24214_v10  ;;  %v22267_v3 = vpop.f32.mrf.mxu1  ;;  %22622 = vmatmul.mubr.bf16.gmra.mxu1 %v24205_v37  ;;  %v24220_v21 = vld [vmem:[#allocation2 + $0x9c] sm:$0xff]  }
 0x31c   :  { %v22227_v14 = vpop.f32.mrf.mxu0  ;;  %22582 = vmatmul.mubr.bf16.gmra.mxu0 %v24197_v59  ;;  %22625 = vmatprep.mubr.bf16.mxu1 %v24211_v24 }
 0x31d   :  { %22638 = vmatpush3.bf16.msra.mxu0 %v24200_v39  ;;  %v26884_v43 = vadd.f32 %v22263_v58, %v22227_v14  ;;  %22585 = vmatprep.mubr.bf16.mxu0 %v24202_v17  ;;  %v3892_v16 = vpop.f32.mrf.mxu1 }
 0x31e   :  { %v3655_v27 = vpop.f32.mrf.mxu0  ;;  %22639 = vmatprep.subr.bf16.mxu0 %v24207_v32  ;;  %22678 = vmatpush3.bf16.msra.mxu1 %v24214_v10 }
 0x31f   :  { %v26889_v35 = vadd.f32 %v3876_v45, %v3655_v27  ;;  %22679 = vmatprep.subr.bf16.mxu1 %v24216_v56  ;;  %v22268_v30 = vpop.f32.mrf.mxu1  ;;  %v24229_v45 = vld [vmem:[%s29960_s3 + $0x1b0] sm:$0xff]  }
 0x320   :  { %v22228_v47 = vpop.f32.mrf.mxu0 }
 0x321   :  { %22640 = vmatpush3.bf16.msra.mxu0 %v24207_v32  ;;  %v26894_v18 = vadd.f32 %v22264_v13, %v22228_v47  ;;  %v3895_v54 = vpop.f32.mrf.mxu1  ;;  %v24225_v13 = vld [vmem:[#allocation2 + $0xa8] sm:$0xff]  }
 0x322   :  { %v3658_v53 = vpop.f32.mrf.mxu0  ;;  %22641 = vmatprep.subr.bf16.mxu0 %v24209_v25  ;;  %22680 = vmatpush3.bf16.msra.mxu1 %v24216_v56 }
 0x323   :  { %v26899_v34 = vadd.f32 %v3879_v33, %v3658_v53  ;;  %22737 = vmatprep.subr.bf16.mxu1 %v24227_v6  ;;  %v22323_v39 = vpop.f32.mrf.mxu1  ;;  %22626 = vmatmul.mubr.bf16.gmra.mxu1 %v24213_v60  ;;  %v24226_v33 = vld [vmem:[#allocation2 + $0xac] sm:$0xff]  }
 0x324   :  { %v22231_v5 = vpop.f32.mrf.mxu0  ;;  %22586 = vmatmul.mubr.bf16.gmra.mxu0 %v24204_v48  ;;  %22681 = vmatprep.mubr.bf16.mxu1 %v24218_v4  ;;  %v24224_v48 = vld [vmem:[#allocation2 + $0xa4] sm:$0xff]  }
 0x325   :  { %22589 = vmatprep.mubr.bf16.mxu0 %v24210_v31  ;;  %v26904_v2 = vadd.f32 %v22267_v3, %v22231_v5  ;;  %22642 = vmatpush3.bf16.msra.mxu0 %v24209_v25  ;;  %v4366_v57 = vpop.f32.mrf.mxu1  ;;  %v24233_v4 = vld [vmem:[#allocation2 + $0xc0] sm:$0xff]  }
 0x326   :  { %v3671_v50 = vpop.f32.mrf.mxu0  ;;  %22643 = vmatprep.subr.bf16.mxu0 %v24215_v28 }
 0x327   :  { %v26909_v19 = vadd.f32 %v3892_v16, %v3671_v50  ;;  %v22324_v32 = vpop.f32.mrf.mxu1  ;;  %v24230_v50 = vld [vmem:[#allocation2 + $0xb0] sm:$0xff]  }
 0x328   :  { %v22232_v49 = vpop.f32.mrf.mxu0 }
 0x329   :  { %v26914_v38 = vadd.f32 %v22268_v30, %v22232_v49  ;;  %22644 = vmatpush3.bf16.msra.mxu0 %v24215_v28  ;;  %v24235_v28 = vld [vmem:[%s29960_s3 + $0x1a8] sm:$0xff]   ;;  %v24232_v49 = vld [vmem:[%s29960_s3 + $0x160] sm:$0xff]  }
 0x32a   :  { %v3674_v20 = vpop.f32.mrf.mxu0  ;;  %22701 = vmatprep.subr.bf16.mxu0 %v24221_v62 }
 0x32b   :  { %v26916_v29 = vadd.f32 %v3895_v54, %v3674_v20  ;;  %22682 = vmatmul.mubr.bf16.vlgmr.msra.gmra.mxu1 %v24220_v21  ;;  %v24236_v54 = vld [vmem:[%s29960_s3 + $0x158] sm:$0xff]   ;;  %v24238_v21 = vld [vmem:[#allocation2 + $0xc8] sm:$0xff]  }
 0x32c   :  { %v22287_v9 = vpop.f32.mrf.mxu0  ;;  %22590 = vmatmul.mubr.bf16.gmra.mxu0 %v24212_v11  ;;  %22685 = vmatprep.mubr.bf16.mxu1 %v24224_v48 }
 0x32d   :  { %v4168_v59 = vadd.f32 %v22287_v9, %v26830_v61  ;;  %22645 = vmatprep.mubr.bf16.mxu0 %v24217_v12  ;;  %v24222_v61 = vld [vmem:[%s29960_s3 + $0x170] sm:$0xff]   ;;  %22738 = vmatpush3.bf16.msra.mxu1 %v24227_v6 }
 0x32e   :  { %v4087_v22 = vpop.f32.mrf.mxu0  ;;  %22739 = vmatprep.subr.bf16.mxu1 %v24229_v45 }
 0x32f   :  { %v26919_v7 = vadd.f32 %v22323_v39, %v4168_v59  ;;  %v4166_v26 = vadd.f32 %v4087_v22, %v26832_v0  ;;  %v4369_v0 = vpop.f32.mrf.mxu1  ;;  %v24234_v22 = vld [vmem:[#allocation2 + $0xc4] sm:$0xff]  }
 0x330   :  { %v22288_v17 = vpop.f32.mrf.mxu0 }
 0x331   :  { %v26922_v1 = vadd.f32 %v4366_v57, %v4166_v26  ;;  %v4169_v44 = vadd.f32 %v22288_v17, %v26837_v40  ;;  %v22327_v47 = vpop.f32.mrf.mxu1  ;;  %22740 = vmatpush3.bf16.msra.mxu1 %v24229_v45  ;;  %v24242_v26 = vld [vmem:[%s29960_s3 + $0x198] sm:$0xff]   ;;  %v24240_v45 = vld [vmem:[#allocation2 + $0xd0] sm:$0xff]  }
 0x332   :  { %v4090_v14 = vpop.f32.mrf.mxu0  ;;  %22741 = vmatprep.subr.bf16.mxu1 %v24235_v28 }
 0x333   :  { %v26928_v58 = vadd.f32 %v22324_v32, %v4169_v44  ;;  %v4167_v27 = vadd.f32 %v4090_v14, %v26839_v23  ;;  %v24228_v23 = vld [vmem:[%s29960_s3 + $0x168] sm:$0xff]   ;;  %v4382_v24 = vpop.f32.mrf.mxu1  ;;  %22686 = vmatmul.mubr.bf16.gmra.mxu1 %v24226_v33 }
 0x334   :  { %v22291_v25 = vpop.f32.mrf.mxu0  ;;  %22646 = vmatmul.mubr.bf16.vlgmr.msra.gmra.mxu0 %v24219_v15 }
 0x335   :  { %v26934_v40 = vadd.f32 %v4369_v0, %v4167_v27  ;;  %v4172_v37 = vadd.f32 %v22291_v25, %v26844_v42  ;;  %22702 = vmatpush3.bf16.msra.mxu0 %v24221_v62  ;;  %22649 = vmatprep.mubr.bf16.mxu0 %v24223_v55  ;;  %v22328_v3 = vpop.f32.mrf.mxu1  ;;  %v24243_v55 = vld [vmem:[%s29960_s3 + $0x150] sm:$0xff]  }
 0x336   :  { %v4103_v10 = vpop.f32.mrf.mxu0  ;;  %22703 = vmatprep.subr.bf16.mxu0 %v24222_v61  ;;  %22742 = vmatpush3.bf16.msra.mxu1 %v24235_v28  ;;  %v24246_v28 = vld [vmem:[#allocation2 + $0xd8] sm:$0xff]  }
 0x337   :  { %v26940_v31 = vadd.f32 %v22327_v47, %v4172_v37  ;;  %v4170_v53 = vadd.f32 %v4103_v10, %v26849_v41  ;;  %v24231_v41 = vld [vmem:[#allocation2 + $0xb4] sm:$0xff]   ;;  %v4385_v62 = vpop.f32.mrf.mxu1  ;;  %v24245_v37 = vld [vmem:[%s29960_s3 + $0x148] sm:$0xff]  }
 0x338   :  { %v22292_v42 = vpop.f32.mrf.mxu0  ;;  %22689 = vmatprep.mubr.bf16.mxu1 %v24231_v41  ;;  %v24251_v41 = vld [vmem:[%s29960_s3 + $0x140] sm:$0xff]  }
 0x339   :  { %v26946_v5 = vadd.f32 %v4382_v24, %v4170_v53  ;;  %v4173_v56 = vadd.f32 %v22292_v42, %v26854_v52  ;;  %22704 = vmatpush3.bf16.msra.mxu0 %v24222_v61  ;;  %v24237_v52 = vld [vmem:[%s29960_s3 + $0x1a0] sm:$0xff]   ;;  %v22331_v20 = vpop.f32.mrf.mxu1  ;;  %v24250_v53 = vld [vmem:[%s29960_s3 + $0x188] sm:$0xff]  }
 0x33a   :  { %v4106_v11 = vpop.f32.mrf.mxu0  ;;  %22705 = vmatprep.subr.bf16.mxu0 %v24228_v23  ;;  %22743 = vmatprep.subr.bf16.mxu1 %v24237_v52 }
 0x33b   :  { %v26949_v16 = vadd.f32 %v22328_v3, %v4173_v56  ;;  %v4171_v60 = vadd.f32 %v4106_v11, %v26859_v63  ;;  %v4398_v39 = vpop.f32.mrf.mxu1  ;;  %22744 = vmatpush3.bf16.msra.mxu1 %v24237_v52  ;;  %v24248_v52 = vld [vmem:[#allocation2 + $0xe0] sm:$0xff]  }
 0x33c   :  { %v22295_v6 = vpop.f32.mrf.mxu0  ;;  %22650 = vmatmul.mubr.bf16.gmra.mxu0 %v24225_v13  ;;  %22745 = vmatprep.subr.bf16.mxu1 %v24242_v26 }
 0x33d   :  { %v26958_v30 = vadd.f32 %v4385_v62, %v4171_v60  ;;  %v4176_v12 = vadd.f32 %v22295_v6, %v26864_v51  ;;  %22706 = vmatpush3.bf16.msra.mxu0 %v24228_v23  ;;  %22653 = vmatprep.mubr.bf16.mxu0 %v24230_v50  ;;  %v22332_v17 = vpop.f32.mrf.mxu1  ;;  %v24241_v23 = vld [vmem:[#allocation2 + $0xd4] sm:$0xff]  }
 0x33e   :  { %v4119_v63 = vpop.f32.mrf.mxu0  ;;  %22707 = vmatprep.subr.bf16.mxu0 %v24232_v49  ;;  %22690 = vmatmul.mubr.bf16.gmra.mxu1 %v24234_v22 }
 0x33f   :  { %v26964_v9 = vadd.f32 %v22331_v20, %v4176_v12  ;;  %v4174_v59 = vadd.f32 %v4119_v63, %v26869_v46  ;;  %v24239_v46 = vld [vmem:[#allocation2 + $0xcc] sm:$0xff]   ;;  %v4401_v14 = vpop.f32.mrf.mxu1  ;;  %22746 = vmatpush3.bf16.msra.mxu1 %v24242_v26 }
 0x340   :  { %v22296_v51 = vpop.f32.mrf.mxu0  ;;  %22693 = vmatprep.mubr.bf16.mxu1 %v24239_v46 }
 0x341   :  { %v26970_v57 = vadd.f32 %v4398_v39, %v4174_v59  ;;  %v4177_v15 = vadd.f32 %v22296_v51, %v26874_v36  ;;  %22708 = vmatpush3.bf16.msra.mxu0 %v24232_v49  ;;  %v24244_v36 = vld [vmem:[%s29960_s3 + $0x190] sm:$0xff]   ;;  %v22335_v25 = vpop.f32.mrf.mxu1  ;;  %v24263_v59 = vld [vmem:[%s29960_s3 + $0x238] sm:$0xff]  }
 0x342   :  { %v4122_v44 = vpop.f32.mrf.mxu0  ;;  %22709 = vmatprep.subr.bf16.mxu0 %v24236_v54  ;;  %22747 = vmatprep.subr.bf16.mxu1 %v24244_v36 }
 0x343   :  { %v26973_v32 = vadd.f32 %v22332_v17, %v4177_v15  ;;  %v4175_v61 = vadd.f32 %v4122_v44, %v26879_v8  ;;  %v4414_v13 = vpop.f32.mrf.mxu1  ;;  %22748 = vmatpush3.bf16.msra.mxu1 %v24244_v36  ;;  %v24254_v15 = vld [vmem:[#allocation2 + $0xc0] sm:$0xff]  }
 0x344   :  { %v22299_v27 = vpop.f32.mrf.mxu0  ;;  %22654 = vmatmul.mubr.bf16.gmra.mxu0 %v24233_v4  ;;  %22749 = vmatprep.subr.bf16.mxu1 %v24250_v53  ;;  %v24249_v4 = vld [vmem:[#allocation2 + $0xe4] sm:$0xff]  }
 0x345   :  { %v26982_v0 = vadd.f32 %v4401_v14, %v4175_v61  ;;  %v4180_v48 = vadd.f32 %v22299_v27, %v26884_v43  ;;  %22710 = vmatpush3.bf16.msra.mxu0 %v24236_v54  ;;  %22657 = vmatprep.mubr.bf16.mxu0 %v24238_v21  ;;  %v22336_v42 = vpop.f32.mrf.mxu1  ;;  %v24257_v54 = vld [vmem:[%s29960_s3 + $0x1f8] sm:$0xff]  }
 0x346   :  { %v4135_v8 = vpop.f32.mrf.mxu0  ;;  %22711 = vmatprep.subr.bf16.mxu0 %v24243_v55  ;;  %22694 = vmatmul.mubr.bf16.gmra.mxu1 %v24241_v23  ;;  %v24259_v23 = vld [vmem:[#allocation2 + $0xa8] sm:$0xff]  }
 0x347   :  { %v26988_v47 = vadd.f32 %v22335_v25, %v4180_v48  ;;  %v4178_v10 = vadd.f32 %v4135_v8, %v26889_v35  ;;  %v24247_v35 = vld [vmem:[#allocation2 + $0xdc] sm:$0xff]   ;;  %v4417_v11 = vpop.f32.mrf.mxu1  ;;  %22750 = vmatpush3.bf16.msra.mxu1 %v24250_v53  ;;  %v24256_v8 = vld [vmem:[#allocation2 + $0xc8] sm:$0xff]  }
 0x348   :  { %v22300_v43 = vpop.f32.mrf.mxu0  ;;  %22697 = vmatprep.mubr.bf16.mxu1 %v24247_v35  ;;  %v24255_v48 = vld [vmem:[#allocation2 + $0xa0] sm:$0xff]  }
 0x349   :  { %v26994_v24 = vadd.f32 %v4414_v13, %v4178_v10  ;;  %v4181_v33 = vadd.f32 %v22300_v43, %v26894_v18  ;;  %22712 = vmatpush3.bf16.msra.mxu0 %v24243_v55  ;;  %v24252_v18 = vld [vmem:[%s29960_s3 + $0x180] sm:$0xff]   ;;  %v22339_v6 = vpop.f32.mrf.mxu1 }
 0x34a   :  { %v4138_v56 = vpop.f32.mrf.mxu0  ;;  %22713 = vmatprep.subr.bf16.mxu0 %v24245_v37  ;;  %22751 = vmatprep.subr.bf16.mxu1 %v24252_v18 }
 0x34b   :  { %v26997_v3 = vadd.f32 %v22336_v42, %v4181_v33  ;;  %v4179_v50 = vadd.f32 %v4138_v56, %v26899_v34  ;;  %v4430_v63 = vpop.f32.mrf.mxu1  ;;  %22752 = vmatpush3.bf16.msra.mxu1 %v24252_v18  ;;  %v24260_v33 = vld [vmem:[#allocation2 + $0xd0] sm:$0xff]  }
 0x34c   :  { %v22303_v60 = vpop.f32.mrf.mxu0  ;;  %22658 = vmatmul.mubr.bf16.gmra.mxu0 %v24240_v45  ;;  %22809 = vmatprep.subr.bf16.mxu1 %v24263_v59 }
 0x34d   :  { %v27006_v62 = vadd.f32 %v4417_v11, %v4179_v50  ;;  %v4184_v49 = vadd.f32 %v22303_v60, %v26904_v2  ;;  %22661 = vmatprep.mubr.bf16.mxu0 %v24246_v28  ;;  %22714 = vmatpush3.bf16.msra.mxu0 %v24245_v37  ;;  %v22340_v51 = vpop.f32.mrf.mxu1  ;;  %v24265_v28 = vld [vmem:[%s29960_s3 + $0x230] sm:$0xff]  }
 0x34e   :  { %v4151_v34 = vpop.f32.mrf.mxu0  ;;  %22715 = vmatprep.subr.bf16.mxu0 %v24251_v41  ;;  %22698 = vmatmul.mubr.bf16.gmra.mxu1 %v24249_v4  ;;  %v24261_v11 = vld [vmem:[#allocation2 + $0xb0] sm:$0xff]  }
 0x34f   :  { %v27009_v12 = vadd.f32 %v22339_v6, %v4184_v49  ;;  %v4182_v20 = vadd.f32 %v4151_v34, %v26909_v19  ;;  %v24253_v19 = vld [vmem:[#allocation2 + $0x98] sm:$0xff]   ;;  %v4433_v44 = vpop.f32.mrf.mxu1  ;;  %22753 = vmatprep.mubr.bf16.mxu1 %v24254_v15  ;;  %v24271_v6 = vld [vmem:[%s29960_s3 + $0x228] sm:$0xff]  }
 0x350   :  { %v22304_v2 = vpop.f32.mrf.mxu0  ;;  %v24262_v49 = vld [vmem:[#allocation2 + $0xd8] sm:$0xff]  }
 0x351   :  { %v27018_v39 = vadd.f32 %v4430_v63, %v4182_v20  ;;  %v4185_v22 = vadd.f32 %v22304_v2, %v26914_v38  ;;  %22716 = vmatpush3.bf16.msra.mxu0 %v24251_v41  ;;  %v22395_v38 = vpop.f32.mrf.mxu1  ;;  %v24266_v63 = vld [vmem:[#allocation2 + $0xb8] sm:$0xff]  }
 0x352   :  { %v4154_v26 = vpop.f32.mrf.mxu0  ;;  %22773 = vmatprep.subr.bf16.mxu0 %v24257_v54 }
 0x353   :  { %v27021_v17 = vadd.f32 %v22340_v51, %v4185_v22  ;;  %v4183_v21 = vadd.f32 %v4154_v26, %v26916_v29  ;;  %v4924_v29 = vpop.f32.mrf.mxu1  ;;  %v24268_v22 = vld [vmem:[%s29960_s3 + $0x1e0] sm:$0xff]  }
 0x354   :  { %v22359_v46 = vpop.f32.mrf.mxu0  ;;  %22662 = vmatmul.mubr.bf16.gmra.mxu0 %v24248_v52 }
 0x355   :  { %v27024_v61 = vadd.f32 %v4433_v44, %v4183_v21  ;;  %v4726_v14 = vadd.f32 %v22359_v46, %v26919_v7  ;;  %22717 = vmatprep.mubr.bf16.mxu0 %v24253_v19  ;;  %v22396_v10 = vpop.f32.mrf.mxu1  ;;  %v24258_v7 = vld [vmem:[%s29960_s3 + $0x1f0] sm:$0xff]   ;;  %v24269_v21 = vld [vmem:[#allocation2 + $0xc8] sm:$0xff]   ;;  %v24272_v44 = vld [vmem:[%s29960_s3 + $0x1d8] sm:$0xff]  }
 0x356   :  { %v4645_v55 = vpop.f32.mrf.mxu0  ;;  %22754 = vmatmul.mubr.bf16.vlgmr.msra.gmra.mxu1 %v24256_v8  ;;  %v24274_v8 = vld [vmem:[#allocation2 + $0xd0] sm:$0xff]  }
 0x357   :  { %v27027_v27 = vadd.f32 %v22395_v38, %v4726_v14  ;;  %v4724_v36 = vadd.f32 %v4645_v55, %v26922_v1  ;;  %v4927_v1 = vpop.f32.mrf.mxu1  ;;  %22757 = vmatprep.mubr.bf16.mxu1 %v24260_v33  ;;  %22810 = vmatpush3.bf16.msra.mxu1 %v24263_v59  ;;  %v24270_v55 = vld [vmem:[#allocation2 + $0xf0] sm:$0xff]  }
 0x358   :  { %v22360_v25 = vpop.f32.mrf.mxu0  ;;  %22811 = vmatprep.subr.bf16.mxu1 %v24265_v28 }
 0x359   :  { %v27030_v45 = vadd.f32 %v4924_v29, %v4724_v36  ;;  %v4727_v37 = vadd.f32 %v22360_v25, %v26928_v58  ;;  %v22399_v35 = vpop.f32.mrf.mxu1  ;;  %v24278_v36 = vld [vmem:[%s29960_s3 + $0x218] sm:$0xff]  }
 0x35a   :  { %v4648_v13 = vpop.f32.mrf.mxu0 }
 0x35b   :  { %v27036_v43 = vadd.f32 %v22396_v10, %v4727_v37  ;;  %v4725_v53 = vadd.f32 %v4648_v13, %v26934_v40  ;;  %v24264_v40 = vld [vmem:[%s29960_s3 + $0x1e8] sm:$0xff]   ;;  %v4940_v18 = vpop.f32.mrf.mxu1  ;;  %22812 = vmatpush3.bf16.msra.mxu1 %v24265_v28  ;;  %v24276_v28 = vld [vmem:[#allocation2 + $0xd8] sm:$0xff]  }
 0x35c   :  { %v22363_v42 = vpop.f32.mrf.mxu0  ;;  %22718 = vmatmul.mubr.bf16.vlgmr.msra.gmra.mxu0 %v24255_v48  ;;  %22813 = vmatprep.subr.bf16.mxu1 %v24271_v6 }
 0x35d   :  { %v27042_v58 = vadd.f32 %v4927_v1, %v4725_v53  ;;  %v4730_v56 = vadd.f32 %v22363_v42, %v26940_v31  ;;  %22774 = vmatpush3.bf16.msra.mxu0 %v24257_v54  ;;  %22721 = vmatprep.mubr.bf16.mxu0 %v24259_v23  ;;  %v22400_v20 = vpop.f32.mrf.mxu1  ;;  %v24279_v23 = vld [vmem:[%s29960_s3 + $0x1d0] sm:$0xff]  }
 0x35e   :  { %v4661_v50 = vpop.f32.mrf.mxu0  ;;  %22775 = vmatprep.subr.bf16.mxu0 %v24258_v7  ;;  %22758 = vmatmul.mubr.bf16.gmra.mxu1 %v24262_v49 }
 0x35f   :  { %v27048_v41 = vadd.f32 %v22399_v35, %v4730_v56  ;;  %v4728_v60 = vadd.f32 %v4661_v50, %v26946_v5  ;;  %v24267_v5 = vld [vmem:[#allocation2 + $0xe0] sm:$0xff]   ;;  %v4943_v59 = vpop.f32.mrf.mxu1  ;;  %22814 = vmatpush3.bf16.msra.mxu1 %v24271_v6  ;;  %v24281_v56 = vld [vmem:[%s29960_s3 + $0x1c8] sm:$0xff]  }
 0x360   :  { %v22364_v31 = vpop.f32.mrf.mxu0  ;;  %22761 = vmatprep.mubr.bf16.mxu1 %v24267_v5  ;;  %v24282_v6 = vld [vmem:[#allocation2 + $0xe0] sm:$0xff]  }
 0x361   :  { %v27054_v34 = vadd.f32 %v4940_v18, %v4728_v60  ;;  %v4731_v52 = vadd.f32 %v22364_v31, %v26949_v16  ;;  %22776 = vmatpush3.bf16.msra.mxu0 %v24258_v7  ;;  %v24273_v16 = vld [vmem:[%s29960_s3 + $0x220] sm:$0xff]   ;;  %v22403_v15 = vpop.f32.mrf.mxu1  ;;  %v24286_v60 = vld [vmem:[%s29960_s3 + $0x208] sm:$0xff]  }
 0x362   :  { %v4664_v4 = vpop.f32.mrf.mxu0  ;;  %22777 = vmatprep.subr.bf16.mxu0 %v24264_v40  ;;  %22815 = vmatprep.subr.bf16.mxu1 %v24273_v16  ;;  %v24287_v5 = vld [vmem:[%s29960_s3 + $0x1c0] sm:$0xff]  }
 0x363   :  { %v27057_v54 = vadd.f32 %v22400_v20, %v4731_v52  ;;  %v4729_v2 = vadd.f32 %v4664_v4, %v26958_v30  ;;  %v4956_v38 = vpop.f32.mrf.mxu1  ;;  %22816 = vmatpush3.bf16.msra.mxu1 %v24273_v16  ;;  %v24284_v16 = vld [vmem:[#allocation2 + $0xe8] sm:$0xff]  }
 0x364   :  { %v22367_v51 = vpop.f32.mrf.mxu0  ;;  %22722 = vmatmul.mubr.bf16.gmra.mxu0 %v24261_v11  ;;  %22817 = vmatprep.subr.bf16.mxu1 %v24278_v36 }
 0x365   :  { %v27066_v19 = vadd.f32 %v4943_v59, %v4729_v2  ;;  %v4734_v26 = vadd.f32 %v22367_v51, %v26964_v9  ;;  %22778 = vmatpush3.bf16.msra.mxu0 %v24264_v40  ;;  %22725 = vmatprep.mubr.bf16.mxu0 %v24266_v63  ;;  %v22404_v25 = vpop.f32.mrf.mxu1  ;;  %v24277_v40 = vld [vmem:[#allocation2 + $0x100] sm:$0xff]  }
 0x366   :  { %v4677_v30 = vpop.f32.mrf.mxu0  ;;  %22779 = vmatprep.subr.bf16.mxu0 %v24268_v22  ;;  %22762 = vmatmul.mubr.bf16.gmra.mxu1 %v24270_v55 }
 0x367   :  { %v27072_v46 = vadd.f32 %v22403_v15, %v4734_v26  ;;  %v4732_v14 = vadd.f32 %v4677_v30, %v26970_v57  ;;  %v24275_v57 = vld [vmem:[#allocation2 + $0xf8] sm:$0xff]   ;;  %v4959_v13 = vpop.f32.mrf.mxu1  ;;  %22818 = vmatpush3.bf16.msra.mxu1 %v24278_v36 }
 0x368   :  { %v22368_v9 = vpop.f32.mrf.mxu0  ;;  %22765 = vmatprep.mubr.bf16.mxu1 %v24275_v57 }
 0x369   :  { %v27078_v29 = vadd.f32 %v4956_v38, %v4732_v14  ;;  %v4735_v48 = vadd.f32 %v22368_v9, %v26973_v32  ;;  %22780 = vmatpush3.bf16.msra.mxu0 %v24268_v22  ;;  %v24280_v32 = vld [vmem:[%s29960_s3 + $0x210] sm:$0xff]   ;;  %v22407_v42 = vpop.f32.mrf.mxu1  ;;  %v24299_v14 = vld [vmem:[%s29960_s3 + $0x38] sm:$0xff]  }
 0x36a   :  { %v4680_v37 = vpop.f32.mrf.mxu0  ;;  %22781 = vmatprep.subr.bf16.mxu0 %v24272_v44  ;;  %22819 = vmatprep.subr.bf16.mxu1 %v24280_v32 }
 0x36b   :  { %v27081_v10 = vadd.f32 %v22404_v25, %v4735_v48  ;;  %v4733_v7 = vadd.f32 %v4680_v37, %v26982_v0  ;;  %v4972_v11 = vpop.f32.mrf.mxu1  ;;  %22820 = vmatpush3.bf16.msra.mxu1 %v24280_v32  ;;  %v24290_v48 = vld [vmem:[#allocation2 + $0xc8] sm:$0xff]  }
 0x36c   :  { %v22371_v53 = vpop.f32.mrf.mxu0  ;;  %22726 = vmatmul.mubr.bf16.gmra.mxu0 %v24269_v21  ;;  %22821 = vmatprep.subr.bf16.mxu1 %v24286_v60  ;;  %v24285_v21 = vld [vmem:[#allocation2 + $0x110] sm:$0xff]  }
 0x36d   :  { %v27090_v1 = vadd.f32 %v4959_v13, %v4733_v7  ;;  %v4738_v33 = vadd.f32 %v22371_v53, %v26988_v47  ;;  %22782 = vmatpush3.bf16.msra.mxu0 %v24272_v44  ;;  %22729 = vmatprep.mubr.bf16.mxu0 %v24274_v8  ;;  %v22408_v31 = vpop.f32.mrf.mxu1  ;;  %v24293_v44 = vld [vmem:[%s29960_s3 + $0x78] sm:$0xff]  }
 0x36e   :  { %v4693_v0 = vpop.f32.mrf.mxu0  ;;  %22783 = vmatprep.subr.bf16.mxu0 %v24279_v23  ;;  %22766 = vmatmul.mubr.bf16.gmra.mxu1 %v24277_v40 }
 0x36f   :  { %v27096_v35 = vadd.f32 %v22407_v42, %v4738_v33  ;;  %v4736_v50 = vadd.f32 %v4693_v0, %v26994_v24  ;;  %v24283_v24 = vld [vmem:[#allocation2 + $0x108] sm:$0xff]   ;;  %v4975_v4 = vpop.f32.mrf.mxu1  ;;  %22822 = vmatpush3.bf16.msra.mxu1 %v24286_v60  ;;  %v24292_v0 = vld [vmem:[#allocation2 + $0xd0] sm:$0xff]  }
 0x370   :  { %v22372_v47 = vpop.f32.mrf.mxu0  ;;  %22769 = vmatprep.mubr.bf16.mxu1 %v24283_v24  ;;  %v24291_v33 = vld [vmem:[#allocation2 + $0xcc] sm:$0xff]  }
 0x371   :  { %v27102_v18 = vadd.f32 %v4972_v11, %v4736_v50  ;;  %v4739_v49 = vadd.f32 %v22372_v47, %v26997_v3  ;;  %22784 = vmatpush3.bf16.msra.mxu0 %v24279_v23  ;;  %v24288_v3 = vld [vmem:[%s29960_s3 + $0x200] sm:$0xff]   ;;  %v22411_v51 = vpop.f32.mrf.mxu1  ;;  %v24295_v11 = vld [vmem:[#allocation2 + $0xd4] sm:$0xff]   ;;  %v24300_v24 = vld [vmem:[%s29960_s3 + $0x68] sm:$0xff]  }
 0x372   :  { %v4696_v52 = vpop.f32.mrf.mxu0  ;;  %22785 = vmatprep.subr.bf16.mxu0 %v24281_v56  ;;  %22823 = vmatprep.subr.bf16.mxu1 %v24288_v3  ;;  %v24296_v47 = vld [vmem:[#allocation2 + $0xd8] sm:$0xff]   ;;  %v24301_v60 = vld [vmem:[%s29960_s3 + $0x30] sm:$0xff]  }
 0x373   :  { %v27105_v20 = vadd.f32 %v22408_v31, %v4739_v49  ;;  %v4737_v63 = vadd.f32 %v4696_v52, %v27006_v62  ;;  %v4988_v30 = vpop.f32.mrf.mxu1  ;;  %22824 = vmatpush3.bf16.msra.mxu1 %v24288_v3  ;;  %v24297_v52 = vld [vmem:[#allocation2 + $0xdc] sm:$0xff]   ;;  %v24307_v3 = vld [vmem:[%s29960_s3 + $0x28] sm:$0xff]  }
 0x374   :  { %v22375_v2 = vpop.f32.mrf.mxu0  ;;  %22730 = vmatmul.mubr.bf16.gmra.mxu0 %v24276_v28  ;;  %22881 = vmatprep.subr.bf16.mxu1 %v24299_v14 }
 0x375   :  { %v27114_v59 = vadd.f32 %v4975_v4, %v4737_v63  ;;  %v4742_v22 = vadd.f32 %v22375_v2, %v27009_v12  ;;  %22733 = vmatprep.mubr.bf16.mxu0 %v24282_v6  ;;  %22786 = vmatpush3.bf16.msra.mxu0 %v24281_v56  ;;  %v22412_v9 = vpop.f32.mrf.mxu1  ;;  %v24298_v2 = vld [vmem:[#allocation2 + $0xe0] sm:$0xff]  }
 0x376   :  { %v4709_v62 = vpop.f32.mrf.mxu0  ;;  %22787 = vmatprep.subr.bf16.mxu0 %v24287_v5  ;;  %22770 = vmatmul.mubr.bf16.gmra.mxu1 %v24285_v21 }
 0x377   :  { %v27117_v26 = vadd.f32 %v22411_v51, %v4742_v22  ;;  %v4740_v15 = vadd.f32 %v4709_v62, %v27018_v39  ;;  %v24289_v39 = vld [vmem:[#allocation2 + $0xc4] sm:$0xff]   ;;  %v4991_v37 = vpop.f32.mrf.mxu1  ;;  %22825 = vmatprep.mubr.bf16.mxu1 %v24290_v48 }
 0x378   :  { %v22376_v12 = vpop.f32.mrf.mxu0  ;;  %v24302_v62 = vld [vmem:[#allocation2 + $0xe4] sm:$0xff]  }
 0x379   :  { %v27126_v38 = vadd.f32 %v4988_v30, %v4740_v15  ;;  %v4743_v55 = vadd.f32 %v22376_v12, %v27021_v17  ;;  %22788 = vmatpush3.bf16.msra.mxu0 %v24287_v5  ;;  %v22467_v17 = vpop.f32.mrf.mxu1  ;;  %v24304_v30 = vld [vmem:[%s29960_s3 + $0x60] sm:$0xff]  }
 0x37a   :  { %v4712_v36 = vpop.f32.mrf.mxu0  ;;  %22845 = vmatprep.subr.bf16.mxu0 %v24293_v44 }
 0x37b   :  { %v27129_v25 = vadd.f32 %v22412_v9, %v4743_v55  ;;  %v4741_v8 = vadd.f32 %v4712_v36, %v27024_v61  ;;  %v5482_v61 = vpop.f32.mrf.mxu1  ;;  %v24305_v55 = vld [vmem:[#allocation2 + $0xf4] sm:$0xff]  }
 0x37c   :  { %v22431_v57 = vpop.f32.mrf.mxu0  ;;  %22734 = vmatmul.mubr.bf16.gmra.mxu0 %v24284_v16  ;;  %v24308_v9 = vld [vmem:[%s29960_s3 + $0x58] sm:$0xff]  }
 0x37d   :  { %v27132_v7 = vadd.f32 %v4991_v37, %v4741_v8  ;;  %v5284_v13 = vadd.f32 %v22431_v57, %v27027_v27  ;;  %22789 = vmatprep.mubr.bf16.mxu0 %v24289_v39  ;;  %v27142_v56 = vpop.f32.mrf.mxu1  ;;  %v24294_v27 = vld [vmem:[%s29960_s3 + $0x70] sm:$0xff]   ;;  %v24306_v36 = vld [vmem:[#allocation2 + $0xf8] sm:$0xff]  }
 0x37e   :  { %v5203_v23 = vpop.f32.mrf.mxu0  ;;  %22826 = vmatmul.mubr.bf16.vlgmr.msra.gmra.mxu1 %v24292_v0  ;;  %v24314_v8 = vld [vmem:[%s29960_s3 + $0x18] sm:$0xff]  }
 0x37f   :  { %30177 = vst [vmem:[#allocation4_spill] sm:$0xff] %v27132_v7  ;;  %v27135_v53 = vadd.f32 %v22467_v17, %v5284_v13  ;;  %v5282_v32 = vadd.f32 %v5203_v23, %v27030_v45  ;;  %v27149_v40 = vpop.f32.mrf.mxu1  ;;  %22829 = vmatprep.mubr.bf16.mxu1 %v24296_v47  ;;  %22882 = vmatpush3.bf16.msra.mxu1 %v24299_v14  ;;  %v24310_v57 = vld [vmem:[#allocation2 + $0xfc] sm:$0xff]   ;;  %v24317_v47 = vld [vmem:[%s29960_s3 + $0x48] sm:$0xff]  }
 0x380   :  { %v27138_v42 = vpop.f32.mrf.mxu0  ;;  %22883 = vmatprep.subr.bf16.mxu1 %v24301_v60  ;;  %v24311_v17 = vld [vmem:[#allocation2 + $0x100] sm:$0xff]  }
 0x381   :  { %v27140_v28 = vadd.f32 %v5482_v61, %v5282_v32  ;;  %v22471_v31 = vpop.f32.mrf.mxu1  ;;  %v24315_v32 = vld [vmem:[%s29960_s3 + $0x50] sm:$0xff]  }
 0x382   :  { %v27147_v50 = vpop.f32.mrf.mxu0 }
 0x383   :  { %v5498_v5 = vpop.f32.mrf.mxu1  ;;  %22884 = vmatpush3.bf16.msra.mxu1 %v24301_v60  ;;  %v24313_v60 = vld [vmem:[#allocation2 + $0x108] sm:$0xff]   ;;  %v5283_v7 = vadd.f32 %v27147_v50, %v27042_v58  ;;  %v24345_v58 = vld [vmem:[%s29960_s3 + $0xe0] sm:$0xff]  }
 0x384   :  { %v22435_v45 = vpop.f32.mrf.mxu0  ;;  %22790 = vmatmul.mubr.bf16.vlgmr.msra.gmra.mxu0 %v24291_v33  ;;  %22885 = vmatprep.subr.bf16.mxu1 %v24307_v3  ;;  %v24316_v33 = vld [vmem:[%s29960_s3 + $0x10] sm:$0xff]  }
 0x385   :  { %v5288_v49 = vadd.f32 %v22435_v45, %v27048_v41  ;;  %22846 = vmatpush3.bf16.msra.mxu0 %v24293_v44  ;;  %22793 = vmatprep.mubr.bf16.mxu0 %v24295_v11  ;;  %v27168_v51 = vpop.f32.mrf.mxu1  ;;  %v24309_v44 = vld [vmem:[%s29960_s3 + $0x20] sm:$0xff]  }
 0x386   :  { %v5219_v6 = vpop.f32.mrf.mxu0  ;;  %22847 = vmatprep.subr.bf16.mxu0 %v24294_v27  ;;  %30179 = vst [vmem:[#allocation53_spill] sm:$0xff] %v27168_v51  ;;  %22830 = vmatmul.mubr.bf16.gmra.mxu1 %v24298_v2  ;;  %v24312_v11 = vld [vmem:[#allocation2 + $0x104] sm:$0xff]   ;;  %v24327_v51 = vld [vmem:[#allocation2 + $0xcc] sm:$0xff]  }
 0x387   :  { %v27158_v63 = vadd.f32 %v22471_v31, %v5288_v49  ;;  %v5286_v4 = vadd.f32 %v5219_v6, %v27054_v34  ;;  %v24303_v34 = vld [vmem:[#allocation2 + $0xe8] sm:$0xff]   ;;  %v27172_v15 = vpop.f32.mrf.mxu1  ;;  %22886 = vmatpush3.bf16.msra.mxu1 %v24307_v3  ;;  %v24323_v2 = vld [vmem:[%s29960_s3 + $0x40] sm:$0xff]  }
 0x388   :  { %v27161_v41 = vpop.f32.mrf.mxu0  ;;  %22833 = vmatprep.mubr.bf16.mxu1 %v24303_v34  ;;  %22887 = vmatprep.subr.bf16.mxu1 %v24309_v44  ;;  %v24322_v31 = vld [vmem:[%s29960_s3 + $0x8] sm:$0xff]  }
 0x389   :  { %30178 = vst [vmem:[#allocation52_spill] sm:$0xff] %v27158_v63  ;;  %v27166_v22 = vadd.f32 %v5498_v5, %v5286_v4  ;;  %22848 = vmatpush3.bf16.msra.mxu0 %v24294_v27  ;;  %v27182_v12 = vpop.f32.mrf.mxu1  ;;  %v24319_v4 = vld [vmem:[#allocation2 + $0x110] sm:$0xff]  }
 0x38a   :  { %v27170_v16 = vpop.f32.mrf.mxu0  ;;  %22849 = vmatprep.subr.bf16.mxu0 %v24300_v24 }
 0x38b   :  { %v27189_v39 = vpop.f32.mrf.mxu1  ;;  %22888 = vmatpush3.bf16.msra.mxu1 %v24309_v44  ;;  %v24320_v44 = vld [vmem:[#allocation2 + $0x114] sm:$0xff]  }
 0x38c   :  { %v27177_v21 = vpop.f32.mrf.mxu0  ;;  %22794 = vmatmul.mubr.bf16.gmra.mxu0 %v24297_v52  ;;  %22889 = vmatprep.subr.bf16.mxu1 %v24314_v8  ;;  %v24318_v52 = vld [vmem:[#allocation2 + $0x10c] sm:$0xff]  }
 0x38d   :  { %22850 = vmatpush3.bf16.msra.mxu0 %v24300_v24  ;;  %22797 = vmatprep.mubr.bf16.mxu0 %v24302_v62  ;;  %v27196_v37 = vpop.f32.mrf.mxu1  ;;  %v24324_v62 = vld [vmem:[%s29960_s3] sm:$0xff]  }
 0x38e   :  { %v27184_v14 = vpop.f32.mrf.mxu0  ;;  %22851 = vmatprep.subr.bf16.mxu0 %v24304_v30  ;;  %22834 = vmatmul.mubr.bf16.gmra.mxu1 %v24306_v36  ;;  %v24329_v36 = vld [vmem:[%s29960_s3 + $0xb8] sm:$0xff]  }
 0x38f   :  { %v27200_v23 = vpop.f32.mrf.mxu1  ;;  %22837 = vmatprep.mubr.bf16.mxu1 %v24311_v17  ;;  %22890 = vmatpush3.bf16.msra.mxu1 %v24314_v8 }
 0x390   :  { %v27191_v48 = vpop.f32.mrf.mxu0  ;;  %30180 = vst [vmem:[#allocation54_spill] sm:$0xff] %v27200_v23  ;;  %22891 = vmatprep.subr.bf16.mxu1 %v24316_v33 }
 0x391   :  { %22852 = vmatpush3.bf16.msra.mxu0 %v24304_v30  ;;  %v27210_v0 = vpop.f32.mrf.mxu1 }
 0x392   :  { %v27198_v13 = vpop.f32.mrf.mxu0  ;;  %22853 = vmatprep.subr.bf16.mxu0 %v24308_v9 }
 0x393   :  { %v27217_v45 = vpop.f32.mrf.mxu1  ;;  %22892 = vmatpush3.bf16.msra.mxu1 %v24316_v33 }
 0x394   :  { %v27205_v61 = vpop.f32.mrf.mxu0  ;;  %22798 = vmatmul.mubr.bf16.gmra.mxu0 %v24305_v55  ;;  %22893 = vmatprep.subr.bf16.mxu1 %v24322_v31 }
 0x395   :  { %22854 = vmatpush3.bf16.msra.mxu0 %v24308_v9  ;;  %22801 = vmatprep.mubr.bf16.mxu0 %v24310_v57  ;;  %v27224_v6 = vpop.f32.mrf.mxu1  ;;  %v24321_v9 = vld [vmem:[#allocation2 + $0x118] sm:$0xff]  }
 0x396   :  { %v27212_v27 = vpop.f32.mrf.mxu0  ;;  %22855 = vmatprep.subr.bf16.mxu0 %v24315_v32  ;;  %22838 = vmatmul.mubr.bf16.gmra.mxu1 %v24313_v60  ;;  %v24335_v57 = vld [vmem:[%s29960_s3 + $0xf8] sm:$0xff]  }
 0x397   :  { %v27228_v5 = vpop.f32.mrf.mxu1  ;;  %22841 = vmatprep.mubr.bf16.mxu1 %v24319_v4  ;;  %22894 = vmatpush3.bf16.msra.mxu1 %v24322_v31 }
 0x398   :  { %v27219_v49 = vpop.f32.mrf.mxu0  ;;  %22895 = vmatprep.subr.bf16.mxu1 %v24324_v62 }
 0x399   :  { %22856 = vmatpush3.bf16.msra.mxu0 %v24315_v32  ;;  %v27238_v34 = vpop.f32.mrf.mxu1  ;;  %v24325_v32 = vld [vmem:[#allocation2 + $0xc4] sm:$0xff]  }
 0x39a   :  { %v27226_v24 = vpop.f32.mrf.mxu0  ;;  %22857 = vmatprep.subr.bf16.mxu0 %v24317_v47 }
 0x39b   :  { %v27242_v55 = vpop.f32.mrf.mxu1  ;;  %22896 = vmatpush3.bf16.msra.mxu1 %v24324_v62  ;;  %v24330_v62 = vld [vmem:[%s29960_s3 + $0xb0] sm:$0xff]  }
 0x39c   :  { %v27233_v3 = vpop.f32.mrf.mxu0  ;;  %22802 = vmatmul.mubr.bf16.gmra.mxu0 %v24312_v11  ;;  %v24326_v11 = vld [vmem:[#allocation2 + $0xc0] sm:$0xff]   ;;  %22953 = vmatprep.subr.bf16.mxu1 %v24335_v57 }
 0x39d   :  { %22805 = vmatprep.mubr.bf16.mxu0 %v24318_v52  ;;  %22858 = vmatpush3.bf16.msra.mxu0 %v24317_v47  ;;  %v27252_v17 = vpop.f32.mrf.mxu1 }
 0x39e   :  { %v27240_v30 = vpop.f32.mrf.mxu0  ;;  %22859 = vmatprep.subr.bf16.mxu0 %v24323_v2  ;;  %30181 = vst [vmem:[#allocation55_spill] sm:$0xff] %v27252_v17  ;;  %22842 = vmatmul.mubr.bf16.gmra.mxu1 %v24321_v9  ;;  %v24332_v9 = vld [vmem:[#allocation2 + $0xd0] sm:$0xff]  }
 0x39f   :  { %v27256_v47 = vpop.f32.mrf.mxu1  ;;  %22897 = vmatprep.mubr.bf16.mxu1 %v24326_v11  ;;  %v24337_v11 = vld [vmem:[%s29960_s3 + $0xf0] sm:$0xff]  }
 0x3a0   :  { %v27247_v8 = vpop.f32.mrf.mxu0  ;;  %30183 = vst [vmem:[#allocation57_spill] sm:$0xff] %v27256_v47  ;;  %v24331_v47 = vld [vmem:[#allocation2 + $0xd4] sm:$0xff]  }
 0x3a1   :  { %22860 = vmatpush3.bf16.msra.mxu0 %v24323_v2  ;;  %v27260_v31 = vpop.f32.mrf.mxu1  ;;  %v24328_v2 = vld [vmem:[#allocation2 + $0xc8] sm:$0xff]  }
 0x3a2   :  { %v27254_v33 = vpop.f32.mrf.mxu0  ;;  %22917 = vmatprep.subr.bf16.mxu0 %v24329_v36  ;;  %30184 = vst [vmem:[#allocation58_spill] sm:$0xff] %v27260_v31  ;;  %v24333_v31 = vld [vmem:[#allocation2 + $0xdc] sm:$0xff]  }
 0x3a3   :  { %30182 = vst [vmem:[#allocation56_spill] sm:$0xff] %v27254_v33  ;;  %v27262_v4 = vpop.f32.mrf.mxu1  ;;  %v24334_v33 = vld [vmem:[#allocation2 + $0xd8] sm:$0xff]  }
 0x3a4   :  { %v27258_v60 = vpop.f32.mrf.mxu0  ;;  %22806 = vmatmul.mubr.bf16.gmra.mxu0 %v24320_v44  ;;  %30185 = vst [vmem:[#allocation59_spill] sm:$0xff] %v27262_v4 }
 0x3a5   :  { %22861 = vmatprep.mubr.bf16.mxu0 %v24325_v32  ;;  %v27266_v17 = vpop.f32.mrf.mxu1 }
 0x3a6   :  { %v5761_v52 = vpop.f32.mrf.mxu0  ;;  %30186 = vst [vmem:[#allocation60_spill] sm:$0xff] %v27266_v17  ;;  %22898 = vmatmul.mubr.bf16.vlgmr.msra.gmra.mxu1 %v24328_v2  ;;  %v24338_v2 = vld [vmem:[#allocation2 + $0xe4] sm:$0xff]  }
 0x3a7   :  { %v27271_v23 = vpop.f32.mrf.mxu1  ;;  %22901 = vmatprep.mubr.bf16.mxu1 %v24332_v9  ;;  %22954 = vmatpush3.bf16.msra.mxu1 %v24335_v57  ;;  %v5293_v9 = vadd.f32 %v27191_v48, %v27081_v10  ;;  %v5840_v50 = vadd.f32 %v5761_v52, %v27140_v28  ;;  %v5562_v10 = vadd.f32 %v27149_v40, %v5283_v7 }
 0x3a8   :  { %v27264_v63 = vpop.f32.mrf.mxu0  ;;  %30187 = vst [vmem:[#allocation61_spill] sm:$0xff] %v27271_v23  ;;  %v24336_v23 = vld [vmem:[%s29960_s3 + $0xa8] sm:$0xff]   ;;  %22955 = vmatprep.subr.bf16.mxu1 %v24337_v11  ;;  %v5296_v28 = vadd.f32 %v27205_v61, %v27096_v35  ;;  %v5287_v7 = vadd.f32 %v27170_v16, %v27066_v19  ;;  %v5294_v40 = vadd.f32 %v27212_v27, %v27102_v18  ;;  %v24347_v19 = vld [vmem:[#allocation2 + $0xf8] sm:$0xff]  }
 0x3a9   :  { %v27278_v4 = vpop.f32.mrf.mxu1  ;;  %v5285_v18 = vadd.f32 %v27138_v42, %v27036_v43  ;;  %v24352_v43 = vld [vmem:[%s29960_s3 + $0xd0] sm:$0xff]  }
 0x3aa   :  { %v5764_v44 = vpop.f32.mrf.mxu0  ;;  %30189 = vst [vmem:[#allocation63_spill] sm:$0xff] %v27278_v4  ;;  %v5575_v16 = vadd.f32 %v27210_v0, %v5296_v28 }
 0x3ab   :  { %22956 = vmatpush3.bf16.msra.mxu1 %v24337_v11  ;;  %v24341_v11 = vld [vmem:[#allocation2 + $0xf4] sm:$0xff]  }
 0x3ac   :  { %v27273_v32 = vpop.f32.mrf.mxu0  ;;  %22862 = vmatmul.mubr.bf16.vlgmr.msra.gmra.mxu0 %v24327_v51  ;;  %v5292_v51 = vadd.f32 %v27177_v21, %v27072_v46  ;;  %v24339_v21 = vld [vmem:[#allocation2 + $0xe0] sm:$0xff]  }
 0x3ad   :  { %30188 = vst [vmem:[#allocation62_spill] sm:$0xff] %v27273_v32  ;;  %22918 = vmatpush3.bf16.msra.mxu0 %v24329_v36  ;;  %22865 = vmatprep.mubr.bf16.mxu0 %v24331_v47  ;;  %v27287_v32 = vpop.f32.mrf.mxu1  ;;  %v24343_v36 = vld [vmem:[%s29960_s3 + $0xe8] sm:$0xff]  }
 0x3ae   :  { %v27280_v17 = vpop.f32.mrf.mxu0  ;;  %22919 = vmatprep.subr.bf16.mxu0 %v24330_v62  ;;  %30190 = vst [vmem:[#allocation64_spill] sm:$0xff] %v27287_v32  ;;  %v5571_v57 = vadd.f32 %v27182_v12, %v5292_v51  ;;  %22957 = vmatprep.subr.bf16.mxu1 %v24343_v36 }
 0x3af   :  { %v27294_v47 = vpop.f32.mrf.mxu1  ;;  %22902 = vmatmul.mubr.bf16.gmra.mxu1 %v24334_v33  ;;  %v5844_v42 = vadd.f32 %v27280_v17, %v27166_v22  ;;  %v24353_v22 = vld [vmem:[%s29960_s3 + $0x88] sm:$0xff]   ;;  %v5842_v17 = vadd.f32 %v27258_v60, %v27135_v53 }
 0x3b0   :  { %v27289_v4 = vpop.f32.mrf.mxu0  ;;  %30191 = vst [vmem:[#allocation65_spill] sm:$0xff] %v27294_v47  ;;  %22905 = vmatprep.mubr.bf16.mxu1 %v24339_v21  ;;  %22958 = vmatpush3.bf16.msra.mxu1 %v24343_v36  ;;  %v24346_v21 = vld [vmem:[#allocation2 + $0xfc] sm:$0xff]   ;;  %v5297_v36 = vadd.f32 %v27219_v49, %v27105_v20  ;;  %v5573_v20 = vadd.f32 %v27217_v45, %v5294_v40 }
 0x3b1   :  { %22920 = vmatpush3.bf16.msra.mxu0 %v24330_v62  ;;  %v27303_v32 = vpop.f32.mrf.mxu1  ;;  %v24340_v62 = vld [vmem:[%s29960_s3 + $0xa0] sm:$0xff]   ;;  %22959 = vmatprep.subr.bf16.mxu1 %v24345_v58  ;;  %v5295_v49 = vadd.f32 %v27226_v24, %v27114_v59  ;;  %v5290_v59 = vadd.f32 %v27184_v14, %v27078_v29  ;;  %v5300_v45 = vadd.f32 %v27233_v3, %v27117_v26  ;;  %v24358_v3 = vld [vmem:[%s29960_s3 + $0xc8] sm:$0xff]  }
 0x3b2   :  { %v27298_v46 = vpop.f32.mrf.mxu0  ;;  %22921 = vmatprep.subr.bf16.mxu0 %v24336_v23  ;;  %30192 = vst [vmem:[#allocation66_spill] sm:$0xff] %v27303_v32  ;;  %v5572_v32 = vadd.f32 %v27196_v37, %v5293_v9  ;;  %v24350_v37 = vld [vmem:[%s29960_s3 + $0xd8] sm:$0xff]   ;;  %v24349_v29 = vld [vmem:[#allocation2 + $0x100] sm:$0xff]   ;;  %v5564_v26 = vadd.f32 %v27142_v56, %v5285_v18  ;;  %v5298_v14 = vadd.f32 %v27240_v30, %v27126_v38 }
 0x3b3   :  { %v27312_v51 = vpop.f32.mrf.mxu1  ;;  %v5574_v53 = vadd.f32 %v27228_v5, %v5295_v49  ;;  %v5289_v56 = vadd.f32 %v27161_v41, %v27057_v54  ;;  %v5569_v38 = vadd.f32 %v27189_v39, %v5290_v59  ;;  %v5291_v30 = vadd.f32 %v27198_v13, %v27090_v1  ;;  %v27391_v5 = vld [vmem:[%s29961_s4] ss:$0 sm:$0xff]  ;;  %v30193_v13 = vld [vmem:[#allocation4_spill] sm:$0xff] }
 0x3b4   :  { %v22511_v47 = vpop.f32.mrf.mxu0  ;;  %22866 = vmatmul.mubr.bf16.gmra.mxu0 %v24333_v31  ;;  %v24344_v31 = vld [vmem:[%s29960_s3 + $0x98] sm:$0xff]   ;;  %22960 = vmatpush3.bf16.msra.mxu1 %v24345_v58  ;;  %v5301_v40 = vadd.f32 %v27247_v8, %v27129_v25  ;;  %v5843_v54 = vadd.f32 %v27264_v63, %v5564_v26  ;;  %v24359_v1 = vld [vmem:[%s29960_s3 + $0x80] sm:$0xff]   ;;  %v5577_v25 = vadd.f32 %v27242_v55, %v5298_v14  ;;  %v30194_v8 = vld [vmem:[#allocation56_spill] sm:$0xff] }
 0x3b5   :  { %v5850_v12 = vadd.f32 %v22511_v47, %v5571_v57  ;;  %22922 = vmatpush3.bf16.msra.mxu0 %v24336_v23  ;;  %22869 = vmatprep.mubr.bf16.mxu0 %v24338_v2  ;;  %v27323_v47 = vpop.f32.mrf.mxu1  ;;  %v24342_v23 = vld [vmem:[#allocation2 + $0xf0] sm:$0xff]   ;;  %v5841_v2 = vadd.f32 %v5764_v44, %v5562_v10  ;;  %v24360_v63 = vld [vmem:[%s29960_s3 + $0xc0] sm:$0xff]  }
 0x3b6   :  { %v27315_v48 = vpop.f32.mrf.mxu0  ;;  %22923 = vmatprep.subr.bf16.mxu0 %v24340_v62  ;;  %v24351_v44 = vld [vmem:[%s29960_s3 + $0x90] sm:$0xff]   ;;  %22961 = vmatprep.subr.bf16.mxu1 %v24350_v37  ;;  %v30195_v55 = vld [vmem:[#allocation54_spill] sm:$0xff] }
 0x3b7   :  { %v5860_v52 = vmax.f32 %v5840_v50, %v5850_v12  ;;  %v27332_v61 = vpop.f32.mrf.mxu1  ;;  %22906 = vmatmul.mubr.bf16.gmra.mxu1 %v24342_v23  ;;  %v24348_v12 = vld [vmem:[#allocation2 + $0x104] sm:$0xff]  }
 0x3b8   :  { %v22512_v33 = vpop.f32.mrf.mxu0  ;;  %22909 = vmatprep.mubr.bf16.mxu1 %v24347_v19  ;;  %22962 = vmatpush3.bf16.msra.mxu1 %v24350_v37  ;;  %v5579_v37 = vadd.f32 %v27238_v34, %v5300_v45 }
 0x3b9   :  { %v5851_v35 = vadd.f32 %v22512_v33, %v5572_v32  ;;  %22924 = vmatpush3.bf16.msra.mxu0 %v24340_v62  ;;  %v27341_v9 = vpop.f32.mrf.mxu1  ;;  %v5566_v32 = vadd.f32 %v27172_v15, %v5287_v7  ;;  %v5576_v15 = vadd.f32 %v27224_v6, %v5297_v36  ;;  %22963 = vmatprep.subr.bf16.mxu1 %v24352_v43  ;;  %v24354_v7 = vld [vmem:[#allocation2 + $0x10c] sm:$0xff]  }
 0x3ba   :  { %v27336_v57 = vpop.f32.mrf.mxu0  ;;  %22925 = vmatprep.subr.bf16.mxu0 %v24344_v31  ;;  %v24355_v33 = vld [vmem:[#allocation2 + $0x108] sm:$0xff]  }
 0x3bb   :  { %v5861_v27 = vmax.f32 %v5841_v2, %v5851_v35  ;;  %v27357_v50 = vpop.f32.mrf.mxu1  ;;  %v5845_v60 = vadd.f32 %v27298_v46, %v5566_v32  ;;  %v5299_v35 = vadd.f32 %v30194_v8, %v30193_v13 }
 0x3bc   :  { %v22515_v62 = vpop.f32.mrf.mxu0  ;;  %22870 = vmatmul.mubr.bf16.gmra.mxu0 %v24341_v11  ;;  %22964 = vmatpush3.bf16.msra.mxu1 %v24352_v43  ;;  %v24356_v43 = vld [vmem:[#allocation2 + $0x114] sm:$0xff]  }
 0x3bd   :  { %v27355_v0 = vmax.f32 %v5860_v52, %v5861_v27  ;;  %v5854_v58 = vadd.f32 %v22515_v62, %v5575_v16  ;;  %22926 = vmatpush3.bf16.msra.mxu0 %v24344_v31  ;;  %22873 = vmatprep.mubr.bf16.mxu0 %v24346_v21  ;;  %v27369_v31 = vpop.f32.mrf.mxu1  ;;  %v5848_v21 = vadd.f32 %v27315_v48, %v5569_v38  ;;  %v30198_v48 = vld [vmem:[#allocation62_spill] sm:$0xff] }
 0x3be   :  { %v5809_v24 = vpop.f32.mrf.mxu0  ;;  %22927 = vmatprep.subr.bf16.mxu0 %v24351_v44  ;;  %22965 = vmatprep.subr.bf16.mxu1 %v24358_v3  ;;  %v5570_v27 = vadd.f32 %v30195_v55, %v5291_v30  ;;  %v24364_v55 = vld [vmem:[#allocation2 + $0xf8] sm:$0xff]  }
 0x3bf   :  { %v5864_v10 = vmax.f32 %v5844_v42, %v5854_v58  ;;  %v5852_v11 = vadd.f32 %v5809_v24, %v5573_v20  ;;  %v27379_v23 = vpop.f32.mrf.mxu1  ;;  %22910 = vmatmul.mubr.bf16.gmra.mxu1 %v24349_v29  ;;  %v30197_v20 = vld [vmem:[#allocation52_spill] sm:$0xff]  ;;  %v5881_v42 = vadd.f32 %v27391_v5, %v27355_v0  ;;  %v27427_v0 = vld [vmem:[%s29960_s3 + $0x178] sm:$0xff]  }
 0x3c0   :  { %v22516_v6 = vpop.f32.mrf.mxu0  ;;  %v5846_v49 = vadd.f32 %v30198_v48, %v30197_v20  ;;  %22913 = vmatprep.mubr.bf16.mxu1 %v24355_v33  ;;  %v24357_v24 = vld [vmem:[#allocation2 + $0x110] sm:$0xff]   ;;  %22966 = vmatpush3.bf16.msra.mxu1 %v24358_v3  ;;  %v5849_v26 = vadd.f32 %v27336_v57, %v5570_v27 }
 0x3c1   :  { %v5862_v28 = vmax.f32 %v5842_v17, %v5852_v11  ;;  %v5855_v52 = vadd.f32 %v22516_v6, %v5576_v15  ;;  %22928 = vmatpush3.bf16.msra.mxu0 %v24351_v44  ;;  %v27395_v2 = vpop.f32.mrf.mxu1  ;;  %v30196_v44 = vld [vmem:[#allocation55_spill] sm:$0xff]  ;;  %v30199_v17 = vld [vmem:[#allocation53_spill] sm:$0xff]  ;;  %22967 = vmatprep.subr.bf16.mxu1 %v24360_v63 }
 0x3c2   :  { %v5812_v46 = vpop.f32.mrf.mxu0  ;;  %22929 = vmatprep.subr.bf16.mxu0 %v24353_v22  ;;  %v5580_v32 = vadd.f32 %v30196_v44, %v5301_v40  ;;  %v30200_v11 = vld [vmem:[#allocation57_spill] sm:$0xff] }
 0x3c3   :  { %v5865_v41 = vmax.f32 %v5845_v60, %v5855_v52  ;;  %v5853_v39 = vadd.f32 %v5812_v46, %v5574_v53  ;;  %v27407_v16 = vpop.f32.mrf.mxu1  ;;  %v24361_v60 = vld [vmem:[#allocation2 + $0xc8] sm:$0xff]  }
 0x3c4   :  { %v22519_v36 = vpop.f32.mrf.mxu0  ;;  %22874 = vmatmul.mubr.bf16.gmra.mxu0 %v24348_v12  ;;  %v27420_v12 = vld [vmem:[%s29960_s3 + $0x138] sm:$0xff]   ;;  %22968 = vmatpush3.bf16.msra.mxu1 %v24360_v63 }
 0x3c5   :  { %v5872_v34 = vmax.f32 %v5864_v10, %v5865_v41  ;;  %v5863_v19 = vmax.f32 %v5843_v54, %v5853_v39  ;;  %v5858_v18 = vadd.f32 %v22519_v36, %v5579_v37  ;;  %22877 = vmatprep.mubr.bf16.mxu0 %v24354_v7  ;;  %22930 = vmatpush3.bf16.msra.mxu0 %v24353_v22  ;;  %v27415_v45 = vpop.f32.mrf.mxu1  ;;  %v24362_v7 = vld [vmem:[#allocation2 + $0xf0] sm:$0xff]  }
 0x3c6   :  { %v5825_v62 = vpop.f32.mrf.mxu0  ;;  %v5568_v10 = vadd.f32 %v30199_v17, %v5289_v56  ;;  %v5578_v22 = vadd.f32 %v30200_v11, %v5299_v35  ;;  %22931 = vmatprep.subr.bf16.mxu0 %v24359_v1  ;;  %v5886_v56 = vmax.f32 %v5881_v42, 0.0  ;;  %23025 = vmatprep.subr.bf16.mxu1 %v27427_v0  ;;  %v24367_v42 = vld [vmem:[#allocation2 + $0xd8] sm:$0xff]  }
 0x3c7   :  { %v5871_v58 = vmax.f32 %v5862_v28, %v5863_v19  ;;  %v5868_v59 = vmax.f32 %v5848_v21, %v5858_v18  ;;  %v5856_v15 = vadd.f32 %v5825_v62, %v5577_v25  ;;  %v27431_v53 = vpop.f32.mrf.mxu1  ;;  %22914 = vmatmul.mubr.bf16.gmra.mxu1 %v24357_v24  ;;  %v30202_v21 = vld [vmem:[#allocation59_spill] sm:$0xff]  ;;  %v24363_v19 = vld [vmem:[#allocation2 + $0xd0] sm:$0xff]  }
 0x3c8   :  { %v22520_v29 = vpop.f32.mrf.mxu0  ;;  %v5847_v28 = vadd.f32 %v27289_v4, %v5568_v10  ;;  %v30201_v4 = vld [vmem:[#allocation58_spill] sm:$0xff]  ;;  %22969 = vmatprep.mubr.bf16.mxu1 %v24362_v7  ;;  %v30204_v24 = vld [vmem:[#allocation61_spill] sm:$0xff] }
 0x3c9   :  { %v5882_v14 = vadd.f32 %v27391_v5, %v5871_v58  ;;  %v5866_v6 = vmax.f32 %v5846_v49, %v5856_v15  ;;  %v5859_v3 = vadd.f32 %v22520_v29, %v5580_v32  ;;  %22932 = vmatpush3.bf16.msra.mxu0 %v24359_v1  ;;  %v27434_v46 = vpop.f32.mrf.mxu1  ;;  %v5883_v1 = vadd.f32 %v27391_v5, %v5872_v34  ;;  %v30203_v34 = vld [vmem:[#allocation60_spill] sm:$0xff] }
 0x3ca   :  { %v5828_v52 = vpop.f32.mrf.mxu0  ;;  %22989 = vmatprep.subr.bf16.mxu0 %v27420_v12  ;;  %v24366_v49 = vld [vmem:[%s29960_s3 + $0x130] sm:$0xff]  }
 0x3cb   :  { %v5887_v38 = vmax.f32 %v5882_v14, 0.0  ;;  %v5869_v30 = vmax.f32 %v5849_v26, %v5859_v3  ;;  %v5857_v40 = vadd.f32 %v5828_v52, %v5578_v22  ;;  %v22611_v39 = vpop.f32.mrf.mxu1  ;;  %v5888_v62 = vmax.f32 %v5883_v1, 0.0  ;;  %v24373_v22 = vld [vmem:[%s29960_s3 + $0x170] sm:$0xff]   ;;  %v30205_v14 = vld [vmem:[#allocation63_spill] sm:$0xff] }
 0x3cc   :  { %v22575_v57 = vpop.f32.mrf.mxu0  ;;  %22878 = vmatmul.mubr.bf16.gmra.mxu0 %v24356_v43  ;;  %v24372_v52 = vld [vmem:[%s29960_s3 + $0x128] sm:$0xff]   ;;  %v24375_v1 = vld [vmem:[#allocation2 + $0x110] sm:$0xff]  }
 0x3cd   :  { %v20381_v33 = vpack.c.bf16 %v5887_v38, %v5886_v56  ;;  %v5874_v37 = vmax.f32 %v5868_v59, %v5869_v30  ;;  %v5867_v54 = vmax.f32 %v5847_v28, %v5857_v40  ;;  %v6345_v41 = vadd.f32 %v22575_v57, %v30201_v4  ;;  %22933 = vmatprep.mubr.bf16.mxu0 %v24361_v60  ;;  %v6593_v63 = vpop.f32.mrf.mxu1  ;;  %v24369_v28 = vld [vmem:[#allocation2 + $0xe0] sm:$0xff]   ;;  %v30206_v56 = vld [vmem:[#allocation64_spill] sm:$0xff] }
 0x3ce   :  { %v6336_v25 = vpop.f32.mrf.mxu0  ;;  %v24370_v40 = vld [vmem:[#allocation2 + $0x108] sm:$0xff]  }
 0x3cf   :  { %20382 = vst [vmem:[#allocation3] sm:$0xff] %v20381_v33   ;;  %v5885_v13 = vadd.f32 %v27391_v5, %v5874_v37  ;;  %v5873_v8 = vmax.f32 %v5866_v6, %v5867_v54  ;;  %v27441_v35 = vadd.f32 %v22611_v39, %v6345_v41  ;;  %v6337_v36 = vadd.f32 %v6336_v25, %v30202_v21  ;;  %v22612_v48 = vpop.f32.mrf.mxu1  ;;  %v30207_v37 = vld [vmem:[#allocation65_spill] sm:$0xff]  ;;  %v24374_v41 = vld [vmem:[#allocation2 + $0xe8] sm:$0xff]   ;;  %v24376_v21 = vld [vmem:[%s29960_s3 + $0x120] sm:$0xff]  }
 0x3d0   :  { %v22576_v18 = vpop.f32.mrf.mxu0  ;;  %22970 = vmatmul.mubr.bf16.vlgmr.msra.gmra.mxu1 %v24364_v55 }
 0x3d1   :  { %v5890_v27 = vmax.f32 %v5885_v13, 0.0  ;;  %v5884_v44 = vadd.f32 %v27391_v5, %v5873_v8  ;;  %v27445_v32 = vadd.f32 %v6593_v63, %v6337_v36  ;;  %v6348_v20 = vadd.f32 %v22576_v18, %v30203_v34  ;;  %v6596_v10 = vpop.f32.mrf.mxu1  ;;  %v24368_v5 = vld [vmem:[#allocation2 + $0x100] sm:$0xff]   ;;  %23026 = vmatpush3.bf16.msra.mxu1 %v27427_v0  ;;  %v24380_v34 = vld [vmem:[%s29960_s3 + $0x118] sm:$0xff]  }
 0x3d2   :  { %v6339_v43 = vpop.f32.mrf.mxu0  ;;  %22973 = vmatprep.mubr.bf16.mxu1 %v24368_v5  ;;  %23027 = vmatprep.subr.bf16.mxu1 %v24373_v22  ;;  %v30208_v13 = vld [vmem:[#allocation66_spill] sm:$0xff] }
 0x3d3   :  { %v5895_v58 = vpack.c.bf16 %v5890_v27, %v5890_v27  ;;  %v5889_v59 = vmax.f32 %v5884_v44, 0.0  ;;  %v27451_v15 = vadd.f32 %v22612_v48, %v6348_v20  ;;  %v6340_v17 = vadd.f32 %v6339_v43, %v30204_v24  ;;  %v22615_v3 = vpop.f32.mrf.mxu1  ;;  %v24381_v63 = vld [vmem:[%s29960_s3 + $0x160] sm:$0xff]   ;;  %v24377_v44 = vld [vmem:[#allocation2 + $0xf8] sm:$0xff]  }
 0x3d4   :  { %v22579_v11 = vpop.f32.mrf.mxu0  ;;  %22934 = vmatmul.mubr.bf16.vlgmr.msra.gmra.mxu0 %v24363_v19  ;;  %v24386_v43 = vld [vmem:[%s29960_s3 + $0x158] sm:$0xff]   ;;  %v24382_v24 = vld [vmem:[#allocation2 + $0x100] sm:$0xff]  }
 0x3d5   :  { %5900 = vst [vmem:[#allocation3 + $0x10] sm:$0xf] %v5895_v58  ;;  %v20386_v29 = vpack.c.bf16 %v5889_v59, %v5888_v62  ;;  %v27457_v26 = vadd.f32 %v6596_v10, %v6340_v17  ;;  %v6361_v6 = vadd.f32 %v22579_v11, %v30205_v14  ;;  %22990 = vmatpush3.bf16.msra.mxu0 %v27420_v12  ;;  %v6609_v30 = vpop.f32.mrf.mxu1  ;;  %v24379_v12 = vld [vmem:[%s29960_s3 + $0x168] sm:$0xff]   ;;  %v24378_v62 = vld [vmem:[#allocation2 + $0x120] sm:$0xff]  }
 0x3d6   :  { %v6352_v60 = vpop.f32.mrf.mxu0  ;;  %22991 = vmatprep.subr.bf16.mxu0 %v24366_v49  ;;  %22937 = vmatprep.mubr.bf16.mxu0 %v24367_v42 }
 0x3d7   :  { %20433 = vst [vmem:[#allocation3 + $0x8] sm:$0xff] %v20386_v29   ;;  %v27464_v7 = vadd.f32 %v22615_v3, %v6361_v6  ;;  %v6353_v38 = vadd.f32 %v6352_v60, %v30206_v56  ;;  %v22616_v4 = vpop.f32.mrf.mxu1  ;;  %23028 = vmatpush3.bf16.msra.mxu1 %v24373_v22  ;;  %v24387_v22 = vld [vmem:[%s29960_s3 + $0x110] sm:$0xff]   ;;  %v24384_v60 = vld [vmem:[#allocation2 + $0x108] sm:$0xff]  }
 0x3d8   :  { %v22580_v57 = vpop.f32.mrf.mxu0  ;;  %23029 = vmatprep.subr.bf16.mxu1 %v24379_v12  ;;  %22974 = vmatmul.mubr.bf16.gmra.mxu1 %v24370_v40  ;;  %v24394_v40 = vld [vmem:[%s29960_s3 + $0x148] sm:$0xff]  }
 0x3d9   :  { %v27471_v33 = vadd.f32 %v6609_v30, %v6353_v38  ;;  %v6364_v54 = vadd.f32 %v22580_v57, %v30207_v37  ;;  %22992 = vmatpush3.bf16.msra.mxu0 %v24366_v49  ;;  %v6612_v8 = vpop.f32.mrf.mxu1  ;;  %22977 = vmatprep.mubr.bf16.mxu1 %v24375_v1  ;;  %v24385_v30 = vld [vmem:[#allocation2 + $0x130] sm:$0xff]  }
 0x3da   :  { %v6355_v39 = vpop.f32.mrf.mxu0  ;;  %22993 = vmatprep.subr.bf16.mxu0 %v24372_v52 }
 0x3db   :  { %v27474_v25 = vadd.f32 %v22616_v4, %v6364_v54  ;;  %v6356_v0 = vadd.f32 %v6355_v39, %v30208_v13  ;;  %v22619_v55 = vpop.f32.mrf.mxu1  ;;  %23030 = vmatpush3.bf16.msra.mxu1 %v24379_v12  ;;  %v24390_v54 = vld [vmem:[#allocation2 + $0x110] sm:$0xff]   ;;  %v24395_v13 = vld [vmem:[%s29960_s3 + $0x100] sm:$0xff]  }
 0x3dc   :  { %v22583_v36 = vpop.f32.mrf.mxu0  ;;  %22938 = vmatmul.mubr.bf16.gmra.mxu0 %v24369_v28  ;;  %23031 = vmatprep.subr.bf16.mxu1 %v24381_v63  ;;  %v24389_v28 = vld [vmem:[%s29960_s3 + $0x108] sm:$0xff]  }
 0x3dd   :  { %v27483_v19 = vadd.f32 %v6612_v8, %v6356_v0  ;;  %v6377_v18 = vadd.f32 %v22583_v36, %v27312_v51  ;;  %22994 = vmatpush3.bf16.msra.mxu0 %v24372_v52  ;;  %22941 = vmatprep.mubr.bf16.mxu0 %v24374_v41  ;;  %v6625_v49 = vpop.f32.mrf.mxu1 }
 0x3de   :  { %v6368_v27 = vpop.f32.mrf.mxu0  ;;  %22995 = vmatprep.subr.bf16.mxu0 %v24376_v21 }
 0x3df   :  { %v27489_v20 = vadd.f32 %v22619_v55, %v6377_v18  ;;  %v6369_v48 = vadd.f32 %v6368_v27, %v27323_v47  ;;  %v22620_v59 = vpop.f32.mrf.mxu1  ;;  %v24383_v47 = vld [vmem:[#allocation2 + $0x128] sm:$0xff]   ;;  %23032 = vmatpush3.bf16.msra.mxu1 %v24381_v63  ;;  %v24392_v63 = vld [vmem:[#allocation2 + $0x118] sm:$0xff]  }
 0x3e0   :  { %v22584_v51 = vpop.f32.mrf.mxu0  ;;  %23033 = vmatprep.subr.bf16.mxu1 %v24386_v43  ;;  %22978 = vmatmul.mubr.bf16.gmra.mxu1 %v24378_v62 }
 0x3e1   :  { %v27495_v42 = vadd.f32 %v6625_v49, %v6369_v48  ;;  %v6380_v58 = vadd.f32 %v22584_v51, %v27332_v61  ;;  %22996 = vmatpush3.bf16.msra.mxu0 %v24376_v21  ;;  %v6628_v11 = vpop.f32.mrf.mxu1  ;;  %v24388_v61 = vld [vmem:[%s29960_s3 + $0x150] sm:$0xff]   ;;  %22981 = vmatprep.mubr.bf16.mxu1 %v24383_v47  ;;  %v24407_v48 = vld [vmem:[%s29960_s3 + $0x1f8] sm:$0xff]  }
 0x3e2   :  { %v6371_v17 = vpop.f32.mrf.mxu0  ;;  %22997 = vmatprep.subr.bf16.mxu0 %v24380_v34 }
 0x3e3   :  { %v27498_v10 = vadd.f32 %v22620_v59, %v6380_v58  ;;  %v6372_v5 = vadd.f32 %v6371_v17, %v27341_v9  ;;  %v22623_v3 = vpop.f32.mrf.mxu1  ;;  %23034 = vmatpush3.bf16.msra.mxu1 %v24386_v43  ;;  %v24398_v58 = vld [vmem:[#allocation2 + $0xf8] sm:$0xff]  }
 0x3e4   :  { %v22587_v29 = vpop.f32.mrf.mxu0  ;;  %22942 = vmatmul.mubr.bf16.gmra.mxu0 %v24377_v44  ;;  %23035 = vmatprep.subr.bf16.mxu1 %v24388_v61  ;;  %v24393_v44 = vld [vmem:[#allocation2 + $0x140] sm:$0xff]  }
 0x3e5   :  { %v27507_v14 = vadd.f32 %v6628_v11, %v6372_v5  ;;  %v6393_v6 = vadd.f32 %v22587_v29, %v27357_v50  ;;  %22998 = vmatpush3.bf16.msra.mxu0 %v24380_v34  ;;  %22945 = vmatprep.mubr.bf16.mxu0 %v24382_v24  ;;  %v6641_v38 = vpop.f32.mrf.mxu1  ;;  %v24401_v34 = vld [vmem:[%s29960_s3 + $0x1b8] sm:$0xff]  }
 0x3e6   :  { %v6384_v9 = vpop.f32.mrf.mxu0  ;;  %22999 = vmatprep.subr.bf16.mxu0 %v24387_v22 }
 0x3e7   :  { %v27513_v52 = vadd.f32 %v22623_v3, %v6393_v6  ;;  %v6385_v56 = vadd.f32 %v6384_v9, %v27369_v31  ;;  %v22624_v37 = vpop.f32.mrf.mxu1  ;;  %v24391_v31 = vld [vmem:[#allocation2 + $0x138] sm:$0xff]   ;;  %23036 = vmatpush3.bf16.msra.mxu1 %v24388_v61  ;;  %v24400_v9 = vld [vmem:[#allocation2 + $0x100] sm:$0xff]  }
 0x3e8   :  { %v22588_v50 = vpop.f32.mrf.mxu0  ;;  %23037 = vmatprep.subr.bf16.mxu1 %v24394_v40  ;;  %22982 = vmatmul.mubr.bf16.gmra.mxu1 %v24385_v30  ;;  %v24399_v6 = vld [vmem:[#allocation2 + $0xfc] sm:$0xff]   ;;  %v24403_v30 = vld [vmem:[#allocation2 + $0x104] sm:$0xff]  }
 0x3e9   :  { %v27519_v57 = vadd.f32 %v6641_v38, %v6385_v56  ;;  %v6396_v12 = vadd.f32 %v22588_v50, %v27379_v23  ;;  %23000 = vmatpush3.bf16.msra.mxu0 %v24387_v22  ;;  %v6644_v1 = vpop.f32.mrf.mxu1  ;;  %v24396_v23 = vld [vmem:[%s29960_s3 + $0x140] sm:$0xff]   ;;  %22985 = vmatprep.mubr.bf16.mxu1 %v24391_v31 }
 0x3ea   :  { %v6387_v4 = vpop.f32.mrf.mxu0  ;;  %23001 = vmatprep.subr.bf16.mxu0 %v24389_v28 }
 0x3eb   :  { %v27522_v41 = vadd.f32 %v22624_v37, %v6396_v12  ;;  %v6388_v39 = vadd.f32 %v6387_v4, %v27395_v2  ;;  %v22627_v36 = vpop.f32.mrf.mxu1  ;;  %23038 = vmatpush3.bf16.msra.mxu1 %v24394_v40  ;;  %v24404_v12 = vld [vmem:[#allocation2 + $0x108] sm:$0xff]  }
 0x3ec   :  { %v22591_v0 = vpop.f32.mrf.mxu0  ;;  %22946 = vmatmul.mubr.bf16.gmra.mxu0 %v24384_v60  ;;  %23039 = vmatprep.subr.bf16.mxu1 %v24396_v23 }
 0x3ed   :  { %v27531_v8 = vadd.f32 %v6644_v1, %v6388_v39  ;;  %v6409_v21 = vadd.f32 %v22591_v0, %v27407_v16  ;;  %22949 = vmatprep.mubr.bf16.mxu0 %v24390_v54  ;;  %23002 = vmatpush3.bf16.msra.mxu0 %v24389_v28  ;;  %v6657_v27 = vpop.f32.mrf.mxu1  ;;  %v24409_v54 = vld [vmem:[%s29960_s3 + $0x1f0] sm:$0xff]  }
 0x3ee   :  { %v6400_v2 = vpop.f32.mrf.mxu0  ;;  %23003 = vmatprep.subr.bf16.mxu0 %v24395_v13  ;;  %v24405_v1 = vld [vmem:[#allocation2 + $0x10c] sm:$0xff]  }
 0x3ef   :  { %v27534_v18 = vadd.f32 %v22627_v36, %v6409_v21  ;;  %v6401_v55 = vadd.f32 %v6400_v2, %v27415_v45  ;;  %v22628_v51 = vpop.f32.mrf.mxu1  ;;  %v24397_v45 = vld [vmem:[#allocation2 + $0xf4] sm:$0xff]   ;;  %23040 = vmatpush3.bf16.msra.mxu1 %v24396_v23  ;;  %v24415_v36 = vld [vmem:[%s29960_s3 + $0x1e8] sm:$0xff]  }
 0x3f0   :  { %v22592_v16 = vpop.f32.mrf.mxu0  ;;  %23097 = vmatprep.subr.bf16.mxu1 %v24407_v48  ;;  %22986 = vmatmul.mubr.bf16.gmra.mxu1 %v24393_v44  ;;  %v24406_v21 = vld [vmem:[#allocation2 + $0x110] sm:$0xff]  }
 0x3f1   :  { %v27543_v49 = vadd.f32 %v6657_v27, %v6401_v55  ;;  %v6412_v62 = vadd.f32 %v22592_v16, %v27431_v53  ;;  %23004 = vmatpush3.bf16.msra.mxu0 %v24395_v13  ;;  %v6660_v17 = vpop.f32.mrf.mxu1  ;;  %23041 = vmatprep.mubr.bf16.mxu1 %v24398_v58  ;;  %v24410_v27 = vld [vmem:[#allocation2 + $0x114] sm:$0xff]  }
 0x3f2   :  { %v6403_v43 = vpop.f32.mrf.mxu0  ;;  %23061 = vmatprep.subr.bf16.mxu0 %v24401_v34 }
 0x3f3   :  { %v27546_v59 = vadd.f32 %v22628_v51, %v6412_v62  ;;  %v6404_v24 = vadd.f32 %v6403_v43, %v27434_v46  ;;  %v22683_v53 = vpop.f32.mrf.mxu1  ;;  %v24412_v62 = vld [vmem:[%s29960_s3 + $0x1a0] sm:$0xff]  }
 0x3f4   :  { %v22647_v47 = vpop.f32.mrf.mxu0  ;;  %22950 = vmatmul.mubr.bf16.gmra.mxu0 %v24392_v63 }
 0x3f5   :  { %v27549_v5 = vadd.f32 %v6660_v17, %v6404_v24  ;;  %v6952_v11 = vadd.f32 %v22647_v47, %v27441_v35  ;;  %23005 = vmatprep.mubr.bf16.mxu0 %v24397_v45  ;;  %v7149_v46 = vpop.f32.mrf.mxu1  ;;  %v24402_v35 = vld [vmem:[%s29960_s3 + $0x1b0] sm:$0xff]   ;;  %v24413_v24 = vld [vmem:[#allocation2 + $0x124] sm:$0xff]   ;;  %v24416_v17 = vld [vmem:[%s29960_s3 + $0x198] sm:$0xff]  }
 0x3f6   :  { %v6871_v22 = vpop.f32.mrf.mxu0 }
 0x3f7   :  { %v27552_v29 = vadd.f32 %v22683_v53, %v6952_v11  ;;  %v6950_v61 = vadd.f32 %v6871_v22, %v27445_v32  ;;  %v22684_v56 = vpop.f32.mrf.mxu1  ;;  %v24414_v22 = vld [vmem:[#allocation2 + $0x128] sm:$0xff]  }
 0x3f8   :  { %v22648_v3 = vpop.f32.mrf.mxu0  ;;  %23042 = vmatmul.mubr.bf16.vlgmr.msra.gmra.mxu1 %v24400_v9  ;;  %v24418_v9 = vld [vmem:[#allocation2 + $0x12c] sm:$0xff]  }
 0x3f9   :  { %v27555_v60 = vadd.f32 %v7149_v46, %v6950_v61  ;;  %v6953_v28 = vadd.f32 %v22648_v3, %v27451_v15  ;;  %v7152_v32 = vpop.f32.mrf.mxu1  ;;  %23045 = vmatprep.mubr.bf16.mxu1 %v24404_v12  ;;  %23098 = vmatpush3.bf16.msra.mxu1 %v24407_v48  ;;  %v24422_v61 = vld [vmem:[%s29960_s3 + $0x1d8] sm:$0xff]  }
 0x3fa   :  { %v6874_v38 = vpop.f32.mrf.mxu0  ;;  %23099 = vmatprep.subr.bf16.mxu1 %v24409_v54 }
 0x3fb   :  { %v27561_v50 = vadd.f32 %v22684_v56, %v6953_v28  ;;  %v6951_v40 = vadd.f32 %v6874_v38, %v27457_v26  ;;  %v22687_v31 = vpop.f32.mrf.mxu1  ;;  %v24408_v26 = vld [vmem:[%s29960_s3 + $0x1a8] sm:$0xff]  }
 0x3fc   :  { %v22651_v37 = vpop.f32.mrf.mxu0  ;;  %23006 = vmatmul.mubr.bf16.vlgmr.msra.gmra.mxu0 %v24399_v6 }
 0x3fd   :  { %v27567_v15 = vadd.f32 %v7152_v32, %v6951_v40  ;;  %v6956_v4 = vadd.f32 %v22651_v37, %v27464_v7  ;;  %23062 = vmatpush3.bf16.msra.mxu0 %v24401_v34  ;;  %23009 = vmatprep.mubr.bf16.mxu0 %v24403_v30  ;;  %v7165_v23 = vpop.f32.mrf.mxu1  ;;  %v24423_v30 = vld [vmem:[%s29960_s3 + $0x190] sm:$0xff]  }
 0x3fe   :  { %v6887_v39 = vpop.f32.mrf.mxu0  ;;  %23063 = vmatprep.subr.bf16.mxu0 %v24402_v35  ;;  %23100 = vmatpush3.bf16.msra.mxu1 %v24409_v54  ;;  %v24420_v54 = vld [vmem:[#allocation2 + $0x134] sm:$0xff]  }
 0x3ff   :  { %v27573_v13 = vadd.f32 %v22687_v31, %v6956_v4  ;;  %v6954_v0 = vadd.f32 %v6887_v39, %v27471_v33  ;;  %v22688_v55 = vpop.f32.mrf.mxu1  ;;  %v24411_v33 = vld [vmem:[#allocation2 + $0x118] sm:$0xff]   ;;  %23101 = vmatprep.subr.bf16.mxu1 %v24415_v36  ;;  %v24425_v4 = vld [vmem:[%s29960_s3 + $0x188] sm:$0xff]  }
 0x400   :  { %v22652_v7 = vpop.f32.mrf.mxu0  ;;  %23046 = vmatmul.mubr.bf16.gmra.mxu1 %v24406_v21 }
 0x401   :  { %v27579_v2 = vadd.f32 %v7165_v23, %v6954_v0  ;;  %v6957_v63 = vadd.f32 %v22652_v7, %v27474_v25  ;;  %23064 = vmatpush3.bf16.msra.mxu0 %v24402_v35  ;;  %v7168_v48 = vpop.f32.mrf.mxu1  ;;  %v24417_v25 = vld [vmem:[%s29960_s3 + $0x1e0] sm:$0xff]   ;;  %23049 = vmatprep.mubr.bf16.mxu1 %v24411_v33  ;;  %v24430_v0 = vld [vmem:[%s29960_s3 + $0x1c8] sm:$0xff]  }
 0x402   :  { %v6890_v44 = vpop.f32.mrf.mxu0  ;;  %23065 = vmatprep.subr.bf16.mxu0 %v24408_v26  ;;  %23102 = vmatpush3.bf16.msra.mxu1 %v24415_v36  ;;  %v24426_v36 = vld [vmem:[#allocation2 + $0x13c] sm:$0xff]  }
 0x403   :  { %v27582_v34 = vadd.f32 %v22688_v55, %v6957_v63  ;;  %v6955_v16 = vadd.f32 %v6890_v44, %v27483_v19  ;;  %v22691_v58 = vpop.f32.mrf.mxu1  ;;  %23103 = vmatprep.subr.bf16.mxu1 %v24417_v25  ;;  %v24431_v33 = vld [vmem:[%s29960_s3 + $0x180] sm:$0xff]  }
 0x404   :  { %v22655_v51 = vpop.f32.mrf.mxu0  ;;  %23010 = vmatmul.mubr.bf16.gmra.mxu0 %v24405_v1 }
 0x405   :  { %v27591_v45 = vadd.f32 %v7168_v48, %v6955_v16  ;;  %v6960_v43 = vadd.f32 %v22655_v51, %v27489_v20  ;;  %23066 = vmatpush3.bf16.msra.mxu0 %v24408_v26  ;;  %23013 = vmatprep.mubr.bf16.mxu0 %v24410_v27  ;;  %v7181_v53 = vpop.f32.mrf.mxu1  ;;  %v24421_v26 = vld [vmem:[#allocation2 + $0x138] sm:$0xff]  }
 0x406   :  { %v6903_v19 = vpop.f32.mrf.mxu0  ;;  %23067 = vmatprep.subr.bf16.mxu0 %v24412_v62  ;;  %23104 = vmatpush3.bf16.msra.mxu1 %v24417_v25  ;;  %v24428_v25 = vld [vmem:[#allocation2 + $0x144] sm:$0xff]  }
 0x407   :  { %v27597_v47 = vadd.f32 %v22691_v58, %v6960_v43  ;;  %v6958_v11 = vadd.f32 %v6903_v19, %v27495_v42  ;;  %v22692_v3 = vpop.f32.mrf.mxu1  ;;  %v24419_v42 = vld [vmem:[#allocation2 + $0x130] sm:$0xff]   ;;  %23105 = vmatprep.subr.bf16.mxu1 %v24422_v61 }
 0x408   :  { %v22656_v20 = vpop.f32.mrf.mxu0  ;;  %23050 = vmatmul.mubr.bf16.gmra.mxu1 %v24414_v22 }
 0x409   :  { %v27603_v46 = vadd.f32 %v7181_v53, %v6958_v11  ;;  %v6961_v6 = vadd.f32 %v22656_v20, %v27498_v10  ;;  %23068 = vmatpush3.bf16.msra.mxu0 %v24412_v62  ;;  %v7184_v38 = vpop.f32.mrf.mxu1  ;;  %v24424_v10 = vld [vmem:[%s29960_s3 + $0x1d0] sm:$0xff]   ;;  %23053 = vmatprep.mubr.bf16.mxu1 %v24419_v42  ;;  %v24443_v11 = vld [vmem:[%s29960_s3 + $0x78] sm:$0xff]  }
 0x40a   :  { %v6906_v28 = vpop.f32.mrf.mxu0  ;;  %23069 = vmatprep.subr.bf16.mxu0 %v24416_v17  ;;  %23106 = vmatpush3.bf16.msra.mxu1 %v24422_v61 }
 0x40b   :  { %v27606_v56 = vadd.f32 %v22692_v3, %v6961_v6  ;;  %v6959_v35 = vadd.f32 %v6906_v28, %v27507_v14  ;;  %v22695_v37 = vpop.f32.mrf.mxu1  ;;  %23107 = vmatprep.subr.bf16.mxu1 %v24424_v10  ;;  %v24434_v6 = vld [vmem:[#allocation2 + $0x124] sm:$0xff]  }
 0x40c   :  { %v22659_v40 = vpop.f32.mrf.mxu0  ;;  %23014 = vmatmul.mubr.bf16.gmra.mxu0 %v24413_v24  ;;  %v24429_v24 = vld [vmem:[#allocation2 + $0x148] sm:$0xff]  }
 0x40d   :  { %v27615_v32 = vadd.f32 %v7184_v38, %v6959_v35  ;;  %v6964_v12 = vadd.f32 %v22659_v40, %v27513_v52  ;;  %23070 = vmatpush3.bf16.msra.mxu0 %v24416_v17  ;;  %23017 = vmatprep.mubr.bf16.mxu0 %v24418_v9  ;;  %v7197_v1 = vpop.f32.mrf.mxu1  ;;  %v24437_v17 = vld [vmem:[%s29960_s3 + $0x238] sm:$0xff]  }
 0x40e   :  { %v6919_v14 = vpop.f32.mrf.mxu0  ;;  %23071 = vmatprep.subr.bf16.mxu0 %v24423_v30  ;;  %23108 = vmatpush3.bf16.msra.mxu1 %v24424_v10 }
 0x40f   :  { %v27621_v31 = vadd.f32 %v22695_v37, %v6964_v12  ;;  %v6962_v39 = vadd.f32 %v6919_v14, %v27519_v57  ;;  %v22696_v7 = vpop.f32.mrf.mxu1  ;;  %v24427_v57 = vld [vmem:[#allocation2 + $0x140] sm:$0xff]   ;;  %23109 = vmatprep.subr.bf16.mxu1 %v24430_v0  ;;  %v24436_v37 = vld [vmem:[#allocation2 + $0x12c] sm:$0xff]  }
 0x410   :  { %v22660_v52 = vpop.f32.mrf.mxu0  ;;  %23054 = vmatmul.mubr.bf16.gmra.mxu1 %v24421_v26 }
 0x411   :  { %v27627_v23 = vadd.f32 %v7197_v1, %v6962_v39  ;;  %v6965_v21 = vadd.f32 %v22660_v52, %v27522_v41  ;;  %23072 = vmatpush3.bf16.msra.mxu0 %v24423_v30  ;;  %v7200_v44 = vpop.f32.mrf.mxu1  ;;  %v24432_v41 = vld [vmem:[%s29960_s3 + $0x1c0] sm:$0xff]   ;;  %23057 = vmatprep.mubr.bf16.mxu1 %v24427_v57  ;;  %v24440_v1 = vld [vmem:[#allocation2 + $0x134] sm:$0xff]  }
 0x412   :  { %v6922_v63 = vpop.f32.mrf.mxu0  ;;  %23073 = vmatprep.subr.bf16.mxu0 %v24425_v4  ;;  %23110 = vmatpush3.bf16.msra.mxu1 %v24430_v0  ;;  %v24445_v52 = vld [vmem:[%s29960_s3 + $0x70] sm:$0xff]  }
 0x413   :  { %v27630_v55 = vadd.f32 %v22696_v7, %v6965_v21  ;;  %v6963_v27 = vadd.f32 %v6922_v63, %v27531_v8  ;;  %v22699_v51 = vpop.f32.mrf.mxu1  ;;  %23111 = vmatprep.subr.bf16.mxu1 %v24432_v41  ;;  %v24444_v63 = vld [vmem:[%s29960_s3 + $0x228] sm:$0xff]  }
 0x414   :  { %v22663_v16 = vpop.f32.mrf.mxu0  ;;  %23018 = vmatmul.mubr.bf16.gmra.mxu0 %v24420_v54 }
 0x415   :  { %v27639_v48 = vadd.f32 %v7200_v44, %v6963_v27  ;;  %v6968_v62 = vadd.f32 %v22663_v16, %v27534_v18  ;;  %23021 = vmatprep.mubr.bf16.mxu0 %v24426_v36  ;;  %23074 = vmatpush3.bf16.msra.mxu0 %v24425_v4  ;;  %v7213_v19 = vpop.f32.mrf.mxu1  ;;  %v24439_v4 = vld [vmem:[#allocation2 + $0x130] sm:$0xff]   ;;  %v24441_v36 = vld [vmem:[#allocation2 + $0x138] sm:$0xff]  }
 0x416   :  { %v6935_v8 = vpop.f32.mrf.mxu0  ;;  %23075 = vmatprep.subr.bf16.mxu0 %v24431_v33  ;;  %23112 = vmatpush3.bf16.msra.mxu1 %v24432_v41  ;;  %v24442_v44 = vld [vmem:[#allocation2 + $0x13c] sm:$0xff]  }
 0x417   :  { %v27642_v43 = vadd.f32 %v22699_v51, %v6968_v62  ;;  %v6966_v58 = vadd.f32 %v6935_v8, %v27543_v49  ;;  %v22700_v20 = vpop.f32.mrf.mxu1  ;;  %v24433_v49 = vld [vmem:[#allocation2 + $0x120] sm:$0xff]   ;;  %23169 = vmatprep.subr.bf16.mxu1 %v24443_v11 }
 0x418   :  { %v22664_v18 = vpop.f32.mrf.mxu0  ;;  %23058 = vmatmul.mubr.bf16.gmra.mxu1 %v24429_v24  ;;  %v24446_v41 = vld [vmem:[#allocation2 + $0x140] sm:$0xff]  }
 0x419   :  { %v27651_v53 = vadd.f32 %v7213_v19, %v6966_v58  ;;  %v6969_v22 = vadd.f32 %v22664_v18, %v27546_v59  ;;  %23076 = vmatpush3.bf16.msra.mxu0 %v24431_v33  ;;  %v7216_v28 = vpop.f32.mrf.mxu1  ;;  %23113 = vmatprep.mubr.bf16.mxu1 %v24434_v6  ;;  %v24451_v33 = vld [vmem:[%s29960_s3 + $0x68] sm:$0xff]   ;;  %v24453_v19 = vld [vmem:[%s29960_s3 + $0x60] sm:$0xff]   ;;  %v24449_v18 = vld [vmem:[#allocation2 + $0x150] sm:$0xff]  }
 0x41a   :  { %v6938_v61 = vpop.f32.mrf.mxu0  ;;  %23133 = vmatprep.subr.bf16.mxu0 %v24437_v17  ;;  %v24447_v51 = vld [vmem:[#allocation2 + $0x144] sm:$0xff]  }
 0x41b   :  { %30209 = vst [vmem:[#allocation4_spill] sm:$0xff] %v27651_v53  ;;  %v27654_v3 = vadd.f32 %v22700_v20, %v6969_v22  ;;  %v6967_v9 = vadd.f32 %v6938_v61, %v27549_v5  ;;  %v22755_v59 = vpop.f32.mrf.mxu1  ;;  %v24435_v5 = vld [vmem:[#allocation2 + $0x128] sm:$0xff]   ;;  %v24450_v20 = vld [vmem:[#allocation2 + $0x154] sm:$0xff]   ;;  %v24477_v53 = vld [vmem:[#allocation2 + $0x140] sm:$0xff]  }
 0x41c   :  { %v22719_v42 = vpop.f32.mrf.mxu0  ;;  %23022 = vmatmul.mubr.bf16.gmra.mxu0 %v24428_v25  ;;  %v24448_v25 = vld [vmem:[%s29960_s3 + $0x220] sm:$0xff]   ;;  %v24458_v61 = vld [vmem:[%s29960_s3 + $0x58] sm:$0xff]  }
 0x41d   :  { %30210 = vst [vmem:[#allocation56_spill] sm:$0xff] %v27654_v3  ;;  %v27657_v35 = vadd.f32 %v7216_v28, %v6967_v9  ;;  %v7508_v38 = vadd.f32 %v22719_v42, %v27552_v29  ;;  %23077 = vmatprep.mubr.bf16.mxu0 %v24433_v49  ;;  %v27664_v10 = vpop.f32.mrf.mxu1  ;;  %v24438_v29 = vld [vmem:[%s29960_s3 + $0x230] sm:$0xff]   ;;  %v24454_v9 = vld [vmem:[#allocation2 + $0x158] sm:$0xff]  }
 0x41e   :  { %v27660_v30 = vpop.f32.mrf.mxu0  ;;  %v24455_v42 = vld [vmem:[#allocation2 + $0x15c] sm:$0xff]  }
 0x41f   :  { %30211 = vst [vmem:[#allocation54_spill] sm:$0xff] %v27657_v35  ;;  %v27662_v40 = vadd.f32 %v22755_v59, %v7508_v38  ;;  %v27668_v14 = vpop.f32.mrf.mxu1  ;;  %v24459_v59 = vld [vmem:[%s29960_s3 + $0x210] sm:$0xff]  }
 0x420   :  { %v27666_v12 = vpop.f32.mrf.mxu0  ;;  %23114 = vmatmul.mubr.bf16.vlgmr.msra.gmra.mxu1 %v24436_v37  ;;  %v24460_v37 = vld [vmem:[%s29960_s3 + $0x50] sm:$0xff]  }
 0x421   :  { %v27675_v39 = vpop.f32.mrf.mxu1  ;;  %23117 = vmatprep.mubr.bf16.mxu1 %v24440_v1  ;;  %23170 = vmatpush3.bf16.msra.mxu1 %v24443_v11  ;;  %v24452_v11 = vld [vmem:[%s29960_s3 + $0x218] sm:$0xff]   ;;  %v24456_v1 = vld [vmem:[#allocation2 + $0x160] sm:$0xff]  }
 0x422   :  { %v27673_v54 = vpop.f32.mrf.mxu0  ;;  %23171 = vmatprep.subr.bf16.mxu1 %v24445_v52 }
 0x423   :  { %v22759_v21 = vpop.f32.mrf.mxu1 }
 0x424   :  { %v22723_v26 = vpop.f32.mrf.mxu0  ;;  %23078 = vmatmul.mubr.bf16.vlgmr.msra.gmra.mxu0 %v24435_v5 }
 0x425   :  { %v7512_v0 = vadd.f32 %v22723_v26, %v27573_v13  ;;  %23134 = vmatpush3.bf16.msra.mxu0 %v24437_v17  ;;  %23081 = vmatprep.mubr.bf16.mxu0 %v24439_v4  ;;  %v27688_v27 = vpop.f32.mrf.mxu1  ;;  %v24461_v26 = vld [vmem:[%s29960_s3 + $0x208] sm:$0xff]  }
 0x426   :  { %v27681_v7 = vpop.f32.mrf.mxu0  ;;  %23135 = vmatprep.subr.bf16.mxu0 %v24438_v29  ;;  %23172 = vmatpush3.bf16.msra.mxu1 %v24445_v52 }
 0x427   :  { %v27686_v57 = vadd.f32 %v22759_v21, %v7512_v0  ;;  %v27695_v16 = vpop.f32.mrf.mxu1  ;;  %23173 = vmatprep.subr.bf16.mxu1 %v24451_v33  ;;  %v24457_v0 = vld [vmem:[#allocation2 + $0x164] sm:$0xff]  }
 0x428   :  { %v27690_v13 = vpop.f32.mrf.mxu0  ;;  %23118 = vmatmul.mubr.bf16.gmra.mxu1 %v24442_v44  ;;  %v24462_v44 = vld [vmem:[#allocation2 + $0x168] sm:$0xff]  }
 0x429   :  { %30212 = vst [vmem:[#allocation55_spill] sm:$0xff] %v27686_v57  ;;  %23136 = vmatpush3.bf16.msra.mxu0 %v24438_v29  ;;  %v27699_v8 = vpop.f32.mrf.mxu1  ;;  %23121 = vmatprep.mubr.bf16.mxu1 %v24447_v51 }
 0x42a   :  { %v27697_v62 = vpop.f32.mrf.mxu0  ;;  %23137 = vmatprep.subr.bf16.mxu0 %v24444_v63  ;;  %23174 = vmatpush3.bf16.msra.mxu1 %v24451_v33 }
 0x42b   :  { %v27709_v24 = vpop.f32.mrf.mxu1  ;;  %23175 = vmatprep.subr.bf16.mxu1 %v24453_v19 }
 0x42c   :  { %v27704_v58 = vpop.f32.mrf.mxu0  ;;  %23082 = vmatmul.mubr.bf16.gmra.mxu0 %v24441_v36  ;;  %v24466_v36 = vld [vmem:[%s29960_s3 + $0x48] sm:$0xff]  }
 0x42d   :  { %23138 = vmatpush3.bf16.msra.mxu0 %v24444_v63  ;;  %23085 = vmatprep.mubr.bf16.mxu0 %v24446_v41  ;;  %v27716_v22 = vpop.f32.mrf.mxu1  ;;  %v24463_v41 = vld [vmem:[#allocation2 + $0x16c] sm:$0xff]  }
 0x42e   :  { %v27711_v17 = vpop.f32.mrf.mxu0  ;;  %23139 = vmatprep.subr.bf16.mxu0 %v24448_v25  ;;  %23176 = vmatpush3.bf16.msra.mxu1 %v24453_v19 }
 0x42f   :  { %v27723_v6 = vpop.f32.mrf.mxu1  ;;  %23177 = vmatprep.subr.bf16.mxu1 %v24458_v61 }
 0x430   :  { %v27718_v49 = vpop.f32.mrf.mxu0  ;;  %23122 = vmatmul.mubr.bf16.gmra.mxu1 %v24450_v20 }
 0x431   :  { %23140 = vmatpush3.bf16.msra.mxu0 %v24448_v25  ;;  %v27727_v38 = vpop.f32.mrf.mxu1  ;;  %23125 = vmatprep.mubr.bf16.mxu1 %v24455_v42  ;;  %v24467_v25 = vld [vmem:[%s29960_s3 + $0x200] sm:$0xff]   ;;  %v24465_v42 = vld [vmem:[#allocation2 + $0x174] sm:$0xff]  }
 0x432   :  { %v27725_v28 = vpop.f32.mrf.mxu0  ;;  %23141 = vmatprep.subr.bf16.mxu0 %v24452_v11  ;;  %23178 = vmatpush3.bf16.msra.mxu1 %v24458_v61  ;;  %v24464_v61 = vld [vmem:[#allocation2 + $0x170] sm:$0xff]  }
 0x433   :  { %v27737_v29 = vpop.f32.mrf.mxu1  ;;  %23179 = vmatprep.subr.bf16.mxu1 %v24460_v37 }
 0x434   :  { %v27732_v5 = vpop.f32.mrf.mxu0  ;;  %23086 = vmatmul.mubr.bf16.gmra.mxu0 %v24449_v18  ;;  %v24468_v18 = vld [vmem:[%s29960_s3 + $0x40] sm:$0xff]  }
 0x435   :  { %23142 = vmatpush3.bf16.msra.mxu0 %v24452_v11  ;;  %23089 = vmatprep.mubr.bf16.mxu0 %v24454_v9  ;;  %v27744_v52 = vpop.f32.mrf.mxu1 }
 0x436   :  { %v27739_v4 = vpop.f32.mrf.mxu0  ;;  %23143 = vmatprep.subr.bf16.mxu0 %v24459_v59  ;;  %23180 = vmatpush3.bf16.msra.mxu1 %v24460_v37 }
 0x437   :  { %v27751_v63 = vpop.f32.mrf.mxu1  ;;  %23181 = vmatprep.subr.bf16.mxu1 %v24466_v36 }
 0x438   :  { %v27746_v21 = vpop.f32.mrf.mxu0  ;;  %23126 = vmatmul.mubr.bf16.gmra.mxu1 %v24457_v0 }
 0x439   :  { %23144 = vmatpush3.bf16.msra.mxu0 %v24459_v59  ;;  %v27755_v51 = vpop.f32.mrf.mxu1  ;;  %23129 = vmatprep.mubr.bf16.mxu1 %v24463_v41  ;;  %v24473_v59 = vld [vmem:[%s29960_s3 + $0x38] sm:$0xff]   ;;  %v24470_v41 = vld [vmem:[#allocation2 + $0x124] sm:$0xff]  }
 0x43a   :  { %v27753_v33 = vpop.f32.mrf.mxu0  ;;  %23145 = vmatprep.subr.bf16.mxu0 %v24461_v26  ;;  %23182 = vmatpush3.bf16.msra.mxu1 %v24466_v36 }
 0x43b   :  { %v27765_v11 = vpop.f32.mrf.mxu1  ;;  %23183 = vmatprep.subr.bf16.mxu1 %v24468_v18 }
 0x43c   :  { %v27760_v19 = vpop.f32.mrf.mxu0  ;;  %23090 = vmatmul.mubr.bf16.gmra.mxu0 %v24456_v1  ;;  %30213 = vst [vmem:[#allocation52_spill] sm:$0xff] %v27765_v11  ;;  %v24479_v1 = vld [vmem:[%s29960_s3 + $0xb8] sm:$0xff]  }
 0x43d   :  { %23093 = vmatprep.mubr.bf16.mxu0 %v24462_v44  ;;  %23146 = vmatpush3.bf16.msra.mxu0 %v24461_v26  ;;  %v27769_v9 = vpop.f32.mrf.mxu1  ;;  %v24469_v26 = vld [vmem:[#allocation2 + $0x128] sm:$0xff]  }
 0x43e   :  { %v27767_v20 = vpop.f32.mrf.mxu0  ;;  %30215 = vst [vmem:[#allocation53_spill] sm:$0xff] %v27769_v9  ;;  %23147 = vmatprep.subr.bf16.mxu0 %v24467_v25  ;;  %23184 = vmatpush3.bf16.msra.mxu1 %v24468_v18  ;;  %v24474_v18 = vld [vmem:[%s29960_s3 + $0x30] sm:$0xff]  }
 0x43f   :  { %30214 = vst [vmem:[#allocation62_spill] sm:$0xff] %v27767_v20  ;;  %v27779_v0 = vpop.f32.mrf.mxu1  ;;  %23241 = vmatprep.subr.bf16.mxu1 %v24479_v1 }
 0x440   :  { %v27774_v37 = vpop.f32.mrf.mxu0  ;;  %30217 = vst [vmem:[#allocation58_spill] sm:$0xff] %v27779_v0  ;;  %23130 = vmatmul.mubr.bf16.gmra.mxu1 %v24465_v42  ;;  %v24476_v42 = vld [vmem:[#allocation2 + $0x134] sm:$0xff]  }
 0x441   :  { %30216 = vst [vmem:[#allocation57_spill] sm:$0xff] %v27774_v37  ;;  %23148 = vmatpush3.bf16.msra.mxu0 %v24467_v25  ;;  %v27783_v36 = vpop.f32.mrf.mxu1  ;;  %23185 = vmatprep.mubr.bf16.mxu1 %v24470_v41  ;;  %v24471_v37 = vld [vmem:[#allocation2 + $0x130] sm:$0xff]  }
 0x442   :  { %v27781_v44 = vpop.f32.mrf.mxu0  ;;  %30219 = vst [vmem:[#allocation60_spill] sm:$0xff] %v27783_v36  ;;  %23205 = vmatprep.subr.bf16.mxu0 %v24473_v59  ;;  %v24472_v25 = vld [vmem:[#allocation2 + $0x12c] sm:$0xff]   ;;  %v24475_v36 = vld [vmem:[#allocation2 + $0x138] sm:$0xff]  }
 0x443   :  { %30218 = vst [vmem:[#allocation59_spill] sm:$0xff] %v27781_v44  ;;  %v27787_v9 = vpop.f32.mrf.mxu1  ;;  %v24481_v41 = vld [vmem:[%s29960_s3 + $0xb0] sm:$0xff]  }
 0x444   :  { %v27785_v57 = vpop.f32.mrf.mxu0  ;;  %23094 = vmatmul.mubr.bf16.gmra.mxu0 %v24464_v61  ;;  %30220 = vst [vmem:[#allocation61_spill] sm:$0xff] %v27787_v9 }
 0x445   :  { %23149 = vmatprep.mubr.bf16.mxu0 %v24469_v26  ;;  %v27789_v0 = vpop.f32.mrf.mxu1 }
 0x446   :  { %v7983_v35 = vpop.f32.mrf.mxu0 }
 0x447   :  { %v27793_v3 = vpop.f32.mrf.mxu1 }
 0x448   :  { %v27791_v44 = vpop.f32.mrf.mxu0  ;;  %30222 = vst [vmem:[#allocation64_spill] sm:$0xff] %v27793_v3  ;;  %23186 = vmatmul.mubr.bf16.vlgmr.msra.gmra.mxu1 %v24472_v25 }
 0x449   :  { %30221 = vst [vmem:[#allocation63_spill] sm:$0xff] %v27791_v44  ;;  %v27798_v20 = vpop.f32.mrf.mxu1  ;;  %v7506_v44 = vadd.f32 %v27660_v30, %v27555_v60  ;;  %23189 = vmatprep.mubr.bf16.mxu1 %v24476_v42  ;;  %v24478_v60 = vld [vmem:[#allocation2 + $0x13c] sm:$0xff]   ;;  %23242 = vmatpush3.bf16.msra.mxu1 %v24479_v1  ;;  %v7507_v30 = vadd.f32 %v27673_v54, %v27567_v15  ;;  %v24483_v15 = vld [vmem:[#allocation2 + $0x144] sm:$0xff]  }
 0x44a   :  { %v7986_v61 = vpop.f32.mrf.mxu0  ;;  %23243 = vmatprep.subr.bf16.mxu1 %v24481_v41  ;;  %v7509_v54 = vadd.f32 %v27666_v12, %v27561_v50  ;;  %v24489_v50 = vld [vmem:[%s29960_s3 + $0xa0] sm:$0xff]   ;;  %v7514_v12 = vadd.f32 %v27711_v17, %v27603_v46  ;;  %v24488_v46 = vld [vmem:[%s29960_s3 + $0x18] sm:$0xff]  }
 0x44b   :  { %v27807_v3 = vpop.f32.mrf.mxu1  ;;  %v7784_v25 = vadd.f32 %v27664_v10, %v7506_v44  ;;  %v24484_v10 = vld [vmem:[%s29960_s3 + $0x20] sm:$0xff]   ;;  %v7785_v44 = vadd.f32 %v27675_v39, %v7507_v30 }
 0x44c   :  { %v27800_v26 = vpop.f32.mrf.mxu0  ;;  %23150 = vmatmul.mubr.bf16.vlgmr.msra.gmra.mxu0 %v24471_v37  ;;  %30224 = vst [vmem:[#allocation66_spill] sm:$0xff] %v27807_v3  ;;  %v24480_v37 = vld [vmem:[%s29960_s3 + $0x28] sm:$0xff]  }
 0x44d   :  { %30223 = vst [vmem:[#allocation65_spill] sm:$0xff] %v27800_v26  ;;  %23206 = vmatpush3.bf16.msra.mxu0 %v24473_v59  ;;  %23153 = vmatprep.mubr.bf16.mxu0 %v24475_v36  ;;  %v7516_v26 = vadd.f32 %v27704_v58, %v27597_v47  ;;  %v27816_v11 = vpop.f32.mrf.mxu1  ;;  %v24487_v36 = vld [vmem:[%s29960_s3 + $0xa8] sm:$0xff]   ;;  %v7517_v58 = vadd.f32 %v27718_v49, %v27606_v56 }
 0x44e   :  { %v27809_v9 = vpop.f32.mrf.mxu0  ;;  %23207 = vmatprep.subr.bf16.mxu0 %v24474_v18  ;;  %30225 = vst [vmem:[#allocation67_spill] sm:$0xff] %v27816_v11  ;;  %v24482_v47 = vld [vmem:[#allocation2 + $0x148] sm:$0xff]   ;;  %23244 = vmatpush3.bf16.msra.mxu1 %v24481_v41  ;;  %v7510_v56 = vadd.f32 %v27681_v7, %v27579_v2  ;;  %v7513_v49 = vadd.f32 %v27690_v13, %v27582_v34 }
 0x44f   :  { %v27826_v3 = vpop.f32.mrf.mxu1  ;;  %v7794_v42 = vadd.f32 %v27709_v24, %v7516_v26  ;;  %23245 = vmatprep.subr.bf16.mxu1 %v24487_v36  ;;  %v7795_v2 = vadd.f32 %v27723_v6, %v7517_v58  ;;  %v7515_v34 = vadd.f32 %v27725_v28, %v27615_v32  ;;  %v24486_v32 = vld [vmem:[#allocation2 + $0x154] sm:$0xff]   ;;  %v7521_v41 = vadd.f32 %v27746_v21, %v27630_v55 }
 0x450   :  { %v27820_v59 = vpop.f32.mrf.mxu0  ;;  %23190 = vmatmul.mubr.bf16.gmra.mxu1 %v24478_v60  ;;  %v7788_v28 = vadd.f32 %v27688_v27, %v7510_v56  ;;  %v24490_v27 = vld [vmem:[#allocation2 + $0x160] sm:$0xff]  }
 0x451   :  { %30226 = vst [vmem:[#allocation68_spill] sm:$0xff] %v27820_v59  ;;  %23208 = vmatpush3.bf16.msra.mxu0 %v24474_v18  ;;  %v8062_v59 = vadd.f32 %v7983_v35, %v7784_v25  ;;  %v27835_v11 = vpop.f32.mrf.mxu1  ;;  %v7511_v35 = vadd.f32 %v27697_v62, %v27591_v45  ;;  %23193 = vmatprep.mubr.bf16.mxu1 %v24483_v15  ;;  %v24485_v45 = vld [vmem:[#allocation2 + $0x158] sm:$0xff]  }
 0x452   :  { %v27830_v1 = vpop.f32.mrf.mxu0  ;;  %23209 = vmatprep.subr.bf16.mxu0 %v24480_v37  ;;  %v8063_v62 = vadd.f32 %v7986_v61, %v7785_v44  ;;  %23246 = vmatpush3.bf16.msra.mxu1 %v24487_v36  ;;  %v27873_v61 = vadd.f32 %v27695_v16, %v7513_v49  ;;  %v24491_v16 = vld [vmem:[#allocation2 + $0x15c] sm:$0xff]   ;;  %v27885_v55 = vadd.f32 %v27727_v38, %v7515_v34 }
 0x453   :  { %v22835_v24 = vpop.f32.mrf.mxu1  ;;  %v8340_v13 = vadd.f32 %v27789_v0, %v8062_v59  ;;  %23247 = vmatprep.subr.bf16.mxu1 %v24489_v50  ;;  %v24494_v0 = vld [vmem:[%s29960_s3 + $0x98] sm:$0xff]   ;;  %v7789_v30 = vadd.f32 %v27699_v8, %v7511_v35  ;;  %v8066_v59 = vadd.f32 %v27809_v9, %v7788_v28  ;;  %v8064_v38 = vadd.f32 %v27785_v57, %v27662_v40  ;;  %v30229_v35 = vld [vmem:[#allocation4_spill] sm:$0xff] }
 0x454   :  { %v22799_v18 = vpop.f32.mrf.mxu0  ;;  %23154 = vmatmul.mubr.bf16.gmra.mxu0 %v24477_v53  ;;  %v7520_v53 = vadd.f32 %v27732_v5, %v27621_v31  ;;  %v7787_v31 = vadd.f32 %v27668_v14, %v7509_v54  ;;  %v7518_v5 = vadd.f32 %v27739_v4, %v27627_v23  ;;  %v7792_v23 = vadd.f32 %v27716_v22, %v7514_v12  ;;  %v30230_v12 = vld [vmem:[#allocation62_spill] sm:$0xff] }
 0x455   :  { %v8072_v39 = vadd.f32 %v22799_v18, %v7794_v42  ;;  %23210 = vmatpush3.bf16.msra.mxu0 %v24480_v37  ;;  %23157 = vmatprep.mubr.bf16.mxu0 %v24482_v47  ;;  %v27863_v6 = vpop.f32.mrf.mxu1  ;;  %v7519_v4 = vadd.f32 %v27753_v33, %v27639_v48  ;;  %v8341_v25 = vadd.f32 %v27798_v20, %v8063_v62  ;;  %v24495_v48 = vld [vmem:[%s29960_s3 + $0x10] sm:$0xff]   ;;  %v24492_v42 = vld [vmem:[#allocation2 + $0x168] sm:$0xff]  }
 0x456   :  { %v27857_v7 = vpop.f32.mrf.mxu0  ;;  %23211 = vmatprep.subr.bf16.mxu0 %v24484_v10  ;;  %v7798_v21 = vadd.f32 %v27737_v29, %v7520_v53  ;;  %23248 = vmatpush3.bf16.msra.mxu1 %v24489_v50  ;;  %v7796_v22 = vadd.f32 %v27744_v52, %v7518_v5  ;;  %v7524_v33 = vadd.f32 %v27760_v19, %v27642_v43  ;;  %v24496_v29 = vld [vmem:[%s29960_s3 + $0x90] sm:$0xff]   ;;  %v30227_v43 = vld [vmem:[#allocation67_spill] sm:$0xff] }
 0x457   :  { %v8350_v17 = vadd.f32 %v22835_v24, %v8072_v39  ;;  %v22836_v14 = vpop.f32.mrf.mxu1  ;;  %23249 = vmatprep.subr.bf16.mxu1 %v24494_v0  ;;  %v7799_v20 = vadd.f32 %v27751_v63, %v7521_v41  ;;  %v7797_v52 = vadd.f32 %v27755_v51, %v7519_v4  ;;  %v27905_v19 = vadd.f32 %v30227_v43, %v8066_v59  ;;  %v24497_v63 = vld [vmem:[%s29960_s3 + $0x8] sm:$0xff]   ;;  %v30231_v39 = vld [vmem:[#allocation61_spill] sm:$0xff]  ;;  %v30235_v41 = vld [vmem:[#allocation54_spill] sm:$0xff] }
 0x458   :  { %v22800_v26 = vpop.f32.mrf.mxu0  ;;  %23194 = vmatmul.mubr.bf16.gmra.mxu1 %v24486_v32  ;;  %v8067_v40 = vadd.f32 %v27830_v1, %v7789_v30  ;;  %v24493_v18 = vld [vmem:[#allocation2 + $0x164] sm:$0xff]   ;;  %v30228_v51 = vld [vmem:[#allocation52_spill] sm:$0xff]  ;;  %v7522_v1 = vadd.f32 %v30230_v12, %v30229_v35  ;;  %v27915_v24 = vadd.f32 %v30231_v39, %v8064_v38  ;;  %v24501_v12 = vld [vmem:[#allocation2 + $0x174] sm:$0xff]  }
 0x459   :  { %v8360_v37 = vmax.f32 %v8340_v13, %v8350_v17  ;;  %v8073_v60 = vadd.f32 %v22800_v26, %v7795_v2  ;;  %23212 = vmatpush3.bf16.msra.mxu0 %v24484_v10  ;;  %v27889_v8 = vpop.f32.mrf.mxu1  ;;  %23197 = vmatprep.mubr.bf16.mxu1 %v24491_v16  ;;  %v7802_v50 = vadd.f32 %v30228_v51, %v7524_v33  ;;  %v30232_v2 = vld [vmem:[#allocation63_spill] sm:$0xff]  ;;  %v30233_v5 = vld [vmem:[#allocation56_spill] sm:$0xff]  ;;  %v30234_v26 = vld [vmem:[#allocation57_spill] sm:$0xff] }
 0x45a   :  { %v27882_v36 = vpop.f32.mrf.mxu0  ;;  %23213 = vmatprep.subr.bf16.mxu0 %v24488_v46  ;;  %23250 = vmatpush3.bf16.msra.mxu1 %v24494_v0  ;;  %v8065_v34 = vadd.f32 %v30232_v2, %v7787_v31  ;;  %v24498_v31 = vld [vmem:[#allocation2 + $0x170] sm:$0xff]   ;;  %v7525_v0 = vadd.f32 %v30234_v26, %v30233_v5 }
 0x45b   :  { %v8351_v47 = vadd.f32 %v22836_v14, %v8073_v60  ;;  %v22839_v54 = vpop.f32.mrf.mxu1  ;;  %23251 = vmatprep.subr.bf16.mxu1 %v24496_v29  ;;  %v8345_v14 = vadd.f32 %v27835_v11, %v8067_v40  ;;  %v24499_v4 = vld [vmem:[#allocation2 + $0x16c] sm:$0xff]  }
 0x45c   :  { %v22803_v9 = vpop.f32.mrf.mxu0  ;;  %23158 = vmatmul.mubr.bf16.gmra.mxu0 %v24485_v45  ;;  %v24502_v45 = vld [vmem:[%s29960_s3 + $0x88] sm:$0xff]  }
 0x45d   :  { %v8361_v58 = vmax.f32 %v8341_v25, %v8351_v47  ;;  %v8076_v15 = vadd.f32 %v22803_v9, %v7798_v21  ;;  %23214 = vmatpush3.bf16.msra.mxu0 %v24488_v46  ;;  %23161 = vmatprep.mubr.bf16.mxu0 %v24490_v27  ;;  %v8309_v49 = vpop.f32.mrf.mxu1  ;;  %v27924_v46 = vld [vmem:[%s29961_s4] ss:$0 sm:$0xff]  ;;  %v8070_v27 = vadd.f32 %v27857_v7, %v7792_v23  ;;  %v30238_v33 = vld [vmem:[#allocation64_spill] sm:$0xff]  ;;  %v30239_v9 = vld [vmem:[#allocation55_spill] sm:$0xff] }
 0x45e   :  { %v8031_v57 = vpop.f32.mrf.mxu0  ;;  %23215 = vmatprep.subr.bf16.mxu0 %v24495_v48  ;;  %23252 = vmatpush3.bf16.msra.mxu1 %v24496_v29  ;;  %v8343_v38 = vadd.f32 %v30238_v33, %v8065_v34  ;;  %v24503_v7 = vld [vmem:[%s29960_s3] sm:$0xff]  }
 0x45f   :  { %v8370_v10 = vmax.f32 %v8360_v37, %v8361_v58  ;;  %v8354_v44 = vadd.f32 %v22839_v54, %v8076_v15  ;;  %v8074_v56 = vadd.f32 %v8031_v57, %v7796_v22  ;;  %v22840_v28 = vpop.f32.mrf.mxu1  ;;  %v30236_v37 = vld [vmem:[#allocation59_spill] sm:$0xff]  ;;  %23253 = vmatprep.subr.bf16.mxu1 %v24502_v45  ;;  %v30242_v57 = vld [vmem:[#allocation60_spill] sm:$0xff] }
 0x460   :  { %v22804_v53 = vpop.f32.mrf.mxu0  ;;  %v7523_v60 = vadd.f32 %v30236_v37, %v30235_v41  ;;  %23198 = vmatmul.mubr.bf16.gmra.mxu1 %v24493_v18  ;;  %v24504_v29 = vld [vmem:[%s29960_s3 + $0x80] sm:$0xff]  }
 0x461   :  { %v8375_v13 = vadd.f32 %v27924_v46, %v8370_v10  ;;  %v8364_v62 = vmax.f32 %v27905_v19, %v8354_v44  ;;  %v8352_v17 = vadd.f32 %v8309_v49, %v8074_v56  ;;  %v8077_v32 = vadd.f32 %v22804_v53, %v7799_v20  ;;  %23216 = vmatpush3.bf16.msra.mxu0 %v24495_v48  ;;  %v8312_v47 = vpop.f32.mrf.mxu1  ;;  %v30237_v48 = vld [vmem:[#allocation53_spill] sm:$0xff]  ;;  %v30241_v19 = vld [vmem:[#allocation58_spill] sm:$0xff] }
 0x462   :  { %v8034_v30 = vpop.f32.mrf.mxu0  ;;  %23217 = vmatprep.subr.bf16.mxu0 %v24497_v63  ;;  %v7800_v22 = vadd.f32 %v30237_v48, %v7522_v1  ;;  %v30240_v20 = vld [vmem:[#allocation65_spill] sm:$0xff]  ;;  %v7803_v40 = vadd.f32 %v30241_v19, %v7525_v0  ;;  %v7801_v10 = vadd.f32 %v30242_v57, %v7523_v60  ;;  %23201 = vmatprep.mubr.bf16.mxu1 %v24499_v4  ;;  %v30243_v1 = vld [vmem:[#allocation66_spill] sm:$0xff] }
 0x463   :  { %v8380_v59 = vmax.f32 %v8375_v13, 0.0  ;;  %v8362_v16 = vmax.f32 %v27915_v24, %v8352_v17  ;;  %v8355_v21 = vadd.f32 %v22840_v28, %v8077_v32  ;;  %v8075_v25 = vadd.f32 %v8034_v30, %v7797_v52  ;;  %v22843_v43 = vpop.f32.mrf.mxu1  ;;  %v24500_v56 = vld [vmem:[#allocation2 + $0x178] sm:$0xff]   ;;  %v30244_v24 = vld [vmem:[#allocation68_spill] sm:$0xff]  ;;  %23254 = vmatpush3.bf16.msra.mxu1 %v24502_v45  ;;  %v24505_v53 = vld [vmem:[#allocation2 + $0x120] sm:$0xff]  }
 0x464   :  { %v8068_v58 = vadd.f32 %v30240_v20, %v30239_v9  ;;  %v22807_v11 = vpop.f32.mrf.mxu0  ;;  %23162 = vmatmul.mubr.bf16.gmra.mxu0 %v24492_v42  ;;  %v8348_v42 = vadd.f32 %v27863_v6, %v8070_v27  ;;  %v8069_v2 = vadd.f32 %v30244_v24, %v27873_v61  ;;  %v8071_v6 = vadd.f32 %v27882_v36, %v27885_v55  ;;  %v24509_v61 = vld [vmem:[%s29960_s3 + $0xf8] sm:$0xff]   ;;  %v24508_v9 = vld [vmem:[#allocation2 + $0x130] sm:$0xff]  }
 0x465   :  { %v8385_v23 = vpack.c.bf16 %v8380_v59, %v8380_v59  ;;  %v8365_v15 = vmax.f32 %v8345_v14, %v8355_v21  ;;  %v8353_v54 = vadd.f32 %v8312_v47, %v8075_v25  ;;  %v8080_v52 = vadd.f32 %v22807_v11, %v7802_v50  ;;  %23165 = vmatprep.mubr.bf16.mxu0 %v24498_v31  ;;  %v8325_v18 = vpop.f32.mrf.mxu1  ;;  %v24515_v0 = vld [vmem:[%s29960_s3 + $0x138] sm:$0xff]   ;;  %v24510_v11 = vld [vmem:[%s29960_s3 + $0xf0] sm:$0xff]  }
 0x466   :  { %v8047_v44 = vpop.f32.mrf.mxu0  ;;  %23218 = vmatpush3.bf16.msra.mxu0 %v24497_v63  ;;  %v8346_v39 = vadd.f32 %v30243_v1, %v8068_v58  ;;  %23255 = vmatprep.subr.bf16.mxu1 %v24504_v29  ;;  %v24506_v63 = vld [vmem:[#allocation2 + $0x128] sm:$0xff]   ;;  %v8349_v41 = vadd.f32 %v27889_v8, %v8071_v6  ;;  %v8347_v14 = vadd.f32 %v27826_v3, %v8069_v2  ;;  %v24517_v57 = vld [vmem:[%s29960_s3 + $0x130] sm:$0xff]   ;;  %v24518_v2 = vld [vmem:[#allocation2 + $0x140] sm:$0xff]  }
 0x467   :  { %8390 = vst [vmem:[#allocation3 + $0x14] sm:$0xf] %v8385_v23  ;;  %v8372_v49 = vmax.f32 %v8364_v62, %v8365_v15  ;;  %v8363_v51 = vmax.f32 %v8343_v38, %v8353_v54  ;;  %v8358_v50 = vadd.f32 %v22843_v43, %v8080_v52  ;;  %v8078_v35 = vadd.f32 %v8047_v44, %v7800_v22  ;;  %v22844_v28 = vpop.f32.mrf.mxu1  ;;  %v24507_v22 = vld [vmem:[#allocation2 + $0x128] sm:$0xff]   ;;  %v24511_v54 = vld [vmem:[#allocation2 + $0x130] sm:$0xff]  }
 0x468   :  { %v22808_v34 = vpop.f32.mrf.mxu0  ;;  %23219 = vmatprep.subr.bf16.mxu0 %v24503_v7  ;;  %23256 = vmatpush3.bf16.msra.mxu1 %v24504_v29  ;;  %v24512_v29 = vld [vmem:[#allocation2 + $0x138] sm:$0xff]  }
 0x469   :  { %v8377_v13 = vadd.f32 %v27924_v46, %v8372_v49  ;;  %v8371_v62 = vmax.f32 %v8362_v16, %v8363_v51  ;;  %v8368_v17 = vmax.f32 %v8348_v42, %v8358_v50  ;;  %v8356_v32 = vadd.f32 %v8325_v18, %v8078_v35  ;;  %v8328_v26 = vpop.f32.mrf.mxu1  ;;  %23202 = vmatmul.mubr.bf16.gmra.mxu1 %v24501_v12  ;;  %v24516_v51 = vld [vmem:[%s29960_s3 + $0xe8] sm:$0xff]   ;;  %v24514_v18 = vld [vmem:[#allocation2 + $0x140] sm:$0xff]  }
 0x46a   :  { %v8081_v31 = vadd.f32 %v22808_v34, %v7803_v40  ;;  %v8050_v5 = vpop.f32.mrf.mxu0  ;;  %23220 = vmatpush3.bf16.msra.mxu0 %v24503_v7  ;;  %23257 = vmatprep.mubr.bf16.mxu1 %v24506_v63 }
 0x46b   :  { %v8376_v36 = vadd.f32 %v27924_v46, %v8371_v62  ;;  %v8366_v55 = vmax.f32 %v8346_v39, %v8356_v32  ;;  %v8079_v45 = vadd.f32 %v8050_v5, %v7801_v10  ;;  %v8382_v27 = vmax.f32 %v8377_v13, 0.0  ;;  %v22899_v59 = vpop.f32.mrf.mxu1  ;;  %23277 = vmatprep.subr.bf16.mxu0 %v24509_v61  ;;  %23313 = vmatprep.subr.bf16.mxu1 %v24515_v0  ;;  %v24523_v39 = vld [vmem:[%s29960_s3 + $0x128] sm:$0xff]   ;;  %v24520_v62 = vld [vmem:[%s29960_s3 + $0xe0] sm:$0xff]  }
 0x46c   :  { %v8359_v37 = vadd.f32 %v22844_v28, %v8081_v31  ;;  %v22863_v60 = vpop.f32.mrf.mxu0  ;;  %23166 = vmatmul.mubr.bf16.gmra.mxu0 %v24500_v56  ;;  %v24525_v28 = vld [vmem:[%s29960_s3 + $0x120] sm:$0xff]  }
 0x46d   :  { %v8381_v30 = vmax.f32 %v8376_v36, 0.0  ;;  %v8357_v4 = vadd.f32 %v8328_v26, %v8079_v45  ;;  %23221 = vmatprep.mubr.bf16.mxu0 %v24505_v53  ;;  %v27963_v21 = vadd.f32 %v22899_v59, %v22863_v60  ;;  %v8830_v48 = vpop.f32.mrf.mxu1  ;;  %v24519_v53 = vld [vmem:[#allocation2 + $0x148] sm:$0xff]   ;;  %v24524_v36 = vld [vmem:[%s29960_s3 + $0xd8] sm:$0xff]   ;;  %v24531_v59 = vld [vmem:[%s29960_s3 + $0xd0] sm:$0xff]  }
 0x46e   :  { %v8369_v16 = vmax.f32 %v8349_v41, %v8359_v37  ;;  %v8609_v25 = vpop.f32.mrf.mxu0  ;;  %v24522_v45 = vld [vmem:[#allocation2 + $0x158] sm:$0xff]  }
 0x46f   :  { %v20391_v47 = vpack.c.bf16 %v8382_v27, %v8381_v30  ;;  %v8367_v8 = vmax.f32 %v8347_v14, %v8357_v4  ;;  %v27965_v38 = vadd.f32 %v8830_v48, %v8609_v25  ;;  %v22900_v58 = vpop.f32.mrf.mxu1  ;;  %v24530_v41 = vld [vmem:[%s29960_s3 + $0x118] sm:$0xff]   ;;  %v24527_v30 = vld [vmem:[#allocation2 + $0x160] sm:$0xff]  }
 0x470   :  { %v8374_v33 = vmax.f32 %v8368_v17, %v8369_v16  ;;  %v22864_v3 = vpop.f32.mrf.mxu0  ;;  %v24526_v60 = vld [vmem:[#allocation2 + $0x158] sm:$0xff]  }
 0x471   :  { %20434 = vst [vmem:[#allocation3 + $0x18] sm:$0xff] %v20391_v47   ;;  %v8373_v20 = vmax.f32 %v8366_v55, %v8367_v8  ;;  %v27971_v23 = vadd.f32 %v22900_v58, %v22864_v3  ;;  %v8833_v43 = vpop.f32.mrf.mxu1  ;;  %23258 = vmatmul.mubr.bf16.vlgmr.msra.gmra.mxu1 %v24508_v9  ;;  %v24532_v47 = vld [vmem:[%s29960_s3 + $0x110] sm:$0xff]   ;;  %v24533_v3 = vld [vmem:[%s29960_s3 + $0xc8] sm:$0xff]  }
 0x472   :  { %v8379_v7 = vadd.f32 %v27924_v46, %v8374_v33  ;;  %v8612_v15 = vpop.f32.mrf.mxu0  ;;  %23261 = vmatprep.mubr.bf16.mxu1 %v24512_v29  ;;  %23314 = vmatpush3.bf16.msra.mxu1 %v24515_v0  ;;  %v24528_v33 = vld [vmem:[#allocation2 + $0x160] sm:$0xff]   ;;  %v24535_v29 = vld [vmem:[#allocation2 + $0x170] sm:$0xff]  }
 0x473   :  { %v8378_v52 = vadd.f32 %v27924_v46, %v8373_v20  ;;  %v27974_v19 = vadd.f32 %v8833_v43, %v8612_v15  ;;  %v22903_v44 = vpop.f32.mrf.mxu1  ;;  %v24513_v46 = vld [vmem:[#allocation2 + $0x138] sm:$0xff]   ;;  %23315 = vmatprep.subr.bf16.mxu1 %v24517_v57  ;;  %v24529_v20 = vld [vmem:[#allocation2 + $0x168] sm:$0xff]  }
 0x474   :  { %v22867_v40 = vpop.f32.mrf.mxu0  ;;  %23222 = vmatmul.mubr.bf16.vlgmr.msra.gmra.mxu0 %v24507_v22  ;;  %v8384_v10 = vmax.f32 %v8379_v7, 0.0  ;;  %v24538_v7 = vld [vmem:[%s29960_s3 + $0x108] sm:$0xff]  }
 0x475   :  { %v8383_v42 = vmax.f32 %v8378_v52, 0.0  ;;  %23278 = vmatpush3.bf16.msra.mxu0 %v24509_v61  ;;  %v27979_v56 = vadd.f32 %v22903_v44, %v22867_v40  ;;  %23225 = vmatprep.mubr.bf16.mxu0 %v24511_v54  ;;  %v8846_v35 = vpop.f32.mrf.mxu1  ;;  %v24521_v61 = vld [vmem:[#allocation2 + $0x150] sm:$0xff]   ;;  %v24534_v54 = vld [vmem:[#allocation2 + $0x168] sm:$0xff]   ;;  %v24540_v44 = vld [vmem:[%s29960_s3 + $0x100] sm:$0xff]  }
 0x476   :  { %v8625_v49 = vpop.f32.mrf.mxu0  ;;  %23279 = vmatprep.subr.bf16.mxu0 %v24510_v11  ;;  %23316 = vmatpush3.bf16.msra.mxu1 %v24517_v57  ;;  %v24539_v57 = vld [vmem:[%s29960_s3 + $0xc0] sm:$0xff]  }
 0x477   :  { %v20396_v50 = vpack.c.bf16 %v8384_v10, %v8383_v42  ;;  %v27984_v12 = vadd.f32 %v8846_v35, %v8625_v49  ;;  %v22904_v24 = vpop.f32.mrf.mxu1  ;;  %23317 = vmatprep.subr.bf16.mxu1 %v24523_v39 }
 0x478   :  { %v22868_v1 = vpop.f32.mrf.mxu0 }
 0x479   :  { %20435 = vst [vmem:[#allocation3 + $0x20] sm:$0xff] %v20396_v50   ;;  %23280 = vmatpush3.bf16.msra.mxu0 %v24510_v11  ;;  %v27989_v6 = vadd.f32 %v22904_v24, %v22868_v1  ;;  %v8849_v13 = vpop.f32.mrf.mxu1  ;;  %23262 = vmatmul.mubr.bf16.gmra.mxu1 %v24514_v18  ;;  %v24536_v50 = vld [vmem:[#allocation2 + $0x170] sm:$0xff]   ;;  %v24537_v18 = vld [vmem:[#allocation2 + $0x178] sm:$0xff]  }
 0x47a   :  { %v8628_v34 = vpop.f32.mrf.mxu0  ;;  %23281 = vmatprep.subr.bf16.mxu0 %v24516_v51  ;;  %23265 = vmatprep.mubr.bf16.mxu1 %v24519_v53  ;;  %v24545_v1 = vld [vmem:[%s29960_s3 + $0x178] sm:$0xff]   ;;  %v24541_v53 = vld [vmem:[#allocation2 + $0x150] sm:$0xff]  }
 0x47b   :  { %v27994_v17 = vadd.f32 %v8849_v13, %v8628_v34  ;;  %v22907_v63 = vpop.f32.mrf.mxu1  ;;  %23318 = vmatpush3.bf16.msra.mxu1 %v24523_v39 }
 0x47c   :  { %v22871_v32 = vpop.f32.mrf.mxu0  ;;  %23226 = vmatmul.mubr.bf16.gmra.mxu0 %v24513_v46  ;;  %23319 = vmatprep.subr.bf16.mxu1 %v24525_v28 }
 0x47d   :  { %23282 = vmatpush3.bf16.msra.mxu0 %v24516_v51  ;;  %v27999_v31 = vadd.f32 %v22907_v63, %v22871_v32  ;;  %23229 = vmatprep.mubr.bf16.mxu0 %v24518_v2  ;;  %v8862_v55 = vpop.f32.mrf.mxu1  ;;  %v24551_v2 = vld [vmem:[%s29960_s3 + $0x1b8] sm:$0xff]  }
 0x47e   :  { %v8641_v5 = vpop.f32.mrf.mxu0  ;;  %23283 = vmatprep.subr.bf16.mxu0 %v24520_v62  ;;  %v24542_v32 = vld [vmem:[#allocation2 + $0x154] sm:$0xff]  }
 0x47f   :  { %v28004_v26 = vadd.f32 %v8862_v55, %v8641_v5  ;;  %v22908_v37 = vpop.f32.mrf.mxu1  ;;  %23320 = vmatpush3.bf16.msra.mxu1 %v24525_v28 }
 0x480   :  { %v22872_v0 = vpop.f32.mrf.mxu0  ;;  %23321 = vmatprep.subr.bf16.mxu1 %v24530_v41 }
 0x481   :  { %23284 = vmatpush3.bf16.msra.mxu0 %v24520_v62  ;;  %v28009_v14 = vadd.f32 %v22908_v37, %v22872_v0  ;;  %v8865_v4 = vpop.f32.mrf.mxu1  ;;  %23266 = vmatmul.mubr.bf16.gmra.mxu1 %v24522_v45  ;;  %v24543_v37 = vld [vmem:[#allocation2 + $0x158] sm:$0xff]  }
 0x482   :  { %v8644_v27 = vpop.f32.mrf.mxu0  ;;  %23285 = vmatprep.subr.bf16.mxu0 %v24524_v36  ;;  %23269 = vmatprep.mubr.bf16.mxu1 %v24527_v30 }
 0x483   :  { %v28014_v16 = vadd.f32 %v8865_v4, %v8644_v27  ;;  %v22911_v8 = vpop.f32.mrf.mxu1  ;;  %23322 = vmatpush3.bf16.msra.mxu1 %v24530_v41  ;;  %v24544_v27 = vld [vmem:[#allocation2 + $0x15c] sm:$0xff]  }
 0x484   :  { %v22875_v25 = vpop.f32.mrf.mxu0  ;;  %23230 = vmatmul.mubr.bf16.gmra.mxu0 %v24521_v61  ;;  %23323 = vmatprep.subr.bf16.mxu1 %v24532_v47 }
 0x485   :  { %23286 = vmatpush3.bf16.msra.mxu0 %v24524_v36  ;;  %v28019_v48 = vadd.f32 %v22911_v8, %v22875_v25  ;;  %23233 = vmatprep.mubr.bf16.mxu0 %v24526_v60  ;;  %v8878_v9 = vpop.f32.mrf.mxu1 }
 0x486   :  { %v8657_v22 = vpop.f32.mrf.mxu0  ;;  %23287 = vmatprep.subr.bf16.mxu0 %v24531_v59 }
 0x487   :  { %v28024_v58 = vadd.f32 %v8878_v9, %v8657_v22  ;;  %v22912_v15 = vpop.f32.mrf.mxu1  ;;  %23324 = vmatpush3.bf16.msra.mxu1 %v24532_v47  ;;  %v24547_v47 = vld [vmem:[#allocation2 + $0x160] sm:$0xff]   ;;  %v24553_v9 = vld [vmem:[%s29960_s3 + $0x1b0] sm:$0xff]  }
 0x488   :  { %v22876_v11 = vpop.f32.mrf.mxu0  ;;  %23325 = vmatprep.subr.bf16.mxu1 %v24538_v7 }
 0x489   :  { %23288 = vmatpush3.bf16.msra.mxu0 %v24531_v59  ;;  %v28029_v52 = vadd.f32 %v22912_v15, %v22876_v11  ;;  %v8881_v40 = vpop.f32.mrf.mxu1  ;;  %23270 = vmatmul.mubr.bf16.gmra.mxu1 %v24529_v20  ;;  %v24549_v15 = vld [vmem:[#allocation2 + $0x168] sm:$0xff]  }
 0x48a   :  { %v8660_v43 = vpop.f32.mrf.mxu0  ;;  %23289 = vmatprep.subr.bf16.mxu0 %v24533_v3  ;;  %23273 = vmatprep.mubr.bf16.mxu1 %v24535_v29 }
 0x48b   :  { %v28034_v10 = vadd.f32 %v8881_v40, %v8660_v43  ;;  %v22915_v49 = vpop.f32.mrf.mxu1  ;;  %23326 = vmatpush3.bf16.msra.mxu1 %v24538_v7  ;;  %v24550_v40 = vld [vmem:[#allocation2 + $0x16c] sm:$0xff]  }
 0x48c   :  { %v22879_v42 = vpop.f32.mrf.mxu0  ;;  %23234 = vmatmul.mubr.bf16.gmra.mxu0 %v24528_v33  ;;  %23327 = vmatprep.subr.bf16.mxu1 %v24540_v44  ;;  %v24548_v33 = vld [vmem:[#allocation2 + $0x164] sm:$0xff]  }
 0x48d   :  { %23237 = vmatprep.mubr.bf16.mxu0 %v24534_v54  ;;  %v28039_v46 = vadd.f32 %v22915_v49, %v22879_v42  ;;  %23290 = vmatpush3.bf16.msra.mxu0 %v24533_v3  ;;  %v8894_v35 = vpop.f32.mrf.mxu1 }
 0x48e   :  { %v8673_v51 = vpop.f32.mrf.mxu0  ;;  %23291 = vmatprep.subr.bf16.mxu0 %v24539_v57 }
 0x48f   :  { %v28044_v39 = vadd.f32 %v8894_v35, %v8673_v51  ;;  %v22916_v34 = vpop.f32.mrf.mxu1  ;;  %23328 = vmatpush3.bf16.msra.mxu1 %v24540_v44  ;;  %v24554_v51 = vld [vmem:[#allocation2 + $0x170] sm:$0xff]  }
 0x490   :  { %v22880_v24 = vpop.f32.mrf.mxu0  ;;  %23385 = vmatprep.subr.bf16.mxu1 %v24551_v2 }
 0x491   :  { %v28049_v13 = vadd.f32 %v22916_v34, %v22880_v24  ;;  %23292 = vmatpush3.bf16.msra.mxu0 %v24539_v57  ;;  %v8897_v28 = vpop.f32.mrf.mxu1  ;;  %23274 = vmatmul.mubr.bf16.gmra.mxu1 %v24537_v18  ;;  %v24559_v57 = vld [vmem:[%s29960_s3 + $0x1a8] sm:$0xff]   ;;  %v24556_v24 = vld [vmem:[%s29960_s3 + $0x160] sm:$0xff]  }
 0x492   :  { %v8676_v62 = vpop.f32.mrf.mxu0  ;;  %23349 = vmatprep.subr.bf16.mxu0 %v24545_v1  ;;  %23329 = vmatprep.mubr.bf16.mxu1 %v24542_v32  ;;  %v24557_v32 = vld [vmem:[#allocation2 + $0x180] sm:$0xff]  }
 0x493   :  { %v28051_v63 = vadd.f32 %v8897_v28, %v8676_v62  ;;  %v22971_v36 = vpop.f32.mrf.mxu1  ;;  %v24560_v28 = vld [vmem:[%s29960_s3 + $0x158] sm:$0xff]  }
 0x494   :  { %v22935_v5 = vpop.f32.mrf.mxu0  ;;  %23238 = vmatmul.mubr.bf16.gmra.mxu0 %v24536_v50 }
 0x495   :  { %v9168_v61 = vadd.f32 %v22935_v5, %v27963_v21  ;;  %23293 = vmatprep.mubr.bf16.mxu0 %v24541_v53  ;;  %v9365_v41 = vpop.f32.mrf.mxu1  ;;  %v24546_v21 = vld [vmem:[%s29960_s3 + $0x170] sm:$0xff]  }
 0x496   :  { %v9087_v55 = vpop.f32.mrf.mxu0 }
 0x497   :  { %v28054_v45 = vadd.f32 %v22971_v36, %v9168_v61  ;;  %v9166_v0 = vadd.f32 %v9087_v55, %v27965_v38  ;;  %v22972_v59 = vpop.f32.mrf.mxu1  ;;  %v24558_v55 = vld [vmem:[#allocation2 + $0x184] sm:$0xff]  }
 0x498   :  { %v22936_v60 = vpop.f32.mrf.mxu0 }
 0x499   :  { %v28057_v30 = vadd.f32 %v9365_v41, %v9166_v0  ;;  %v9169_v4 = vadd.f32 %v22936_v60, %v27971_v23  ;;  %v9368_v38 = vpop.f32.mrf.mxu1  ;;  %23330 = vmatmul.mubr.bf16.vlgmr.msra.gmra.mxu1 %v24544_v27  ;;  %v24566_v0 = vld [vmem:[%s29960_s3 + $0x198] sm:$0xff]   ;;  %v24562_v27 = vld [vmem:[#allocation2 + $0x188] sm:$0xff]  }
 0x49a   :  { %v9090_v25 = vpop.f32.mrf.mxu0  ;;  %23333 = vmatprep.mubr.bf16.mxu1 %v24548_v33  ;;  %23386 = vmatpush3.bf16.msra.mxu1 %v24551_v2 }
 0x49b   :  { %v28063_v8 = vadd.f32 %v22972_v59, %v9169_v4  ;;  %v9167_v22 = vadd.f32 %v9090_v25, %v27974_v19  ;;  %v22975_v11 = vpop.f32.mrf.mxu1  ;;  %v24552_v19 = vld [vmem:[%s29960_s3 + $0x168] sm:$0xff]   ;;  %23387 = vmatprep.subr.bf16.mxu1 %v24553_v9 }
 0x49c   :  { %v22939_v3 = vpop.f32.mrf.mxu0  ;;  %23294 = vmatmul.mubr.bf16.vlgmr.msra.gmra.mxu0 %v24543_v37 }
 0x49d   :  { %v28069_v23 = vadd.f32 %v9368_v38, %v9167_v22  ;;  %v9172_v20 = vadd.f32 %v22939_v3, %v27979_v56  ;;  %23350 = vmatpush3.bf16.msra.mxu0 %v24545_v1  ;;  %23297 = vmatprep.mubr.bf16.mxu0 %v24547_v47  ;;  %v9381_v29 = vpop.f32.mrf.mxu1  ;;  %v24567_v47 = vld [vmem:[%s29960_s3 + $0x150] sm:$0xff]  }
 0x49e   :  { %v9103_v7 = vpop.f32.mrf.mxu0  ;;  %23351 = vmatprep.subr.bf16.mxu0 %v24546_v21  ;;  %23388 = vmatpush3.bf16.msra.mxu1 %v24553_v9  ;;  %v24564_v9 = vld [vmem:[#allocation2 + $0x190] sm:$0xff]  }
 0x49f   :  { %v28075_v54 = vadd.f32 %v22975_v11, %v9172_v20  ;;  %v9170_v43 = vadd.f32 %v9103_v7, %v27984_v12  ;;  %v22976_v49 = vpop.f32.mrf.mxu1  ;;  %v24555_v12 = vld [vmem:[#allocation2 + $0x174] sm:$0xff]   ;;  %23389 = vmatprep.subr.bf16.mxu1 %v24559_v57  ;;  %v24569_v20 = vld [vmem:[%s29960_s3 + $0x148] sm:$0xff]  }
 0x4a0   :  { %v22940_v56 = vpop.f32.mrf.mxu0 }
 0x4a1   :  { %v28081_v42 = vadd.f32 %v9381_v29, %v9170_v43  ;;  %v9173_v44 = vadd.f32 %v22940_v56, %v27989_v6  ;;  %23352 = vmatpush3.bf16.msra.mxu0 %v24546_v21  ;;  %v9384_v1 = vpop.f32.mrf.mxu1  ;;  %v24561_v6 = vld [vmem:[%s29960_s3 + $0x1a0] sm:$0xff]   ;;  %23334 = vmatmul.mubr.bf16.gmra.mxu1 %v24550_v40  ;;  %v24574_v43 = vld [vmem:[%s29960_s3 + $0x188] sm:$0xff]  }
 0x4a2   :  { %v9106_v50 = vpop.f32.mrf.mxu0  ;;  %23353 = vmatprep.subr.bf16.mxu0 %v24552_v19  ;;  %23337 = vmatprep.mubr.bf16.mxu1 %v24555_v12  ;;  %v24575_v12 = vld [vmem:[%s29960_s3 + $0x140] sm:$0xff]  }
 0x4a3   :  { %v28084_v35 = vadd.f32 %v22976_v49, %v9173_v44  ;;  %v9171_v18 = vadd.f32 %v9106_v50, %v27994_v17  ;;  %v22979_v62 = vpop.f32.mrf.mxu1  ;;  %23390 = vmatpush3.bf16.msra.mxu1 %v24559_v57  ;;  %v24570_v57 = vld [vmem:[#allocation2 + $0x198] sm:$0xff]  }
 0x4a4   :  { %v22943_v2 = vpop.f32.mrf.mxu0  ;;  %23298 = vmatmul.mubr.bf16.gmra.mxu0 %v24549_v15  ;;  %23391 = vmatprep.subr.bf16.mxu1 %v24561_v6 }
 0x4a5   :  { %v28093_v34 = vadd.f32 %v9384_v1, %v9171_v18  ;;  %v9176_v53 = vadd.f32 %v22943_v2, %v27999_v31  ;;  %23354 = vmatpush3.bf16.msra.mxu0 %v24552_v19  ;;  %23301 = vmatprep.mubr.bf16.mxu0 %v24554_v51  ;;  %v9397_v36 = vpop.f32.mrf.mxu1  ;;  %v24565_v19 = vld [vmem:[#allocation2 + $0x194] sm:$0xff]  }
 0x4a6   :  { %v9119_v17 = vpop.f32.mrf.mxu0  ;;  %23355 = vmatprep.subr.bf16.mxu0 %v24556_v24 }
 0x4a7   :  { %v28099_v5 = vadd.f32 %v22979_v62, %v9176_v53  ;;  %v9174_v61 = vadd.f32 %v9119_v17, %v28004_v26  ;;  %v22980_v60 = vpop.f32.mrf.mxu1  ;;  %v24563_v26 = vld [vmem:[#allocation2 + $0x18c] sm:$0xff]   ;;  %23392 = vmatpush3.bf16.msra.mxu1 %v24561_v6  ;;  %v24572_v6 = vld [vmem:[#allocation2 + $0x1a0] sm:$0xff]  }
 0x4a8   :  { %v22944_v31 = vpop.f32.mrf.mxu0  ;;  %23393 = vmatprep.subr.bf16.mxu1 %v24566_v0 }
 0x4a9   :  { %v28105_v41 = vadd.f32 %v9397_v36, %v9174_v61  ;;  %v9177_v37 = vadd.f32 %v22944_v31, %v28009_v14  ;;  %23356 = vmatpush3.bf16.msra.mxu0 %v24556_v24  ;;  %v9400_v25 = vpop.f32.mrf.mxu1  ;;  %v24568_v14 = vld [vmem:[%s29960_s3 + $0x190] sm:$0xff]   ;;  %23338 = vmatmul.mubr.bf16.gmra.mxu1 %v24558_v55  ;;  %v24587_v61 = vld [vmem:[%s29960_s3 + $0x238] sm:$0xff]  }
 0x4aa   :  { %v9122_v4 = vpop.f32.mrf.mxu0  ;;  %23357 = vmatprep.subr.bf16.mxu0 %v24560_v28  ;;  %23341 = vmatprep.mubr.bf16.mxu1 %v24563_v26 }
 0x4ab   :  { %v28108_v59 = vadd.f32 %v22980_v60, %v9177_v37  ;;  %v9175_v21 = vadd.f32 %v9122_v4, %v28014_v16  ;;  %v22983_v3 = vpop.f32.mrf.mxu1  ;;  %23394 = vmatpush3.bf16.msra.mxu1 %v24566_v0  ;;  %v24578_v37 = vld [vmem:[#allocation2 + $0x180] sm:$0xff]  }
 0x4ac   :  { %v22947_v22 = vpop.f32.mrf.mxu0  ;;  %23302 = vmatmul.mubr.bf16.gmra.mxu0 %v24557_v32  ;;  %23395 = vmatprep.subr.bf16.mxu1 %v24568_v14  ;;  %v24573_v32 = vld [vmem:[#allocation2 + $0x1a4] sm:$0xff]  }
 0x4ad   :  { %v28117_v38 = vadd.f32 %v9400_v25, %v9175_v21  ;;  %v9180_v33 = vadd.f32 %v22947_v22, %v28019_v48  ;;  %23358 = vmatpush3.bf16.msra.mxu0 %v24560_v28  ;;  %23305 = vmatprep.mubr.bf16.mxu0 %v24562_v27  ;;  %v9413_v15 = vpop.f32.mrf.mxu1  ;;  %v24581_v28 = vld [vmem:[%s29960_s3 + $0x1f8] sm:$0xff]  }
 0x4ae   :  { %v9135_v16 = vpop.f32.mrf.mxu0  ;;  %23359 = vmatprep.subr.bf16.mxu0 %v24567_v47 }
 0x4af   :  { %v28123_v11 = vadd.f32 %v22983_v3, %v9180_v33  ;;  %v9178_v7 = vadd.f32 %v9135_v16, %v28024_v58  ;;  %v22984_v56 = vpop.f32.mrf.mxu1  ;;  %v24571_v58 = vld [vmem:[#allocation2 + $0x19c] sm:$0xff]   ;;  %23396 = vmatpush3.bf16.msra.mxu1 %v24568_v14  ;;  %v24580_v16 = vld [vmem:[#allocation2 + $0x188] sm:$0xff]  }
 0x4b0   :  { %v22948_v48 = vpop.f32.mrf.mxu0  ;;  %23397 = vmatprep.subr.bf16.mxu1 %v24574_v43  ;;  %v24579_v33 = vld [vmem:[#allocation2 + $0x160] sm:$0xff]  }
 0x4b1   :  { %v28129_v29 = vadd.f32 %v9413_v15, %v9178_v7  ;;  %v9181_v40 = vadd.f32 %v22948_v48, %v28029_v52  ;;  %23360 = vmatpush3.bf16.msra.mxu0 %v24567_v47  ;;  %v9416_v50 = vpop.f32.mrf.mxu1  ;;  %v24576_v52 = vld [vmem:[%s29960_s3 + $0x180] sm:$0xff]   ;;  %23342 = vmatmul.mubr.bf16.gmra.mxu1 %v24565_v19  ;;  %v24583_v19 = vld [vmem:[#allocation2 + $0x168] sm:$0xff]  }
 0x4b2   :  { %v9138_v44 = vpop.f32.mrf.mxu0  ;;  %23361 = vmatprep.subr.bf16.mxu0 %v24569_v20  ;;  %23345 = vmatprep.mubr.bf16.mxu1 %v24571_v58 }
 0x4b3   :  { %v28132_v49 = vadd.f32 %v22984_v56, %v9181_v40  ;;  %v9179_v51 = vadd.f32 %v9138_v44, %v28034_v10  ;;  %v22987_v2 = vpop.f32.mrf.mxu1  ;;  %23398 = vmatpush3.bf16.msra.mxu1 %v24574_v43  ;;  %v24584_v40 = vld [vmem:[#allocation2 + $0x190] sm:$0xff]  }
 0x4b4   :  { %v22951_v18 = vpop.f32.mrf.mxu0  ;;  %23306 = vmatmul.mubr.bf16.gmra.mxu0 %v24564_v9  ;;  %23399 = vmatprep.subr.bf16.mxu1 %v24576_v52 }
 0x4b5   :  { %v28141_v1 = vadd.f32 %v9416_v50, %v9179_v51  ;;  %v9184_v24 = vadd.f32 %v22951_v18, %v28039_v46  ;;  %23309 = vmatprep.mubr.bf16.mxu0 %v24570_v57  ;;  %23362 = vmatpush3.bf16.msra.mxu0 %v24569_v20  ;;  %v9429_v17 = vpop.f32.mrf.mxu1  ;;  %v24589_v57 = vld [vmem:[%s29960_s3 + $0x230] sm:$0xff]  }
 0x4b6   :  { %v9151_v10 = vpop.f32.mrf.mxu0  ;;  %23363 = vmatprep.subr.bf16.mxu0 %v24575_v12  ;;  %v24585_v50 = vld [vmem:[#allocation2 + $0x170] sm:$0xff]  }
 0x4b7   :  { %v28144_v53 = vadd.f32 %v22987_v2, %v9184_v24  ;;  %v9182_v62 = vadd.f32 %v9151_v10, %v28044_v39  ;;  %v22988_v31 = vpop.f32.mrf.mxu1  ;;  %v24577_v39 = vld [vmem:[#allocation2 + $0x158] sm:$0xff]   ;;  %23400 = vmatpush3.bf16.msra.mxu1 %v24576_v52  ;;  %v24595_v2 = vld [vmem:[%s29960_s3 + $0x228] sm:$0xff]  }
 0x4b8   :  { %v22952_v46 = vpop.f32.mrf.mxu0  ;;  %23457 = vmatprep.subr.bf16.mxu1 %v24587_v61  ;;  %v24586_v24 = vld [vmem:[#allocation2 + $0x198] sm:$0xff]  }
 0x4b9   :  { %v28153_v36 = vadd.f32 %v9429_v17, %v9182_v62  ;;  %v9185_v55 = vadd.f32 %v22952_v46, %v28049_v13  ;;  %23364 = vmatpush3.bf16.msra.mxu0 %v24575_v12  ;;  %v9432_v4 = vpop.f32.mrf.mxu1  ;;  %23346 = vmatmul.mubr.bf16.gmra.mxu1 %v24573_v32  ;;  %v24590_v17 = vld [vmem:[#allocation2 + $0x178] sm:$0xff]  }
 0x4ba   :  { %v9154_v0 = vpop.f32.mrf.mxu0  ;;  %23421 = vmatprep.subr.bf16.mxu0 %v24581_v28  ;;  %23401 = vmatprep.mubr.bf16.mxu1 %v24578_v37 }
 0x4bb   :  { %v28156_v60 = vadd.f32 %v22988_v31, %v9185_v55  ;;  %v9183_v27 = vadd.f32 %v9154_v0, %v28051_v63  ;;  %v23043_v13 = vpop.f32.mrf.mxu1  ;;  %v24592_v55 = vld [vmem:[%s29960_s3 + $0x1e0] sm:$0xff]  }
 0x4bc   :  { %v23007_v26 = vpop.f32.mrf.mxu0  ;;  %23310 = vmatmul.mubr.bf16.gmra.mxu0 %v24572_v6 }
 0x4bd   :  { %v28159_v21 = vadd.f32 %v9432_v4, %v9183_v27  ;;  %v9724_v25 = vadd.f32 %v23007_v26, %v28054_v45  ;;  %23365 = vmatprep.mubr.bf16.mxu0 %v24577_v39  ;;  %v9921_v63 = vpop.f32.mrf.mxu1  ;;  %v24582_v45 = vld [vmem:[%s29960_s3 + $0x1f0] sm:$0xff]   ;;  %v24593_v27 = vld [vmem:[#allocation2 + $0x188] sm:$0xff]   ;;  %v24596_v4 = vld [vmem:[%s29960_s3 + $0x1d8] sm:$0xff]  }
 0x4be   :  { %v9643_v47 = vpop.f32.mrf.mxu0 }
 0x4bf   :  { %v28162_v22 = vadd.f32 %v23043_v13, %v9724_v25  ;;  %v9722_v14 = vadd.f32 %v9643_v47, %v28057_v30  ;;  %v23044_v7 = vpop.f32.mrf.mxu1  ;;  %v24594_v47 = vld [vmem:[#allocation2 + $0x1b0] sm:$0xff]  }
 0x4c0   :  { %v23008_v3 = vpop.f32.mrf.mxu0 }
 0x4c1   :  { %v28165_v9 = vadd.f32 %v9921_v63, %v9722_v14  ;;  %v9725_v20 = vadd.f32 %v23008_v3, %v28063_v8  ;;  %v9924_v30 = vpop.f32.mrf.mxu1  ;;  %23402 = vmatmul.mubr.bf16.vlgmr.msra.gmra.mxu1 %v24580_v16  ;;  %v24602_v14 = vld [vmem:[%s29960_s3 + $0x218] sm:$0xff]   ;;  %v24598_v16 = vld [vmem:[#allocation2 + $0x190] sm:$0xff]  }
 0x4c2   :  { %v9646_v15 = vpop.f32.mrf.mxu0  ;;  %23405 = vmatprep.mubr.bf16.mxu1 %v24584_v40  ;;  %23458 = vmatpush3.bf16.msra.mxu1 %v24587_v61 }
 0x4c3   :  { %v28171_v48 = vadd.f32 %v23044_v7, %v9725_v20  ;;  %v9723_v43 = vadd.f32 %v9646_v15, %v28069_v23  ;;  %v23047_v58 = vpop.f32.mrf.mxu1  ;;  %v24588_v23 = vld [vmem:[%s29960_s3 + $0x1e8] sm:$0xff]   ;;  %23459 = vmatprep.subr.bf16.mxu1 %v24589_v57 }
 0x4c4   :  { %v23011_v56 = vpop.f32.mrf.mxu0  ;;  %23366 = vmatmul.mubr.bf16.vlgmr.msra.gmra.mxu0 %v24579_v33 }
 0x4c5   :  { %v28177_v8 = vadd.f32 %v9924_v30, %v9723_v43  ;;  %v9728_v44 = vadd.f32 %v23011_v56, %v28075_v54  ;;  %23422 = vmatpush3.bf16.msra.mxu0 %v24581_v28  ;;  %23369 = vmatprep.mubr.bf16.mxu0 %v24583_v19  ;;  %v9937_v52 = vpop.f32.mrf.mxu1  ;;  %v24603_v19 = vld [vmem:[%s29960_s3 + $0x1d0] sm:$0xff]  }
 0x4c6   :  { %v9659_v51 = vpop.f32.mrf.mxu0  ;;  %23423 = vmatprep.subr.bf16.mxu0 %v24582_v45  ;;  %23460 = vmatpush3.bf16.msra.mxu1 %v24589_v57  ;;  %v24600_v57 = vld [vmem:[#allocation2 + $0x198] sm:$0xff]  }
 0x4c7   :  { %v28183_v12 = vadd.f32 %v23047_v58, %v9728_v44  ;;  %v9726_v18 = vadd.f32 %v9659_v51, %v28081_v42  ;;  %v23048_v62 = vpop.f32.mrf.mxu1  ;;  %v24591_v42 = vld [vmem:[#allocation2 + $0x1a0] sm:$0xff]   ;;  %23461 = vmatprep.subr.bf16.mxu1 %v24595_v2  ;;  %v24605_v44 = vld [vmem:[%s29960_s3 + $0x1c8] sm:$0xff]  }
 0x4c8   :  { %v23012_v54 = vpop.f32.mrf.mxu0 }
 0x4c9   :  { %v28189_v10 = vadd.f32 %v9937_v52, %v9726_v18  ;;  %v9729_v6 = vadd.f32 %v23012_v54, %v28084_v35  ;;  %23424 = vmatpush3.bf16.msra.mxu0 %v24582_v45  ;;  %v9940_v61 = vpop.f32.mrf.mxu1  ;;  %v24597_v35 = vld [vmem:[%s29960_s3 + $0x220] sm:$0xff]   ;;  %23406 = vmatmul.mubr.bf16.gmra.mxu1 %v24586_v24  ;;  %v24610_v18 = vld [vmem:[%s29960_s3 + $0x208] sm:$0xff]  }
 0x4ca   :  { %v9662_v32 = vpop.f32.mrf.mxu0  ;;  %23425 = vmatprep.subr.bf16.mxu0 %v24588_v23  ;;  %23409 = vmatprep.mubr.bf16.mxu1 %v24591_v42  ;;  %v24611_v42 = vld [vmem:[%s29960_s3 + $0x1c0] sm:$0xff]  }
 0x4cb   :  { %v28192_v28 = vadd.f32 %v23048_v62, %v9729_v6  ;;  %v9727_v46 = vadd.f32 %v9662_v32, %v28093_v34  ;;  %v23051_v37 = vpop.f32.mrf.mxu1  ;;  %23462 = vmatpush3.bf16.msra.mxu1 %v24595_v2  ;;  %v24606_v2 = vld [vmem:[#allocation2 + $0x1a0] sm:$0xff]  }
 0x4cc   :  { %v23015_v31 = vpop.f32.mrf.mxu0  ;;  %23370 = vmatmul.mubr.bf16.gmra.mxu0 %v24585_v50  ;;  %23463 = vmatprep.subr.bf16.mxu1 %v24597_v35 }
 0x4cd   :  { %v28201_v39 = vadd.f32 %v9940_v61, %v9727_v46  ;;  %v9732_v0 = vadd.f32 %v23015_v31, %v28099_v5  ;;  %23426 = vmatpush3.bf16.msra.mxu0 %v24588_v23  ;;  %23373 = vmatprep.mubr.bf16.mxu0 %v24590_v17  ;;  %v9953_v13 = vpop.f32.mrf.mxu1  ;;  %v24601_v23 = vld [vmem:[#allocation2 + $0x1c0] sm:$0xff]  }
 0x4ce   :  { %v9675_v34 = vpop.f32.mrf.mxu0  ;;  %23427 = vmatprep.subr.bf16.mxu0 %v24592_v55 }
 0x4cf   :  { %v28207_v26 = vadd.f32 %v23051_v37, %v9732_v0  ;;  %v9730_v25 = vadd.f32 %v9675_v34, %v28105_v41  ;;  %v23052_v3 = vpop.f32.mrf.mxu1  ;;  %v24599_v41 = vld [vmem:[#allocation2 + $0x1b8] sm:$0xff]   ;;  %23464 = vmatpush3.bf16.msra.mxu1 %v24597_v35  ;;  %v24608_v35 = vld [vmem:[#allocation2 + $0x1a8] sm:$0xff]  }
 0x4d0   :  { %v23016_v5 = vpop.f32.mrf.mxu0  ;;  %23465 = vmatprep.subr.bf16.mxu1 %v24602_v14 }
 0x4d1   :  { %v28213_v63 = vadd.f32 %v9953_v13, %v9730_v25  ;;  %v9733_v33 = vadd.f32 %v23016_v5, %v28108_v59  ;;  %23428 = vmatpush3.bf16.msra.mxu0 %v24592_v55  ;;  %v9956_v15 = vpop.f32.mrf.mxu1  ;;  %v24604_v59 = vld [vmem:[%s29960_s3 + $0x210] sm:$0xff]   ;;  %23410 = vmatmul.mubr.bf16.gmra.mxu1 %v24594_v47  ;;  %v24623_v25 = vld [vmem:[%s29960_s3 + $0x38] sm:$0xff]  }
 0x4d2   :  { %v9678_v20 = vpop.f32.mrf.mxu0  ;;  %23429 = vmatprep.subr.bf16.mxu0 %v24596_v4  ;;  %23413 = vmatprep.mubr.bf16.mxu1 %v24599_v41 }
 0x4d3   :  { %v28216_v7 = vadd.f32 %v23052_v3, %v9733_v33  ;;  %v9731_v45 = vadd.f32 %v9678_v20, %v28117_v38  ;;  %v23055_v56 = vpop.f32.mrf.mxu1  ;;  %23466 = vmatpush3.bf16.msra.mxu1 %v24602_v14  ;;  %v24614_v33 = vld [vmem:[#allocation2 + $0x188] sm:$0xff]  }
 0x4d4   :  { %v23019_v43 = vpop.f32.mrf.mxu0  ;;  %23374 = vmatmul.mubr.bf16.gmra.mxu0 %v24593_v27  ;;  %23467 = vmatprep.subr.bf16.mxu1 %v24604_v59  ;;  %v24609_v27 = vld [vmem:[#allocation2 + $0x1d0] sm:$0xff]  }
 0x4d5   :  { %v28225_v30 = vadd.f32 %v9956_v15, %v9731_v45  ;;  %v9736_v40 = vadd.f32 %v23019_v43, %v28123_v11  ;;  %23430 = vmatpush3.bf16.msra.mxu0 %v24596_v4  ;;  %23377 = vmatprep.mubr.bf16.mxu0 %v24598_v16  ;;  %v9969_v50 = vpop.f32.mrf.mxu1  ;;  %v24617_v4 = vld [vmem:[%s29960_s3 + $0x78] sm:$0xff]  }
 0x4d6   :  { %v9691_v38 = vpop.f32.mrf.mxu0  ;;  %23431 = vmatprep.subr.bf16.mxu0 %v24603_v19 }
 0x4d7   :  { %v28231_v58 = vadd.f32 %v23055_v56, %v9736_v40  ;;  %v9734_v51 = vadd.f32 %v9691_v38, %v28129_v29  ;;  %v23056_v54 = vpop.f32.mrf.mxu1  ;;  %v24607_v29 = vld [vmem:[#allocation2 + $0x1c8] sm:$0xff]   ;;  %23468 = vmatpush3.bf16.msra.mxu1 %v24604_v59  ;;  %v24616_v38 = vld [vmem:[#allocation2 + $0x190] sm:$0xff]  }
 0x4d8   :  { %v23020_v11 = vpop.f32.mrf.mxu0  ;;  %23469 = vmatprep.subr.bf16.mxu1 %v24610_v18  ;;  %v24615_v40 = vld [vmem:[#allocation2 + $0x18c] sm:$0xff]  }
 0x4d9   :  { %v28237_v52 = vadd.f32 %v9969_v50, %v9734_v51  ;;  %v9737_v24 = vadd.f32 %v23020_v11, %v28132_v49  ;;  %23432 = vmatpush3.bf16.msra.mxu0 %v24603_v19  ;;  %v9972_v32 = vpop.f32.mrf.mxu1  ;;  %v24612_v49 = vld [vmem:[%s29960_s3 + $0x200] sm:$0xff]   ;;  %23414 = vmatmul.mubr.bf16.gmra.mxu1 %v24601_v23  ;;  %v24619_v50 = vld [vmem:[#allocation2 + $0x194] sm:$0xff]  }
 0x4da   :  { %v9694_v6 = vpop.f32.mrf.mxu0  ;;  %23433 = vmatprep.subr.bf16.mxu0 %v24605_v44  ;;  %23417 = vmatprep.mubr.bf16.mxu1 %v24607_v29  ;;  %v24620_v11 = vld [vmem:[#allocation2 + $0x198] sm:$0xff]   ;;  %v24624_v29 = vld [vmem:[%s29960_s3 + $0x68] sm:$0xff]  }
 0x4db   :  { %v28240_v62 = vadd.f32 %v23056_v54, %v9737_v24  ;;  %v9735_v17 = vadd.f32 %v9694_v6, %v28141_v1  ;;  %v23059_v31 = vpop.f32.mrf.mxu1  ;;  %23470 = vmatpush3.bf16.msra.mxu1 %v24610_v18  ;;  %v24625_v18 = vld [vmem:[%s29960_s3 + $0x30] sm:$0xff]   ;;  %v24621_v6 = vld [vmem:[#allocation2 + $0x19c] sm:$0xff]  }
 0x4dc   :  { %v23023_v46 = vpop.f32.mrf.mxu0  ;;  %23378 = vmatmul.mubr.bf16.gmra.mxu0 %v24600_v57  ;;  %23471 = vmatprep.subr.bf16.mxu1 %v24612_v49 }
 0x4dd   :  { %v28249_v61 = vadd.f32 %v9972_v32, %v9735_v17  ;;  %v9740_v55 = vadd.f32 %v23023_v46, %v28144_v53  ;;  %23381 = vmatprep.mubr.bf16.mxu0 %v24606_v2  ;;  %23434 = vmatpush3.bf16.msra.mxu0 %v24605_v44  ;;  %v9985_v34 = vpop.f32.mrf.mxu1  ;;  %v24622_v46 = vld [vmem:[#allocation2 + $0x1a0] sm:$0xff]  }
 0x4de   :  { %v9707_v1 = vpop.f32.mrf.mxu0  ;;  %23435 = vmatprep.subr.bf16.mxu0 %v24611_v42 }
 0x4df   :  { %v28252_v0 = vadd.f32 %v23059_v31, %v9740_v55  ;;  %v9738_v37 = vadd.f32 %v9707_v1, %v28153_v36  ;;  %v23060_v5 = vpop.f32.mrf.mxu1  ;;  %v24613_v36 = vld [vmem:[#allocation2 + $0x184] sm:$0xff]   ;;  %23472 = vmatpush3.bf16.msra.mxu1 %v24612_v49 }
 0x4e0   :  { %v23024_v53 = vpop.f32.mrf.mxu0  ;;  %23529 = vmatprep.subr.bf16.mxu1 %v24623_v25  ;;  %v24631_v49 = vld [vmem:[%s29960_s3 + $0x28] sm:$0xff]  }
 0x4e1   :  { %v28261_v13 = vadd.f32 %v9985_v34, %v9738_v37  ;;  %v9741_v47 = vadd.f32 %v23024_v53, %v28156_v60  ;;  %23436 = vmatpush3.bf16.msra.mxu0 %v24611_v42  ;;  %v9988_v20 = vpop.f32.mrf.mxu1  ;;  %23418 = vmatmul.mubr.bf16.gmra.mxu1 %v24609_v27  ;;  %v24626_v1 = vld [vmem:[#allocation2 + $0x1a4] sm:$0xff]  }
 0x4e2   :  { %v9710_v14 = vpop.f32.mrf.mxu0  ;;  %23493 = vmatprep.subr.bf16.mxu0 %v24617_v4  ;;  %23473 = vmatprep.mubr.bf16.mxu1 %v24614_v33  ;;  %v24628_v34 = vld [vmem:[%s29960_s3 + $0x60] sm:$0xff]  }
 0x4e3   :  { %v28264_v3 = vadd.f32 %v23060_v5, %v9741_v47  ;;  %v9739_v16 = vadd.f32 %v9710_v14, %v28159_v21  ;;  %v23115_v60 = vpop.f32.mrf.mxu1  ;;  %v24629_v47 = vld [vmem:[#allocation2 + $0x1b4] sm:$0xff]  }
 0x4e4   :  { %v23079_v41 = vpop.f32.mrf.mxu0  ;;  %23382 = vmatmul.mubr.bf16.gmra.mxu0 %v24608_v35  ;;  %v24632_v5 = vld [vmem:[%s29960_s3 + $0x58] sm:$0xff]  }
 0x4e5   :  { %v28267_v45 = vadd.f32 %v9988_v20, %v9739_v16  ;;  %v10280_v15 = vadd.f32 %v23079_v41, %v28162_v22  ;;  %23437 = vmatprep.mubr.bf16.mxu0 %v24613_v36  ;;  %v10477_v21 = vpop.f32.mrf.mxu1  ;;  %v24618_v22 = vld [vmem:[%s29960_s3 + $0x70] sm:$0xff]   ;;  %v24630_v14 = vld [vmem:[#allocation2 + $0x1b8] sm:$0xff]  }
 0x4e6   :  { %v10199_v19 = vpop.f32.mrf.mxu0  ;;  %v24638_v16 = vld [vmem:[%s29960_s3 + $0x18] sm:$0xff]  }
 0x4e7   :  { %30245 = vst [vmem:[#allocation67_spill] sm:$0xff] %v28267_v45  ;;  %v28270_v43 = vadd.f32 %v23115_v60, %v10280_v15  ;;  %v10278_v59 = vadd.f32 %v10199_v19, %v28165_v9  ;;  %v28277_v44 = vpop.f32.mrf.mxu1  ;;  %v24634_v41 = vld [vmem:[#allocation2 + $0x1bc] sm:$0xff]  }
 0x4e8   :  { %v28273_v56 = vpop.f32.mrf.mxu0  ;;  %v24635_v60 = vld [vmem:[#allocation2 + $0x1c0] sm:$0xff]  }
 0x4e9   :  { %v28275_v57 = vadd.f32 %v10477_v21, %v10278_v59  ;;  %v28284_v23 = vpop.f32.mrf.mxu1  ;;  %23474 = vmatmul.mubr.bf16.vlgmr.msra.gmra.mxu1 %v24616_v38  ;;  %v24639_v59 = vld [vmem:[%s29960_s3 + $0x50] sm:$0xff]  }
 0x4ea   :  { %v28282_v51 = vpop.f32.mrf.mxu0  ;;  %23477 = vmatprep.mubr.bf16.mxu1 %v24620_v11  ;;  %23530 = vmatpush3.bf16.msra.mxu1 %v24623_v25  ;;  %v24641_v11 = vld [vmem:[%s29960_s3 + $0x48] sm:$0xff]  }
 0x4eb   :  { %v23119_v54 = vpop.f32.mrf.mxu1  ;;  %23531 = vmatprep.subr.bf16.mxu1 %v24625_v18  ;;  %v10279_v45 = vadd.f32 %v28282_v51, %v28177_v8  ;;  %v24669_v8 = vld [vmem:[%s29960_s3 + $0xe0] sm:$0xff]  }
 0x4ec   :  { %v23083_v9 = vpop.f32.mrf.mxu0  ;;  %23438 = vmatmul.mubr.bf16.vlgmr.msra.gmra.mxu0 %v24615_v40  ;;  %v24640_v40 = vld [vmem:[%s29960_s3 + $0x10] sm:$0xff]  }
 0x4ed   :  { %v10284_v24 = vadd.f32 %v23083_v9, %v28183_v12  ;;  %23494 = vmatpush3.bf16.msra.mxu0 %v24617_v4  ;;  %23441 = vmatprep.mubr.bf16.mxu0 %v24619_v50  ;;  %v10493_v42 = vpop.f32.mrf.mxu1  ;;  %v24633_v4 = vld [vmem:[%s29960_s3 + $0x20] sm:$0xff]  }
 0x4ee   :  { %v10215_v2 = vpop.f32.mrf.mxu0  ;;  %23495 = vmatprep.subr.bf16.mxu0 %v24618_v22  ;;  %23532 = vmatpush3.bf16.msra.mxu1 %v24625_v18  ;;  %v24636_v50 = vld [vmem:[#allocation2 + $0x1c4] sm:$0xff]  }
 0x4ef   :  { %v28293_v17 = vadd.f32 %v23119_v54, %v10284_v24  ;;  %v10282_v32 = vadd.f32 %v10215_v2, %v28189_v10  ;;  %v28303_v31 = vpop.f32.mrf.mxu1  ;;  %v24627_v10 = vld [vmem:[#allocation2 + $0x1a8] sm:$0xff]   ;;  %23533 = vmatprep.subr.bf16.mxu1 %v24631_v49 }
 0x4f0   :  { %v28296_v12 = vpop.f32.mrf.mxu0  ;;  %30247 = vst [vmem:[#allocation4_spill] sm:$0xff] %v28303_v31  ;;  %v24637_v18 = vld [vmem:[#allocation2 + $0x1c8] sm:$0xff]  }
 0x4f1   :  { %30246 = vst [vmem:[#allocation52_spill] sm:$0xff] %v28293_v17  ;;  %v28301_v55 = vadd.f32 %v10493_v42, %v10282_v32  ;;  %23496 = vmatpush3.bf16.msra.mxu0 %v24618_v22  ;;  %v28307_v37 = vpop.f32.mrf.mxu1  ;;  %23478 = vmatmul.mubr.bf16.gmra.mxu1 %v24622_v46  ;;  %v24646_v54 = vld [vmem:[%s29960_s3 + $0x8] sm:$0xff]   ;;  %v24643_v32 = vld [vmem:[#allocation2 + $0x1d0] sm:$0xff]   ;;  %v24647_v46 = vld [vmem:[%s29960_s3 + $0x40] sm:$0xff]  }
 0x4f2   :  { %v28305_v35 = vpop.f32.mrf.mxu0  ;;  %23497 = vmatprep.subr.bf16.mxu0 %v24624_v29  ;;  %23481 = vmatprep.mubr.bf16.mxu1 %v24627_v10  ;;  %v24651_v31 = vld [vmem:[#allocation2 + $0x18c] sm:$0xff]  }
 0x4f3   :  { %v28317_v53 = vpop.f32.mrf.mxu1  ;;  %23534 = vmatpush3.bf16.msra.mxu1 %v24631_v49 }
 0x4f4   :  { %v28312_v27 = vpop.f32.mrf.mxu0  ;;  %23442 = vmatmul.mubr.bf16.gmra.mxu0 %v24621_v6  ;;  %23535 = vmatprep.subr.bf16.mxu1 %v24633_v4  ;;  %v24642_v6 = vld [vmem:[#allocation2 + $0x1cc] sm:$0xff]  }
 0x4f5   :  { %23498 = vmatpush3.bf16.msra.mxu0 %v24624_v29  ;;  %23445 = vmatprep.mubr.bf16.mxu0 %v24626_v1  ;;  %v28324_v36 = vpop.f32.mrf.mxu1  ;;  %v24648_v1 = vld [vmem:[%s29960_s3] sm:$0xff]  }
 0x4f6   :  { %v28319_v25 = vpop.f32.mrf.mxu0  ;;  %23499 = vmatprep.subr.bf16.mxu0 %v24628_v34 }
 0x4f7   :  { %v28331_v20 = vpop.f32.mrf.mxu1  ;;  %23536 = vmatpush3.bf16.msra.mxu1 %v24633_v4  ;;  %v24644_v4 = vld [vmem:[#allocation2 + $0x1d4] sm:$0xff]  }
 0x4f8   :  { %v28326_v33 = vpop.f32.mrf.mxu0  ;;  %23537 = vmatprep.subr.bf16.mxu1 %v24638_v16 }
 0x4f9   :  { %23500 = vmatpush3.bf16.msra.mxu0 %v24628_v34  ;;  %v28335_v19 = vpop.f32.mrf.mxu1  ;;  %23482 = vmatmul.mubr.bf16.gmra.mxu1 %v24630_v14  ;;  %v24653_v14 = vld [vmem:[%s29960_s3 + $0xb8] sm:$0xff]  }
 0x4fa   :  { %v28333_v15 = vpop.f32.mrf.mxu0  ;;  %23501 = vmatprep.subr.bf16.mxu0 %v24632_v5  ;;  %30248 = vst [vmem:[#allocation62_spill] sm:$0xff] %v28335_v19  ;;  %23485 = vmatprep.mubr.bf16.mxu1 %v24635_v60 }
 0x4fb   :  { %v28345_v38 = vpop.f32.mrf.mxu1  ;;  %23538 = vmatpush3.bf16.msra.mxu1 %v24638_v16 }
 0x4fc   :  { %v28340_v21 = vpop.f32.mrf.mxu0  ;;  %23446 = vmatmul.mubr.bf16.gmra.mxu0 %v24629_v47  ;;  %23539 = vmatprep.subr.bf16.mxu1 %v24640_v40 }
 0x4fd   :  { %23502 = vmatpush3.bf16.msra.mxu0 %v24632_v5  ;;  %23449 = vmatprep.mubr.bf16.mxu0 %v24634_v41  ;;  %v28352_v9 = vpop.f32.mrf.mxu1  ;;  %v24645_v5 = vld [vmem:[#allocation2 + $0x1d8] sm:$0xff]  }
 0x4fe   :  { %v28347_v22 = vpop.f32.mrf.mxu0  ;;  %23503 = vmatprep.subr.bf16.mxu0 %v24639_v59  ;;  %v24659_v41 = vld [vmem:[%s29960_s3 + $0xf8] sm:$0xff]  }
 0x4ff   :  { %v28359_v2 = vpop.f32.mrf.mxu1  ;;  %23540 = vmatpush3.bf16.msra.mxu1 %v24640_v40 }
 0x500   :  { %v28354_v24 = vpop.f32.mrf.mxu0  ;;  %23541 = vmatprep.subr.bf16.mxu1 %v24646_v54 }
 0x501   :  { %23504 = vmatpush3.bf16.msra.mxu0 %v24639_v59  ;;  %v28363_v42 = vpop.f32.mrf.mxu1  ;;  %23486 = vmatmul.mubr.bf16.gmra.mxu1 %v24637_v18  ;;  %v24649_v59 = vld [vmem:[#allocation2 + $0x184] sm:$0xff]  }
 0x502   :  { %v28361_v29 = vpop.f32.mrf.mxu0  ;;  %23505 = vmatprep.subr.bf16.mxu0 %v24641_v11  ;;  %23489 = vmatprep.mubr.bf16.mxu1 %v24643_v32 }
 0x503   :  { %v28373_v10 = vpop.f32.mrf.mxu1  ;;  %23542 = vmatpush3.bf16.msra.mxu1 %v24646_v54 }
 0x504   :  { %v28368_v49 = vpop.f32.mrf.mxu0  ;;  %23450 = vmatmul.mubr.bf16.gmra.mxu0 %v24636_v50  ;;  %23543 = vmatprep.subr.bf16.mxu1 %v24648_v1  ;;  %v24650_v50 = vld [vmem:[#allocation2 + $0x180] sm:$0xff]  }
 0x505   :  { %23453 = vmatprep.mubr.bf16.mxu0 %v24642_v6  ;;  %23506 = vmatpush3.bf16.msra.mxu0 %v24641_v11  ;;  %v28377_v47 = vpop.f32.mrf.mxu1 }
 0x506   :  { %v28375_v34 = vpop.f32.mrf.mxu0  ;;  %23507 = vmatprep.subr.bf16.mxu0 %v24647_v46 }
 0x507   :  { %v28387_v60 = vpop.f32.mrf.mxu1  ;;  %23544 = vmatpush3.bf16.msra.mxu1 %v24648_v1  ;;  %v24654_v1 = vld [vmem:[%s29960_s3 + $0xb0] sm:$0xff]  }
 0x508   :  { %v28382_v16 = vpop.f32.mrf.mxu0  ;;  %30249 = vst [vmem:[#allocation61_spill] sm:$0xff] %v28387_v60  ;;  %23601 = vmatprep.subr.bf16.mxu1 %v24659_v41 }
 0x509   :  { %23508 = vmatpush3.bf16.msra.mxu0 %v24647_v46  ;;  %v28391_v11 = vpop.f32.mrf.mxu1  ;;  %23490 = vmatmul.mubr.bf16.gmra.mxu1 %v24645_v5  ;;  %v24652_v46 = vld [vmem:[#allocation2 + $0x188] sm:$0xff]   ;;  %v24656_v5 = vld [vmem:[#allocation2 + $0x190] sm:$0xff]  }
 0x50a   :  { %v28389_v40 = vpop.f32.mrf.mxu0  ;;  %30251 = vst [vmem:[#allocation56_spill] sm:$0xff] %v28391_v11  ;;  %23565 = vmatprep.subr.bf16.mxu0 %v24653_v14  ;;  %23545 = vmatprep.mubr.bf16.mxu1 %v24650_v50  ;;  %v24655_v11 = vld [vmem:[#allocation2 + $0x194] sm:$0xff]  }
 0x50b   :  { %30250 = vst [vmem:[#allocation63_spill] sm:$0xff] %v28389_v40  ;;  %v28395_v54 = vpop.f32.mrf.mxu1  ;;  %v24661_v50 = vld [vmem:[%s29960_s3 + $0xf0] sm:$0xff]   ;;  %v24658_v40 = vld [vmem:[#allocation2 + $0x198] sm:$0xff]  }
 0x50c   :  { %v28393_v18 = vpop.f32.mrf.mxu0  ;;  %23454 = vmatmul.mubr.bf16.gmra.mxu0 %v24644_v4  ;;  %30252 = vst [vmem:[#allocation57_spill] sm:$0xff] %v28395_v54  ;;  %v24657_v54 = vld [vmem:[#allocation2 + $0x19c] sm:$0xff]  }
 0x50d   :  { %23509 = vmatprep.mubr.bf16.mxu0 %v24649_v59  ;;  %v28397_v32 = vpop.f32.mrf.mxu1 }
 0x50e   :  { %v10755_v6 = vpop.f32.mrf.mxu0  ;;  %30253 = vst [vmem:[#allocation54_spill] sm:$0xff] %v28397_v32 }
 0x50f   :  { %v28401_v60 = vpop.f32.mrf.mxu1  ;;  %v10834_v51 = vadd.f32 %v10755_v6, %v28275_v57  ;;  %v10292_v57 = vadd.f32 %v28340_v21, %v28231_v58 }
 0x510   :  { %v28399_v17 = vpop.f32.mrf.mxu0  ;;  %30254 = vst [vmem:[#allocation59_spill] sm:$0xff] %v28401_v60 }
 0x511   :  { %v28406_v19 = vpop.f32.mrf.mxu1  ;;  %23546 = vmatmul.mubr.bf16.vlgmr.msra.gmra.mxu1 %v24652_v46  ;;  %v24662_v46 = vld [vmem:[#allocation2 + $0x1a4] sm:$0xff]  }
 0x512   :  { %v10758_v4 = vpop.f32.mrf.mxu0  ;;  %30255 = vst [vmem:[#allocation53_spill] sm:$0xff] %v28406_v19  ;;  %v24660_v19 = vld [vmem:[%s29960_s3 + $0xa8] sm:$0xff]   ;;  %23549 = vmatprep.mubr.bf16.mxu1 %v24656_v5  ;;  %23602 = vmatpush3.bf16.msra.mxu1 %v24659_v41  ;;  %v10289_v5 = vadd.f32 %v28326_v33, %v28216_v7  ;;  %v10557_v7 = vadd.f32 %v28284_v23, %v10279_v45 }
 0x513   :  { %v28413_v32 = vpop.f32.mrf.mxu1  ;;  %23603 = vmatprep.subr.bf16.mxu1 %v24661_v50  ;;  %v10283_v45 = vadd.f32 %v28305_v35, %v28201_v39  ;;  %v10290_v23 = vadd.f32 %v28347_v22, %v28237_v52  ;;  %v24671_v39 = vld [vmem:[#allocation2 + $0x1b8] sm:$0xff]   ;;  %v10281_v52 = vadd.f32 %v28273_v56, %v28171_v48  ;;  %v10570_v35 = vadd.f32 %v28345_v38, %v10292_v57  ;;  %v24676_v48 = vld [vmem:[%s29960_s3 + $0xd0] sm:$0xff]  }
 0x514   :  { %v28408_v59 = vpop.f32.mrf.mxu0  ;;  %23510 = vmatmul.mubr.bf16.vlgmr.msra.gmra.mxu0 %v24651_v31  ;;  %30257 = vst [vmem:[#allocation55_spill] sm:$0xff] %v28413_v32  ;;  %v10288_v31 = vadd.f32 %v28312_v27, %v28207_v26  ;;  %v24663_v27 = vld [vmem:[#allocation2 + $0x1a0] sm:$0xff]  }
 0x515   :  { %30256 = vst [vmem:[#allocation64_spill] sm:$0xff] %v28408_v59  ;;  %23566 = vmatpush3.bf16.msra.mxu0 %v24653_v14  ;;  %23513 = vmatprep.mubr.bf16.mxu0 %v24655_v11  ;;  %v28422_v59 = vpop.f32.mrf.mxu1  ;;  %v24667_v14 = vld [vmem:[%s29960_s3 + $0xe8] sm:$0xff]  }
 0x516   :  { %v28415_v60 = vpop.f32.mrf.mxu0  ;;  %23567 = vmatprep.subr.bf16.mxu0 %v24654_v1  ;;  %30258 = vst [vmem:[#allocation65_spill] sm:$0xff] %v28422_v59  ;;  %v10566_v41 = vadd.f32 %v28317_v53, %v10288_v31  ;;  %23604 = vmatpush3.bf16.msra.mxu1 %v24661_v50  ;;  %v24665_v50 = vld [vmem:[#allocation2 + $0x1b4] sm:$0xff]  }
 0x517   :  { %v28429_v11 = vpop.f32.mrf.mxu1  ;;  %23605 = vmatprep.subr.bf16.mxu1 %v24667_v14  ;;  %v10838_v56 = vadd.f32 %v28415_v60, %v28301_v55  ;;  %v24677_v55 = vld [vmem:[%s29960_s3 + $0x88] sm:$0xff]   ;;  %v10836_v60 = vadd.f32 %v28393_v18, %v28270_v43 }
 0x518   :  { %v28424_v32 = vpop.f32.mrf.mxu0  ;;  %30259 = vst [vmem:[#allocation58_spill] sm:$0xff] %v28429_v11 }
 0x519   :  { %23568 = vmatpush3.bf16.msra.mxu0 %v24654_v1  ;;  %v28438_v59 = vpop.f32.mrf.mxu1  ;;  %v24664_v1 = vld [vmem:[%s29960_s3 + $0xa0] sm:$0xff]   ;;  %23550 = vmatmul.mubr.bf16.gmra.mxu1 %v24658_v40 }
 0x51a   :  { %v28433_v26 = vpop.f32.mrf.mxu0  ;;  %23569 = vmatprep.subr.bf16.mxu0 %v24660_v19  ;;  %30260 = vst [vmem:[#allocation60_spill] sm:$0xff] %v28438_v59  ;;  %23553 = vmatprep.mubr.bf16.mxu1 %v24663_v27  ;;  %v10567_v59 = vadd.f32 %v28331_v20, %v10289_v5  ;;  %v24674_v20 = vld [vmem:[%s29960_s3 + $0xd8] sm:$0xff]  }
 0x51b   :  { %v28447_v31 = vpop.f32.mrf.mxu1  ;;  %23606 = vmatpush3.bf16.msra.mxu1 %v24667_v14  ;;  %v24670_v27 = vld [vmem:[#allocation2 + $0x1bc] sm:$0xff]   ;;  %v10293_v14 = vadd.f32 %v28354_v24, %v28240_v62  ;;  %v10568_v62 = vadd.f32 %v28352_v9, %v10290_v23  ;;  %v10291_v24 = vadd.f32 %v28361_v29, %v28249_v61  ;;  %v10286_v61 = vadd.f32 %v28319_v25, %v28213_v63 }
 0x51c   :  { %v23159_v11 = vpop.f32.mrf.mxu0  ;;  %23514 = vmatmul.mubr.bf16.gmra.mxu0 %v24657_v54  ;;  %v24668_v54 = vld [vmem:[%s29960_s3 + $0x98] sm:$0xff]   ;;  %23607 = vmatprep.subr.bf16.mxu1 %v24669_v8  ;;  %v10296_v9 = vadd.f32 %v28368_v49, %v28252_v0  ;;  %v24673_v63 = vld [vmem:[#allocation2 + $0x1c0] sm:$0xff]   ;;  %v10559_v0 = vadd.f32 %v28277_v44, %v10281_v52  ;;  %v10294_v25 = vadd.f32 %v28375_v34, %v28261_v13  ;;  %v24682_v49 = vld [vmem:[%s29960_s3 + $0xc8] sm:$0xff]  }
 0x51d   :  { %v10844_v53 = vadd.f32 %v23159_v11, %v10566_v41  ;;  %23570 = vmatpush3.bf16.msra.mxu0 %v24660_v19  ;;  %23517 = vmatprep.mubr.bf16.mxu0 %v24662_v46  ;;  %v28458_v11 = vpop.f32.mrf.mxu1  ;;  %v24666_v19 = vld [vmem:[#allocation2 + $0x1b0] sm:$0xff]   ;;  %v10835_v46 = vadd.f32 %v10758_v4, %v10557_v7  ;;  %v10569_v43 = vadd.f32 %v28363_v42, %v10291_v24 }
 0x51e   :  { %v28450_v33 = vpop.f32.mrf.mxu0  ;;  %23571 = vmatprep.subr.bf16.mxu0 %v24664_v1  ;;  %v24675_v4 = vld [vmem:[%s29960_s3 + $0x90] sm:$0xff]   ;;  %v10285_v44 = vadd.f32 %v28296_v12, %v28192_v28  ;;  %v10564_v13 = vadd.f32 %v28324_v36, %v10286_v61  ;;  %v10287_v34 = vadd.f32 %v28333_v15, %v28225_v30  ;;  %v10297_v23 = vadd.f32 %v28382_v16, %v28264_v3  ;;  %v24683_v28 = vld [vmem:[%s29960_s3 + $0x80] sm:$0xff]  }
 0x51f   :  { %v10854_v6 = vmax.f32 %v10834_v51, %v10844_v53  ;;  %v28467_v21 = vpop.f32.mrf.mxu1  ;;  %23608 = vmatpush3.bf16.msra.mxu1 %v24669_v8  ;;  %v24672_v53 = vld [vmem:[#allocation2 + $0x1c4] sm:$0xff]   ;;  %v10572_v30 = vadd.f32 %v28377_v47, %v10294_v25  ;;  %v30263_v47 = vld [vmem:[#allocation62_spill] sm:$0xff] }
 0x520   :  { %v23160_v40 = vpop.f32.mrf.mxu0  ;;  %23609 = vmatprep.subr.bf16.mxu1 %v24674_v20  ;;  %v30261_v12 = vld [vmem:[#allocation67_spill] sm:$0xff]  ;;  %v10842_v15 = vadd.f32 %v28450_v33, %v10564_v13  ;;  %v30266_v33 = vld [vmem:[#allocation64_spill] sm:$0xff] }
 0x521   :  { %v10845_v58 = vadd.f32 %v23160_v40, %v10567_v59  ;;  %23572 = vmatpush3.bf16.msra.mxu0 %v24664_v1  ;;  %v28476_v5 = vpop.f32.mrf.mxu1  ;;  %v10561_v59 = vadd.f32 %v28307_v37, %v10283_v45  ;;  %23554 = vmatmul.mubr.bf16.gmra.mxu1 %v24666_v19  ;;  %v10571_v37 = vadd.f32 %v28359_v2, %v10293_v14  ;;  %v24678_v45 = vld [vmem:[#allocation2 + $0x1cc] sm:$0xff]   ;;  %v30262_v3 = vld [vmem:[#allocation63_spill] sm:$0xff] }
 0x522   :  { %v28471_v41 = vpop.f32.mrf.mxu0  ;;  %23573 = vmatprep.subr.bf16.mxu0 %v24668_v54  ;;  %23557 = vmatprep.mubr.bf16.mxu1 %v24671_v39  ;;  %v10574_v40 = vadd.f32 %v28373_v10, %v10296_v9  ;;  %v10295_v36 = vadd.f32 %v30262_v3, %v30261_v12 }
 0x523   :  { %v10855_v22 = vmax.f32 %v10835_v46, %v10845_v58  ;;  %v28492_v51 = vpop.f32.mrf.mxu1  ;;  %23610 = vmatpush3.bf16.msra.mxu1 %v24674_v20  ;;  %v10839_v18 = vadd.f32 %v28433_v26, %v10561_v59  ;;  %v24679_v26 = vld [vmem:[#allocation2 + $0x1c8] sm:$0xff]   ;;  %v10837_v20 = vadd.f32 %v28399_v17, %v10559_v0  ;;  %v24684_v17 = vld [vmem:[%s29960_s3 + $0xc0] sm:$0xff]  }
 0x524   :  { %v23163_v1 = vpop.f32.mrf.mxu0  ;;  %23518 = vmatmul.mubr.bf16.gmra.mxu0 %v24665_v50  ;;  %23611 = vmatprep.subr.bf16.mxu1 %v24676_v48  ;;  %v30265_v59 = vld [vmem:[#allocation52_spill] sm:$0xff] }
 0x525   :  { %v28490_v38 = vmax.f32 %v10854_v6, %v10855_v22  ;;  %v10848_v8 = vadd.f32 %v23163_v1, %v10570_v35  ;;  %23574 = vmatpush3.bf16.msra.mxu0 %v24668_v54  ;;  %23521 = vmatprep.mubr.bf16.mxu0 %v24670_v27  ;;  %v28504_v54 = vpop.f32.mrf.mxu1  ;;  %v10565_v35 = vadd.f32 %v30263_v47, %v10287_v34  ;;  %v30264_v22 = vld [vmem:[#allocation61_spill] sm:$0xff] }
 0x526   :  { %v10803_v29 = vpop.f32.mrf.mxu0  ;;  %23575 = vmatprep.subr.bf16.mxu0 %v24675_v4  ;;  %v24680_v1 = vld [vmem:[#allocation2 + $0x1d4] sm:$0xff]  }
 0x527   :  { %v10858_v7 = vmax.f32 %v10838_v56, %v10848_v8  ;;  %v10846_v50 = vadd.f32 %v10803_v29, %v10568_v62  ;;  %v28514_v19 = vpop.f32.mrf.mxu1  ;;  %23612 = vmatpush3.bf16.msra.mxu1 %v24676_v48  ;;  %v10840_v62 = vadd.f32 %v30266_v33, %v30265_v59  ;;  %v25017_v48 = vld [vmem:[%s29961_s4] ss:$0 sm:$0xff]  ;;  %v24681_v29 = vld [vmem:[#allocation2 + $0x1d0] sm:$0xff]   ;;  %v10843_v0 = vadd.f32 %v28471_v41, %v10565_v35  ;;  %v24688_v47 = vld [vmem:[#allocation2 + $0x1b8] sm:$0xff]  }
 0x528   :  { %v23164_v2 = vpop.f32.mrf.mxu0  ;;  %23613 = vmatprep.subr.bf16.mxu1 %v24682_v49  ;;  %v10869_v56 = vadd.f32 %v25017_v48, %v28490_v38  ;;  %v28559_v38 = vld [vmem:[%s29960_s3 + $0x178] sm:$0xff]   ;;  %v30271_v59 = vld [vmem:[#allocation59_spill] sm:$0xff] }
 0x529   :  { %v10856_v57 = vmax.f32 %v10836_v60, %v10846_v50  ;;  %v10849_v6 = vadd.f32 %v23164_v2, %v10571_v37  ;;  %23576 = vmatpush3.bf16.msra.mxu0 %v24675_v4  ;;  %v28525_v27 = vpop.f32.mrf.mxu1  ;;  %23558 = vmatmul.mubr.bf16.gmra.mxu1 %v24673_v63  ;;  %v10575_v4 = vadd.f32 %v30264_v22, %v10297_v23 }
 0x52a   :  { %v10806_v42 = vpop.f32.mrf.mxu0  ;;  %23577 = vmatprep.subr.bf16.mxu0 %v24677_v55  ;;  %23561 = vmatprep.mubr.bf16.mxu1 %v24679_v26 }
 0x52b   :  { %v10859_v46 = vmax.f32 %v10839_v18, %v10849_v6  ;;  %v10847_v58 = vadd.f32 %v10806_v42, %v10569_v43  ;;  %v28537_v52 = vpop.f32.mrf.mxu1  ;;  %23614 = vmatpush3.bf16.msra.mxu1 %v24682_v49  ;;  %v24685_v18 = vld [vmem:[#allocation2 + $0x188] sm:$0xff]  }
 0x52c   :  { %v23167_v16 = vpop.f32.mrf.mxu0  ;;  %23522 = vmatmul.mubr.bf16.gmra.mxu0 %v24672_v53  ;;  %v28552_v53 = vld [vmem:[%s29960_s3 + $0x138] sm:$0xff]   ;;  %23615 = vmatprep.subr.bf16.mxu1 %v24684_v17 }
 0x52d   :  { %v10866_v10 = vmax.f32 %v10858_v7, %v10859_v46  ;;  %v10857_v14 = vmax.f32 %v10837_v20, %v10847_v58  ;;  %v10852_v39 = vadd.f32 %v23167_v16, %v10574_v40  ;;  %23525 = vmatprep.mubr.bf16.mxu0 %v24678_v45  ;;  %23578 = vmatpush3.bf16.msra.mxu0 %v24677_v55  ;;  %v28547_v9 = vpop.f32.mrf.mxu1  ;;  %v30267_v55 = vld [vmem:[#allocation4_spill] sm:$0xff]  ;;  %v30268_v7 = vld [vmem:[#allocation56_spill] sm:$0xff] }
 0x52e   :  { %v10819_v24 = vpop.f32.mrf.mxu0  ;;  %v10563_v60 = vadd.f32 %v30267_v55, %v10285_v44  ;;  %v10573_v50 = vadd.f32 %v30268_v7, %v10295_v36  ;;  %23579 = vmatprep.subr.bf16.mxu0 %v24683_v28  ;;  %v24686_v45 = vld [vmem:[#allocation2 + $0x1b0] sm:$0xff]   ;;  %v10874_v44 = vmax.f32 %v10869_v56, 0.0  ;;  %v24691_v56 = vld [vmem:[#allocation2 + $0x198] sm:$0xff]  }
 0x52f   :  { %v10865_v8 = vmax.f32 %v10856_v57, %v10857_v14  ;;  %v10862_v61 = vmax.f32 %v10842_v15, %v10852_v39  ;;  %v10850_v37 = vadd.f32 %v10819_v24, %v10572_v30  ;;  %v28562_v43 = vpop.f32.mrf.mxu1  ;;  %23616 = vmatpush3.bf16.msra.mxu1 %v24684_v17  ;;  %v30270_v15 = vld [vmem:[#allocation54_spill] sm:$0xff]  ;;  %v24687_v14 = vld [vmem:[#allocation2 + $0x190] sm:$0xff]  }
 0x530   :  { %v23168_v63 = vpop.f32.mrf.mxu0  ;;  %v10841_v57 = vadd.f32 %v28424_v32, %v10563_v60  ;;  %23673 = vmatprep.subr.bf16.mxu1 %v28559_v38  ;;  %v30269_v32 = vld [vmem:[#allocation57_spill] sm:$0xff] }
 0x531   :  { %v10870_v25 = vadd.f32 %v25017_v48, %v10865_v8  ;;  %v10860_v2 = vmax.f32 %v10840_v62, %v10850_v37  ;;  %v10853_v49 = vadd.f32 %v23168_v63, %v10575_v4  ;;  %23580 = vmatpush3.bf16.msra.mxu0 %v24683_v28  ;;  %v28565_v42 = vpop.f32.mrf.mxu1  ;;  %23562 = vmatmul.mubr.bf16.gmra.mxu1 %v24681_v29  ;;  %v24690_v62 = vld [vmem:[%s29960_s3 + $0x130] sm:$0xff]  }
 0x532   :  { %v10822_v6 = vpop.f32.mrf.mxu0  ;;  %23637 = vmatprep.subr.bf16.mxu0 %v28552_v53  ;;  %v10871_v28 = vadd.f32 %v25017_v48, %v10866_v10  ;;  %23617 = vmatprep.mubr.bf16.mxu1 %v24686_v45  ;;  %v30272_v29 = vld [vmem:[#allocation53_spill] sm:$0xff] }
 0x533   :  { %v10875_v13 = vmax.f32 %v10870_v25, 0.0  ;;  %v10863_v34 = vmax.f32 %v10843_v0, %v10853_v49  ;;  %v10851_v23 = vadd.f32 %v10822_v6, %v10573_v50  ;;  %v23259_v58 = vpop.f32.mrf.mxu1  ;;  %v24697_v50 = vld [vmem:[%s29960_s3 + $0x170] sm:$0xff]   ;;  %v30273_v25 = vld [vmem:[#allocation55_spill] sm:$0xff] }
 0x534   :  { %v23223_v41 = vpop.f32.mrf.mxu0  ;;  %23526 = vmatmul.mubr.bf16.gmra.mxu0 %v24680_v1  ;;  %v10876_v24 = vmax.f32 %v10871_v28, 0.0  ;;  %v24696_v6 = vld [vmem:[%s29960_s3 + $0x128] sm:$0xff]   ;;  %v24699_v28 = vld [vmem:[#allocation2 + $0x1d0] sm:$0xff]  }
 0x535   :  { %v20401_v26 = vpack.c.bf16 %v10875_v13, %v10874_v44  ;;  %v10868_v40 = vmax.f32 %v10862_v61, %v10863_v34  ;;  %v10861_v20 = vmax.f32 %v10841_v57, %v10851_v23  ;;  %v11333_v46 = vadd.f32 %v23223_v41, %v30269_v32  ;;  %23581 = vmatprep.mubr.bf16.mxu0 %v24685_v18  ;;  %v11581_v17 = vpop.f32.mrf.mxu1  ;;  %v24693_v57 = vld [vmem:[#allocation2 + $0x1a0] sm:$0xff]   ;;  %v30274_v44 = vld [vmem:[#allocation65_spill] sm:$0xff]  ;;  %v24694_v23 = vld [vmem:[#allocation2 + $0x1c8] sm:$0xff]  }
 0x536   :  { %v11324_v30 = vpop.f32.mrf.mxu0 }
 0x537   :  { %20436 = vst [vmem:[#allocation3 + $0x28] sm:$0xff] %v20401_v26   ;;  %v10873_v12 = vadd.f32 %v25017_v48, %v10868_v40  ;;  %v10867_v3 = vmax.f32 %v10860_v2, %v10861_v20  ;;  %v28570_v36 = vadd.f32 %v23259_v58, %v11333_v46  ;;  %v11325_v16 = vadd.f32 %v11324_v30, %v30270_v15  ;;  %v23260_v33 = vpop.f32.mrf.mxu1  ;;  %v30275_v40 = vld [vmem:[#allocation58_spill] sm:$0xff]  ;;  %v24698_v46 = vld [vmem:[#allocation2 + $0x1a8] sm:$0xff]  }
 0x538   :  { %v23224_v39 = vpop.f32.mrf.mxu0  ;;  %v24700_v15 = vld [vmem:[%s29960_s3 + $0x120] sm:$0xff]  }
 0x539   :  { %v10878_v35 = vmax.f32 %v10873_v12, 0.0  ;;  %v10872_v22 = vadd.f32 %v25017_v48, %v10867_v3  ;;  %v28573_v4 = vadd.f32 %v11581_v17, %v11325_v16  ;;  %v11336_v10 = vadd.f32 %v23224_v39, %v30271_v59  ;;  %v11584_v60 = vpop.f32.mrf.mxu1  ;;  %v24692_v48 = vld [vmem:[#allocation2 + $0x1c0] sm:$0xff]   ;;  %23618 = vmatmul.mubr.bf16.vlgmr.msra.gmra.mxu1 %v24688_v47  ;;  %v30276_v12 = vld [vmem:[#allocation60_spill] sm:$0xff]  ;;  %v24704_v59 = vld [vmem:[%s29960_s3 + $0x118] sm:$0xff]  }
 0x53a   :  { %v11327_v1 = vpop.f32.mrf.mxu0  ;;  %23621 = vmatprep.mubr.bf16.mxu1 %v24692_v48  ;;  %23674 = vmatpush3.bf16.msra.mxu1 %v28559_v38  ;;  %v24705_v17 = vld [vmem:[%s29960_s3 + $0x160] sm:$0xff]  }
 0x53b   :  { %v10883_v8 = vpack.c.bf16 %v10878_v35, %v10878_v35  ;;  %v10877_v61 = vmax.f32 %v10872_v22, 0.0  ;;  %v28579_v37 = vadd.f32 %v23260_v33, %v11336_v10  ;;  %v11328_v55 = vadd.f32 %v11327_v1, %v30272_v29  ;;  %v23263_v49 = vpop.f32.mrf.mxu1  ;;  %23675 = vmatprep.subr.bf16.mxu1 %v24697_v50  ;;  %v24701_v22 = vld [vmem:[#allocation2 + $0x1b8] sm:$0xff]   ;;  %v24706_v29 = vld [vmem:[#allocation2 + $0x1c0] sm:$0xff]  }
 0x53c   :  { %v23227_v7 = vpop.f32.mrf.mxu0  ;;  %23582 = vmatmul.mubr.bf16.vlgmr.msra.gmra.mxu0 %v24687_v14  ;;  %v24710_v1 = vld [vmem:[%s29960_s3 + $0x158] sm:$0xff]  }
 0x53d   :  { %10888 = vst [vmem:[#allocation3 + $0x38] sm:$0xf] %v10883_v8  ;;  %v20406_v63 = vpack.c.bf16 %v10877_v61, %v10876_v24  ;;  %v28585_v0 = vadd.f32 %v11584_v60, %v11328_v55  ;;  %v11349_v2 = vadd.f32 %v23227_v7, %v30273_v25  ;;  %23638 = vmatpush3.bf16.msra.mxu0 %v28552_v53  ;;  %v11597_v34 = vpop.f32.mrf.mxu1  ;;  %v24703_v53 = vld [vmem:[%s29960_s3 + $0x168] sm:$0xff]   ;;  %v24702_v24 = vld [vmem:[#allocation2 + $0x1e0] sm:$0xff]  }
 0x53e   :  { %v11340_v18 = vpop.f32.mrf.mxu0  ;;  %23639 = vmatprep.subr.bf16.mxu0 %v24690_v62  ;;  %23585 = vmatprep.mubr.bf16.mxu0 %v24691_v56 }
 0x53f   :  { %20437 = vst [vmem:[#allocation3 + $0x30] sm:$0xff] %v20406_v63   ;;  %v28592_v45 = vadd.f32 %v23263_v49, %v11349_v2  ;;  %v11341_v13 = vadd.f32 %v11340_v18, %v30274_v44  ;;  %v23264_v32 = vpop.f32.mrf.mxu1  ;;  %23676 = vmatpush3.bf16.msra.mxu1 %v24697_v50  ;;  %v24711_v50 = vld [vmem:[%s29960_s3 + $0x110] sm:$0xff]   ;;  %v24713_v18 = vld [vmem:[%s29960_s3 + $0x108] sm:$0xff]  }
 0x540   :  { %v23228_v41 = vpop.f32.mrf.mxu0  ;;  %23677 = vmatprep.subr.bf16.mxu1 %v24703_v53 }
 0x541   :  { %v28599_v26 = vadd.f32 %v11597_v34, %v11341_v13  ;;  %v11352_v20 = vadd.f32 %v23228_v41, %v30275_v40  ;;  %23640 = vmatpush3.bf16.msra.mxu0 %v24690_v62  ;;  %v11600_v3 = vpop.f32.mrf.mxu1  ;;  %23622 = vmatmul.mubr.bf16.gmra.mxu1 %v24694_v23  ;;  %v24708_v13 = vld [vmem:[#allocation2 + $0x1c8] sm:$0xff]   ;;  %v24709_v34 = vld [vmem:[#allocation2 + $0x1f0] sm:$0xff]  }
 0x542   :  { %v11343_v58 = vpop.f32.mrf.mxu0  ;;  %23641 = vmatprep.subr.bf16.mxu0 %v24696_v6  ;;  %23625 = vmatprep.mubr.bf16.mxu1 %v24699_v28  ;;  %v24718_v23 = vld [vmem:[%s29960_s3 + $0x148] sm:$0xff]  }
 0x543   :  { %v28602_v30 = vadd.f32 %v23264_v32, %v11352_v20  ;;  %v11344_v38 = vadd.f32 %v11343_v58, %v30276_v12  ;;  %v23267_v47 = vpop.f32.mrf.mxu1  ;;  %23678 = vmatpush3.bf16.msra.mxu1 %v24703_v53  ;;  %v24714_v20 = vld [vmem:[#allocation2 + $0x1d0] sm:$0xff]   ;;  %v24719_v12 = vld [vmem:[%s29960_s3 + $0x100] sm:$0xff]  }
 0x544   :  { %v23231_v16 = vpop.f32.mrf.mxu0  ;;  %23586 = vmatmul.mubr.bf16.gmra.mxu0 %v24693_v57  ;;  %23679 = vmatprep.subr.bf16.mxu1 %v24705_v17 }
 0x545   :  { %v28611_v14 = vadd.f32 %v11600_v3, %v11344_v38  ;;  %v11365_v39 = vadd.f32 %v23231_v16, %v28447_v31  ;;  %23642 = vmatpush3.bf16.msra.mxu0 %v24696_v6  ;;  %23589 = vmatprep.mubr.bf16.mxu0 %v24698_v46  ;;  %v11613_v62 = vpop.f32.mrf.mxu1 }
 0x546   :  { %v11356_v35 = vpop.f32.mrf.mxu0  ;;  %23643 = vmatprep.subr.bf16.mxu0 %v24700_v15 }
 0x547   :  { %v28617_v10 = vadd.f32 %v23267_v47, %v11365_v39  ;;  %v11357_v33 = vadd.f32 %v11356_v35, %v28458_v11  ;;  %v23268_v61 = vpop.f32.mrf.mxu1  ;;  %v24707_v11 = vld [vmem:[#allocation2 + $0x1e8] sm:$0xff]   ;;  %23680 = vmatpush3.bf16.msra.mxu1 %v24705_v17  ;;  %v24716_v17 = vld [vmem:[#allocation2 + $0x1d8] sm:$0xff]  }
 0x548   :  { %v23232_v31 = vpop.f32.mrf.mxu0  ;;  %23681 = vmatprep.subr.bf16.mxu1 %v24710_v1 }
 0x549   :  { %v28623_v56 = vadd.f32 %v11613_v62, %v11357_v33  ;;  %v11368_v8 = vadd.f32 %v23232_v31, %v28467_v21  ;;  %23644 = vmatpush3.bf16.msra.mxu0 %v24700_v15  ;;  %v11616_v7 = vpop.f32.mrf.mxu1  ;;  %v24712_v21 = vld [vmem:[%s29960_s3 + $0x150] sm:$0xff]   ;;  %23626 = vmatmul.mubr.bf16.gmra.mxu1 %v24702_v24  ;;  %v24731_v33 = vld [vmem:[%s29960_s3 + $0x1f8] sm:$0xff]  }
 0x54a   :  { %v11359_v55 = vpop.f32.mrf.mxu0  ;;  %23645 = vmatprep.subr.bf16.mxu0 %v24704_v59  ;;  %23629 = vmatprep.mubr.bf16.mxu1 %v24707_v11 }
 0x54b   :  { %v28626_v60 = vadd.f32 %v23268_v61, %v11368_v8  ;;  %v11360_v48 = vadd.f32 %v11359_v55, %v28476_v5  ;;  %v23271_v49 = vpop.f32.mrf.mxu1  ;;  %23682 = vmatpush3.bf16.msra.mxu1 %v24710_v1  ;;  %v24722_v8 = vld [vmem:[#allocation2 + $0x1b8] sm:$0xff]  }
 0x54c   :  { %v23235_v63 = vpop.f32.mrf.mxu0  ;;  %23590 = vmatmul.mubr.bf16.gmra.mxu0 %v24701_v22  ;;  %23683 = vmatprep.subr.bf16.mxu1 %v24712_v21  ;;  %v24717_v22 = vld [vmem:[#allocation2 + $0x200] sm:$0xff]  }
 0x54d   :  { %v28635_v25 = vadd.f32 %v11616_v7, %v11360_v48  ;;  %v11381_v2 = vadd.f32 %v23235_v63, %v28492_v51  ;;  %23646 = vmatpush3.bf16.msra.mxu0 %v24704_v59  ;;  %23593 = vmatprep.mubr.bf16.mxu0 %v24706_v29  ;;  %v11629_v44 = vpop.f32.mrf.mxu1  ;;  %v24725_v59 = vld [vmem:[%s29960_s3 + $0x1b8] sm:$0xff]  }
 0x54e   :  { %v11372_v5 = vpop.f32.mrf.mxu0  ;;  %23647 = vmatprep.subr.bf16.mxu0 %v24711_v50 }
 0x54f   :  { %v28641_v57 = vadd.f32 %v23271_v49, %v11381_v2  ;;  %v11373_v6 = vadd.f32 %v11372_v5, %v28504_v54  ;;  %v23272_v40 = vpop.f32.mrf.mxu1  ;;  %v24715_v54 = vld [vmem:[#allocation2 + $0x1f8] sm:$0xff]   ;;  %23684 = vmatpush3.bf16.msra.mxu1 %v24712_v21  ;;  %v24724_v5 = vld [vmem:[#allocation2 + $0x1c0] sm:$0xff]  }
 0x550   :  { %v23236_v51 = vpop.f32.mrf.mxu0  ;;  %23685 = vmatprep.subr.bf16.mxu1 %v24718_v23  ;;  %v24723_v2 = vld [vmem:[#allocation2 + $0x1bc] sm:$0xff]  }
 0x551   :  { %v28647_v41 = vadd.f32 %v11629_v44, %v11373_v6  ;;  %v11384_v53 = vadd.f32 %v23236_v51, %v28514_v19  ;;  %23648 = vmatpush3.bf16.msra.mxu0 %v24711_v50  ;;  %v11632_v28 = vpop.f32.mrf.mxu1  ;;  %v24720_v19 = vld [vmem:[%s29960_s3 + $0x140] sm:$0xff]   ;;  %23630 = vmatmul.mubr.bf16.gmra.mxu1 %v24709_v34 }
 0x552   :  { %v11375_v32 = vpop.f32.mrf.mxu0  ;;  %23649 = vmatprep.subr.bf16.mxu0 %v24713_v18  ;;  %23633 = vmatprep.mubr.bf16.mxu1 %v24715_v54  ;;  %v24727_v34 = vld [vmem:[#allocation2 + $0x1c4] sm:$0xff]  }
 0x553   :  { %v28650_v46 = vadd.f32 %v23272_v40, %v11384_v53  ;;  %v11376_v58 = vadd.f32 %v11375_v32, %v28525_v27  ;;  %v23275_v16 = vpop.f32.mrf.mxu1  ;;  %23686 = vmatpush3.bf16.msra.mxu1 %v24718_v23  ;;  %v24728_v53 = vld [vmem:[#allocation2 + $0x1c8] sm:$0xff]  }
 0x554   :  { %v23239_v38 = vpop.f32.mrf.mxu0  ;;  %23594 = vmatmul.mubr.bf16.gmra.mxu0 %v24708_v13  ;;  %23687 = vmatprep.subr.bf16.mxu1 %v24720_v19 }
 0x555   :  { %v28659_v3 = vadd.f32 %v11632_v28, %v11376_v58  ;;  %v11397_v15 = vadd.f32 %v23239_v38, %v28537_v52  ;;  %23597 = vmatprep.mubr.bf16.mxu0 %v24714_v20  ;;  %23650 = vmatpush3.bf16.msra.mxu0 %v24713_v18  ;;  %v11645_v35 = vpop.f32.mrf.mxu1  ;;  %v24733_v20 = vld [vmem:[%s29960_s3 + $0x1f0] sm:$0xff]  }
 0x556   :  { %v11388_v27 = vpop.f32.mrf.mxu0  ;;  %23651 = vmatprep.subr.bf16.mxu0 %v24719_v12  ;;  %v24729_v28 = vld [vmem:[#allocation2 + $0x1cc] sm:$0xff]  }
 0x557   :  { %v28662_v39 = vadd.f32 %v23275_v16, %v11397_v15  ;;  %v11389_v47 = vadd.f32 %v11388_v27, %v28547_v9  ;;  %v23276_v31 = vpop.f32.mrf.mxu1  ;;  %v24721_v9 = vld [vmem:[#allocation2 + $0x1b4] sm:$0xff]   ;;  %23688 = vmatpush3.bf16.msra.mxu1 %v24720_v19  ;;  %v24739_v16 = vld [vmem:[%s29960_s3 + $0x1e8] sm:$0xff]  }
 0x558   :  { %v23240_v52 = vpop.f32.mrf.mxu0  ;;  %23745 = vmatprep.subr.bf16.mxu1 %v24731_v33  ;;  %v24730_v15 = vld [vmem:[#allocation2 + $0x1d0] sm:$0xff]  }
 0x559   :  { %v28671_v62 = vadd.f32 %v11645_v35, %v11389_v47  ;;  %v11400_v24 = vadd.f32 %v23240_v52, %v28562_v43  ;;  %23652 = vmatpush3.bf16.msra.mxu0 %v24719_v12  ;;  %v11648_v55 = vpop.f32.mrf.mxu1  ;;  %23634 = vmatmul.mubr.bf16.gmra.mxu1 %v24717_v22  ;;  %v24734_v35 = vld [vmem:[#allocation2 + $0x1d4] sm:$0xff]  }
 0x55a   :  { %v11391_v1 = vpop.f32.mrf.mxu0  ;;  %23709 = vmatprep.subr.bf16.mxu0 %v24725_v59  ;;  %23689 = vmatprep.mubr.bf16.mxu1 %v24722_v8 }
 0x55b   :  { %v28674_v61 = vadd.f32 %v23276_v31, %v11400_v24  ;;  %v11392_v29 = vadd.f32 %v11391_v1, %v28565_v42  ;;  %v23331_v43 = vpop.f32.mrf.mxu1  ;;  %v24736_v24 = vld [vmem:[%s29960_s3 + $0x1a0] sm:$0xff]  }
 0x55c   :  { %v23295_v11 = vpop.f32.mrf.mxu0  ;;  %23598 = vmatmul.mubr.bf16.gmra.mxu0 %v24716_v17 }
 0x55d   :  { %v28677_v48 = vadd.f32 %v11648_v55, %v11392_v29  ;;  %v11940_v7 = vadd.f32 %v23295_v11, %v28570_v36  ;;  %23653 = vmatprep.mubr.bf16.mxu0 %v24721_v9  ;;  %v12137_v42 = vpop.f32.mrf.mxu1  ;;  %v24726_v36 = vld [vmem:[%s29960_s3 + $0x1b0] sm:$0xff]   ;;  %v24737_v29 = vld [vmem:[#allocation2 + $0x1e4] sm:$0xff]   ;;  %v24740_v55 = vld [vmem:[%s29960_s3 + $0x198] sm:$0xff]  }
 0x55e   :  { %v11859_v50 = vpop.f32.mrf.mxu0 }
 0x55f   :  { %v28680_v63 = vadd.f32 %v23331_v43, %v11940_v7  ;;  %v11938_v21 = vadd.f32 %v11859_v50, %v28573_v4  ;;  %v23332_v44 = vpop.f32.mrf.mxu1  ;;  %v24738_v50 = vld [vmem:[#allocation2 + $0x1e8] sm:$0xff]  }
 0x560   :  { %v23296_v49 = vpop.f32.mrf.mxu0 }
 0x561   :  { %v28683_v18 = vadd.f32 %v12137_v42, %v11938_v21  ;;  %v11941_v6 = vadd.f32 %v23296_v49, %v28579_v37  ;;  %v12140_v4 = vpop.f32.mrf.mxu1  ;;  %23690 = vmatmul.mubr.bf16.vlgmr.msra.gmra.mxu1 %v24724_v5  ;;  %v24746_v21 = vld [vmem:[%s29960_s3 + $0x1d8] sm:$0xff]   ;;  %v24742_v5 = vld [vmem:[#allocation2 + $0x1ec] sm:$0xff]  }
 0x562   :  { %v11862_v13 = vpop.f32.mrf.mxu0  ;;  %23693 = vmatprep.mubr.bf16.mxu1 %v24728_v53  ;;  %23746 = vmatpush3.bf16.msra.mxu1 %v24731_v33 }
 0x563   :  { %v28689_v51 = vadd.f32 %v23332_v44, %v11941_v6  ;;  %v11939_v23 = vadd.f32 %v11862_v13, %v28585_v0  ;;  %v23335_v54 = vpop.f32.mrf.mxu1  ;;  %v24732_v0 = vld [vmem:[%s29960_s3 + $0x1a8] sm:$0xff]   ;;  %23747 = vmatprep.subr.bf16.mxu1 %v24733_v20 }
 0x564   :  { %v23299_v40 = vpop.f32.mrf.mxu0  ;;  %23654 = vmatmul.mubr.bf16.vlgmr.msra.gmra.mxu0 %v24723_v2 }
 0x565   :  { %v28695_v37 = vadd.f32 %v12140_v4, %v11939_v23  ;;  %v11944_v32 = vadd.f32 %v23299_v40, %v28592_v45  ;;  %23710 = vmatpush3.bf16.msra.mxu0 %v24725_v59  ;;  %23657 = vmatprep.mubr.bf16.mxu0 %v24727_v34  ;;  %v12153_v19 = vpop.f32.mrf.mxu1  ;;  %v24747_v34 = vld [vmem:[%s29960_s3 + $0x190] sm:$0xff]  }
 0x566   :  { %v11875_v58 = vpop.f32.mrf.mxu0  ;;  %23711 = vmatprep.subr.bf16.mxu0 %v24726_v36  ;;  %23748 = vmatpush3.bf16.msra.mxu1 %v24733_v20  ;;  %v24744_v20 = vld [vmem:[#allocation2 + $0x1f4] sm:$0xff]  }
 0x567   :  { %v28701_v12 = vadd.f32 %v23335_v54, %v11944_v32  ;;  %v11942_v38 = vadd.f32 %v11875_v58, %v28599_v26  ;;  %v23336_v47 = vpop.f32.mrf.mxu1  ;;  %v24735_v26 = vld [vmem:[#allocation2 + $0x1d8] sm:$0xff]   ;;  %23749 = vmatprep.subr.bf16.mxu1 %v24739_v16  ;;  %v24749_v32 = vld [vmem:[%s29960_s3 + $0x188] sm:$0xff]  }
 0x568   :  { %v23300_v45 = vpop.f32.mrf.mxu0 }
 0x569   :  { %v28707_v27 = vadd.f32 %v12153_v19, %v11942_v38  ;;  %v11945_v17 = vadd.f32 %v23300_v45, %v28602_v30  ;;  %23712 = vmatpush3.bf16.msra.mxu0 %v24726_v36  ;;  %v12156_v33 = vpop.f32.mrf.mxu1  ;;  %v24741_v30 = vld [vmem:[%s29960_s3 + $0x1e0] sm:$0xff]   ;;  %23694 = vmatmul.mubr.bf16.gmra.mxu1 %v24730_v15  ;;  %v24754_v38 = vld [vmem:[%s29960_s3 + $0x1c8] sm:$0xff]  }
 0x56a   :  { %v11878_v22 = vpop.f32.mrf.mxu0  ;;  %23713 = vmatprep.subr.bf16.mxu0 %v24732_v0  ;;  %23697 = vmatprep.mubr.bf16.mxu1 %v24735_v26  ;;  %v24755_v26 = vld [vmem:[%s29960_s3 + $0x180] sm:$0xff]  }
 0x56b   :  { %v28710_v59 = vadd.f32 %v23336_v47, %v11945_v17  ;;  %v11943_v52 = vadd.f32 %v11878_v22, %v28611_v14  ;;  %v23339_v8 = vpop.f32.mrf.mxu1  ;;  %23750 = vmatpush3.bf16.msra.mxu1 %v24739_v16  ;;  %v24750_v16 = vld [vmem:[#allocation2 + $0x1fc] sm:$0xff]  }
 0x56c   :  { %v23303_v31 = vpop.f32.mrf.mxu0  ;;  %23658 = vmatmul.mubr.bf16.gmra.mxu0 %v24729_v28  ;;  %23751 = vmatprep.subr.bf16.mxu1 %v24741_v30 }
 0x56d   :  { %v28719_v9 = vadd.f32 %v12156_v33, %v11943_v52  ;;  %v11948_v1 = vadd.f32 %v23303_v31, %v28617_v10  ;;  %23714 = vmatpush3.bf16.msra.mxu0 %v24732_v0  ;;  %23661 = vmatprep.mubr.bf16.mxu0 %v24734_v35  ;;  %v12169_v43 = vpop.f32.mrf.mxu1  ;;  %v24745_v0 = vld [vmem:[#allocation2 + $0x1f8] sm:$0xff]  }
 0x56e   :  { %v11891_v14 = vpop.f32.mrf.mxu0  ;;  %23715 = vmatprep.subr.bf16.mxu0 %v24736_v24 }
 0x56f   :  { %v28725_v11 = vadd.f32 %v23339_v8, %v11948_v1  ;;  %v11946_v7 = vadd.f32 %v11891_v14, %v28623_v56  ;;  %v23340_v49 = vpop.f32.mrf.mxu1  ;;  %v24743_v56 = vld [vmem:[#allocation2 + $0x1f0] sm:$0xff]   ;;  %23752 = vmatpush3.bf16.msra.mxu1 %v24741_v30  ;;  %v24752_v30 = vld [vmem:[#allocation2 + $0x204] sm:$0xff]  }
 0x570   :  { %v23304_v10 = vpop.f32.mrf.mxu0  ;;  %23753 = vmatprep.subr.bf16.mxu1 %v24746_v21 }
 0x571   :  { %v28731_v42 = vadd.f32 %v12169_v43, %v11946_v7  ;;  %v11949_v2 = vadd.f32 %v23304_v10, %v28626_v60  ;;  %23716 = vmatpush3.bf16.msra.mxu0 %v24736_v24  ;;  %v12172_v13 = vpop.f32.mrf.mxu1  ;;  %v24748_v60 = vld [vmem:[%s29960_s3 + $0x1d0] sm:$0xff]   ;;  %23698 = vmatmul.mubr.bf16.gmra.mxu1 %v24738_v50  ;;  %v24765_v7 = vld [vmem:[%s29962_s5 + $0x78] sm:$0xff]  }
 0x572   :  { %v11894_v6 = vpop.f32.mrf.mxu0  ;;  %23717 = vmatprep.subr.bf16.mxu0 %v24740_v55  ;;  %23701 = vmatprep.mubr.bf16.mxu1 %v24743_v56 }
 0x573   :  { %v28734_v44 = vadd.f32 %v23340_v49, %v11949_v2  ;;  %v11947_v36 = vadd.f32 %v11894_v6, %v28635_v25  ;;  %v23343_v40 = vpop.f32.mrf.mxu1  ;;  %23754 = vmatpush3.bf16.msra.mxu1 %v24746_v21  ;;  %v24758_v2 = vld [vmem:[#allocation2 + $0x1e4] sm:$0xff]  }
 0x574   :  { %v23307_v23 = vpop.f32.mrf.mxu0  ;;  %23662 = vmatmul.mubr.bf16.gmra.mxu0 %v24737_v29  ;;  %23755 = vmatprep.subr.bf16.mxu1 %v24748_v60  ;;  %v24753_v29 = vld [vmem:[#allocation2 + $0x208] sm:$0xff]  }
 0x575   :  { %v28743_v4 = vadd.f32 %v12172_v13, %v11947_v36  ;;  %v11952_v53 = vadd.f32 %v23307_v23, %v28641_v57  ;;  %23718 = vmatpush3.bf16.msra.mxu0 %v24740_v55  ;;  %23665 = vmatprep.mubr.bf16.mxu0 %v24742_v5  ;;  %v12185_v28 = vpop.f32.mrf.mxu1  ;;  %v24761_v55 = vld [vmem:[%s29960_s3 + $0x238] sm:$0xff]   ;;  %v24759_v23 = vld [vmem:[#allocation2 + $0x1e8] sm:$0xff]  }
 0x576   :  { %v11907_v25 = vpop.f32.mrf.mxu0  ;;  %23719 = vmatprep.subr.bf16.mxu0 %v24747_v34 }
 0x577   :  { %v28749_v54 = vadd.f32 %v23343_v40, %v11952_v53  ;;  %v11950_v58 = vadd.f32 %v11907_v25, %v28647_v41  ;;  %v23344_v45 = vpop.f32.mrf.mxu1  ;;  %v24751_v41 = vld [vmem:[#allocation2 + $0x200] sm:$0xff]   ;;  %23756 = vmatpush3.bf16.msra.mxu1 %v24748_v60  ;;  %v24760_v53 = vld [vmem:[#allocation2 + $0x1ec] sm:$0xff]  }
 0x578   :  { %v23308_v57 = vpop.f32.mrf.mxu0  ;;  %23757 = vmatprep.subr.bf16.mxu1 %v24754_v38  ;;  %v24762_v25 = vld [vmem:[%s29960_s3 + $0x230] sm:$0xff]  }
 0x579   :  { %v28755_v19 = vadd.f32 %v12185_v28, %v11950_v58  ;;  %v11953_v15 = vadd.f32 %v23308_v57, %v28650_v46  ;;  %23720 = vmatpush3.bf16.msra.mxu0 %v24747_v34  ;;  %v12188_v22 = vpop.f32.mrf.mxu1  ;;  %v24756_v46 = vld [vmem:[%s29960_s3 + $0x1c0] sm:$0xff]   ;;  %23702 = vmatmul.mubr.bf16.gmra.mxu1 %v24745_v0  ;;  %v24764_v58 = vld [vmem:[#allocation2 + $0x1f4] sm:$0xff]  }
 0x57a   :  { %v11910_v17 = vpop.f32.mrf.mxu0  ;;  %23721 = vmatprep.subr.bf16.mxu0 %v24749_v32  ;;  %23705 = vmatprep.mubr.bf16.mxu1 %v24751_v41  ;;  %v24768_v0 = vld [vmem:[%s29962_s5 + $0x38] sm:$0xff]   ;;  %v24769_v41 = vld [vmem:[%s29960_s3 + $0x228] sm:$0xff]  }
 0x57b   :  { %v28758_v47 = vadd.f32 %v23344_v45, %v11953_v15  ;;  %v11951_v35 = vadd.f32 %v11910_v17, %v28659_v3  ;;  %v23347_v31 = vpop.f32.mrf.mxu1  ;;  %23758 = vmatpush3.bf16.msra.mxu1 %v24754_v38  ;;  %v24770_v38 = vld [vmem:[%s29962_s5 + $0x70] sm:$0xff]   ;;  %v24766_v17 = vld [vmem:[#allocation2 + $0x1f8] sm:$0xff]  }
 0x57c   :  { %v23311_v52 = vpop.f32.mrf.mxu0  ;;  %23666 = vmatmul.mubr.bf16.gmra.mxu0 %v24744_v20  ;;  %23759 = vmatprep.subr.bf16.mxu1 %v24756_v46 }
 0x57d   :  { %v28767_v33 = vadd.f32 %v12188_v22, %v11951_v35  ;;  %v11956_v24 = vadd.f32 %v23311_v52, %v28662_v39  ;;  %23669 = vmatprep.mubr.bf16.mxu0 %v24750_v16  ;;  %23722 = vmatpush3.bf16.msra.mxu0 %v24749_v32  ;;  %v12201_v14 = vpop.f32.mrf.mxu1 }
 0x57e   :  { %v11923_v3 = vpop.f32.mrf.mxu0  ;;  %23723 = vmatprep.subr.bf16.mxu0 %v24755_v26 }
 0x57f   :  { %v28770_v1 = vadd.f32 %v23347_v31, %v11956_v24  ;;  %v11954_v8 = vadd.f32 %v11923_v3, %v28671_v62  ;;  %v23348_v10 = vpop.f32.mrf.mxu1  ;;  %v24757_v62 = vld [vmem:[#allocation2 + $0x1e0] sm:$0xff]   ;;  %23760 = vmatpush3.bf16.msra.mxu1 %v24756_v46  ;;  %v24775_v24 = vld [vmem:[%s29962_s5 + $0x68] sm:$0xff]  }
 0x580   :  { %v23312_v39 = vpop.f32.mrf.mxu0  ;;  %21476 = vmatprep.subr.bf16.mxu1 %v24765_v7  ;;  %v24772_v46 = vld [vmem:[#allocation2 + $0x200] sm:$0xff]  }
 0x581   :  { %v28779_v43 = vadd.f32 %v12201_v14, %v11954_v8  ;;  %v11957_v50 = vadd.f32 %v23312_v39, %v28674_v61  ;;  %23724 = vmatpush3.bf16.msra.mxu0 %v24755_v26  ;;  %v12204_v6 = vpop.f32.mrf.mxu1  ;;  %23706 = vmatmul.mubr.bf16.gmra.mxu1 %v24753_v29  ;;  %v24767_v26 = vld [vmem:[#allocation2 + $0x1fc] sm:$0xff]   ;;  %v24773_v3 = vld [vmem:[#allocation2 + $0x204] sm:$0xff]  }
 0x582   :  { %v11926_v21 = vpop.f32.mrf.mxu0  ;;  %23781 = vmatprep.subr.bf16.mxu0 %v24761_v55  ;;  %23761 = vmatprep.mubr.bf16.mxu1 %v24758_v2  ;;  %v24774_v8 = vld [vmem:[%s29960_s3 + $0x220] sm:$0xff]   ;;  %v24778_v29 = vld [vmem:[%s29962_s5 + $0x28] sm:$0xff]   ;;  %v24777_v2 = vld [vmem:[#allocation2 + $0x214] sm:$0xff]  }
 0x583   :  { %v28782_v49 = vadd.f32 %v23348_v10, %v11957_v50  ;;  %v11955_v5 = vadd.f32 %v11926_v21, %v28677_v48  ;;  %v23403_v61 = vpop.f32.mrf.mxu1  ;;  %v24779_v39 = vld [vmem:[%s29962_s5 + $0x60] sm:$0xff]   ;;  %v24776_v10 = vld [vmem:[#allocation2 + $0x210] sm:$0xff]  }
 0x584   :  { %v23367_v56 = vpop.f32.mrf.mxu0  ;;  %23670 = vmatmul.mubr.bf16.gmra.mxu0 %v24752_v30 }
 0x585   :  { %30277 = vst [vmem:[#allocation66_spill] sm:$0xff] %v28782_v49  ;;  %v28785_v36 = vadd.f32 %v12204_v6, %v11955_v5  ;;  %v12496_v13 = vadd.f32 %v23367_v56, %v28680_v63  ;;  %23725 = vmatprep.mubr.bf16.mxu0 %v24757_v62  ;;  %v28792_v48 = vpop.f32.mrf.mxu1  ;;  %v24763_v63 = vld [vmem:[#allocation2 + $0x1f0] sm:$0xff]   ;;  %v24780_v62 = vld [vmem:[%s29960_s3 + $0x218] sm:$0xff]   ;;  %v24781_v5 = vld [vmem:[%s29962_s5 + $0x20] sm:$0xff]  }
 0x586   :  { %v28788_v34 = vpop.f32.mrf.mxu0  ;;  %v24782_v56 = vld [vmem:[#allocation2 + $0x218] sm:$0xff]  }
 0x587   :  { %30278 = vst [vmem:[#allocation68_spill] sm:$0xff] %v28785_v36  ;;  %v28790_v60 = vadd.f32 %v23403_v61, %v12496_v13  ;;  %v28799_v20 = vpop.f32.mrf.mxu1  ;;  %v24784_v13 = vld [vmem:[%s29962_s5 + $0x58] sm:$0xff]  }
 0x588   :  { %v28794_v40 = vpop.f32.mrf.mxu0 }
 0x589   :  { %v28803_v28 = vpop.f32.mrf.mxu1  ;;  %23762 = vmatmul.mubr.bf16.vlgmr.msra.gmra.mxu1 %v24760_v53 }
 0x58a   :  { %v28801_v32 = vpop.f32.mrf.mxu0  ;;  %23765 = vmatprep.mubr.bf16.mxu1 %v24764_v58  ;;  %21477 = vmatpush3.bf16.msra.mxu1 %v24768_v0  ;;  %v24788_v58 = vld [vmem:[%s29960_s3 + $0x210] sm:$0xff]  }
 0x58b   :  { %v23407_v45 = vpop.f32.mrf.mxu1  ;;  %21478 = vmatprep.subr.bf16.mxu1 %v24770_v38 }
 0x58c   :  { %v23371_v57 = vpop.f32.mrf.mxu0  ;;  %23726 = vmatmul.mubr.bf16.vlgmr.msra.gmra.mxu0 %v24759_v23  ;;  %v24783_v23 = vld [vmem:[#allocation2 + $0x21c] sm:$0xff]  }
 0x58d   :  { %v12500_v15 = vadd.f32 %v23371_v57, %v28701_v12  ;;  %23782 = vmatpush3.bf16.msra.mxu0 %v24761_v55  ;;  %23729 = vmatprep.mubr.bf16.mxu0 %v24763_v63  ;;  %v28819_v22 = vpop.f32.mrf.mxu1  ;;  %v24771_v12 = vld [vmem:[%s29962_s5 + $0x30] sm:$0xff]  }
 0x58e   :  { %v28812_v16 = vpop.f32.mrf.mxu0  ;;  %23783 = vmatprep.subr.bf16.mxu0 %v24762_v25  ;;  %21479 = vmatpush3.bf16.msra.mxu1 %v24771_v12  ;;  %v24789_v57 = vld [vmem:[%s29962_s5 + $0x50] sm:$0xff]   ;;  %v24786_v12 = vld [vmem:[#allocation2 + $0x224] sm:$0xff]  }
 0x58f   :  { %v28817_v35 = vadd.f32 %v23407_v45, %v12500_v15  ;;  %v28829_v31 = vpop.f32.mrf.mxu1  ;;  %21480 = vmatprep.subr.bf16.mxu1 %v24775_v24  ;;  %v24790_v15 = vld [vmem:[%s29962_s5 + $0x10] sm:$0xff]  }
 0x590   :  { %v28824_v52 = vpop.f32.mrf.mxu0  ;;  %30280 = vst [vmem:[#allocation63_spill] sm:$0xff] %v28829_v31 }
 0x591   :  { %30279 = vst [vmem:[#allocation67_spill] sm:$0xff] %v28817_v35  ;;  %23784 = vmatpush3.bf16.msra.mxu0 %v24762_v25  ;;  %v28836_v14 = vpop.f32.mrf.mxu1  ;;  %23766 = vmatmul.mubr.bf16.gmra.mxu1 %v24767_v26  ;;  %v24787_v25 = vld [vmem:[%s29962_s5 + $0x18] sm:$0xff]  }
 0x592   :  { %v28831_v30 = vpop.f32.mrf.mxu0  ;;  %23785 = vmatprep.subr.bf16.mxu0 %v24769_v41  ;;  %23769 = vmatprep.mubr.bf16.mxu1 %v24773_v3  ;;  %v24794_v3 = vld [vmem:[%s29962_s5 + $0x48] sm:$0xff]  }
 0x593   :  { %v28846_v7 = vpop.f32.mrf.mxu1  ;;  %21481 = vmatpush3.bf16.msra.mxu1 %v24778_v29  ;;  %v24793_v29 = vld [vmem:[#allocation2 + $0x22c] sm:$0xff]  }
 0x594   :  { %v28841_v55 = vpop.f32.mrf.mxu0  ;;  %23730 = vmatmul.mubr.bf16.gmra.mxu0 %v24766_v17  ;;  %21482 = vmatprep.subr.bf16.mxu1 %v24779_v39  ;;  %v24785_v17 = vld [vmem:[#allocation2 + $0x220] sm:$0xff]  }
 0x595   :  { %23786 = vmatpush3.bf16.msra.mxu0 %v24769_v41  ;;  %23733 = vmatprep.mubr.bf16.mxu0 %v24772_v46  ;;  %v28853_v21 = vpop.f32.mrf.mxu1  ;;  %v24791_v41 = vld [vmem:[%s29960_s3 + $0x208] sm:$0xff]  }
 0x596   :  { %v28848_v50 = vpop.f32.mrf.mxu0  ;;  %23787 = vmatprep.subr.bf16.mxu0 %v24774_v8  ;;  %v24792_v46 = vld [vmem:[#allocation2 + $0x228] sm:$0xff]  }
 0x597   :  { %v28863_v61 = vpop.f32.mrf.mxu1  ;;  %21483 = vmatpush3.bf16.msra.mxu1 %v24781_v5 }
 0x598   :  { %v28858_v6 = vpop.f32.mrf.mxu0  ;;  %21484 = vmatprep.subr.bf16.mxu1 %v24784_v13 }
 0x599   :  { %23788 = vmatpush3.bf16.msra.mxu0 %v24774_v8  ;;  %v28870_v63 = vpop.f32.mrf.mxu1  ;;  %23770 = vmatmul.mubr.bf16.gmra.mxu1 %v24777_v2  ;;  %v24800_v2 = vld [vmem:[%s29960_s3 + $0x200] sm:$0xff]  }
 0x59a   :  { %v28865_v53 = vpop.f32.mrf.mxu0  ;;  %23789 = vmatprep.subr.bf16.mxu0 %v24780_v62  ;;  %30281 = vst [vmem:[#allocation62_spill] sm:$0xff] %v28870_v63  ;;  %23773 = vmatprep.mubr.bf16.mxu1 %v24783_v23 }
 0x59b   :  { %v28880_v38 = vpop.f32.mrf.mxu1  ;;  %21485 = vmatpush3.bf16.msra.mxu1 %v24787_v25  ;;  %v24795_v25 = vld [vmem:[#allocation2 + $0x230] sm:$0xff]  }
 0x59c   :  { %v28875_v0 = vpop.f32.mrf.mxu0  ;;  %23734 = vmatmul.mubr.bf16.gmra.mxu0 %v24776_v10  ;;  %21486 = vmatprep.subr.bf16.mxu1 %v24789_v57  ;;  %v24797_v10 = vld [vmem:[%s29962_s5 + $0x8] sm:$0xff]  }
 0x59d   :  { %23790 = vmatpush3.bf16.msra.mxu0 %v24780_v62  ;;  %23737 = vmatprep.mubr.bf16.mxu0 %v24782_v56  ;;  %v28890_v26 = vpop.f32.mrf.mxu1  ;;  %v24801_v56 = vld [vmem:[%s29962_s5 + $0x40] sm:$0xff]  }
 0x59e   :  { %v28885_v45 = vpop.f32.mrf.mxu0  ;;  %23791 = vmatprep.subr.bf16.mxu0 %v24788_v58 }
 0x59f   :  { %v28897_v8 = vpop.f32.mrf.mxu1  ;;  %21487 = vmatpush3.bf16.msra.mxu1 %v24790_v15  ;;  %v24796_v15 = vld [vmem:[#allocation2 + $0x234] sm:$0xff]  }
 0x5a0   :  { %v28892_v24 = vpop.f32.mrf.mxu0  ;;  %21488 = vmatprep.subr.bf16.mxu1 %v24794_v3 }
 0x5a1   :  { %23792 = vmatpush3.bf16.msra.mxu0 %v24788_v58  ;;  %v28904_v62 = vpop.f32.mrf.mxu1  ;;  %23774 = vmatmul.mubr.bf16.gmra.mxu1 %v24786_v12  ;;  %v24802_v58 = vld [vmem:[%s29962_s5] sm:$0xff]   ;;  %v24813_v12 = vld [vmem:[%s29962_s5 + $0x178] sm:$0xff]  }
 0x5a2   :  { %v28899_v39 = vpop.f32.mrf.mxu0  ;;  %23793 = vmatprep.subr.bf16.mxu0 %v24791_v41  ;;  %30282 = vst [vmem:[#allocation61_spill] sm:$0xff] %v28904_v62  ;;  %23777 = vmatprep.mubr.bf16.mxu1 %v24793_v29  ;;  %v24803_v29 = vld [vmem:[#allocation2 + $0x1e8] sm:$0xff]  }
 0x5a3   :  { %v28914_v13 = vpop.f32.mrf.mxu1  ;;  %21489 = vmatpush3.bf16.msra.mxu1 %v24797_v10 }
 0x5a4   :  { %v28909_v5 = vpop.f32.mrf.mxu0  ;;  %23738 = vmatmul.mubr.bf16.gmra.mxu0 %v24785_v17  ;;  %30283 = vst [vmem:[#allocation52_spill] sm:$0xff] %v28914_v13  ;;  %v15877_v17 = vld [vmem:[#allocation3] sm:$0xff]  ;;  %21490 = vmatprep.subr.bf16.mxu1 %v24801_v56  ;;  %v12504_v13 = vadd.f32 %v28841_v55, %v28725_v11  ;;  %v12495_v55 = vadd.f32 %v28801_v32, %v28695_v37  ;;  %v24826_v37 = vld [vmem:[%s29962_s5 + $0x128] sm:$0xff]  }
 0x5a5   :  { %23741 = vmatprep.mubr.bf16.mxu0 %v24792_v46  ;;  %23794 = vmatpush3.bf16.msra.mxu0 %v24791_v41  ;;  %v28921_v57 = vpop.f32.mrf.mxu1  ;;  %v24804_v41 = vld [vmem:[%s29962_s5 + $0xf8] sm:$0xff]   ;;  %v20122_v35 = vcombine.high %v15877_v17, %v15877_v17  ;;  %v12498_v32 = vadd.f32 %v28812_v16, %v28707_v27  ;;  %v12499_v27 = vadd.f32 %v28831_v30, %v28719_v9  ;;  %v24830_v9 = vld [vmem:[%s29962_s5 + $0x120] sm:$0xff]  }
 0x5a6   :  { %v28916_v23 = vpop.f32.mrf.mxu0  ;;  %30284 = vst [vmem:[#allocation64_spill] sm:$0xff] %v28921_v57  ;;  %23795 = vmatprep.subr.bf16.mxu0 %v24800_v2  ;;  %v12508_v16 = vadd.f32 %v28875_v0, %v28749_v54  ;;  %v29051_v0 = vadd.f32 %v28824_v52, %v28710_v59  ;;  %v24827_v59 = vld [vmem:[%s29962_s5 + $0xd0] sm:$0xff]  }
 0x5a7   :  { %v28931_v3 = vpop.f32.mrf.mxu1  ;;  %21491 = vmatpush3.bf16.msra.mxu1 %v24802_v58  ;;  %v28948_v58 = vld [vmem:[#allocation3 + $0x8] sm:$0xff]  ;;  %v12776_v54 = vadd.f32 %v28819_v22, %v12498_v32  ;;  %v12510_v32 = vadd.f32 %v28916_v23, %v28779_v43 }
 0x5a8   :  { %v28926_v46 = vpop.f32.mrf.mxu0  ;;  %30286 = vst [vmem:[#allocation56_spill] sm:$0xff] %v28931_v3  ;;  %21498 = vmatprep.subr.bf16.mxu1 %v24804_v41  ;;  %30291 = vst [vmem:[#allocation55_spill] sm:$0xff] %v28948_v58  ;;  %v20124_v57 = vcombine.high %v28948_v58, %v28948_v58 }
 0x5a9   :  { %30285 = vst [vmem:[#allocation4_spill] sm:$0xff] %v28926_v46  ;;  %23796 = vmatpush3.bf16.msra.mxu0 %v24800_v2  ;;  %v28935_v10 = vpop.f32.mrf.mxu1  ;;  %23778 = vmatmul.mubr.bf16.gmra.mxu1 %v24796_v15  ;;  %v24805_v46 = vld [vmem:[#allocation2 + $0x1f0] sm:$0xff]   ;;  %v24806_v2 = vld [vmem:[%s29962_s5 + $0xb8] sm:$0xff]   ;;  %v20121_v15 = vcombine.low %v15877_v17, %v15877_v17 }
 0x5aa   :  { %v28933_v63 = vpop.f32.mrf.mxu0  ;;  %30288 = vst [vmem:[#allocation54_spill] sm:$0xff] %v28935_v10  ;;  %21520 = vmatprep.subr.bf16.mxu0 %v24813_v12  ;;  %17617 = vmatprep.mubr.bf16.mxu1 %v20122_v35  ;;  %v24811_v12 = vld [vmem:[#allocation2 + $0x1f8] sm:$0xff]   ;;  %v24809_v35 = vld [vmem:[%s29962_s5 + $0xf0] sm:$0xff]  }
 0x5ab   :  { %30287 = vst [vmem:[#allocation57_spill] sm:$0xff] %v28933_v63  ;;  %v28939_v56 = vpop.f32.mrf.mxu1  ;;  %v24816_v10 = vld [vmem:[%s29962_s5 + $0x138] sm:$0xff]   ;;  %v24818_v17 = vld [vmem:[%s29962_s5 + $0x170] sm:$0xff]  }
 0x5ac   :  { %v28937_v31 = vpop.f32.mrf.mxu0  ;;  %23742 = vmatmul.mubr.bf16.gmra.mxu0 %v24795_v25  ;;  %30289 = vst [vmem:[#allocation59_spill] sm:$0xff] %v28939_v56  ;;  %v30297_v23 = vld [vmem:[#allocation52_spill] sm:$0xff] }
 0x5ad   :  { %23797 = vmatprep.mubr.bf16.mxu0 %v24803_v29  ;;  %v28941_v3 = vpop.f32.mrf.mxu1 }
 0x5ae   :  { %v12971_v36 = vpop.f32.mrf.mxu0 }
 0x5af   :  { %v28950_v25 = vpop.f32.mrf.mxu1 }
 0x5b0   :  { %v28943_v63 = vpop.f32.mrf.mxu0  ;;  %30292 = vst [vmem:[#allocation65_spill] sm:$0xff] %v28950_v25  ;;  %v24810_v25 = vld [vmem:[%s29962_s5 + $0xb0] sm:$0xff]  }
 0x5b1   :  { %30290 = vst [vmem:[#allocation53_spill] sm:$0xff] %v28943_v63  ;;  %v28955_v29 = vpop.f32.mrf.mxu1  ;;  %v12494_v63 = vadd.f32 %v28788_v34, %v28683_v18  ;;  %17618 = vmatmul.mubr.bf16.vlgmr.msra.gmra.mxu1 %v20121_v15  ;;  %v24820_v18 = vld [vmem:[%s29962_s5 + $0x130] sm:$0xff]  }
 0x5b2   :  { %v12974_v41 = vpop.f32.mrf.mxu0  ;;  %21499 = vmatpush3.bf16.msra.mxu1 %v24806_v2  ;;  %17657 = vmatprep.mubr.bf16.mxu1 %v20124_v57  ;;  %v24815_v57 = vld [vmem:[%s29962_s5 + $0xa8] sm:$0xff]  }
 0x5b3   :  { %v28972_v56 = vpop.f32.mrf.mxu1  ;;  %21500 = vmatprep.subr.bf16.mxu1 %v24809_v35  ;;  %v24823_v2 = vld [vmem:[%s29962_s5 + $0x168] sm:$0xff]   ;;  %v12772_v11 = vadd.f32 %v28792_v48, %v12494_v63  ;;  %v12505_v35 = vadd.f32 %v28858_v6, %v28734_v44  ;;  %v12497_v44 = vadd.f32 %v28794_v40, %v28689_v51  ;;  %v12773_v63 = vadd.f32 %v28803_v28, %v12495_v55  ;;  %v24822_v51 = vld [vmem:[%s29962_s5 + $0xd8] sm:$0xff]  }
 0x5b4   :  { %v28960_v49 = vpop.f32.mrf.mxu0  ;;  %23798 = vmatmul.mubr.bf16.vlgmr.msra.gmra.mxu0 %v24805_v46  ;;  %30294 = vst [vmem:[#allocation60_spill] sm:$0xff] %v28972_v56  ;;  %v24812_v46 = vld [vmem:[%s29962_s5 + $0xe8] sm:$0xff]  }
 0x5b5   :  { %30293 = vst [vmem:[#allocation58_spill] sm:$0xff] %v28960_v49  ;;  %23801 = vmatprep.mubr.bf16.mxu0 %v24811_v12  ;;  %v24814_v49 = vld [vmem:[#allocation2 + $0x200] sm:$0xff]   ;;  %v28981_v62 = vpop.f32.mrf.mxu1  ;;  %21521 = vmatpush3.bf16.msra.mxu0 %v24816_v10  ;;  %v24821_v12 = vld [vmem:[#allocation2 + $0x208] sm:$0xff]   ;;  %v13050_v56 = vadd.f32 %v12971_v36, %v12772_v11  ;;  %v12783_v40 = vadd.f32 %v28863_v61, %v12505_v35  ;;  %v24833_v61 = vld [vmem:[%s29962_s5 + $0x158] sm:$0xff]  }
 0x5b6   :  { %v28977_v58 = vpop.f32.mrf.mxu0  ;;  %21522 = vmatprep.subr.bf16.mxu0 %v24818_v17  ;;  %21501 = vmatpush3.bf16.msra.mxu1 %v24810_v25  ;;  %v24817_v17 = vld [vmem:[%s29962_s5 + $0xe0] sm:$0xff]  }
 0x5b7   :  { %v28997_v10 = vpop.f32.mrf.mxu1  ;;  %21502 = vmatprep.subr.bf16.mxu1 %v24812_v46  ;;  %v24819_v36 = vld [vmem:[%s29962_s5 + $0xa0] sm:$0xff]   ;;  %v24824_v46 = vld [vmem:[#allocation2 + $0x218] sm:$0xff]   ;;  %v13054_v35 = vadd.f32 %v28977_v58, %v12776_v54 }
 0x5b8   :  { %v28986_v34 = vpop.f32.mrf.mxu0 }
 0x5b9   :  { %30295 = vst [vmem:[#allocation69_spill] sm:$0xff] %v28986_v34  ;;  %v12782_v34 = vadd.f32 %v28846_v7, %v12504_v13  ;;  %v29007_v48 = vpop.f32.mrf.mxu1  ;;  %21523 = vmatpush3.bf16.msra.mxu0 %v24820_v18  ;;  %v24828_v7 = vld [vmem:[%s29962_s5 + $0x160] sm:$0xff]   ;;  %v13328_v18 = vadd.f32 %v28941_v3, %v13050_v56  ;;  %v12506_v3 = vadd.f32 %v28885_v45, %v28755_v19 }
 0x5ba   :  { %v29001_v15 = vpop.f32.mrf.mxu0  ;;  %21524 = vmatprep.subr.bf16.mxu0 %v24823_v2  ;;  %21503 = vmatpush3.bf16.msra.mxu1 %v24815_v57  ;;  %v12777_v57 = vadd.f32 %v28836_v14, %v12499_v27  ;;  %v12786_v19 = vadd.f32 %v28880_v38, %v12508_v16  ;;  %v13052_v38 = vadd.f32 %v28937_v31, %v28790_v60  ;;  %v24832_v31 = vld [vmem:[%s29962_s5 + $0xc8] sm:$0xff]  }
 0x5bb   :  { %v23483_v25 = vpop.f32.mrf.mxu1  ;;  %21504 = vmatprep.subr.bf16.mxu1 %v24817_v17  ;;  %v24842_v16 = vld [vmem:[%s29962_s5 + $0x148] sm:$0xff]  }
 0x5bc   :  { %v23447_v6 = vpop.f32.mrf.mxu0  ;;  %23802 = vmatmul.mubr.bf16.gmra.mxu0 %v24814_v49  ;;  %v12502_v49 = vadd.f32 %v28848_v50, %v28731_v42  ;;  %v12775_v42 = vadd.f32 %v28799_v20, %v12497_v44  ;;  %v24825_v50 = vld [vmem:[%s29962_s5 + $0x98] sm:$0xff]  }
 0x5bd   :  { %v13060_v13 = vadd.f32 %v23447_v6, %v12782_v34  ;;  %23805 = vmatprep.mubr.bf16.mxu0 %v24821_v12  ;;  %v13051_v34 = vadd.f32 %v12974_v41, %v12773_v63  ;;  %v29036_v11 = vpop.f32.mrf.mxu1  ;;  %21525 = vmatpush3.bf16.msra.mxu0 %v24826_v37  ;;  %v24831_v41 = vld [vmem:[#allocation2 + $0x220] sm:$0xff]   ;;  %v12509_v12 = vadd.f32 %v28892_v24, %v28758_v47  ;;  %v24836_v47 = vld [vmem:[%s29962_s5 + $0x118] sm:$0xff]   ;;  %v24838_v37 = vld [vmem:[%s29962_s5 + $0x150] sm:$0xff]  }
 0x5be   :  { %v29033_v28 = vpop.f32.mrf.mxu0  ;;  %21526 = vmatprep.subr.bf16.mxu0 %v24828_v7  ;;  %v12780_v55 = vadd.f32 %v28853_v21, %v12502_v49  ;;  %21505 = vmatpush3.bf16.msra.mxu1 %v24819_v36  ;;  %v12507_v21 = vadd.f32 %v28899_v39, %v28767_v33  ;;  %v12512_v24 = vadd.f32 %v28909_v5, %v28770_v1 }
 0x5bf   :  { %v13338_v2 = vadd.f32 %v23483_v25, %v13060_v13  ;;  %v23484_v22 = vpop.f32.mrf.mxu1  ;;  %v13329_v52 = vadd.f32 %v28955_v29, %v13051_v34  ;;  %21506 = vmatprep.subr.bf16.mxu1 %v24822_v51  ;;  %v24829_v29 = vld [vmem:[%s29962_s5 + $0x90] sm:$0xff]   ;;  %v29086_v33 = vadd.f32 %v28865_v53, %v28743_v4  ;;  %v12784_v1 = vadd.f32 %v28890_v26, %v12506_v3  ;;  %v24834_v26 = vld [vmem:[#allocation2 + $0x228] sm:$0xff]  }
 0x5c0   :  { %v23448_v30 = vpop.f32.mrf.mxu0  ;;  %v12787_v44 = vadd.f32 %v28897_v8, %v12509_v12  ;;  %v29096_v6 = vadd.f32 %v28981_v62, %v13054_v35  ;;  %v13055_v4 = vadd.f32 %v29001_v15, %v12777_v57  ;;  %v24840_v8 = vld [vmem:[%s29962_s5 + $0x110] sm:$0xff]   ;;  %v12790_v62 = vadd.f32 %v30297_v23, %v12512_v24  ;;  %v30298_v51 = vld [vmem:[#allocation59_spill] sm:$0xff] }
 0x5c1   :  { %v13348_v20 = vmax.f32 %v13328_v18, %v13338_v2  ;;  %v13061_v56 = vadd.f32 %v23448_v30, %v12783_v40  ;;  %v29067_v14 = vpop.f32.mrf.mxu1  ;;  %21527 = vmatpush3.bf16.msra.mxu0 %v24830_v9  ;;  %v30296_v25 = vld [vmem:[#allocation61_spill] sm:$0xff]  ;;  %v29105_v27 = vadd.f32 %v30298_v51, %v13052_v38  ;;  %v30302_v3 = vld [vmem:[#allocation4_spill] sm:$0xff]  ;;  %v30307_v38 = vld [vmem:[#allocation58_spill] sm:$0xff] }
 0x5c2   :  { %v29060_v17 = vpop.f32.mrf.mxu0  ;;  %21528 = vmatprep.subr.bf16.mxu0 %v24833_v61  ;;  %21507 = vmatpush3.bf16.msra.mxu1 %v24825_v50  ;;  %v12785_v43 = vadd.f32 %v30296_v25, %v12507_v21  ;;  %v30299_v15 = vld [vmem:[#allocation53_spill] sm:$0xff]  ;;  %v30301_v61 = vld [vmem:[#allocation66_spill] sm:$0xff]  ;;  %v24835_v57 = vld [vmem:[%s29962_s5 + $0x88] sm:$0xff]  }
 0x5c3   :  { %v13339_v45 = vadd.f32 %v23484_v22, %v13061_v56  ;;  %v23487_v60 = vpop.f32.mrf.mxu1  ;;  %21508 = vmatprep.subr.bf16.mxu1 %v24827_v59  ;;  %v13053_v49 = vadd.f32 %v30299_v15, %v12775_v42  ;;  %v24841_v30 = vld [vmem:[#allocation2 + $0x230] sm:$0xff]   ;;  %v13333_v56 = vadd.f32 %v29007_v48, %v13055_v4  ;;  %v13058_v22 = vadd.f32 %v29033_v28, %v12780_v55  ;;  %v30306_v24 = vld [vmem:[#allocation67_spill] sm:$0xff]  ;;  %v24844_v51 = vld [vmem:[#allocation2 + $0x238] sm:$0xff]  }
 0x5c4   :  { %v23451_v58 = vpop.f32.mrf.mxu0  ;;  %23806 = vmatmul.mubr.bf16.gmra.mxu0 %v24824_v46  ;;  %v29114_v46 = vld [vmem:[%s29961_s4] ss:$0 sm:$0xff]  ;;  %v30300_v42 = vld [vmem:[#allocation64_spill] sm:$0xff]  ;;  %v30304_v28 = vld [vmem:[#allocation57_spill] sm:$0xff] }
 0x5c5   :  { %v13349_v39 = vmax.f32 %v13329_v52, %v13339_v45  ;;  %v13064_v5 = vadd.f32 %v23451_v58, %v12786_v19  ;;  %23809 = vmatprep.mubr.bf16.mxu0 %v24831_v41  ;;  %v13297_v13 = vpop.f32.mrf.mxu1  ;;  %21529 = vmatpush3.bf16.msra.mxu0 %v24836_v47  ;;  %v12788_v50 = vadd.f32 %v30300_v42, %v12510_v32  ;;  %v24837_v45 = vld [vmem:[%s29962_s5 + $0xc0] sm:$0xff]   ;;  %v30303_v48 = vld [vmem:[#allocation68_spill] sm:$0xff]  ;;  %v30305_v47 = vld [vmem:[#allocation65_spill] sm:$0xff] }
 0x5c6   :  { %v13019_v53 = vpop.f32.mrf.mxu0  ;;  %21530 = vmatprep.subr.bf16.mxu0 %v24838_v37  ;;  %21509 = vmatpush3.bf16.msra.mxu1 %v24829_v29  ;;  %v12511_v55 = vadd.f32 %v30304_v28, %v30303_v48  ;;  %v13331_v21 = vadd.f32 %v30305_v47, %v13053_v49  ;;  %v13056_v58 = vadd.f32 %v30307_v38, %v30306_v24  ;;  %v24839_v37 = vld [vmem:[%s29962_s5 + $0x80] sm:$0xff]   ;;  %v30312_v15 = vld [vmem:[#allocation60_spill] sm:$0xff] }
 0x5c7   :  { %v13358_v36 = vmax.f32 %v13348_v20, %v13349_v39  ;;  %v13342_v7 = vadd.f32 %v23487_v60, %v13064_v5  ;;  %v13062_v63 = vadd.f32 %v13019_v53, %v12784_v1  ;;  %v23488_v54 = vpop.f32.mrf.mxu1  ;;  %v12513_v20 = vadd.f32 %v30302_v3, %v30301_v61  ;;  %21510 = vmatprep.subr.bf16.mxu1 %v24832_v31  ;;  %v24845_v1 = vld [vmem:[%s29962_s5 + $0x108] sm:$0xff]   ;;  %v24851_v32 = vld [vmem:[%s29962_s5 + $0x140] sm:$0xff]   ;;  %v29166_v61 = vld [vmem:[#allocation3 + $0x18] sm:$0xff] }
 0x5c8   :  { %v23452_v40 = vpop.f32.mrf.mxu0  ;;  %v30309_v53 = vld [vmem:[#allocation62_spill] sm:$0xff]  ;;  %v13334_v49 = vadd.f32 %v30312_v15, %v13056_v58  ;;  %v30314_v3 = vld [vmem:[#allocation55_spill] sm:$0xff]  ;;  %v20128_v28 = vcombine.high %v29166_v61, %v29166_v61 }
 0x5c9   :  { %v13363_v18 = vadd.f32 %v29114_v46, %v13358_v36  ;;  %v13352_v34 = vmax.f32 %v29096_v6, %v13342_v7  ;;  %v13340_v2 = vadd.f32 %v13297_v13, %v13062_v63  ;;  %v13065_v9 = vadd.f32 %v23452_v40, %v12787_v44  ;;  %v13300_v52 = vpop.f32.mrf.mxu1  ;;  %21531 = vmatpush3.bf16.msra.mxu0 %v24840_v8  ;;  %v30308_v6 = vld [vmem:[#allocation63_spill] sm:$0xff]  ;;  %v30310_v36 = vld [vmem:[#allocation56_spill] sm:$0xff]  ;;  %v24843_v8 = vld [vmem:[%s29962_s5 + $0x1f8] sm:$0xff]  }
 0x5ca   :  { %v13022_v41 = vpop.f32.mrf.mxu0  ;;  %21532 = vmatprep.subr.bf16.mxu0 %v24842_v16  ;;  %v12779_v4 = vadd.f32 %v30308_v6, %v29051_v0  ;;  %v12791_v7 = vadd.f32 %v30310_v36, %v12513_v20  ;;  %v29150_v63 = vadd.f32 %v29036_v11, %v13058_v22  ;;  %21511 = vmatpush3.bf16.msra.mxu1 %v24835_v57  ;;  %v30313_v11 = vld [vmem:[#allocation69_spill] sm:$0xff]  ;;  %v24857_v6 = vld [vmem:[%s29962_s5 + $0x1a8] sm:$0xff]  }
 0x5cb   :  { %v13368_v12 = vmax.f32 %v13363_v18, 0.0  ;;  %v13350_v35 = vmax.f32 %v29105_v27, %v13340_v2  ;;  %v13343_v59 = vadd.f32 %v23488_v54, %v13065_v9  ;;  %v13063_v19 = vadd.f32 %v13022_v41, %v12785_v43  ;;  %v23491_v44 = vpop.f32.mrf.mxu1  ;;  %21512 = vmatprep.subr.bf16.mxu1 %v24837_v45  ;;  %v29162_v2 = vld [vmem:[#allocation3 + $0x10] sm:$0xff]  ;;  %v24858_v36 = vld [vmem:[%s29962_s5 + $0x238] sm:$0xff]  }
 0x5cc   :  { %v23455_v29 = vpop.f32.mrf.mxu0  ;;  %23810 = vmatmul.mubr.bf16.gmra.mxu0 %v24834_v26  ;;  %v12781_v26 = vadd.f32 %v30309_v53, %v29086_v33  ;;  %v30311_v33 = vld [vmem:[#allocation54_spill] sm:$0xff]  ;;  %v13057_v40 = vadd.f32 %v30313_v11, %v12779_v4  ;;  %v24852_v22 = vld [vmem:[%s29962_s5 + $0x1f0] sm:$0xff]  }
 0x5cd   :  { %v13373_v39 = vpack.c.bf16 %v13368_v12, %v13368_v12  ;;  %v13353_v5 = vmax.f32 %v13333_v56, %v13343_v59  ;;  %v13341_v60 = vadd.f32 %v13300_v52, %v13063_v19  ;;  %v13068_v31 = vadd.f32 %v23455_v29, %v12790_v62  ;;  %23813 = vmatprep.mubr.bf16.mxu0 %v24841_v30  ;;  %v13313_v0 = vpop.f32.mrf.mxu1  ;;  %v24853_v19 = vld [vmem:[%s29962_s5 + $0x100] sm:$0xff]  }
 0x5ce   :  { %v13035_v13 = vpop.f32.mrf.mxu0  ;;  %v12789_v27 = vadd.f32 %v30311_v33, %v12511_v55  ;;  %v13059_v16 = vadd.f32 %v29060_v17, %v12781_v26  ;;  %21533 = vmatpush3.bf16.msra.mxu0 %v24845_v1  ;;  %v20123_v17 = vcombine.low %v30314_v3, %v30314_v3  ;;  %21513 = vmatpush3.bf16.msra.mxu1 %v24839_v37  ;;  %v24856_v55 = vld [vmem:[%s29962_s5 + $0x278] sm:$0xff]   ;;  %v24854_v1 = vld [vmem:[%s29962_s5 + $0x1b0] sm:$0xff]   ;;  %v29199_v4 = vld [vmem:[#allocation3 + $0x20] sm:$0xff] }
 0x5cf   :  { %13378 = vst [vmem:[#allocation3 + $0x3c] sm:$0xf] %v13373_v39  ;;  %v13360_v25 = vmax.f32 %v13352_v34, %v13353_v5  ;;  %v13351_v43 = vmax.f32 %v13331_v21, %v13341_v60  ;;  %v13346_v23 = vadd.f32 %v23491_v44, %v13068_v31  ;;  %v13066_v62 = vadd.f32 %v13035_v13, %v12788_v50  ;;  %v24846_v34 = vld [vmem:[%s29962_s5 + $0x1b8] sm:$0xff]   ;;  %v23492_v50 = vpop.f32.mrf.mxu1  ;;  %v24863_v33 = vld [vmem:[%s29962_s5 + $0x1a0] sm:$0xff]  }
 0x5d0   :  { %v23456_v18 = vpop.f32.mrf.mxu0  ;;  %21534 = vmatprep.subr.bf16.mxu0 %v24851_v32  ;;  %21542 = vmatprep.subr.bf16.mxu1 %v24843_v8  ;;  %v20126_v59 = vcombine.high %v29162_v2, %v29162_v2  ;;  %v13337_v52 = vadd.f32 %v29067_v14, %v13059_v16  ;;  %v13335_v47 = vadd.f32 %v28997_v10, %v13057_v40  ;;  %v24855_v10 = vld [vmem:[%s29962_s5 + $0x1e8] sm:$0xff]  }
 0x5d1   :  { %v13365_v9 = vadd.f32 %v29114_v46, %v13360_v25  ;;  %v13359_v54 = vmax.f32 %v13350_v35, %v13351_v43  ;;  %v13356_v30 = vmax.f32 %v29150_v63, %v13346_v23  ;;  %v13344_v42 = vadd.f32 %v13313_v0, %v13066_v62  ;;  %v13316_v35 = vpop.f32.mrf.mxu1  ;;  %17658 = vmatmul.mubr.bf16.vlgmr.msra.gmra.mxu1 %v20123_v17  ;;  %v24862_v25 = vld [vmem:[%s29962_s5 + $0x270] sm:$0xff]   ;;  %v24861_v0 = vld [vmem:[%s29962_s5 + $0x1e0] sm:$0xff]   ;;  %v24866_v16 = vld [vmem:[%s29962_s5 + $0x268] sm:$0xff]  }
 0x5d2   :  { %v13069_v20 = vadd.f32 %v23456_v18, %v12791_v7  ;;  %v13038_v56 = vpop.f32.mrf.mxu0  ;;  %21543 = vmatpush3.bf16.msra.mxu1 %v24846_v34  ;;  %17737 = vmatprep.mubr.bf16.mxu1 %v20128_v28  ;;  %v20125_v63 = vcombine.low %v29162_v2, %v29162_v2  ;;  %v20130_v62 = vcombine.high %v29199_v4, %v29199_v4  ;;  %v24865_v2 = vld [vmem:[%s29962_s5 + $0x1d8] sm:$0xff]  }
 0x5d3   :  { %v13364_v41 = vadd.f32 %v29114_v46, %v13359_v54  ;;  %v13354_v57 = vmax.f32 %v13334_v49, %v13344_v42  ;;  %v13067_v12 = vadd.f32 %v13038_v56, %v12789_v27  ;;  %v13370_v21 = vmax.f32 %v13365_v9, 0.0  ;;  %v23547_v58 = vpop.f32.mrf.mxu1  ;;  %21544 = vmatprep.subr.bf16.mxu1 %v24852_v22  ;;  %21535 = vmatpush3.bf16.msra.mxu0 %v24853_v19  ;;  %v24869_v22 = vld [vmem:[%s29962_s5 + $0x1d0] sm:$0xff]  }
 0x5d4   :  { %v13347_v45 = vadd.f32 %v23492_v50, %v13069_v20  ;;  %v23511_v48 = vpop.f32.mrf.mxu0  ;;  %23814 = vmatmul.mubr.bf16.gmra.mxu0 %v24844_v51  ;;  %21564 = vmatprep.subr.bf16.mxu0 %v24856_v55  ;;  %v24868_v50 = vld [vmem:[%s29962_s5 + $0x228] sm:$0xff]   ;;  %v24870_v20 = vld [vmem:[%s29962_s5 + $0x260] sm:$0xff]  }
 0x5d5   :  { %v13369_v24 = vmax.f32 %v13364_v41, 0.0  ;;  %v13345_v38 = vadd.f32 %v13316_v35, %v13067_v12  ;;  %17697 = vmatprep.mubr.bf16.mxu0 %v20126_v59  ;;  %v29186_v14 = vadd.f32 %v23547_v58, %v23511_v48  ;;  %v13818_v60 = vpop.f32.mrf.mxu1  ;;  %v24872_v35 = vld [vmem:[%s29962_s5 + $0x220] sm:$0xff]   ;;  %v24873_v48 = vld [vmem:[%s29962_s5 + $0x1c8] sm:$0xff]  }
 0x5d6   :  { %v13357_v29 = vmax.f32 %v13337_v52, %v13347_v45  ;;  %v13597_v37 = vpop.f32.mrf.mxu0  ;;  %21545 = vmatpush3.bf16.msra.mxu1 %v24854_v1  ;;  %v24874_v52 = vld [vmem:[%s29962_s5 + $0x258] sm:$0xff]   ;;  %v24877_v1 = vld [vmem:[%s29962_s5 + $0x1c0] sm:$0xff]  }
 0x5d7   :  { %v20411_v39 = vpack.c.bf16 %v13370_v21, %v13369_v24  ;;  %v13355_v5 = vmax.f32 %v13335_v47, %v13345_v38  ;;  %v29194_v44 = vadd.f32 %v13818_v60, %v13597_v37  ;;  %v23548_v26 = vpop.f32.mrf.mxu1  ;;  %21546 = vmatprep.subr.bf16.mxu1 %v24855_v10  ;;  %v24875_v47 = vld [vmem:[%s29962_s5 + $0x188] sm:$0xff]   ;;  %v24876_v24 = vld [vmem:[%s29962_s5 + $0x218] sm:$0xff]   ;;  %v24880_v60 = vld [vmem:[%s29962_s5 + $0x210] sm:$0xff]  }
 0x5d8   :  { %v13362_v31 = vmax.f32 %v13356_v30, %v13357_v29  ;;  %v23512_v32 = vpop.f32.mrf.mxu0  ;;  %v24867_v30 = vld [vmem:[%s29962_s5 + $0x198] sm:$0xff]   ;;  %v24878_v29 = vld [vmem:[%s29962_s5 + $0x250] sm:$0xff]  }
 0x5d9   :  { %20438 = vst [vmem:[#allocation3 + $0x40] sm:$0xff] %v20411_v39   ;;  %v13361_v53 = vmax.f32 %v13354_v57, %v13355_v5  ;;  %v29207_v13 = vadd.f32 %v23548_v26, %v23512_v32  ;;  %v29215_v23 = vpop.f32.mrf.mxu1  ;;  %v24871_v57 = vld [vmem:[%s29962_s5 + $0x190] sm:$0xff]   ;;  %v24879_v5 = vld [vmem:[%s29962_s5 + $0x180] sm:$0xff]  }
 0x5da   :  { %v13367_v7 = vadd.f32 %v29114_v46, %v13362_v31  ;;  %v29209_v8 = vpop.f32.mrf.mxu0  ;;  %21547 = vmatpush3.bf16.msra.mxu1 %v24857_v6  ;;  %v24881_v31 = vld [vmem:[%s29962_s5 + $0x248] sm:$0xff]  }
 0x5db   :  { %v13366_v43 = vadd.f32 %v29114_v46, %v13361_v53  ;;  %v24864_v46 = vld [vmem:[%s29962_s5 + $0x230] sm:$0xff]   ;;  %v23551_v49 = vpop.f32.mrf.mxu1  ;;  %21548 = vmatprep.subr.bf16.mxu1 %v24861_v0  ;;  %v24882_v53 = vld [vmem:[%s29962_s5 + $0x2f8] sm:$0xff]   ;;  %v24887_v0 = vld [vmem:[%s29962_s5 + $0x240] sm:$0xff]  }
 0x5dc   :  { %v23515_v51 = vpop.f32.mrf.mxu0  ;;  %17698 = vmatmul.mubr.bf16.vlgmr.msra.gmra.mxu0 %v20125_v63  ;;  %v13372_v27 = vmax.f32 %v13367_v7, 0.0  ;;  %v29307_v7 = vld [vmem:[#allocation3 + $0x28] sm:$0xff] }
 0x5dd   :  { %v13371_v15 = vmax.f32 %v13366_v43, 0.0  ;;  %21565 = vmatpush3.bf16.msra.mxu0 %v24858_v36  ;;  %17777 = vmatprep.mubr.bf16.mxu0 %v20130_v62  ;;  %v29228_v11 = vadd.f32 %v23551_v49, %v23515_v51  ;;  %v13834_v34 = vpop.f32.mrf.mxu1  ;;  %v24883_v36 = vld [vmem:[%s29962_s5 + $0x208] sm:$0xff]   ;;  %v24884_v43 = vld [vmem:[%s29962_s5 + $0x2b8] sm:$0xff]   ;;  %v24888_v51 = vld [vmem:[%s29962_s5 + $0x2f0] sm:$0xff]  }
 0x5de   :  { %v13613_v40 = vpop.f32.mrf.mxu0  ;;  %21566 = vmatprep.subr.bf16.mxu0 %v24862_v25  ;;  %21549 = vmatpush3.bf16.msra.mxu1 %v24863_v33  ;;  %v24889_v49 = vld [vmem:[%s29962_s5 + $0x200] sm:$0xff]  }
 0x5df   :  { %v20416_v18 = vpack.c.bf16 %v13372_v27, %v13371_v15  ;;  %v29236_v9 = vadd.f32 %v13834_v34, %v13613_v40  ;;  %v23552_v42 = vpop.f32.mrf.mxu1  ;;  %21550 = vmatprep.subr.bf16.mxu1 %v24865_v2  ;;  %v20127_v27 = vcombine.low %v29166_v61, %v29166_v61  ;;  %v24890_v34 = vld [vmem:[%s29962_s5 + $0x2b0] sm:$0xff]   ;;  %v24892_v61 = vld [vmem:[%s29962_s5 + $0x378] sm:$0xff]  }
 0x5e0   :  { %v23516_v54 = vpop.f32.mrf.mxu0 }
 0x5e1   :  { %20439 = vst [vmem:[#allocation3 + $0x48] sm:$0xff] %v20416_v18   ;;  %21567 = vmatpush3.bf16.msra.mxu0 %v24864_v46  ;;  %v29244_v3 = vadd.f32 %v23552_v42, %v23516_v54  ;;  %v29251_v56 = vpop.f32.mrf.mxu1  ;;  %v20132_v18 = vcombine.high %v29307_v7, %v29307_v7  ;;  %v24891_v54 = vld [vmem:[%s29962_s5 + $0x2e8] sm:$0xff]  }
 0x5e2   :  { %v29246_v17 = vpop.f32.mrf.mxu0  ;;  %21568 = vmatprep.subr.bf16.mxu0 %v24866_v16  ;;  %21551 = vmatpush3.bf16.msra.mxu1 %v24867_v30 }
 0x5e3   :  { %v23555_v12 = vpop.f32.mrf.mxu1  ;;  %21552 = vmatprep.subr.bf16.mxu1 %v24869_v22  ;;  %v29345_v22 = vld [vmem:[#allocation3 + $0x30] sm:$0xff] }
 0x5e4   :  { %v23519_v41 = vpop.f32.mrf.mxu0 }
 0x5e5   :  { %21569 = vmatpush3.bf16.msra.mxu0 %v24868_v50  ;;  %v29262_v59 = vadd.f32 %v23555_v12, %v23519_v41  ;;  %v13850_v45 = vpop.f32.mrf.mxu1  ;;  %v24893_v12 = vld [vmem:[%s29962_s5 + $0x2a8] sm:$0xff]  }
 0x5e6   :  { %v13629_v19 = vpop.f32.mrf.mxu0  ;;  %21570 = vmatprep.subr.bf16.mxu0 %v24870_v20  ;;  %21553 = vmatpush3.bf16.msra.mxu1 %v24871_v57  ;;  %v24894_v20 = vld [vmem:[%s29962_s5 + $0x338] sm:$0xff]  }
 0x5e7   :  { %v29270_v28 = vadd.f32 %v13850_v45, %v13629_v19  ;;  %v23556_v21 = vpop.f32.mrf.mxu1  ;;  %21554 = vmatprep.subr.bf16.mxu1 %v24873_v48  ;;  %v20129_v45 = vcombine.low %v29199_v4, %v29199_v4  ;;  %v24899_v4 = vld [vmem:[%s29962_s5 + $0x2a0] sm:$0xff]  }
 0x5e8   :  { %v23520_v55 = vpop.f32.mrf.mxu0 }
 0x5e9   :  { %21571 = vmatpush3.bf16.msra.mxu0 %v24872_v35  ;;  %v29278_v38 = vadd.f32 %v23556_v21, %v23520_v55  ;;  %v29285_v37 = vpop.f32.mrf.mxu1  ;;  %v24898_v35 = vld [vmem:[%s29962_s5 + $0x370] sm:$0xff]   ;;  %v20134_v21 = vcombine.high %v29345_v22, %v29345_v22 }
 0x5ea   :  { %v29280_v58 = vpop.f32.mrf.mxu0  ;;  %21572 = vmatprep.subr.bf16.mxu0 %v24874_v52  ;;  %21555 = vmatpush3.bf16.msra.mxu1 %v24875_v47  ;;  %v24897_v52 = vld [vmem:[%s29962_s5 + $0x2e0] sm:$0xff]  }
 0x5eb   :  { %v23559_v10 = vpop.f32.mrf.mxu1  ;;  %21556 = vmatprep.subr.bf16.mxu1 %v24877_v1 }
 0x5ec   :  { %v23523_v39 = vpop.f32.mrf.mxu0 }
 0x5ed   :  { %21573 = vmatpush3.bf16.msra.mxu0 %v24876_v24  ;;  %v29299_v32 = vadd.f32 %v23559_v10, %v23523_v39  ;;  %v13866_v26 = vpop.f32.mrf.mxu1  ;;  %v24900_v24 = vld [vmem:[%s29962_s5 + $0x330] sm:$0xff]   ;;  %v24902_v39 = vld [vmem:[%s29962_s5 + $0x368] sm:$0xff]   ;;  %v24901_v10 = vld [vmem:[%s29962_s5 + $0x2d8] sm:$0xff]  }
 0x5ee   :  { %v13645_v6 = vpop.f32.mrf.mxu0  ;;  %21574 = vmatprep.subr.bf16.mxu0 %v24878_v29  ;;  %21557 = vmatpush3.bf16.msra.mxu1 %v24879_v5 }
 0x5ef   :  { %v29309_v63 = vadd.f32 %v13866_v26, %v13645_v6  ;;  %v23560_v62 = vpop.f32.mrf.mxu1  ;;  %21586 = vmatprep.subr.bf16.mxu1 %v24882_v53 }
 0x5f0   :  { %v23524_v25 = vpop.f32.mrf.mxu0 }
 0x5f1   :  { %21575 = vmatpush3.bf16.msra.mxu0 %v24880_v60  ;;  %v29320_v33 = vadd.f32 %v23560_v62, %v23524_v25  ;;  %v13869_v15 = vpop.f32.mrf.mxu1  ;;  %17738 = vmatmul.mubr.bf16.vlgmr.msra.gmra.mxu1 %v20127_v27  ;;  %v24903_v25 = vld [vmem:[%s29962_s5 + $0x298] sm:$0xff]   ;;  %v13822_v62 = vadd.f32 %v29215_v23, %v29209_v8  ;;  %v24908_v8 = vld [vmem:[%s29962_s5 + $0x320] sm:$0xff]  }
 0x5f2   :  { %v13648_v46 = vpop.f32.mrf.mxu0  ;;  %21576 = vmatprep.subr.bf16.mxu0 %v24881_v31  ;;  %21587 = vmatpush3.bf16.msra.mxu1 %v24884_v43  ;;  %v24906_v43 = vld [vmem:[%s29962_s5 + $0x360] sm:$0xff]  }
 0x5f3   :  { %v29327_v40 = vadd.f32 %v13869_v15, %v13648_v46  ;;  %v23563_v2 = vpop.f32.mrf.mxu1  ;;  %17817 = vmatprep.mubr.bf16.mxu1 %v20132_v18  ;;  %21588 = vmatprep.subr.bf16.mxu1 %v24888_v51  ;;  %v24905_v46 = vld [vmem:[%s29962_s5 + $0x2d0] sm:$0xff]   ;;  %v24910_v18 = vld [vmem:[%s29962_s5 + $0x358] sm:$0xff]  }
 0x5f4   :  { %v23527_v16 = vpop.f32.mrf.mxu0 }
 0x5f5   :  { %21577 = vmatpush3.bf16.msra.mxu0 %v24883_v36  ;;  %v29340_v30 = vadd.f32 %v23563_v2, %v23527_v16  ;;  %v13882_v50 = vpop.f32.mrf.mxu1 }
 0x5f6   :  { %v13661_v42 = vpop.f32.mrf.mxu0  ;;  %21578 = vmatprep.subr.bf16.mxu0 %v24887_v0  ;;  %21589 = vmatpush3.bf16.msra.mxu1 %v24890_v34 }
 0x5f7   :  { %v29347_v41 = vadd.f32 %v13882_v50, %v13661_v42  ;;  %v23564_v19 = vpop.f32.mrf.mxu1  ;;  %21590 = vmatprep.subr.bf16.mxu1 %v24891_v54  ;;  %v24909_v54 = vld [vmem:[%s29962_s5 + $0x2c8] sm:$0xff]  }
 0x5f8   :  { %v23528_v57 = vpop.f32.mrf.mxu0 }
 0x5f9   :  { %21579 = vmatpush3.bf16.msra.mxu0 %v24889_v49  ;;  %v29360_v48 = vadd.f32 %v23564_v19, %v23528_v57  ;;  %v13885_v47 = vpop.f32.mrf.mxu1  ;;  %v13838_v19 = vadd.f32 %v29251_v56, %v29246_v17  ;;  %v24913_v17 = vld [vmem:[%s29962_s5 + $0x2c0] sm:$0xff]  }
 0x5fa   :  { %v13664_v55 = vpop.f32.mrf.mxu0  ;;  %21608 = vmatprep.subr.bf16.mxu0 %v24892_v61  ;;  %21591 = vmatpush3.bf16.msra.mxu1 %v24893_v12  ;;  %v24912_v12 = vld [vmem:[%s29962_s5 + $0x318] sm:$0xff]  }
 0x5fb   :  { %v29367_v29 = vadd.f32 %v13885_v47, %v13664_v55  ;;  %v23619_v60 = vpop.f32.mrf.mxu1  ;;  %21592 = vmatprep.subr.bf16.mxu1 %v24897_v52  ;;  %v24914_v47 = vld [vmem:[%s29962_s5 + $0x350] sm:$0xff]  }
 0x5fc   :  { %17778 = vmatmul.mubr.bf16.vlgmr.msra.gmra.mxu0 %v20129_v45  ;;  %v23583_v1 = vpop.f32.mrf.mxu0 }
 0x5fd   :  { %v14156_v5 = vadd.f32 %v23583_v1, %v29186_v14  ;;  %21609 = vmatpush3.bf16.msra.mxu0 %v24894_v20  ;;  %17857 = vmatprep.mubr.bf16.mxu0 %v20134_v21  ;;  %v14353_v26 = vpop.f32.mrf.mxu1  ;;  %v24904_v14 = vld [vmem:[%s29962_s5 + $0x328] sm:$0xff]  }
 0x5fe   :  { %v14075_v31 = vpop.f32.mrf.mxu0  ;;  %21610 = vmatprep.subr.bf16.mxu0 %v24898_v35  ;;  %21593 = vmatpush3.bf16.msra.mxu1 %v24899_v4  ;;  %v24911_v35 = vld [vmem:[%s29962_s5 + $0x288] sm:$0xff]  }
 0x5ff   :  { %v29379_v6 = vadd.f32 %v23619_v60, %v14156_v5  ;;  %v14154_v53 = vadd.f32 %v14075_v31, %v29194_v44  ;;  %v23620_v51 = vpop.f32.mrf.mxu1  ;;  %21594 = vmatprep.subr.bf16.mxu1 %v24901_v10  ;;  %v24916_v5 = vld [vmem:[%s29962_s5 + $0x310] sm:$0xff]   ;;  %v24915_v10 = vld [vmem:[%s29962_s5 + $0x280] sm:$0xff]   ;;  %v24917_v31 = vld [vmem:[%s29962_s5 + $0x348] sm:$0xff]  }
 0x600   :  { %v23584_v36 = vpop.f32.mrf.mxu0 }
 0x601   :  { %v29393_v0 = vadd.f32 %v14353_v26, %v14154_v53  ;;  %v14157_v44 = vadd.f32 %v23584_v36, %v29207_v13  ;;  %21611 = vmatpush3.bf16.msra.mxu0 %v24900_v24  ;;  %v14356_v16 = vpop.f32.mrf.mxu1  ;;  %v24907_v13 = vld [vmem:[%s29962_s5 + $0x290] sm:$0xff]  }
 0x602   :  { %v14078_v27 = vpop.f32.mrf.mxu0  ;;  %21612 = vmatprep.subr.bf16.mxu0 %v24902_v39  ;;  %21595 = vmatpush3.bf16.msra.mxu1 %v24903_v25  ;;  %v13854_v25 = vadd.f32 %v29285_v37, %v29280_v58  ;;  %v20131_v58 = vcombine.low %v29307_v7, %v29307_v7 }
 0x603   :  { %v29399_v15 = vadd.f32 %v23620_v51, %v14157_v44  ;;  %v14155_v49 = vadd.f32 %v14078_v27, %v13822_v62  ;;  %v23623_v2 = vpop.f32.mrf.mxu1  ;;  %21596 = vmatprep.subr.bf16.mxu1 %v24905_v46  ;;  %v29464_v51 = vld [vmem:[#allocation3 + $0x38] sm:$0xff] }
 0x604   :  { %v23587_v23 = vpop.f32.mrf.mxu0  ;;  %v24920_v27 = vld [vmem:[%s29962_s5 + $0x3b8] sm:$0xff]  }
 0x605   :  { %v29410_v34 = vadd.f32 %v14356_v16, %v14155_v49  ;;  %v14160_v61 = vadd.f32 %v23587_v23, %v29228_v11  ;;  %21613 = vmatpush3.bf16.msra.mxu0 %v24904_v14  ;;  %v14369_v57 = vpop.f32.mrf.mxu1  ;;  %v24918_v14 = vld [vmem:[%s29962_s5 + $0x3f8] sm:$0xff]   ;;  %v24923_v16 = vld [vmem:[%s29962_s5 + $0x340] sm:$0xff]  }
 0x606   :  { %v14091_v42 = vpop.f32.mrf.mxu0  ;;  %21614 = vmatprep.subr.bf16.mxu0 %v24906_v43  ;;  %21597 = vmatpush3.bf16.msra.mxu1 %v24907_v13  ;;  %v20136_v13 = vcombine.high %v29464_v51, %v29464_v51 }
 0x607   :  { %v29416_v50 = vadd.f32 %v23623_v2, %v14160_v61  ;;  %v14158_v20 = vadd.f32 %v14091_v42, %v29236_v9  ;;  %v23624_v55 = vpop.f32.mrf.mxu1  ;;  %21598 = vmatprep.subr.bf16.mxu1 %v24909_v54  ;;  %v24925_v2 = vld [vmem:[%s29962_s5 + $0x300] sm:$0xff]   ;;  %v24926_v42 = vld [vmem:[%s29962_s5 + $0x3b0] sm:$0xff]  }
 0x608   :  { %v23588_v11 = vpop.f32.mrf.mxu0 }
 0x609   :  { %v29427_v52 = vadd.f32 %v14369_v57, %v14158_v20  ;;  %v14161_v45 = vadd.f32 %v23588_v11, %v29244_v3  ;;  %21615 = vmatpush3.bf16.msra.mxu0 %v24908_v8  ;;  %v14372_v1 = vpop.f32.mrf.mxu1  ;;  %v24924_v8 = vld [vmem:[%s29962_s5 + $0x3f0] sm:$0xff]   ;;  %v24928_v20 = vld [vmem:[%s29962_s5 + $0x478] sm:$0xff]   ;;  %v24927_v11 = vld [vmem:[%s29962_s5 + $0x3e8] sm:$0xff]  }
 0x60a   :  { %v14094_v9 = vpop.f32.mrf.mxu0  ;;  %21616 = vmatprep.subr.bf16.mxu0 %v24910_v18  ;;  %21599 = vmatpush3.bf16.msra.mxu1 %v24911_v35 }
 0x60b   :  { %v29433_v21 = vadd.f32 %v23624_v55, %v14161_v45  ;;  %v14159_v24 = vadd.f32 %v14094_v9, %v13838_v19  ;;  %v23627_v39 = vpop.f32.mrf.mxu1  ;;  %21600 = vmatprep.subr.bf16.mxu1 %v24913_v17  ;;  %v29499_v19 = vld [vmem:[#allocation3 + $0x40] sm:$0xff] }
 0x60c   :  { %v23591_v56 = vpop.f32.mrf.mxu0 }
 0x60d   :  { %v29438_v3 = vadd.f32 %v14372_v1, %v14159_v24  ;;  %v14164_v4 = vadd.f32 %v23591_v56, %v29262_v59  ;;  %21617 = vmatpush3.bf16.msra.mxu0 %v24912_v12  ;;  %v14385_v26 = vpop.f32.mrf.mxu1  ;;  %v24929_v1 = vld [vmem:[%s29962_s5 + $0x3a8] sm:$0xff]  }
 0x60e   :  { %v14107_v60 = vpop.f32.mrf.mxu0  ;;  %21618 = vmatprep.subr.bf16.mxu0 %v24914_v47  ;;  %21601 = vmatpush3.bf16.msra.mxu1 %v24915_v10  ;;  %v20133_v47 = vcombine.low %v29345_v22, %v29345_v22  ;;  %v20138_v22 = vcombine.high %v29499_v19, %v29499_v19 }
 0x60f   :  { %v29450_v53 = vadd.f32 %v23627_v39, %v14164_v4  ;;  %v14162_v59 = vadd.f32 %v14107_v60, %v29270_v28  ;;  %v23628_v44 = vpop.f32.mrf.mxu1  ;;  %v24919_v28 = vld [vmem:[%s29962_s5 + $0x308] sm:$0xff]   ;;  %21630 = vmatprep.subr.bf16.mxu1 %v24918_v14  ;;  %v24933_v39 = vld [vmem:[%s29962_s5 + $0x3e0] sm:$0xff]  }
 0x610   :  { %v23592_v36 = vpop.f32.mrf.mxu0  ;;  %v24938_v14 = vld [vmem:[%s29962_s5 + $0x468] sm:$0xff]  }
 0x611   :  { %v29458_v43 = vadd.f32 %v14385_v26, %v14162_v59  ;;  %v14165_v62 = vadd.f32 %v23592_v36, %v29278_v38  ;;  %21619 = vmatpush3.bf16.msra.mxu0 %v24916_v5  ;;  %v14388_v49 = vpop.f32.mrf.mxu1  ;;  %17818 = vmatmul.mubr.bf16.vlgmr.msra.gmra.mxu1 %v20131_v58  ;;  %v24935_v26 = vld [vmem:[%s29962_s5 + $0x3a0] sm:$0xff]   ;;  %v24940_v58 = vld [vmem:[%s29962_s5 + $0x428] sm:$0xff]  }
 0x612   :  { %v14110_v46 = vpop.f32.mrf.mxu0  ;;  %21620 = vmatprep.subr.bf16.mxu0 %v24917_v31  ;;  %21631 = vmatpush3.bf16.msra.mxu1 %v24920_v27 }
 0x613   :  { %v29471_v37 = vadd.f32 %v23628_v44, %v14165_v62  ;;  %v14163_v38 = vadd.f32 %v14110_v46, %v13854_v25  ;;  %v23631_v61 = vpop.f32.mrf.mxu1  ;;  %17897 = vmatprep.mubr.bf16.mxu1 %v20136_v13  ;;  %21632 = vmatprep.subr.bf16.mxu1 %v24924_v8  ;;  %v24937_v62 = vld [vmem:[%s29962_s5 + $0x3d8] sm:$0xff]  }
 0x614   :  { %v23595_v23 = vpop.f32.mrf.mxu0 }
 0x615   :  { %v29481_v18 = vadd.f32 %v14388_v49, %v14163_v38  ;;  %v14168_v7 = vadd.f32 %v23595_v23, %v29299_v32  ;;  %21621 = vmatpush3.bf16.msra.mxu0 %v24919_v28  ;;  %v14401_v12 = vpop.f32.mrf.mxu1  ;;  %v24942_v49 = vld [vmem:[%s29962_s5 + $0x460] sm:$0xff]   ;;  %v24941_v23 = vld [vmem:[%s29962_s5 + $0x3d0] sm:$0xff]  }
 0x616   :  { %v14123_v54 = vpop.f32.mrf.mxu0  ;;  %21622 = vmatprep.subr.bf16.mxu0 %v24923_v16  ;;  %21633 = vmatpush3.bf16.msra.mxu1 %v24926_v42 }
 0x617   :  { %v29493_v57 = vadd.f32 %v23631_v61, %v14168_v7  ;;  %v14166_v32 = vadd.f32 %v14123_v54, %v29309_v63  ;;  %v23632_v9 = vpop.f32.mrf.mxu1  ;;  %v24930_v63 = vld [vmem:[%s29962_s5 + $0x438] sm:$0xff]   ;;  %21634 = vmatprep.subr.bf16.mxu1 %v24927_v11  ;;  %v24944_v54 = vld [vmem:[%s29962_s5 + $0x420] sm:$0xff]   ;;  %v24945_v11 = vld [vmem:[%s29962_s5 + $0x3c8] sm:$0xff]  }
 0x618   :  { %v23596_v35 = vpop.f32.mrf.mxu0 }
 0x619   :  { %v29501_v45 = vadd.f32 %v14401_v12, %v14166_v32  ;;  %v14169_v55 = vadd.f32 %v23596_v35, %v29320_v33  ;;  %21623 = vmatpush3.bf16.msra.mxu0 %v24925_v2  ;;  %v24934_v33 = vld [vmem:[%s29962_s5 + $0x470] sm:$0xff]   ;;  %v14404_v4 = vpop.f32.mrf.mxu1 }
 0x61a   :  { %v14126_v24 = vpop.f32.mrf.mxu0  ;;  %21652 = vmatprep.subr.bf16.mxu0 %v24928_v20  ;;  %21635 = vmatpush3.bf16.msra.mxu1 %v24929_v1  ;;  %v24946_v20 = vld [vmem:[%s29962_s5 + $0x458] sm:$0xff]   ;;  %v24950_v1 = vld [vmem:[%s29962_s5 + $0x450] sm:$0xff]  }
 0x61b   :  { %v29515_v17 = vadd.f32 %v23632_v9, %v14169_v55  ;;  %v14167_v56 = vadd.f32 %v14126_v24, %v29327_v40  ;;  %v23635_v31 = vpop.f32.mrf.mxu1  ;;  %v24936_v40 = vld [vmem:[%s29962_s5 + $0x430] sm:$0xff]   ;;  %21636 = vmatprep.subr.bf16.mxu1 %v24933_v39 }
 0x61c   :  { %17858 = vmatmul.mubr.bf16.vlgmr.msra.gmra.mxu0 %v20133_v47  ;;  %v23599_v5 = vpop.f32.mrf.mxu0  ;;  %v24948_v47 = vld [vmem:[%s29962_s5 + $0x418] sm:$0xff]  }
 0x61d   :  { %v29523_v60 = vadd.f32 %v14404_v4, %v14167_v56  ;;  %v14172_v10 = vadd.f32 %v23599_v5, %v29340_v30  ;;  %21653 = vmatpush3.bf16.msra.mxu0 %v24930_v63  ;;  %17937 = vmatprep.mubr.bf16.mxu0 %v20138_v22  ;;  %v14417_v25 = vpop.f32.mrf.mxu1  ;;  %v24949_v4 = vld [vmem:[%s29962_s5 + $0x3c0] sm:$0xff]  }
 0x61e   :  { %v14139_v59 = vpop.f32.mrf.mxu0  ;;  %21654 = vmatprep.subr.bf16.mxu0 %v24934_v33  ;;  %21637 = vmatpush3.bf16.msra.mxu1 %v24935_v26 }
 0x61f   :  { %v29535_v36 = vadd.f32 %v23635_v31, %v14172_v10  ;;  %v14170_v30 = vadd.f32 %v14139_v59, %v29347_v41  ;;  %v23636_v27 = vpop.f32.mrf.mxu1  ;;  %v24939_v41 = vld [vmem:[%s29962_s5 + $0x398] sm:$0xff]   ;;  %21638 = vmatprep.subr.bf16.mxu1 %v24937_v62  ;;  %v24952_v31 = vld [vmem:[%s29962_s5 + $0x410] sm:$0xff]   ;;  %v24953_v59 = vld [vmem:[%s29962_s5 + $0x448] sm:$0xff]  }
 0x620   :  { %v23600_v44 = vpop.f32.mrf.mxu0 }
 0x621   :  { %v29541_v28 = vadd.f32 %v14417_v25, %v14170_v30  ;;  %v14173_v46 = vadd.f32 %v23600_v44, %v29360_v48  ;;  %21655 = vmatpush3.bf16.msra.mxu0 %v24936_v40  ;;  %v14420_v8 = vpop.f32.mrf.mxu1  ;;  %v24954_v30 = vld [vmem:[%s29962_s5 + $0x4f8] sm:$0xff]  }
 0x622   :  { %v14142_v38 = vpop.f32.mrf.mxu0  ;;  %21656 = vmatprep.subr.bf16.mxu0 %v24938_v14  ;;  %21639 = vmatpush3.bf16.msra.mxu1 %v24939_v41  ;;  %v20135_v41 = vcombine.low %v29464_v51, %v29464_v51 }
 0x623   :  { %v29553_v16 = vadd.f32 %v23636_v27, %v14173_v46  ;;  %v14171_v48 = vadd.f32 %v14142_v38, %v29367_v29  ;;  %v23691_v2 = vpop.f32.mrf.mxu1  ;;  %v24943_v29 = vld [vmem:[%s29962_s5 + $0x390] sm:$0xff]   ;;  %21640 = vmatprep.subr.bf16.mxu1 %v24941_v23  ;;  %v24955_v27 = vld [vmem:[%s29962_s5 + $0x408] sm:$0xff]   ;;  %v24956_v38 = vld [vmem:[%s29962_s5 + $0x4b8] sm:$0xff]  }
 0x624   :  { %v23655_v13 = vpop.f32.mrf.mxu0  ;;  %v24960_v23 = vld [vmem:[%s29962_s5 + $0x4f0] sm:$0xff]  }
 0x625   :  { %v29559_v7 = vadd.f32 %v14420_v8, %v14171_v48  ;;  %v14712_v61 = vadd.f32 %v23655_v13, %v29379_v6  ;;  %21657 = vmatpush3.bf16.msra.mxu0 %v24940_v58  ;;  %v14909_v12 = vpop.f32.mrf.mxu1  ;;  %v29619_v58 = vld [vmem:[#allocation3 + $0x48] sm:$0xff]  ;;  %v24959_v8 = vld [vmem:[%s29962_s5 + $0x440] sm:$0xff]  }
 0x626   :  { %v14631_v42 = vpop.f32.mrf.mxu0  ;;  %21658 = vmatprep.subr.bf16.mxu0 %v24942_v49  ;;  %21641 = vmatpush3.bf16.msra.mxu1 %v24943_v29  ;;  %v24962_v29 = vld [vmem:[%s29962_s5 + $0x4b0] sm:$0xff]  }
 0x627   :  { %v29571_v32 = vadd.f32 %v23691_v2, %v14712_v61  ;;  %v14710_v6 = vadd.f32 %v14631_v42, %v29393_v0  ;;  %v23692_v63 = vpop.f32.mrf.mxu1  ;;  %v24947_v0 = vld [vmem:[%s29962_s5 + $0x388] sm:$0xff]   ;;  %21642 = vmatprep.subr.bf16.mxu1 %v24945_v11  ;;  %v20140_v61 = vcombine.high %v29619_v58, %v29619_v58 }
 0x628   :  { %v23656_v35 = vpop.f32.mrf.mxu0  ;;  %v24963_v11 = vld [vmem:[%s29962_s5 + $0x4e8] sm:$0xff]  }
 0x629   :  { %v29577_v55 = vadd.f32 %v14909_v12, %v14710_v6  ;;  %v14713_v9 = vadd.f32 %v23656_v35, %v29399_v15  ;;  %21659 = vmatpush3.bf16.msra.mxu0 %v24944_v54  ;;  %v14912_v56 = vpop.f32.mrf.mxu1  ;;  %v24961_v54 = vld [vmem:[%s29962_s5 + $0x400] sm:$0xff]  }
 0x62a   :  { %v14634_v24 = vpop.f32.mrf.mxu0  ;;  %21660 = vmatprep.subr.bf16.mxu0 %v24946_v20  ;;  %21643 = vmatpush3.bf16.msra.mxu1 %v24947_v0  ;;  %v24975_v20 = vld [vmem:[%s29962_s5 + $0x578] sm:$0xff]  }
 0x62b   :  { %v29589_v33 = vadd.f32 %v23692_v63, %v14713_v9  ;;  %v14711_v15 = vadd.f32 %v14634_v24, %v29410_v34  ;;  %v23695_v10 = vpop.f32.mrf.mxu1  ;;  %v24951_v34 = vld [vmem:[%s29962_s5 + $0x380] sm:$0xff]   ;;  %21644 = vmatprep.subr.bf16.mxu1 %v24949_v4  ;;  %v24976_v24 = vld [vmem:[%s29962_s5 + $0x538] sm:$0xff]  }
 0x62c   :  { %v23659_v22 = vpop.f32.mrf.mxu0 }
 0x62d   :  { %v29595_v39 = vadd.f32 %v14912_v56, %v14711_v15  ;;  %v14716_v5 = vadd.f32 %v23659_v22, %v29416_v50  ;;  %21661 = vmatpush3.bf16.msra.mxu0 %v24948_v47  ;;  %v14925_v14 = vpop.f32.mrf.mxu1 }
 0x62e   :  { %v14647_v40 = vpop.f32.mrf.mxu0  ;;  %21662 = vmatprep.subr.bf16.mxu0 %v24950_v1  ;;  %21645 = vmatpush3.bf16.msra.mxu1 %v24951_v34  ;;  %v24964_v1 = vld [vmem:[%s29962_s5 + $0x4a8] sm:$0xff]   ;;  %v24966_v34 = vld [vmem:[%s29962_s5 + $0x4a0] sm:$0xff]  }
 0x62f   :  { %v29607_v26 = vadd.f32 %v23695_v10, %v14716_v5  ;;  %v14714_v50 = vadd.f32 %v14647_v40, %v29427_v52  ;;  %v23696_v46 = vpop.f32.mrf.mxu1  ;;  %21674 = vmatprep.subr.bf16.mxu1 %v24954_v30  ;;  %v24978_v40 = vld [vmem:[%s29962_s5 + $0x530] sm:$0xff]   ;;  %v24967_v30 = vld [vmem:[%s29962_s5 + $0x4d8] sm:$0xff]  }
 0x630   :  { %v23660_v25 = vpop.f32.mrf.mxu0 }
 0x631   :  { %v29613_v62 = vadd.f32 %v14925_v14, %v14714_v50  ;;  %v14717_v44 = vadd.f32 %v23660_v25, %v29433_v21  ;;  %21663 = vmatpush3.bf16.msra.mxu0 %v24952_v31  ;;  %v14928_v48 = vpop.f32.mrf.mxu1  ;;  %17898 = vmatmul.mubr.bf16.vlgmr.msra.gmra.mxu1 %v20135_v41  ;;  %v24983_v41 = vld [vmem:[%s29962_s5 + $0x560] sm:$0xff]  }
 0x632   :  { %v14650_v52 = vpop.f32.mrf.mxu0  ;;  %21664 = vmatprep.subr.bf16.mxu0 %v24953_v59  ;;  %21675 = vmatpush3.bf16.msra.mxu1 %v24956_v38  ;;  %v24979_v59 = vld [vmem:[%s29962_s5 + $0x568] sm:$0xff]  }
 0x633   :  { %v29626_v49 = vadd.f32 %v23696_v46, %v14717_v44  ;;  %v14715_v21 = vadd.f32 %v14650_v52, %v29438_v3  ;;  %v23699_v3 = vpop.f32.mrf.mxu1  ;;  %17977 = vmatprep.mubr.bf16.mxu1 %v20140_v61  ;;  %21676 = vmatprep.subr.bf16.mxu1 %v24960_v23  ;;  %v24980_v52 = vld [vmem:[%s29962_s5 + $0x528] sm:$0xff]  }
 0x634   :  { %v23663_v13 = vpop.f32.mrf.mxu0 }
 0x635   :  { %v29637_v2 = vadd.f32 %v14928_v48, %v14715_v21  ;;  %v14720_v51 = vadd.f32 %v23663_v13, %v29450_v53  ;;  %21665 = vmatpush3.bf16.msra.mxu0 %v24955_v27  ;;  %v14941_v12 = vpop.f32.mrf.mxu1 }
 0x636   :  { %v14663_v42 = vpop.f32.mrf.mxu0  ;;  %21666 = vmatprep.subr.bf16.mxu0 %v24959_v8  ;;  %21677 = vmatpush3.bf16.msra.mxu1 %v24962_v29  ;;  %v24969_v8 = vld [vmem:[%s29962_s5 + $0x4d0] sm:$0xff]  }
 0x637   :  { %v29649_v6 = vadd.f32 %v23699_v3, %v14720_v51  ;;  %v14718_v53 = vadd.f32 %v14663_v42, %v29458_v43  ;;  %v23700_v47 = vpop.f32.mrf.mxu1  ;;  %v20137_v43 = vcombine.low %v29499_v19, %v29499_v19  ;;  %21678 = vmatprep.subr.bf16.mxu1 %v24963_v11  ;;  %v24965_v19 = vld [vmem:[%s29962_s5 + $0x4e0] sm:$0xff]   ;;  %v24987_v42 = vld [vmem:[%s29962_s5 + $0x558] sm:$0xff]  }
 0x638   :  { %v23664_v35 = vpop.f32.mrf.mxu0  ;;  %v24984_v3 = vld [vmem:[%s29962_s5 + $0x520] sm:$0xff]  }
 0x639   :  { %v29655_v9 = vadd.f32 %v14941_v12, %v14718_v53  ;;  %v14721_v63 = vadd.f32 %v23664_v35, %v29471_v37  ;;  %21667 = vmatpush3.bf16.msra.mxu0 %v24961_v54  ;;  %v24977_v37 = vld [vmem:[%s29962_s5 + $0x570] sm:$0xff]   ;;  %v14944_v4 = vpop.f32.mrf.mxu1  ;;  %v24971_v53 = vld [vmem:[%s29962_s5 + $0x4c8] sm:$0xff]  }
 0x63a   :  { %v14666_v0 = vpop.f32.mrf.mxu0  ;;  %21696 = vmatprep.subr.bf16.mxu0 %v24975_v20  ;;  %21679 = vmatpush3.bf16.msra.mxu1 %v24964_v1 }
 0x63b   :  { %v29669_v15 = vadd.f32 %v23700_v47, %v14721_v63  ;;  %v14719_v56 = vadd.f32 %v14666_v0, %v29481_v18  ;;  %v23703_v31 = vpop.f32.mrf.mxu1  ;;  %21680 = vmatprep.subr.bf16.mxu1 %v24965_v19  ;;  %v24988_v47 = vld [vmem:[%s29962_s5 + $0x518] sm:$0xff]  }
 0x63c   :  { %17938 = vmatmul.mubr.bf16.vlgmr.msra.gmra.mxu0 %v20137_v43  ;;  %v23667_v22 = vpop.f32.mrf.mxu0  ;;  %v24991_v43 = vld [vmem:[%s29962_s5 + $0x550] sm:$0xff]  }
 0x63d   :  { %v29675_v5 = vadd.f32 %v14944_v4, %v14719_v56  ;;  %v14724_v10 = vadd.f32 %v23667_v22, %v29493_v57  ;;  %21697 = vmatpush3.bf16.msra.mxu0 %v24976_v24  ;;  %v14957_v14 = vpop.f32.mrf.mxu1 }
 0x63e   :  { %v14679_v18 = vpop.f32.mrf.mxu0  ;;  %21698 = vmatprep.subr.bf16.mxu0 %v24977_v37  ;;  %21681 = vmatpush3.bf16.msra.mxu1 %v24966_v34  ;;  %v24973_v37 = vld [vmem:[%s29962_s5 + $0x4c0] sm:$0xff]  }
 0x63f   :  { %v29687_v50 = vadd.f32 %v23703_v31, %v14724_v10  ;;  %v14722_v57 = vadd.f32 %v14679_v18, %v29501_v45  ;;  %v23704_v27 = vpop.f32.mrf.mxu1  ;;  %v24968_v45 = vld [vmem:[%s29962_s5 + $0x498] sm:$0xff]   ;;  %21682 = vmatprep.subr.bf16.mxu1 %v24967_v30  ;;  %v24992_v10 = vld [vmem:[%s29962_s5 + $0x510] sm:$0xff]  }
 0x640   :  { %v23668_v25 = vpop.f32.mrf.mxu0 }
 0x641   :  { %v29693_v44 = vadd.f32 %v14957_v14, %v14722_v57  ;;  %v14725_v46 = vadd.f32 %v23668_v25, %v29515_v17  ;;  %21699 = vmatpush3.bf16.msra.mxu0 %v24978_v40  ;;  %v14960_v48 = vpop.f32.mrf.mxu1  ;;  %v24995_v40 = vld [vmem:[%s29962_s5 + $0x548] sm:$0xff]  }
 0x642   :  { %v14682_v38 = vpop.f32.mrf.mxu0  ;;  %21700 = vmatprep.subr.bf16.mxu0 %v24979_v59  ;;  %21683 = vmatpush3.bf16.msra.mxu1 %v24968_v45  ;;  %v24981_v59 = vld [vmem:[%s29962_s5 + $0x5f8] sm:$0xff]   ;;  %v24996_v25 = vld [vmem:[%s29962_s5 + $0x508] sm:$0xff]   ;;  %v24985_v45 = vld [vmem:[%s29962_s5 + $0x5f0] sm:$0xff]  }
 0x643   :  { %v29705_v21 = vadd.f32 %v23704_v27, %v14725_v46  ;;  %v14723_v17 = vadd.f32 %v14682_v38, %v29523_v60  ;;  %v23707_v51 = vpop.f32.mrf.mxu1  ;;  %v24970_v60 = vld [vmem:[%s29962_s5 + $0x490] sm:$0xff]   ;;  %21684 = vmatprep.subr.bf16.mxu1 %v24969_v8  ;;  %v24999_v27 = vld [vmem:[%s29962_s5 + $0x540] sm:$0xff]  }
 0x644   :  { %v23671_v23 = vpop.f32.mrf.mxu0  ;;  %v25000_v8 = vld [vmem:[%s29962_s5 + $0x500] sm:$0xff]  }
 0x645   :  { %v29711_v13 = vadd.f32 %v14960_v48, %v14723_v17  ;;  %v14728_v61 = vadd.f32 %v23671_v23, %v29535_v36  ;;  %21701 = vmatpush3.bf16.msra.mxu0 %v24980_v52  ;;  %v14973_v20 = vpop.f32.mrf.mxu1  ;;  %v20139_v52 = vcombine.low %v29619_v58, %v29619_v58  ;;  %v24986_v58 = vld [vmem:[%s29962_s5 + $0x5b0] sm:$0xff]  }
 0x646   :  { %v14695_v54 = vpop.f32.mrf.mxu0  ;;  %21702 = vmatprep.subr.bf16.mxu0 %v24983_v41  ;;  %21685 = vmatpush3.bf16.msra.mxu1 %v24970_v60 }
 0x647   :  { %v29723_v29 = vadd.f32 %v23707_v51, %v14728_v61  ;;  %v14726_v36 = vadd.f32 %v14695_v54, %v29541_v28  ;;  %v23708_v63 = vpop.f32.mrf.mxu1  ;;  %v24972_v28 = vld [vmem:[%s29962_s5 + $0x488] sm:$0xff]   ;;  %21686 = vmatprep.subr.bf16.mxu1 %v24971_v53 }
 0x648   :  { %v23672_v12 = vpop.f32.mrf.mxu0 }
 0x649   :  { %v29729_v11 = vadd.f32 %v14973_v20, %v14726_v36  ;;  %v14729_v35 = vadd.f32 %v23672_v12, %v29553_v16  ;;  %21703 = vmatpush3.bf16.msra.mxu0 %v24984_v3  ;;  %v14976_v1 = vpop.f32.mrf.mxu1  ;;  %v30013_v20 = vmov 0.0   ;;  %v24993_v12 = vld [vmem:[%s29962_s5 + $0x5e0] sm:$0xff]  }
 0x64a   :  { %v14698_v24 = vpop.f32.mrf.mxu0  ;;  %21704 = vmatprep.subr.bf16.mxu0 %v24987_v42  ;;  %21687 = vmatpush3.bf16.msra.mxu1 %v24972_v28 }
 0x64b   :  { %v29741_v0 = vadd.f32 %v23708_v63, %v14729_v35  ;;  %v14727_v16 = vadd.f32 %v14698_v24, %v29559_v7  ;;  %v23763_v22 = vpop.f32.mrf.mxu1  ;;  %v24974_v7 = vld [vmem:[%s29962_s5 + $0x480] sm:$0xff]   ;;  %21688 = vmatprep.subr.bf16.mxu1 %v24973_v37 }
 0x64c   :  { %v23727_v56 = vpop.f32.mrf.mxu0  ;;  %v24994_v24 = vld [vmem:[%s29962_s5 + $0x5a0] sm:$0xff]  }
 0x64d   :  { %v29747_v4 = vadd.f32 %v14976_v1, %v14727_v16  ;;  %v15268_v19 = vadd.f32 %v23727_v56, %v29571_v32  ;;  %21705 = vmatpush3.bf16.msra.mxu0 %v24988_v47  ;;  %v15465_v34 = vpop.f32.mrf.mxu1  ;;  %v24998_v56 = vld [vmem:[%s29962_s5 + $0x598] sm:$0xff]  }
 0x64e   :  { %v15187_v31 = vpop.f32.mrf.mxu0  ;;  %21706 = vmatprep.subr.bf16.mxu0 %v24991_v43  ;;  %21689 = vmatpush3.bf16.msra.mxu1 %v24974_v7  ;;  %v24997_v43 = vld [vmem:[%s29962_s5 + $0x5d8] sm:$0xff]  }
 0x64f   :  { %30315 = vst [vmem:[#allocation61_spill] sm:$0xff] %v29747_v4  ;;  %v29759_v18 = vadd.f32 %v23763_v22, %v15268_v19  ;;  %v15266_v32 = vadd.f32 %v15187_v31, %v29577_v55  ;;  %v29769_v30 = vpop.f32.mrf.mxu1  ;;  %v24982_v55 = vld [vmem:[%s29962_s5 + $0x5b8] sm:$0xff]   ;;  %21718 = vmatprep.subr.bf16.mxu1 %v24981_v59  ;;  %v25001_v22 = vld [vmem:[%s29962_s5 + $0x5d0] sm:$0xff]  }
 0x650   :  { %v29765_v57 = vpop.f32.mrf.mxu0 }
 0x651   :  { %v29767_v14 = vadd.f32 %v15465_v34, %v15266_v32  ;;  %21707 = vmatpush3.bf16.msra.mxu0 %v24992_v10  ;;  %v29784_v38 = vpop.f32.mrf.mxu1  ;;  %17978 = vmatmul.mubr.bf16.vlgmr.msra.gmra.mxu1 %v20139_v52  ;;  %v25003_v34 = vld [vmem:[%s29962_s5 + $0x5c8] sm:$0xff]  }
 0x652   :  { %v29774_v46 = vpop.f32.mrf.mxu0  ;;  %21708 = vmatprep.subr.bf16.mxu0 %v24995_v40  ;;  %21719 = vmatpush3.bf16.msra.mxu1 %v24982_v55  ;;  %v25002_v40 = vld [vmem:[%s29962_s5 + $0x590] sm:$0xff]  }
 0x653   :  { %v23767_v48 = vpop.f32.mrf.mxu1  ;;  %21720 = vmatprep.subr.bf16.mxu1 %v24985_v45  ;;  %v25006_v45 = vld [vmem:[%s29962_s5 + $0x5c0] sm:$0xff]  }
 0x654   :  { %v23731_v41 = vpop.f32.mrf.mxu0 }
 0x655   :  { %v15272_v17 = vadd.f32 %v23731_v41, %v29607_v26  ;;  %21709 = vmatpush3.bf16.msra.mxu0 %v24996_v25  ;;  %v15481_v3 = vpop.f32.mrf.mxu1  ;;  %v24989_v26 = vld [vmem:[%s29962_s5 + $0x5e8] sm:$0xff]  }
 0x656   :  { %v15203_v23 = vpop.f32.mrf.mxu0  ;;  %21710 = vmatprep.subr.bf16.mxu0 %v24999_v27  ;;  %21721 = vmatpush3.bf16.msra.mxu1 %v24986_v58  ;;  %v25005_v27 = vld [vmem:[%s29962_s5 + $0x588] sm:$0xff]  }
 0x657   :  { %v29796_v61 = vadd.f32 %v23767_v48, %v15272_v17  ;;  %v15270_v51 = vadd.f32 %v15203_v23, %v29613_v62  ;;  %v29806_v42 = vpop.f32.mrf.mxu1  ;;  %v24990_v62 = vld [vmem:[%s29962_s5 + $0x5a8] sm:$0xff]   ;;  %21722 = vmatprep.subr.bf16.mxu1 %v24989_v26 }
 0x658   :  { %v29802_v54 = vpop.f32.mrf.mxu0  ;;  %30317 = vst [vmem:[#allocation59_spill] sm:$0xff] %v29806_v42 }
 0x659   :  { %30316 = vst [vmem:[#allocation52_spill] sm:$0xff] %v29796_v61  ;;  %v29804_v60 = vadd.f32 %v15481_v3, %v15270_v51  ;;  %21711 = vmatpush3.bf16.msra.mxu0 %v25000_v8  ;;  %v29814_v53 = vpop.f32.mrf.mxu1  ;;  %v25008_v8 = vld [vmem:[%s29962_s5 + $0x580] sm:$0xff]  }
 0x65a   :  { %v29808_v36 = vpop.f32.mrf.mxu0  ;;  %23817 = vmatprep.subr.bf16.mxu0 %v30013_v20  ;;  %21723 = vmatpush3.bf16.msra.mxu1 %v24990_v62 }
 0x65b   :  { %v23771_v63 = vpop.f32.mrf.mxu1  ;;  %21724 = vmatprep.subr.bf16.mxu1 %v24993_v12 }
 0x65c   :  { %v23735_v35 = vpop.f32.mrf.mxu0 }
 0x65d   :  { %v29824_v28 = vpop.f32.mrf.mxu1  ;;  %v15276_v42 = vadd.f32 %v23735_v35, %v29649_v6 }
 0x65e   :  { %v29819_v47 = vpop.f32.mrf.mxu0  ;;  %21725 = vmatpush3.bf16.msra.mxu1 %v24994_v24 }
 0x65f   :  { %v23772_v1 = vpop.f32.mrf.mxu1  ;;  %21726 = vmatprep.subr.bf16.mxu1 %v24997_v43 }
 0x660   :  { %v23736_v16 = vpop.f32.mrf.mxu0 }
 0x661   :  { %v29834_v19 = vpop.f32.mrf.mxu1 }
 0x662   :  { %v29829_v37 = vpop.f32.mrf.mxu0  ;;  %30318 = vst [vmem:[#allocation53_spill] sm:$0xff] %v29834_v19  ;;  %21727 = vmatpush3.bf16.msra.mxu1 %v24998_v56  ;;  %v15277_v19 = vadd.f32 %v23736_v16, %v29669_v15 }
 0x663   :  { %v23775_v31 = vpop.f32.mrf.mxu1  ;;  %21728 = vmatprep.subr.bf16.mxu1 %v25001_v22 }
 0x664   :  { %v23739_v10 = vpop.f32.mrf.mxu0 }
 0x665   :  { %v15513_v32 = vpop.f32.mrf.mxu1 }
 0x666   :  { %v15235_v7 = vpop.f32.mrf.mxu0  ;;  %21729 = vmatpush3.bf16.msra.mxu1 %v25002_v40 }
 0x667   :  { %v23776_v25 = vpop.f32.mrf.mxu1  ;;  %21730 = vmatprep.subr.bf16.mxu1 %v25003_v34  ;;  %v15278_v35 = vadd.f32 %v15235_v7, %v29693_v44 }
 0x668   :  { %v23740_v59 = vpop.f32.mrf.mxu0 }
 0x669   :  { %v29848_v52 = vpop.f32.mrf.mxu1  ;;  %v15281_v15 = vadd.f32 %v23740_v59, %v29705_v21 }
 0x66a   :  { %v15238_v55 = vpop.f32.mrf.mxu0  ;;  %21731 = vmatpush3.bf16.msra.mxu1 %v25005_v27 }
 0x66b   :  { %v29853_v17 = vpop.f32.mrf.mxu1  ;;  %21732 = vmatprep.subr.bf16.mxu1 %v25006_v45  ;;  %v15559_v21 = vadd.f32 %v23776_v25, %v15281_v15 }
 0x66c   :  { %v23743_v41 = vpop.f32.mrf.mxu0 }
 0x66d   :  { %v29858_v23 = vpop.f32.mrf.mxu1 }
 0x66e   :  { %v15251_v48 = vpop.f32.mrf.mxu0  ;;  %30319 = vst [vmem:[#allocation64_spill] sm:$0xff] %v29858_v23  ;;  %21733 = vmatpush3.bf16.msra.mxu1 %v25008_v8 }
 0x66f   :  { %v29862_v51 = vpop.f32.mrf.mxu1 }
 0x670   :  { %v29860_v58 = vpop.f32.mrf.mxu0  ;;  %30320 = vst [vmem:[#allocation66_spill] sm:$0xff] %v29862_v51  ;;  %v15554_v51 = vadd.f32 %v23771_v63, %v15276_v42  ;;  %v15556_v63 = vadd.f32 %v15513_v32, %v15278_v35 }
 0x671   :  { %v29866_v26 = vpop.f32.mrf.mxu1 }
 0x672   :  { %v29864_v3 = vpop.f32.mrf.mxu0  ;;  %30322 = vst [vmem:[#allocation68_spill] sm:$0xff] %v29866_v26  ;;  %v15267_v26 = vadd.f32 %v29774_v46, %v29595_v39  ;;  %v15271_v39 = vadd.f32 %v29808_v36, %v29637_v2  ;;  %v15274_v2 = vadd.f32 %v29819_v47, %v29655_v9  ;;  %v15275_v47 = vadd.f32 %v29829_v37, %v29675_v5  ;;  %v20120_v5 = vld [vmem:[%s29963_s6] ss:$0 sm:$0xff] }
 0x673   :  { %30321 = vst [vmem:[#allocation4_spill] sm:$0xff] %v29864_v3  ;;  %v21492_v12 = vpop.f32.mrf.mxu1  ;;  %v15280_v3 = vadd.f32 %v23739_v10, %v29687_v50  ;;  %v15279_v50 = vadd.f32 %v15238_v55, %v29711_v13  ;;  %v15282_v13 = vadd.f32 %v15251_v48, %v29729_v11  ;;  %v15273_v55 = vadd.f32 %v29802_v54, %v29626_v49  ;;  %v30327_v48 = vld [vmem:[#allocation61_spill] sm:$0xff]  ;;  %v30331_v49 = vld [vmem:[#allocation52_spill] sm:$0xff] }
 0x674   :  { %v23799_v62 = vpop.f32.mrf.mxu0  ;;  %v15552_v9 = vadd.f32 %v29824_v28, %v15274_v2 }
 0x675   :  { %v21493_v43 = vpop.f32.mrf.mxu1  ;;  %v15824_v10 = vadd.f32 %v23799_v62, %v29759_v18 }
 0x676   :  { %v15743_v24 = vpop.f32.mrf.mxu0  ;;  %v29868_v56 = vadd.f32 %v21493_v43, %v21492_v12 }
 0x677   :  { %v21495_v40 = vpop.f32.mrf.mxu1  ;;  %v15822_v43 = vadd.f32 %v15743_v24, %v29767_v14  ;;  %v15558_v14 = vadd.f32 %v23775_v31, %v15280_v3  ;;  %v30330_v24 = vld [vmem:[#allocation66_spill] sm:$0xff] }
 0x678   :  { %30323 = vst [vmem:[#allocation57_spill] sm:$0xff] %v29868_v56  ;;  %v23800_v22 = vpop.f32.mrf.mxu0 }
 0x679   :  { %v21496_v27 = vpop.f32.mrf.mxu1 }
 0x67a   :  { %v15746_v34 = vpop.f32.mrf.mxu0  ;;  %v15545_v27 = vadd.f32 %v29784_v38, %v15267_v26  ;;  %v15269_v38 = vadd.f32 %v29765_v57, %v29589_v33  ;;  %v30329_v26 = vld [vmem:[#allocation53_spill] sm:$0xff] }
 0x67b   :  { %v15553_v62 = vadd.f32 %v30329_v26, %v15275_v47 }
 0x67c   :  { %v29870_v45 = vpop.f32.mrf.mxu0  ;;  %v15823_v4 = vadd.f32 %v15746_v34, %v15545_v27  ;;  %v15547_v31 = vadd.f32 %v29769_v30, %v15269_v38 }
 0x67d   :  { %30324 = vst [vmem:[#allocation65_spill] sm:$0xff] %v29870_v45  ;;  %v15555_v45 = vadd.f32 %v23772_v1, %v15277_v19 }
 0x67e   :  { %v15759_v20 = vpop.f32.mrf.mxu0  ;;  %v15825_v30 = vadd.f32 %v23800_v22, %v15547_v31 }
 0x67f   :  { %v15826_v44 = vadd.f32 %v15759_v20, %v29804_v60  ;;  %v15557_v20 = vadd.f32 %v29848_v52, %v15279_v50  ;;  %v30326_v52 = vld [vmem:[#allocation64_spill] sm:$0xff] }
 0x680   :  { %v29873_v61 = vpop.f32.mrf.mxu0 }
 0x681   :  { %30325 = vst [vmem:[#allocation67_spill] sm:$0xff] %v29873_v61 }
 0x682   :  { %v15762_v8 = vpop.f32.mrf.mxu0 }
 0x684   :  { %v23807_v12 = vpop.f32.mrf.mxu0  ;;  %v30332_v54 = vld [vmem:[#allocation65_spill] sm:$0xff] }
 0x685   :  { %v15832_v40 = vadd.f32 %v23807_v12, %v15554_v51  ;;  %v15828_v34 = vadd.f32 %v30332_v54, %v30331_v49 }
 0x686   :  { %v15775_v56 = vpop.f32.mrf.mxu0 }
 0x687   :  { %v15842_v6 = vmax.f32 %v15822_v43, %v15832_v40 }
 0x688   :  { %v23808_v61 = vpop.f32.mrf.mxu0  ;;  %v30336_v2 = vld [vmem:[#allocation67_spill] sm:$0xff] }
 0x689   :  { %v15833_v23 = vadd.f32 %v23808_v61, %v15555_v45  ;;  %v15549_v61 = vadd.f32 %v29814_v53, %v15271_v39  ;;  %v30334_v39 = vld [vmem:[#allocation68_spill] sm:$0xff] }
 0x68a   :  { %v15778_v46 = vpop.f32.mrf.mxu0 }
 0x68b   :  { %v15843_v42 = vmax.f32 %v15823_v4, %v15833_v23  ;;  %v15284_v4 = vadd.f32 %v23743_v41, %v29723_v29  ;;  %v15827_v7 = vadd.f32 %v15762_v8, %v15549_v61  ;;  %v15285_v29 = vadd.f32 %v29860_v58, %v29741_v0  ;;  %v30328_v23 = vld [vmem:[#allocation4_spill] sm:$0xff]  ;;  %v25019_v8 = vld [vmem:[%s29961_s4] ss:$0 sm:$0xff] }
 0x68c   :  { %v23811_v16 = vpop.f32.mrf.mxu0  ;;  %v15560_v41 = vadd.f32 %v30326_v52, %v15282_v13  ;;  %v15283_v28 = vadd.f32 %v30328_v23, %v30327_v48  ;;  %v15830_v0 = vadd.f32 %v15775_v56, %v15552_v9  ;;  %v25007_v23 = vld [vmem:[%s29962_s5 + $0x630] sm:$0xff]  }
 0x68d   :  { %v15852_v1 = vmax.f32 %v15842_v6, %v15843_v42  ;;  %v15836_v19 = vadd.f32 %v23811_v16, %v15558_v14  ;;  %v15562_v59 = vadd.f32 %v29853_v17, %v15284_v4  ;;  %v15563_v22 = vadd.f32 %v30330_v24, %v15285_v29  ;;  %v30333_v6 = vld [vmem:[#allocation59_spill] sm:$0xff]  ;;  %v30335_v14 = vld [vmem:[#allocation57_spill] sm:$0xff] }
 0x68e   :  { %v15791_v36 = vpop.f32.mrf.mxu0  ;;  %v15551_v35 = vadd.f32 %v30333_v6, %v15273_v55  ;;  %v15561_v15 = vadd.f32 %v30334_v39, %v15283_v28  ;;  %v17620_v42 = vadd.f32 %v30335_v14, %v20120_v5  ;;  %v15831_v16 = vadd.f32 %v15778_v46, %v15553_v62  ;;  %v25013_v24 = vld [vmem:[%s29962_s5 + $0x608] sm:$0xff]  }
 0x68f   :  { %v15846_v33 = vmax.f32 %v15826_v44, %v15836_v19  ;;  %v15834_v57 = vadd.f32 %v15791_v36, %v15556_v63  ;;  %v15857_v12 = vadd.f32 %v25019_v8, %v15852_v1  ;;  %v30337_v28 = vmov 0.0  }
 0x690   :  { %v23812_v60 = vpop.f32.mrf.mxu0 }
 0x691   :  { %v15844_v53 = vmax.f32 %v15824_v10, %v15834_v57  ;;  %v15837_v32 = vadd.f32 %v23812_v60, %v15559_v21  ;;  %v21514_v17 = vpop.f32.mrf.mxu1  ;;  %v15829_v21 = vadd.f32 %v30336_v2, %v15551_v35  ;;  %v15862_v4 = vmax.f32 %v15857_v12, 0.0 }
 0x692   :  { %v15794_v18 = vpop.f32.mrf.mxu0 }
 0x693   :  { %v15847_v25 = vmax.f32 %v15827_v7, %v15837_v32  ;;  %v15835_v11 = vadd.f32 %v15794_v18, %v15557_v20  ;;  %v21515_v56 = vpop.f32.mrf.mxu1  ;;  %v25020_v47 = vpack.c.bf16 %v15862_v4, %v15862_v4 }
 0x694   :  { %v23815_v51 = vpop.f32.mrf.mxu0  ;;  %v21516_v38 = vadd.f32 %v21515_v56, %v21514_v17  ;;  %v25012_v17 = vld [vmem:[%s29962_s5 + $0x610] sm:$0xff]  }
 0x695   :  { %v15854_v37 = vmax.f32 %v15846_v33, %v15847_v25  ;;  %v15845_v58 = vmax.f32 %v15825_v30, %v15835_v11  ;;  %v15840_v3 = vadd.f32 %v23815_v51, %v15562_v59  ;;  %v21517_v19 = vpop.f32.mrf.mxu1  ;;  %v25004_v59 = vld [vmem:[%s29962_s5 + $0x638] sm:$0xff]  }
 0x696   :  { %v15807_v45 = vpop.f32.mrf.mxu0  ;;  %v17660_v1 = vadd.f32 %v21516_v38, %v17620_v42 }
 0x697   :  { %v15853_v43 = vmax.f32 %v15844_v53, %v15845_v58  ;;  %v15850_v40 = vmax.f32 %v15830_v0, %v15840_v3  ;;  %v15838_v27 = vadd.f32 %v15807_v45, %v15560_v41  ;;  %v21518_v57 = vpop.f32.mrf.mxu1  ;;  %v15859_v7 = vadd.f32 %v25019_v8, %v15854_v37  ;;  %v25009_v0 = vld [vmem:[%s29962_s5 + $0x628] sm:$0xff]   ;;  %v25010_v37 = vld [vmem:[%s29962_s5 + $0x620] sm:$0xff]   ;;  %v25011_v58 = vld [vmem:[%s29962_s5 + $0x618] sm:$0xff]  }
 0x698   :  { %v23816_v63 = vpop.f32.mrf.mxu0  ;;  %v25014_v45 = vld [vmem:[%s29962_s5 + $0x600] sm:$0xff]  }
 0x699   :  { %v15858_v50 = vadd.f32 %v25019_v8, %v15853_v43  ;;  %v15848_v44 = vmax.f32 %v15828_v34, %v15838_v27  ;;  %v15841_v61 = vadd.f32 %v23816_v63, %v15563_v22  ;;  %v15864_v52 = vmax.f32 %v15859_v7, 0.0 }
 0x69a   :  { %v15810_v36 = vpop.f32.mrf.mxu0 }
 0x69b   :  { %v15863_v10 = vmax.f32 %v15858_v50, 0.0  ;;  %v15851_v33 = vmax.f32 %v15831_v16, %v15841_v61  ;;  %v15839_v31 = vadd.f32 %v15810_v36, %v15561_v15  ;;  %v25022_v51 = vpack.c.bf16 %v15864_v52, %v15864_v52 }
 0x69c   :  { %v21536_v13 = vpop.f32.mrf.mxu0 }
 0x69d   :  { %v15856_v60 = vmax.f32 %v15850_v40, %v15851_v33  ;;  %v15849_v20 = vmax.f32 %v15829_v21, %v15839_v31  ;;  %v25021_v18 = vpack.c.bf16 %v15863_v10, %v15863_v10 }
 0x69e   :  { %v21537_v53 = vpop.f32.mrf.mxu0 }
 0x69f   :  { %v15861_v32 = vadd.f32 %v25019_v8, %v15856_v60  ;;  %v15855_v46 = vmax.f32 %v15848_v44, %v15849_v20  ;;  %v21538_v9 = vadd.f32 %v21537_v53, %v21536_v13  ;;  %18017 = vmatprep.mubr.bf16.mxu0 %v25021_v18 }
 0x6a0   :  { %v21539_v29 = vpop.f32.mrf.mxu0  ;;  %18018 = vmatmul.mubr.bf16.vlgmr.msra.gmra.mxu0 %v25020_v47 }
 0x6a1   :  { %v15866_v30 = vmax.f32 %v15861_v32, 0.0  ;;  %v15860_v25 = vadd.f32 %v25019_v8, %v15855_v46  ;;  %v17700_v11 = vadd.f32 %v21538_v9, %v17660_v1  ;;  %23818 = vmatpush3.bf16.msra.mxu0 %v25004_v59  ;;  %23833 = vmatprep.mubr.msk.bf16.mxu0 %vm25033_vm2, %v30337_v28 }
 0x6a2   :  { %v21540_v55 = vpop.f32.mrf.mxu0  ;;  %23819 = vmatprep.subr.bf16.mxu0 %v30337_v28 }
 0x6a3   :  { %v15871_v41 = vpack.c.bf16 %v15866_v30, %v15866_v30  ;;  %v15865_v48 = vmax.f32 %v15860_v25, 0.0 }
 0x6a5   :  { %15876 = vst [vmem:[#allocation3 + $0x60] sm:$0xf] %v15871_v41  ;;  %v25023_v5 = vpack.c.bf16 %v15865_v48, %v15865_v48  ;;  %23820 = vmatpush3.bf16.msra.mxu0 %v25007_v23 }
 0x6a6   :  { %23821 = vmatprep.subr.bf16.mxu0 %v30337_v28 }
 0x6a7   :  { %18057 = vmatprep.mubr.bf16.mxu1 %v25023_v5 }
 0x6a8   :  { %18058 = vmatmul.mubr.bf16.vlgmr.msra.gmra.mxu1 %v25022_v51 }
 0x6a9   :  { %23822 = vmatpush3.bf16.msra.mxu0 %v25009_v0 }
 0x6aa   :  { %23823 = vmatprep.subr.bf16.mxu0 %v30337_v28 }
 0x6ac   :  { %v25015_v56 = vld [vmem:[#allocation3 + $0x60] ss:$0 sps:$4 sm:$0xff]  }
 0x6ad   :  { %23824 = vmatpush3.bf16.msra.mxu0 %v25010_v37 }
 0x6ae   :  { %23825 = vmatprep.subr.bf16.mxu0 %v30337_v28 }
 0x6b1   :  { %23826 = vmatpush3.bf16.msra.mxu0 %v25011_v58  ;;  %v21558_v3 = vpop.f32.mrf.mxu1 }
 0x6b2   :  { %23827 = vmatprep.subr.bf16.mxu0 %v30337_v28 }
 0x6b3   :  { %v21559_v26 = vpop.f32.mrf.mxu1 }
 0x6b4   :  { %v21560_v62 = vadd.f32 %v21559_v26, %v21558_v3 }
 0x6b5   :  { %23828 = vmatpush3.bf16.msra.mxu0 %v25012_v17  ;;  %v21561_v22 = vpop.f32.mrf.mxu1 }
 0x6b6   :  { %23829 = vmatprep.subr.bf16.mxu0 %v30337_v28  ;;  %v17740_v49 = vadd.f32 %v21560_v62, %v17700_v11 }
 0x6b7   :  { %v21562_v54 = vpop.f32.mrf.mxu1 }
 0x6b9   :  { %23830 = vmatpush3.bf16.msra.mxu0 %v25013_v24 }
 0x6ba   :  { %23831 = vmatprep.subr.bf16.mxu0 %v30337_v28 }
 0x6bc   :  { %v21580_v34 = vpop.f32.mrf.mxu0 }
 0x6bd   :  { %23832 = vmatpush3.bf16.msra.mxu0 %v25014_v45 }
 0x6be   :  { %v21581_v8 = vpop.f32.mrf.mxu0 }
 0x6bf   :  { %v21582_v12 = vadd.f32 %v21581_v8, %v21580_v34 }
 0x6c0   :  { %v21583_v43 = vpop.f32.mrf.mxu0  ;;  %23834 = vmatmul.mubr.bf16.vlgmr.msra.gmra.mxu0 %v25015_v56 }
 0x6c1   :  { %v17780_v40 = vadd.f32 %v21582_v12, %v17740_v49 }
 0x6c2   :  { %v21584_v27 = vpop.f32.mrf.mxu0 }
 0x6d1   :  { %v21602_v6 = vpop.f32.mrf.mxu1 }
 0x6d3   :  { %v21603_v35 = vpop.f32.mrf.mxu1 }
 0x6d4   :  { %v21604_v39 = vadd.f32 %v21603_v35, %v21602_v6 }
 0x6d5   :  { %v21605_v15 = vpop.f32.mrf.mxu1 }
 0x6d6   :  { %v17820_v14 = vadd.f32 %v21604_v39, %v17780_v40 }
 0x6d7   :  { %v21606_v42 = vpop.f32.mrf.mxu1 }
 0x6dc   :  { %v21624_v38 = vpop.f32.mrf.mxu0 }
 0x6de   :  { %v21625_v63 = vpop.f32.mrf.mxu0 }
 0x6df   :  { %v21626_v16 = vadd.f32 %v21625_v63, %v21624_v38 }
 0x6e0   :  { %v21627_v50 = vpop.f32.mrf.mxu0 }
 0x6e1   :  { %v17860_v44 = vadd.f32 %v21626_v16, %v17820_v14 }
 0x6e2   :  { %v21628_v19 = vpop.f32.mrf.mxu0 }
 0x6f1   :  { %v21646_v61 = vpop.f32.mrf.mxu1 }
 0x6f3   :  { %v21647_v2 = vpop.f32.mrf.mxu1 }
 0x6f4   :  { %v21648_v21 = vadd.f32 %v21647_v2, %v21646_v61 }
 0x6f5   :  { %v21649_v1 = vpop.f32.mrf.mxu1 }
 0x6f6   :  { %v17900_v36 = vadd.f32 %v21648_v21, %v17860_v44 }
 0x6f7   :  { %v21650_v4 = vpop.f32.mrf.mxu1 }
 0x6fc   :  { %v21668_v10 = vpop.f32.mrf.mxu0 }
 0x6fe   :  { %v21669_v33 = vpop.f32.mrf.mxu0 }
 0x6ff   :  { %v21670_v57 = vadd.f32 %v21669_v33, %v21668_v10 }
 0x700   :  { %v21671_v31 = vpop.f32.mrf.mxu0 }
 0x701   :  { %v17940_v13 = vadd.f32 %v21670_v57, %v17900_v36 }
 0x702   :  { %v21672_v60 = vpop.f32.mrf.mxu0 }
 0x711   :  { %v21690_v20 = vpop.f32.mrf.mxu1 }
 0x713   :  { %v21691_v7 = vpop.f32.mrf.mxu1 }
 0x714   :  { %v21692_v53 = vadd.f32 %v21691_v7, %v21690_v20 }
 0x715   :  { %v21693_v32 = vpop.f32.mrf.mxu1 }
 0x716   :  { %v17980_v46 = vadd.f32 %v21692_v53, %v17940_v13 }
 0x717   :  { %v21694_v9 = vpop.f32.mrf.mxu1 }
 0x760   :  { %v21712_v47 = vpop.f32.mrf.mxu0 }
 0x762   :  { %v21713_v29 = vpop.f32.mrf.mxu0 }
 0x763   :  { %v21714_v52 = vadd.f32 %v21713_v29, %v21712_v47 }
 0x764   :  { %v21715_v18 = vpop.f32.mrf.mxu0 }
 0x765   :  { %v18020_v48 = vadd.f32 %v21714_v52, %v17980_v46 }
 0x766   :  { %v21716_v59 = vpop.f32.mrf.mxu0 }
 0x768   :  { %v21734_v30 = vpop.f32.mrf.mxu1 }
 0x76a   :  { %v21735_v25 = vpop.f32.mrf.mxu1 }
 0x76b   :  { %v21736_v41 = vadd.f32 %v21735_v25, %v21734_v30 }
 0x76c   :  { %v21737_v11 = vpop.f32.mrf.mxu1 }
 0x76d   :  { %v18060_v23 = vadd.f32 %v21736_v41, %v18020_v48 }
 0x76e   :  { %v21738_v55 = vpop.f32.mrf.mxu1 }
 0x780   :  { %v18099_v28 = vpop.f32.mrf.mxu0 }
 0x781   :  { %v18100_v51 = vadd.f32 %v18099_v28, %v18060_v23 }
 0x782   :  { %v23835_v5 = vpop.f32.mrf.mxu0 }
 0x783   :  { %v18105_v0 = vmax.f32 %v18100_v51, 0.0 }
 0x784   :  { %v18102_v37 = vpop.f32.mrf.mxu0 }
 0x785   :  { %18106 = vst [vmem:[%s29964_s7] sm:$0xff] %v18105_v0 }
 0x786   :  { %v23836_v58 = vpop.f32.mrf.mxu0 }

</bundles_post_ra>
